<compile_context>
chip_gen: v7x
topology: tpu7x:2x2x1
jax: 0.10.0
libtpu: 0.0.40
codegen_flags: <defaults>
</compile_context>

<pallas_src>
import functools

import jax
import jax.numpy as jnp
from jax.experimental import pallas as pl
from jax.experimental.pallas import tpu as pltpu

_SQRT_HALF = 0.7071067811865476


def _gelu_exact(x):
    # torch.nn.GELU default = exact erf formulation
    return 0.5 * x * (1.0 + jax.lax.erf(x * _SQRT_HALF))


def fpn_kernel(x_ref, w1_ref, b1_ref, w2_ref, b2_ref,
               g1_ref, be1_ref, g2t_ref, be2t_ref, savg_ref, sones_ref,
               o_ref, *, eps=1e-6):
    """Fused FPN branch for one tile of TP flattened input pixels."""
    x = x_ref[...]                                   # [TP, C]   compute dtype
    w2 = w2_ref[...]                                 # [C, 4V]   compute dtype
    b1 = b1_ref[...]                                 # [1, C]    f32
    b2 = b2_ref[...]                                 # [1, 4V]   f32 (tiled per k2)
    g1 = g1_ref[...]                                 # [1, C]    f32
    be1 = be1_ref[...]                               # [1, C]    f32
    g2t = g2t_ref[...]                               # [1, 4V]   f32 (tiled per k2)
    be2t = be2t_ref[...]                             # [1, 4V]   f32 (tiled per k2)
    savg = savg_ref[...]                             # [4V, 4]   segment-average (1/V)
    sones = sones_ref[...]                           # [4, 4V]   segment-broadcast (1)

    slab = w2.shape[-1]                              # 4 * V

    for k1 in range(4):                              # unrolled 2x2 offsets of convT #1
        # --- ConvTranspose2d #1, offset k1: [TP, C] @ [C, C] on the MXU ---
        y = jnp.dot(x, w1_ref[k1], preferred_element_type=jnp.float32) + b1

        # --- Norm2d(C): channel LayerNorm, biased variance (full lane width) ---
        u = jnp.mean(y, axis=-1, keepdims=True)
        yc = y - u
        s = jnp.mean(yc * yc, axis=-1, keepdims=True)
        yn = g1 * (yc * jax.lax.rsqrt(s + eps)) + be1

        # --- exact GELU (f32, EUP) ---
        ya = _gelu_exact(yn)

        # --- ConvTranspose2d #2, all four (kh2, kw2) offsets at once: [TP,C]@[C,4V] ---
        z = jnp.dot(ya.astype(w2.dtype), w2, preferred_element_type=jnp.float32) + b2

        # --- Norm2d(V) per V-wide lane segment WITHOUT lane slicing:
        #     segment mean / var via block-averaging matmuls, broadcast via [4,4V]. ---
        zm = jnp.dot(z, savg, preferred_element_type=jnp.float32)          # [TP, 4]
        zc = z - jnp.dot(zm, sones, preferred_element_type=jnp.float32)    # centered
        zv = jnp.dot(zc * zc, savg, preferred_element_type=jnp.float32)    # [TP, 4]
        rinv = jnp.dot(jax.lax.rsqrt(zv + eps), sones,
                       preferred_element_type=jnp.float32)                 # [TP, 4V]
        part = zc * rinv * g2t + be2t                                      # [TP, 4V]

        # One slab store per k1 (keeps live ranges small).  The out *block* is
        # the full 16V lanes, so the HBM writeback DMA is dense regardless of V.
        o_ref[:, k1 * slab:(k1 + 1) * slab] = part.astype(o_ref.dtype)


def pose_simple_fpn_forward(x_nchw, params, *, tile_p=256,
                            compute_dtype=jnp.bfloat16,
                            out_dtype=jnp.float32,
                            vmem_limit_bytes=48 * 1024 * 1024,
                            eps=1e-6):
    """PoseSimpleFPN neck: x [N, C, H, W] -> [N, V, 4H, 4W]."""
    W1, b1, g1, be1, W2, b2, g2, be2 = (
        params["w1"], params["b1"], params["g1"], params["be1"],
        params["w2"], params["b2"], params["g2"], params["be2"])
    N, C, H, W = x_nchw.shape
    V = W2.shape[1]
    P = N * H * W

    assert tile_p % 8 == 0, "tile_p must be a multiple of 8 (sublane width)"
    n_tiles = pl.cdiv(P, tile_p)
    P_pad = n_tiles * tile_p

    # channels-last flatten of spatial positions (single XLA transpose pass).
    # TODO(synk): module semantics require NCHW in/out, so this transpose and the
    # output transpose below stay as wrapper-level XLA passes outside the kernel.
    x_flat = jnp.transpose(x_nchw, (0, 2, 3, 1)).reshape(P, C).astype(compute_dtype)
    if P_pad != P:
        x_flat = jnp.pad(x_flat, ((0, P_pad - P), (0, 0)))

    # ConvT#1 weight [C_in, C_out, 2, 2] -> [4, C_in, C_out] per (kh1, kw1).
    w1_k = jnp.transpose(W1, (2, 3, 0, 1)).reshape(4, C, C).astype(compute_dtype)
    b1_r = b1.reshape(1, C).astype(jnp.float32)
    # ConvT#2 weight [C_in, V, 2, 2] -> [C_in, 4V]  (columns ordered (kh2, kw2, v)).
    w2_f = jnp.transpose(W2, (0, 2, 3, 1)).reshape(C, 4 * V).astype(compute_dtype)
    b2_r = jnp.tile(b2, 4).reshape(1, 4 * V).astype(jnp.float32)

    g1_r = g1.reshape(1, C).astype(jnp.float32)
    be1_r = be1.reshape(1, C).astype(jnp.float32)
    g2_t = jnp.tile(g2, 4).reshape(1, 4 * V).astype(jnp.float32)
    be2_t = jnp.tile(be2, 4).reshape(1, 4 * V).astype(jnp.float32)

    # Block-averaging / broadcast matrices for the per-V-segment LayerNorm.
    seg = jax.lax.broadcasted_iota(jnp.int32, (4 * V, 4), 0) // V
    col = jax.lax.broadcasted_iota(jnp.int32, (4 * V, 4), 1)
    savg = (seg == col).astype(jnp.float32) / V          # [4V, 4]
    sones = jnp.transpose(savg) * float(V)               # [4, 4V]

    full2 = lambda i: (0, 0)
    full3 = lambda i: (0, 0, 0)

    out_flat = pl.pallas_call(
        functools.partial(fpn_kernel, eps=eps),
        out_shape=jax.ShapeDtypeStruct((P_pad, 16 * V), out_dtype),
        grid_spec=pltpu.PrefetchScalarGridSpec(
            num_scalar_prefetch=0,
            grid=(n_tiles,),
            in_specs=[
                pl.BlockSpec((tile_p, C), lambda i: (i, 0)),   # x tile
                pl.BlockSpec((4, C, C), full3),                # w1 per (kh1, kw1)
                pl.BlockSpec((1, C), full2),                   # b1
                pl.BlockSpec((C, 4 * V), full2),               # w2
                pl.BlockSpec((1, 4 * V), full2),               # b2 (tiled)
                pl.BlockSpec((1, C), full2),                   # norm1 gamma
                pl.BlockSpec((1, C), full2),                   # norm1 beta
                pl.BlockSpec((1, 4 * V), full2),               # norm2 gamma (tiled)
                pl.BlockSpec((1, 4 * V), full2),               # norm2 beta (tiled)
                pl.BlockSpec((4 * V, 4), full2),               # segment-average matrix
                pl.BlockSpec((4, 4 * V), full2),               # segment-broadcast matrix
            ],
            out_specs=pl.BlockSpec((tile_p, 16 * V), lambda i: (i, 0)),
        ),
        compiler_params=pltpu.CompilerParams(
            dimension_semantics=("parallel",),
            vmem_limit_bytes=vmem_limit_bytes,
        ),
    )(x_flat, w1_k, b1_r, w2_f, b2_r, g1_r, be1_r, g2_t, be2_t, savg, sones)

    out_flat = out_flat[:P]
    # [P, 16V] -> [N, H, W, kh1, kw1, kh2, kw2, V] -> [N, V, 4H, 4W]
    # final row = 4h + 2*kh1 + kh2, final col = 4w + 2*kw1 + kw2
    o = out_flat.reshape(N, H, W, 2, 2, 2, 2, V)
    o = jnp.transpose(o, (0, 7, 1, 3, 5, 2, 4, 6)).reshape(N, V, 4 * H, 4 * W)
    return o


# ------------------------- pure-JAX reference (torch semantics) -------------------------
def _ref_forward(x, params, eps=1e-6):
    W1, b1, g1, be1, W2, b2, g2, be2 = (
        params["w1"], params["b1"], params["g1"], params["be1"],
        params["w2"], params["b2"], params["g2"], params["be2"])

    def convT(x, Wk, bk):
        N, Ci, H, Wd = x.shape
        Co = Wk.shape[1]
        y = jnp.einsum("nchw,cokl->nohkwl", x, Wk)
        y = y.reshape(N, Co, 2 * H, 2 * Wd) + bk[None, :, None, None]
        return y

    def norm2d(x, gamma, beta):
        u = jnp.mean(x, axis=1, keepdims=True)
        s = jnp.mean((x - u) ** 2, axis=1, keepdims=True)
        x = (x - u) / jnp.sqrt(s + eps)
        return gamma[None, :, None, None] * x + beta[None, :, None, None]

    y = convT(x, W1, b1)
    y = norm2d(y, g1, be1)
    y = _gelu_exact(y)
    y = convT(y, W2, b2)
    y = norm2d(y, g2, be2)
    return y


if __name__ == "__main__":
    # Small config: embed_dim C=32, vis_token_dim V=16, N=2, H=W=16  (P = 512 -> grid of 2)
    N, C, H, W, V = 2, 32, 16, 16, 16
    key = jax.random.PRNGKey(0)
    ks = jax.random.split(key, 9)

    x = jax.random.normal(ks[0], (N, C, H, W), jnp.float32)
    params = {
        "w1": 0.1 * jax.random.normal(ks[1], (C, C, 2, 2), jnp.float32),
        "b1": 0.1 * jax.random.normal(ks[2], (C,), jnp.float32),
        "g1": 1.0 + 0.1 * jax.random.normal(ks[3], (C,), jnp.float32),
        "be1": 0.1 * jax.random.normal(ks[4], (C,), jnp.float32),
        "w2": 0.1 * jax.random.normal(ks[5], (C, V, 2, 2), jnp.float32),
        "b2": 0.1 * jax.random.normal(ks[6], (V,), jnp.float32),
        "g2": 1.0 + 0.1 * jax.random.normal(ks[7], (V,), jnp.float32),
        "be2": 0.1 * jax.random.normal(ks[8], (V,), jnp.float32),
    }

    features = {"backbone_output": x}
    ref = _ref_forward(x, params)

    # 1) numerical check with the f32 compute path (tolerance covers MXU matmul
    #    precision differences across chips/precision defaults)
    out_f32 = pose_simple_fpn_forward(features["backbone_output"], params,
                                      tile_p=256, compute_dtype=jnp.float32)
    out_f32 = jax.block_until_ready(out_f32)
    assert out_f32.shape == (N, V, 4 * H, 4 * W)
    assert jnp.allclose(out_f32, ref, atol=3e-2, rtol=3e-2), (
        float(jnp.max(jnp.abs(out_f32 - ref))))

    # 2) fast path: bf16 matmuls (f32 accumulation, f32 norm/GELU) — looser tolerance
    out_bf16 = pose_simple_fpn_forward(features["backbone_output"], params,
                                       tile_p=256, compute_dtype=jnp.bfloat16)
    out_bf16 = jax.block_until_ready(out_bf16)
    assert out_bf16.shape == (N, V, 4 * H, 4 * W)
    assert jnp.allclose(out_bf16, ref, atol=1e-1, rtol=1e-1), (
        float(jnp.max(jnp.abs(out_bf16 - ref))))

    # module semantics: features['neck_output'] = [o]  (single scale, reversed list)
    features["neck_output"] = [out_bf16]

    print("KERNEL_OK")
</pallas_src>

<mosaic_0001>
module attributes {stable_mosaic.version = 11 : i64} {
  func.func @fpn_kernel(%arg0: i32, %arg1: memref<256x32xf32, #tpu.memory_space<vmem>>, %arg2: memref<4x32x32xf32, #tpu.memory_space<vmem>>, %arg3: memref<1x32xf32, #tpu.memory_space<vmem>>, %arg4: memref<32x64xf32, #tpu.memory_space<vmem>>, %arg5: memref<1x64xf32, #tpu.memory_space<vmem>>, %arg6: memref<1x32xf32, #tpu.memory_space<vmem>>, %arg7: memref<1x32xf32, #tpu.memory_space<vmem>>, %arg8: memref<1x64xf32, #tpu.memory_space<vmem>>, %arg9: memref<1x64xf32, #tpu.memory_space<vmem>>, %arg10: memref<64x4xf32, #tpu.memory_space<vmem>>, %arg11: memref<4x64xf32, #tpu.memory_space<vmem>>, %arg12: memref<256x256xf32, #tpu.memory_space<vmem>>) attributes {dimension_semantics = [#tpu.dimension_semantics<parallel>], iteration_bounds = array<i64: 2>, scalar_prefetch = 0 : i64, scratch_operands = 0 : i64, tpu.core_type = #tpu.core_type<tc>, window_params = [{transform_indices = @transform_0, window_bounds = array<i64: 256, 32>}, {pipeline_mode = #tpu.pipeline_mode<synchronous>, transform_indices = @transform_1, window_bounds = array<i64: 4, 32, 32>}, {pipeline_mode = #tpu.pipeline_mode<synchronous>, transform_indices = @transform_2, window_bounds = array<i64: 1, 32>}, {pipeline_mode = #tpu.pipeline_mode<synchronous>, transform_indices = @transform_3, window_bounds = array<i64: 32, 64>}, {pipeline_mode = #tpu.pipeline_mode<synchronous>, transform_indices = @transform_4, window_bounds = array<i64: 1, 64>}, {pipeline_mode = #tpu.pipeline_mode<synchronous>, transform_indices = @transform_5, window_bounds = array<i64: 1, 32>}, {pipeline_mode = #tpu.pipeline_mode<synchronous>, transform_indices = @transform_6, window_bounds = array<i64: 1, 32>}, {pipeline_mode = #tpu.pipeline_mode<synchronous>, transform_indices = @transform_7, window_bounds = array<i64: 1, 64>}, {pipeline_mode = #tpu.pipeline_mode<synchronous>, transform_indices = @transform_8, window_bounds = array<i64: 1, 64>}, {pipeline_mode = #tpu.pipeline_mode<synchronous>, transform_indices = @transform_9, window_bounds = array<i64: 64, 4>}, {pipeline_mode = #tpu.pipeline_mode<synchronous>, transform_indices = @transform_10, window_bounds = array<i64: 4, 64>}, {transform_indices = @transform_11, window_bounds = array<i64: 256, 256>}]} {
    %c0 = arith.constant 0 : index
    %c0_0 = arith.constant 0 : index
    %0 = vector.load %arg1[%c0, %c0_0] : memref<256x32xf32, #tpu.memory_space<vmem>>, vector<256x32xf32>
    %c0_1 = arith.constant 0 : index
    %c0_2 = arith.constant 0 : index
    %1 = vector.load %arg4[%c0_1, %c0_2] : memref<32x64xf32, #tpu.memory_space<vmem>>, vector<32x64xf32>
    %c0_3 = arith.constant 0 : index
    %c0_4 = arith.constant 0 : index
    %2 = vector.load %arg3[%c0_3, %c0_4] : memref<1x32xf32, #tpu.memory_space<vmem>>, vector<1x32xf32>
    %c0_5 = arith.constant 0 : index
    %c0_6 = arith.constant 0 : index
    %3 = vector.load %arg5[%c0_5, %c0_6] : memref<1x64xf32, #tpu.memory_space<vmem>>, vector<1x64xf32>
    %c0_7 = arith.constant 0 : index
    %c0_8 = arith.constant 0 : index
    %4 = vector.load %arg6[%c0_7, %c0_8] : memref<1x32xf32, #tpu.memory_space<vmem>>, vector<1x32xf32>
    %c0_9 = arith.constant 0 : index
    %c0_10 = arith.constant 0 : index
    %5 = vector.load %arg7[%c0_9, %c0_10] : memref<1x32xf32, #tpu.memory_space<vmem>>, vector<1x32xf32>
    %c0_11 = arith.constant 0 : index
    %c0_12 = arith.constant 0 : index
    %6 = vector.load %arg8[%c0_11, %c0_12] : memref<1x64xf32, #tpu.memory_space<vmem>>, vector<1x64xf32>
    %c0_13 = arith.constant 0 : index
    %c0_14 = arith.constant 0 : index
    %7 = vector.load %arg9[%c0_13, %c0_14] : memref<1x64xf32, #tpu.memory_space<vmem>>, vector<1x64xf32>
    %c0_15 = arith.constant 0 : index
    %c0_16 = arith.constant 0 : index
    %8 = vector.load %arg10[%c0_15, %c0_16] : memref<64x4xf32, #tpu.memory_space<vmem>>, vector<64x4xf32>
    %c0_17 = arith.constant 0 : index
    %c0_18 = arith.constant 0 : index
    %9 = vector.load %arg11[%c0_17, %c0_18] : memref<4x64xf32, #tpu.memory_space<vmem>>, vector<4x64xf32>
    %c0_19 = arith.constant 0 : index
    %c0_20 = arith.constant 0 : index
    %c0_21 = arith.constant 0 : index
    %10 = vector.load %arg2[%c0_19, %c0_20, %c0_21] : memref<4x32x32xf32, #tpu.memory_space<vmem>>, vector<1x32x32xf32>
    %11 = vector.shape_cast %10 : vector<1x32x32xf32> to vector<32x32xf32>
    %cst = arith.constant dense<0.000000e+00> : vector<256x32xf32>
    %12 = tpu.matmul %0, %11, %cst {dimension_numbers = #tpu.dot_dimension_numbers<[1], [0], [0], [1], [0, 0, 1, 1], [], []>} : vector<256x32xf32>, vector<32x32xf32>, vector<256x32xf32> -> vector<256x32xf32>
    %13 = vector.broadcast %2 : vector<1x32xf32> to vector<256x32xf32>
    %14 = arith.addf %12, %13 : vector<256x32xf32>
    %cst_22 = arith.constant dense<0.000000e+00> : vector<256xf32>
    %15 = vector.multi_reduction <add>, %14, %cst_22 [1] : vector<256x32xf32> to vector<256xf32>
    %16 = vector.shape_cast %15 : vector<256xf32> to vector<256x1xf32>
    %cst_23 = arith.constant 3.200000e+01 : f32
    %17 = vector.broadcast %cst_23 : f32 to vector<256x1xf32>
    %18 = arith.divf %16, %17 : vector<256x1xf32>
    %19 = vector.broadcast %18 : vector<256x1xf32> to vector<256x32xf32>
    %20 = arith.subf %14, %19 : vector<256x32xf32>
    %21 = arith.mulf %20, %20 : vector<256x32xf32>
    %cst_24 = arith.constant dense<0.000000e+00> : vector<256xf32>
    %22 = vector.multi_reduction <add>, %21, %cst_24 [1] : vector<256x32xf32> to vector<256xf32>
    %23 = vector.shape_cast %22 : vector<256xf32> to vector<256x1xf32>
    %cst_25 = arith.constant 3.200000e+01 : f32
    %24 = vector.broadcast %cst_25 : f32 to vector<256x1xf32>
    %25 = arith.divf %23, %24 : vector<256x1xf32>
    %cst_26 = arith.constant 9.99999997E-7 : f32
    %26 = vector.broadcast %cst_26 : f32 to vector<256x1xf32>
    %27 = arith.addf %25, %26 : vector<256x1xf32>
    %28 = math.rsqrt %27 : vector<256x1xf32>
    %29 = vector.broadcast %28 : vector<256x1xf32> to vector<256x32xf32>
    %30 = arith.mulf %20, %29 : vector<256x32xf32>
    %31 = vector.broadcast %4 : vector<1x32xf32> to vector<256x32xf32>
    %32 = arith.mulf %31, %30 : vector<256x32xf32>
    %33 = vector.broadcast %5 : vector<1x32xf32> to vector<256x32xf32>
    %34 = arith.addf %32, %33 : vector<256x32xf32>
    %cst_27 = arith.constant 5.000000e-01 : f32
    %35 = vector.broadcast %cst_27 : f32 to vector<256x32xf32>
    %36 = arith.mulf %35, %34 : vector<256x32xf32>
    %cst_28 = arith.constant 0.707106769 : f32
    %37 = vector.broadcast %cst_28 : f32 to vector<256x32xf32>
    %38 = arith.mulf %34, %37 : vector<256x32xf32>
    %39 = math.erf %38 : vector<256x32xf32>
    %cst_29 = arith.constant 1.000000e+00 : f32
    %40 = vector.broadcast %cst_29 : f32 to vector<256x32xf32>
    %41 = arith.addf %40, %39 : vector<256x32xf32>
    %42 = arith.mulf %36, %41 : vector<256x32xf32>
    %cst_30 = arith.constant dense<0.000000e+00> : vector<256x64xf32>
    %43 = tpu.matmul %42, %1, %cst_30 {dimension_numbers = #tpu.dot_dimension_numbers<[1], [0], [0], [1], [0, 0, 1, 1], [], []>} : vector<256x32xf32>, vector<32x64xf32>, vector<256x64xf32> -> vector<256x64xf32>
    %44 = vector.broadcast %3 : vector<1x64xf32> to vector<256x64xf32>
    %45 = arith.addf %43, %44 : vector<256x64xf32>
    %cst_31 = arith.constant dense<0.000000e+00> : vector<256x4xf32>
    %46 = tpu.matmul %45, %8, %cst_31 {dimension_numbers = #tpu.dot_dimension_numbers<[1], [0], [0], [1], [0, 0, 1, 1], [], []>} : vector<256x64xf32>, vector<64x4xf32>, vector<256x4xf32> -> vector<256x4xf32>
    %cst_32 = arith.constant dense<0.000000e+00> : vector<256x64xf32>
    %47 = tpu.matmul %46, %9, %cst_32 {dimension_numbers = #tpu.dot_dimension_numbers<[1], [0], [0], [1], [0, 0, 1, 1], [], []>} : vector<256x4xf32>, vector<4x64xf32>, vector<256x64xf32> -> vector<256x64xf32>
    %48 = arith.subf %45, %47 : vector<256x64xf32>
    %49 = arith.mulf %48, %48 : vector<256x64xf32>
    %cst_33 = arith.constant dense<0.000000e+00> : vector<256x4xf32>
    %50 = tpu.matmul %49, %8, %cst_33 {dimension_numbers = #tpu.dot_dimension_numbers<[1], [0], [0], [1], [0, 0, 1, 1], [], []>} : vector<256x64xf32>, vector<64x4xf32>, vector<256x4xf32> -> vector<256x4xf32>
    %cst_34 = arith.constant 9.99999997E-7 : f32
    %51 = vector.broadcast %cst_34 : f32 to vector<256x4xf32>
    %52 = arith.addf %50, %51 : vector<256x4xf32>
    %53 = math.rsqrt %52 : vector<256x4xf32>
    %cst_35 = arith.constant dense<0.000000e+00> : vector<256x64xf32>
    %54 = tpu.matmul %53, %9, %cst_35 {dimension_numbers = #tpu.dot_dimension_numbers<[1], [0], [0], [1], [0, 0, 1, 1], [], []>} : vector<256x4xf32>, vector<4x64xf32>, vector<256x64xf32> -> vector<256x64xf32>
    %55 = arith.mulf %48, %54 : vector<256x64xf32>
    %56 = vector.broadcast %6 : vector<1x64xf32> to vector<256x64xf32>
    %57 = arith.mulf %55, %56 : vector<256x64xf32>
    %58 = vector.broadcast %7 : vector<1x64xf32> to vector<256x64xf32>
    %59 = arith.addf %57, %58 : vector<256x64xf32>
    %c0_36 = arith.constant 0 : index
    %c0_37 = arith.constant 0 : index
    %60 = vector.load %arg12[%c0_36, %c0_37] : memref<256x256xf32, #tpu.memory_space<vmem>>, vector<256x64xf32>
    tpu.vector_store %arg12[%c0_36, %c0_37], %59 {strides = array<i32>} : memref<256x256xf32, #tpu.memory_space<vmem>>, vector<256x64xf32>,
    %c1 = arith.constant 1 : index
    %c0_38 = arith.constant 0 : index
    %c0_39 = arith.constant 0 : index
    %61 = vector.load %arg2[%c1, %c0_38, %c0_39] : memref<4x32x32xf32, #tpu.memory_space<vmem>>, vector<1x32x32xf32>
    %62 = vector.shape_cast %61 : vector<1x32x32xf32> to vector<32x32xf32>
    %cst_40 = arith.constant dense<0.000000e+00> : vector<256x32xf32>
    %63 = tpu.matmul %0, %62, %cst_40 {dimension_numbers = #tpu.dot_dimension_numbers<[1], [0], [0], [1], [0, 0, 1, 1], [], []>} : vector<256x32xf32>, vector<32x32xf32>, vector<256x32xf32> -> vector<256x32xf32>
    %64 = vector.broadcast %2 : vector<1x32xf32> to vector<256x32xf32>
    %65 = arith.addf %63, %64 : vector<256x32xf32>
    %cst_41 = arith.constant dense<0.000000e+00> : vector<256xf32>
    %66 = vector.multi_reduction <add>, %65, %cst_41 [1] : vector<256x32xf32> to vector<256xf32>
    %67 = vector.shape_cast %66 : vector<256xf32> to vector<256x1xf32>
    %cst_42 = arith.constant 3.200000e+01 : f32
    %68 = vector.broadcast %cst_42 : f32 to vector<256x1xf32>
    %69 = arith.divf %67, %68 : vector<256x1xf32>
    %70 = vector.broadcast %69 : vector<256x1xf32> to vector<256x32xf32>
    %71 = arith.subf %65, %70 : vector<256x32xf32>
    %72 = arith.mulf %71, %71 : vector<256x32xf32>
    %cst_43 = arith.constant dense<0.000000e+00> : vector<256xf32>
    %73 = vector.multi_reduction <add>, %72, %cst_43 [1] : vector<256x32xf32> to vector<256xf32>
    %74 = vector.shape_cast %73 : vector<256xf32> to vector<256x1xf32>
    %cst_44 = arith.constant 3.200000e+01 : f32
    %75 = vector.broadcast %cst_44 : f32 to vector<256x1xf32>
    %76 = arith.divf %74, %75 : vector<256x1xf32>
    %cst_45 = arith.constant 9.99999997E-7 : f32
    %77 = vector.broadcast %cst_45 : f32 to vector<256x1xf32>
    %78 = arith.addf %76, %77 : vector<256x1xf32>
    %79 = math.rsqrt %78 : vector<256x1xf32>
    %80 = vector.broadcast %79 : vector<256x1xf32> to vector<256x32xf32>
    %81 = arith.mulf %71, %80 : vector<256x32xf32>
    %82 = vector.broadcast %4 : vector<1x32xf32> to vector<256x32xf32>
    %83 = arith.mulf %82, %81 : vector<256x32xf32>
    %84 = vector.broadcast %5 : vector<1x32xf32> to vector<256x32xf32>
    %85 = arith.addf %83, %84 : vector<256x32xf32>
    %cst_46 = arith.constant 5.000000e-01 : f32
    %86 = vector.broadcast %cst_46 : f32 to vector<256x32xf32>
    %87 = arith.mulf %86, %85 : vector<256x32xf32>
    %cst_47 = arith.constant 0.707106769 : f32
    %88 = vector.broadcast %cst_47 : f32 to vector<256x32xf32>
    %89 = arith.mulf %85, %88 : vector<256x32xf32>
    %90 = math.erf %89 : vector<256x32xf32>
    %cst_48 = arith.constant 1.000000e+00 : f32
    %91 = vector.broadcast %cst_48 : f32 to vector<256x32xf32>
    %92 = arith.addf %91, %90 : vector<256x32xf32>
    %93 = arith.mulf %87, %92 : vector<256x32xf32>
    %cst_49 = arith.constant dense<0.000000e+00> : vector<256x64xf32>
    %94 = tpu.matmul %93, %1, %cst_49 {dimension_numbers = #tpu.dot_dimension_numbers<[1], [0], [0], [1], [0, 0, 1, 1], [], []>} : vector<256x32xf32>, vector<32x64xf32>, vector<256x64xf32> -> vector<256x64xf32>
    %95 = vector.broadcast %3 : vector<1x64xf32> to vector<256x64xf32>
    %96 = arith.addf %94, %95 : vector<256x64xf32>
    %cst_50 = arith.constant dense<0.000000e+00> : vector<256x4xf32>
    %97 = tpu.matmul %96, %8, %cst_50 {dimension_numbers = #tpu.dot_dimension_numbers<[1], [0], [0], [1], [0, 0, 1, 1], [], []>} : vector<256x64xf32>, vector<64x4xf32>, vector<256x4xf32> -> vector<256x4xf32>
    %cst_51 = arith.constant dense<0.000000e+00> : vector<256x64xf32>
    %98 = tpu.matmul %97, %9, %cst_51 {dimension_numbers = #tpu.dot_dimension_numbers<[1], [0], [0], [1], [0, 0, 1, 1], [], []>} : vector<256x4xf32>, vector<4x64xf32>, vector<256x64xf32> -> vector<256x64xf32>
    %99 = arith.subf %96, %98 : vector<256x64xf32>
    %100 = arith.mulf %99, %99 : vector<256x64xf32>
    %cst_52 = arith.constant dense<0.000000e+00> : vector<256x4xf32>
    %101 = tpu.matmul %100, %8, %cst_52 {dimension_numbers = #tpu.dot_dimension_numbers<[1], [0], [0], [1], [0, 0, 1, 1], [], []>} : vector<256x64xf32>, vector<64x4xf32>, vector<256x4xf32> -> vector<256x4xf32>
    %cst_53 = arith.constant 9.99999997E-7 : f32
    %102 = vector.broadcast %cst_53 : f32 to vector<256x4xf32>
    %103 = arith.addf %101, %102 : vector<256x4xf32>
    %104 = math.rsqrt %103 : vector<256x4xf32>
    %cst_54 = arith.constant dense<0.000000e+00> : vector<256x64xf32>
    %105 = tpu.matmul %104, %9, %cst_54 {dimension_numbers = #tpu.dot_dimension_numbers<[1], [0], [0], [1], [0, 0, 1, 1], [], []>} : vector<256x4xf32>, vector<4x64xf32>, vector<256x64xf32> -> vector<256x64xf32>
    %106 = arith.mulf %99, %105 : vector<256x64xf32>
    %107 = vector.broadcast %6 : vector<1x64xf32> to vector<256x64xf32>
    %108 = arith.mulf %106, %107 : vector<256x64xf32>
    %109 = vector.broadcast %7 : vector<1x64xf32> to vector<256x64xf32>
    %110 = arith.addf %108, %109 : vector<256x64xf32>
    %c0_55 = arith.constant 0 : index
    %c64 = arith.constant 64 : index
    %111 = vector.load %arg12[%c0_55, %c64] : memref<256x256xf32, #tpu.memory_space<vmem>>, vector<256x64xf32>
    tpu.vector_store %arg12[%c0_55, %c64], %110 {strides = array<i32>} : memref<256x256xf32, #tpu.memory_space<vmem>>, vector<256x64xf32>,
    %c2 = arith.constant 2 : index
    %c0_56 = arith.constant 0 : index
    %c0_57 = arith.constant 0 : index
    %112 = vector.load %arg2[%c2, %c0_56, %c0_57] : memref<4x32x32xf32, #tpu.memory_space<vmem>>, vector<1x32x32xf32>
    %113 = vector.shape_cast %112 : vector<1x32x32xf32> to vector<32x32xf32>
    %cst_58 = arith.constant dense<0.000000e+00> : vector<256x32xf32>
    %114 = tpu.matmul %0, %113, %cst_58 {dimension_numbers = #tpu.dot_dimension_numbers<[1], [0], [0], [1], [0, 0, 1, 1], [], []>} : vector<256x32xf32>, vector<32x32xf32>, vector<256x32xf32> -> vector<256x32xf32>
    %115 = vector.broadcast %2 : vector<1x32xf32> to vector<256x32xf32>
    %116 = arith.addf %114, %115 : vector<256x32xf32>
    %cst_59 = arith.constant dense<0.000000e+00> : vector<256xf32>
    %117 = vector.multi_reduction <add>, %116, %cst_59 [1] : vector<256x32xf32> to vector<256xf32>
    %118 = vector.shape_cast %117 : vector<256xf32> to vector<256x1xf32>
    %cst_60 = arith.constant 3.200000e+01 : f32
    %119 = vector.broadcast %cst_60 : f32 to vector<256x1xf32>
    %120 = arith.divf %118, %119 : vector<256x1xf32>
    %121 = vector.broadcast %120 : vector<256x1xf32> to vector<256x32xf32>
    %122 = arith.subf %116, %121 : vector<256x32xf32>
    %123 = arith.mulf %122, %122 : vector<256x32xf32>
    %cst_61 = arith.constant dense<0.000000e+00> : vector<256xf32>
    %124 = vector.multi_reduction <add>, %123, %cst_61 [1] : vector<256x32xf32> to vector<256xf32>
    %125 = vector.shape_cast %124 : vector<256xf32> to vector<256x1xf32>
    %cst_62 = arith.constant 3.200000e+01 : f32
    %126 = vector.broadcast %cst_62 : f32 to vector<256x1xf32>
    %127 = arith.divf %125, %126 : vector<256x1xf32>
    %cst_63 = arith.constant 9.99999997E-7 : f32
    %128 = vector.broadcast %cst_63 : f32 to vector<256x1xf32>
    %129 = arith.addf %127, %128 : vector<256x1xf32>
    %130 = math.rsqrt %129 : vector<256x1xf32>
    %131 = vector.broadcast %130 : vector<256x1xf32> to vector<256x32xf32>
    %132 = arith.mulf %122, %131 : vector<256x32xf32>
    %133 = vector.broadcast %4 : vector<1x32xf32> to vector<256x32xf32>
    %134 = arith.mulf %133, %132 : vector<256x32xf32>
    %135 = vector.broadcast %5 : vector<1x32xf32> to vector<256x32xf32>
    %136 = arith.addf %134, %135 : vector<256x32xf32>
    %cst_64 = arith.constant 5.000000e-01 : f32
    %137 = vector.broadcast %cst_64 : f32 to vector<256x32xf32>
    %138 = arith.mulf %137, %136 : vector<256x32xf32>
    %cst_65 = arith.constant 0.707106769 : f32
    %139 = vector.broadcast %cst_65 : f32 to vector<256x32xf32>
    %140 = arith.mulf %136, %139 : vector<256x32xf32>
    %141 = math.erf %140 : vector<256x32xf32>
    %cst_66 = arith.constant 1.000000e+00 : f32
    %142 = vector.broadcast %cst_66 : f32 to vector<256x32xf32>
    %143 = arith.addf %142, %141 : vector<256x32xf32>
    %144 = arith.mulf %138, %143 : vector<256x32xf32>
    %cst_67 = arith.constant dense<0.000000e+00> : vector<256x64xf32>
    %145 = tpu.matmul %144, %1, %cst_67 {dimension_numbers = #tpu.dot_dimension_numbers<[1], [0], [0], [1], [0, 0, 1, 1], [], []>} : vector<256x32xf32>, vector<32x64xf32>, vector<256x64xf32> -> vector<256x64xf32>
    %146 = vector.broadcast %3 : vector<1x64xf32> to vector<256x64xf32>
    %147 = arith.addf %145, %146 : vector<256x64xf32>
    %cst_68 = arith.constant dense<0.000000e+00> : vector<256x4xf32>
    %148 = tpu.matmul %147, %8, %cst_68 {dimension_numbers = #tpu.dot_dimension_numbers<[1], [0], [0], [1], [0, 0, 1, 1], [], []>} : vector<256x64xf32>, vector<64x4xf32>, vector<256x4xf32> -> vector<256x4xf32>
    %cst_69 = arith.constant dense<0.000000e+00> : vector<256x64xf32>
    %149 = tpu.matmul %148, %9, %cst_69 {dimension_numbers = #tpu.dot_dimension_numbers<[1], [0], [0], [1], [0, 0, 1, 1], [], []>} : vector<256x4xf32>, vector<4x64xf32>, vector<256x64xf32> -> vector<256x64xf32>
    %150 = arith.subf %147, %149 : vector<256x64xf32>
    %151 = arith.mulf %150, %150 : vector<256x64xf32>
    %cst_70 = arith.constant dense<0.000000e+00> : vector<256x4xf32>
    %152 = tpu.matmul %151, %8, %cst_70 {dimension_numbers = #tpu.dot_dimension_numbers<[1], [0], [0], [1], [0, 0, 1, 1], [], []>} : vector<256x64xf32>, vector<64x4xf32>, vector<256x4xf32> -> vector<256x4xf32>
    %cst_71 = arith.constant 9.99999997E-7 : f32
    %153 = vector.broadcast %cst_71 : f32 to vector<256x4xf32>
    %154 = arith.addf %152, %153 : vector<256x4xf32>
    %155 = math.rsqrt %154 : vector<256x4xf32>
    %cst_72 = arith.constant dense<0.000000e+00> : vector<256x64xf32>
    %156 = tpu.matmul %155, %9, %cst_72 {dimension_numbers = #tpu.dot_dimension_numbers<[1], [0], [0], [1], [0, 0, 1, 1], [], []>} : vector<256x4xf32>, vector<4x64xf32>, vector<256x64xf32> -> vector<256x64xf32>
    %157 = arith.mulf %150, %156 : vector<256x64xf32>
    %158 = vector.broadcast %6 : vector<1x64xf32> to vector<256x64xf32>
    %159 = arith.mulf %157, %158 : vector<256x64xf32>
    %160 = vector.broadcast %7 : vector<1x64xf32> to vector<256x64xf32>
    %161 = arith.addf %159, %160 : vector<256x64xf32>
    %c0_73 = arith.constant 0 : index
    %c128 = arith.constant 128 : index
    %162 = vector.load %arg12[%c0_73, %c128] : memref<256x256xf32, #tpu.memory_space<vmem>>, vector<256x64xf32>
    tpu.vector_store %arg12[%c0_73, %c128], %161 {strides = array<i32>} : memref<256x256xf32, #tpu.memory_space<vmem>>, vector<256x64xf32>,
    %c3 = arith.constant 3 : index
    %c0_74 = arith.constant 0 : index
    %c0_75 = arith.constant 0 : index
    %163 = vector.load %arg2[%c3, %c0_74, %c0_75] : memref<4x32x32xf32, #tpu.memory_space<vmem>>, vector<1x32x32xf32>
    %164 = vector.shape_cast %163 : vector<1x32x32xf32> to vector<32x32xf32>
    %cst_76 = arith.constant dense<0.000000e+00> : vector<256x32xf32>
    %165 = tpu.matmul %0, %164, %cst_76 {dimension_numbers = #tpu.dot_dimension_numbers<[1], [0], [0], [1], [0, 0, 1, 1], [], []>} : vector<256x32xf32>, vector<32x32xf32>, vector<256x32xf32> -> vector<256x32xf32>
    %166 = vector.broadcast %2 : vector<1x32xf32> to vector<256x32xf32>
    %167 = arith.addf %165, %166 : vector<256x32xf32>
    %cst_77 = arith.constant dense<0.000000e+00> : vector<256xf32>
    %168 = vector.multi_reduction <add>, %167, %cst_77 [1] : vector<256x32xf32> to vector<256xf32>
    %169 = vector.shape_cast %168 : vector<256xf32> to vector<256x1xf32>
    %cst_78 = arith.constant 3.200000e+01 : f32
    %170 = vector.broadcast %cst_78 : f32 to vector<256x1xf32>
    %171 = arith.divf %169, %170 : vector<256x1xf32>
    %172 = vector.broadcast %171 : vector<256x1xf32> to vector<256x32xf32>
    %173 = arith.subf %167, %172 : vector<256x32xf32>
    %174 = arith.mulf %173, %173 : vector<256x32xf32>
    %cst_79 = arith.constant dense<0.000000e+00> : vector<256xf32>
    %175 = vector.multi_reduction <add>, %174, %cst_79 [1] : vector<256x32xf32> to vector<256xf32>
    %176 = vector.shape_cast %175 : vector<256xf32> to vector<256x1xf32>
    %cst_80 = arith.constant 3.200000e+01 : f32
    %177 = vector.broadcast %cst_80 : f32 to vector<256x1xf32>
    %178 = arith.divf %176, %177 : vector<256x1xf32>
    %cst_81 = arith.constant 9.99999997E-7 : f32
    %179 = vector.broadcast %cst_81 : f32 to vector<256x1xf32>
    %180 = arith.addf %178, %179 : vector<256x1xf32>
    %181 = math.rsqrt %180 : vector<256x1xf32>
    %182 = vector.broadcast %181 : vector<256x1xf32> to vector<256x32xf32>
    %183 = arith.mulf %173, %182 : vector<256x32xf32>
    %184 = vector.broadcast %4 : vector<1x32xf32> to vector<256x32xf32>
    %185 = arith.mulf %184, %183 : vector<256x32xf32>
    %186 = vector.broadcast %5 : vector<1x32xf32> to vector<256x32xf32>
    %187 = arith.addf %185, %186 : vector<256x32xf32>
    %cst_82 = arith.constant 5.000000e-01 : f32
    %188 = vector.broadcast %cst_82 : f32 to vector<256x32xf32>
    %189 = arith.mulf %188, %187 : vector<256x32xf32>
    %cst_83 = arith.constant 0.707106769 : f32
    %190 = vector.broadcast %cst_83 : f32 to vector<256x32xf32>
    %191 = arith.mulf %187, %190 : vector<256x32xf32>
    %192 = math.erf %191 : vector<256x32xf32>
    %cst_84 = arith.constant 1.000000e+00 : f32
    %193 = vector.broadcast %cst_84 : f32 to vector<256x32xf32>
    %194 = arith.addf %193, %192 : vector<256x32xf32>
    %195 = arith.mulf %189, %194 : vector<256x32xf32>
    %cst_85 = arith.constant dense<0.000000e+00> : vector<256x64xf32>
    %196 = tpu.matmul %195, %1, %cst_85 {dimension_numbers = #tpu.dot_dimension_numbers<[1], [0], [0], [1], [0, 0, 1, 1], [], []>} : vector<256x32xf32>, vector<32x64xf32>, vector<256x64xf32> -> vector<256x64xf32>
    %197 = vector.broadcast %3 : vector<1x64xf32> to vector<256x64xf32>
    %198 = arith.addf %196, %197 : vector<256x64xf32>
    %cst_86 = arith.constant dense<0.000000e+00> : vector<256x4xf32>
    %199 = tpu.matmul %198, %8, %cst_86 {dimension_numbers = #tpu.dot_dimension_numbers<[1], [0], [0], [1], [0, 0, 1, 1], [], []>} : vector<256x64xf32>, vector<64x4xf32>, vector<256x4xf32> -> vector<256x4xf32>
    %cst_87 = arith.constant dense<0.000000e+00> : vector<256x64xf32>
    %200 = tpu.matmul %199, %9, %cst_87 {dimension_numbers = #tpu.dot_dimension_numbers<[1], [0], [0], [1], [0, 0, 1, 1], [], []>} : vector<256x4xf32>, vector<4x64xf32>, vector<256x64xf32> -> vector<256x64xf32>
    %201 = arith.subf %198, %200 : vector<256x64xf32>
    %202 = arith.mulf %201, %201 : vector<256x64xf32>
    %cst_88 = arith.constant dense<0.000000e+00> : vector<256x4xf32>
    %203 = tpu.matmul %202, %8, %cst_88 {dimension_numbers = #tpu.dot_dimension_numbers<[1], [0], [0], [1], [0, 0, 1, 1], [], []>} : vector<256x64xf32>, vector<64x4xf32>, vector<256x4xf32> -> vector<256x4xf32>
    %cst_89 = arith.constant 9.99999997E-7 : f32
    %204 = vector.broadcast %cst_89 : f32 to vector<256x4xf32>
    %205 = arith.addf %203, %204 : vector<256x4xf32>
    %206 = math.rsqrt %205 : vector<256x4xf32>
    %cst_90 = arith.constant dense<0.000000e+00> : vector<256x64xf32>
    %207 = tpu.matmul %206, %9, %cst_90 {dimension_numbers = #tpu.dot_dimension_numbers<[1], [0], [0], [1], [0, 0, 1, 1], [], []>} : vector<256x4xf32>, vector<4x64xf32>, vector<256x64xf32> -> vector<256x64xf32>
    %208 = arith.mulf %201, %207 : vector<256x64xf32>
    %209 = vector.broadcast %6 : vector<1x64xf32> to vector<256x64xf32>
    %210 = arith.mulf %208, %209 : vector<256x64xf32>
    %211 = vector.broadcast %7 : vector<1x64xf32> to vector<256x64xf32>
    %212 = arith.addf %210, %211 : vector<256x64xf32>
    %c0_91 = arith.constant 0 : index
    %c192 = arith.constant 192 : index
    %213 = vector.load %arg12[%c0_91, %c192] : memref<256x256xf32, #tpu.memory_space<vmem>>, vector<256x64xf32>
    tpu.vector_store %arg12[%c0_91, %c192], %212 {strides = array<i32>} : memref<256x256xf32, #tpu.memory_space<vmem>>, vector<256x64xf32>,
    return
  }
  func.func @transform_0(%arg0: i32) -> (i32, i32) {
    %c0_i32 = arith.constant 0 : i32
    %c0_i32_0 = arith.constant 0 : i32
    return %arg0, %c0_i32 : i32, i32
  }
  func.func @transform_1(%arg0: i32) -> (i32, i32, i32) {
    %c0_i32 = arith.constant 0 : i32
    %c0_i32_0 = arith.constant 0 : i32
    %c0_i32_1 = arith.constant 0 : i32
    %c0_i32_2 = arith.constant 0 : i32
    return %c0_i32, %c0_i32_0, %c0_i32_1 : i32, i32, i32
  }
  func.func @transform_2(%arg0: i32) -> (i32, i32) {
    %c0_i32 = arith.constant 0 : i32
    %c0_i32_0 = arith.constant 0 : i32
    %c0_i32_1 = arith.constant 0 : i32
    return %c0_i32, %c0_i32_0 : i32, i32
  }
  func.func @transform_3(%arg0: i32) -> (i32, i32) {
    %c0_i32 = arith.constant 0 : i32
    %c0_i32_0 = arith.constant 0 : i32
    %c0_i32_1 = arith.constant 0 : i32
    return %c0_i32, %c0_i32_0 : i32, i32
  }
  func.func @transform_4(%arg0: i32) -> (i32, i32) {
    %c0_i32 = arith.constant 0 : i32
    %c0_i32_0 = arith.constant 0 : i32
    %c0_i32_1 = arith.constant 0 : i32
    return %c0_i32, %c0_i32_0 : i32, i32
  }
  func.func @transform_5(%arg0: i32) -> (i32, i32) {
    %c0_i32 = arith.constant 0 : i32
    %c0_i32_0 = arith.constant 0 : i32
    %c0_i32_1 = arith.constant 0 : i32
    return %c0_i32, %c0_i32_0 : i32, i32
  }
  func.func @transform_6(%arg0: i32) -> (i32, i32) {
    %c0_i32 = arith.constant 0 : i32
    %c0_i32_0 = arith.constant 0 : i32
    %c0_i32_1 = arith.constant 0 : i32
    return %c0_i32, %c0_i32_0 : i32, i32
  }
  func.func @transform_7(%arg0: i32) -> (i32, i32) {
    %c0_i32 = arith.constant 0 : i32
    %c0_i32_0 = arith.constant 0 : i32
    %c0_i32_1 = arith.constant 0 : i32
    return %c0_i32, %c0_i32_0 : i32, i32
  }
  func.func @transform_8(%arg0: i32) -> (i32, i32) {
    %c0_i32 = arith.constant 0 : i32
    %c0_i32_0 = arith.constant 0 : i32
    %c0_i32_1 = arith.constant 0 : i32
    return %c0_i32, %c0_i32_0 : i32, i32
  }
  func.func @transform_9(%arg0: i32) -> (i32, i32) {
    %c0_i32 = arith.constant 0 : i32
    %c0_i32_0 = arith.constant 0 : i32
    %c0_i32_1 = arith.constant 0 : i32
    return %c0_i32, %c0_i32_0 : i32, i32
  }
  func.func @transform_10(%arg0: i32) -> (i32, i32) {
    %c0_i32 = arith.constant 0 : i32
    %c0_i32_0 = arith.constant 0 : i32
    %c0_i32_1 = arith.constant 0 : i32
    return %c0_i32, %c0_i32_0 : i32, i32
  }
  func.func @transform_11(%arg0: i32) -> (i32, i32) {
    %c0_i32 = arith.constant 0 : i32
    %c0_i32_0 = arith.constant 0 : i32
    return %arg0, %c0_i32 : i32, i32
  }
}

</mosaic_0001>

<bundles_post_ra>
// kernel: tpu_custom_call.1
= control target key start
LH: loop header
LB: loop body
LE: loop exit
PB: predicated region body
PF: predicated region fallthrough
CT: control target
= control target key end

     0   :  { %s21417_s0 = inlined_call_operand.vmem [shape: f32[512,32], index: 0, kind: input, shape index: {}]   ;;  %s21418_s1 = inlined_call_operand.vmem [shape: f32[4,32,32], index: 1, kind: input, shape index: {}]   ;;  %s21419_s2 = inlined_call_operand.vmem [shape: f32[1,32], index: 2, kind: input, shape index: {}]   ;;  %s21420_s3 = inlined_call_operand.vmem [shape: f32[32,64], index: 3, kind: input, shape index: {}]   ;;  %s21421_s4 = inlined_call_operand.vmem [shape: f32[1,64], index: 4, kind: input, shape index: {}]   ;;  %s21422_s5 = inlined_call_operand.vmem [shape: f32[1,32], index: 5, kind: input, shape index: {}]   ;;  %s21423_s6 = inlined_call_operand.vmem [shape: f32[1,32], index: 6, kind: input, shape index: {}]   ;;  %s21424_s7 = inlined_call_operand.vmem [shape: f32[1,64], index: 7, kind: input, shape index: {}]   ;;  %s21425_s8 = inlined_call_operand.vmem [shape: f32[1,64], index: 8, kind: input, shape index: {}]   ;;  %s21426_s9 = inlined_call_operand.vmem [shape: f32[64,4], index: 9, kind: input, shape index: {}]   ;;  %s21427_s10 = inlined_call_operand.vmem [shape: f32[4,64], index: 10, kind: input, shape index: {}]   ;;  %s21428_s11 = inlined_call_operand.hbm [shape: f32[512,256], index: 11, kind: output, shape index: {}]  }
   0x1   :  { %21508 = sst [smem:[#allocation88_spill]] %s21417_s0 }
   0x2   :  { %16 = vsyncpa [#allocation3], 0 }
   0x3   :  { %18 = vsyncpa [#allocation3 + $0x1], 0  ;;  %s15996_s17 = smov 0   ;;  %s15998_s18 = smov 0  }
   0x4   :  { %s16000_s19 = smov 0   ;;  %s16002_s20 = smov 0  }
   0x5 LB: > { %s16017_s21 = sadd.s32 4294967295, %s15930_s20   ;;  %s11708_s22 = sadd.s32 4294967294, %s15930_s20   ;;  %s15930_s20 = sphi %s16002_s20, %s21721_s20   ;;  %s15926_s19 = sphi %s16000_s19, %s21720_s19   ;;  %s15922_s18 = sphi %s15998_s18, %s21719_s18   ;;  %s15918_s17 = sphi %s15996_s17, %s21718_s17  }
   0x6   : > { %s16021_s23 = sadd.s32 1, %s15930_s20   ;;  %s267_s24 = sadd.s32 1, %s15926_s19 }
   0x7   : > { %s264_s25 = ssub.s32 %s15930_s20, %s16021_s23  ;;  %p277_p0 = scmp.ne.s32.totalorder %s15926_s19, %s15922_s18 }
   0x8   : > { %p265_p1 = scmp.eq.s32.totalorder %s264_s25, 0  ;;  %p278_p2 = scmp.eq.s32.totalorder %s16017_s21, 1 }
   0x9   : > { %p283_p3 = scmp.ne.s32.totalorder %s15922_s18, %s15918_s17  ;;  %p284_p4 = scmp.eq.s32.totalorder %s11708_s22, 1 }
   0xa   : > { %s16032_s26 = scalar_select %p265_p1, %s15926_s19, %s267_s24  }
   0xb   : > { %p16034_p5 = por %p278_p2, %p277_p0  ;;  %p16038_p6 = por %p284_p4, %p283_p3 }
   0xc   : > { %p11711_p7 = scmp.ge.s32.totalorder %s15930_s20, 1  ;;  %p341_p8 = scmp.lt.s32.totalorder %s15930_s20, 3 }
   0xe   : > { %p342_p9 = pnand %p11711_p7, %p341_p8 }
  0x10   : > { %345 = sbr.rel (%p342_p9) target bundleno = 5710 (0x164e), region = 64 }
  0x17   : > { %v439_v0 = vld [vmem:[%s21418_s1] sm:$0xff]  ;;  %v440_v1 = vld [vmem:[%s21418_s1 + $0x8] sm:$0xff]  ;;  %v441_v2 = vld [vmem:[%s21418_s1 + $0x10] sm:$0xff]  ;;  %s11713_s16 = sshll.u32 %s16017_s21, 5  ;;  %vm449_vm0 = vcmask 261120   ;;  %s21511_s0 = sld [smem:[#allocation88_spill]] }
  0x18   : > { %v14749_v3 = vpack.c.bf16 %v440_v1, %v439_v0  ;;  %v442_v4 = vld [vmem:[%s21418_s1 + $0x18] sm:$0xff]  ;;  %p382_p10 = scmp.lt.s32.totalorder %s11713_s16, 63  ;;  %v16129_v38 = vld [vmem:[%s21419_s2] ss:$0 sm:$0xff]  ;;  %vm2170_vm1 = vcmask 1043456   ;;  %vm1751_vm2 = vcmask 523264  }
  0x19   : > { %v14753_v5 = vpack.c.bf16 %v442_v4, %v441_v2  ;;  %vm2073_vm3 = vcmask 31744   ;;  %s378_s24 = sand.u32 1, %s15922_s18   ;;  %vm6072_vm4 = vcmask 1048064  }
  0x1a   : > { %14750 = vmatprep.subr.bf16.mxu0 %v14749_v3  ;;  %s21723_s16 = smov (!%p382_p10, %s11713_s16), 63  ;;  %s11712_s29 = sshll.u32 %s378_s24, 9 }
  0x1b   : > { %14752 = vmatpush3.bf16.msra.mxu0 %v14749_v3  ;;  %s11714_s25 = sshll.u32 %s21723_s16, 3  ;;  %s17475_s14 = scalar_lea.vmem [#allocation2], %s11712_s29 }
  0x1c   : > { %14754 = vmatprep.subr.bf16.mxu0 %v14753_v5  ;;  %s11646_s13 = sshll.u32 %s17475_s14, 4  ;;  %s21368_s13 = int_to_ptr.vmem [resolvable:$true] %s11646_s13 }
  0x1d   : > { %s16060_s12 = scalar_lea.vmem %s21511_s0, %s11714_s25  ;;  %s15932_s25 = smov 64  }
  0x1e   : > { %v388_v6 = vld [vmem:[%s16060_s12] sm:$0xff]  ;;  %v389_v7 = vld [vmem:[%s16060_s12 + $0x8] sm:$0xff]  ;;  %v390_v8 = vld [vmem:[%s16060_s12 + $0x10] sm:$0xff]  ;;  %s15933_s0 = smov [#allocation2]  }
  0x1f   : > { %14756 = vmatpush3.bf16.msra.mxu0 %v14753_v5  ;;  %13397 = vmatprep.mubr.msk.f32.mxu0 %vm449_vm0, %v388_v6  ;;  %v391_v9 = vld [vmem:[%s16060_s12 + $0x18] sm:$0xff]  ;;  %v392_v10 = vld [vmem:[%s16060_s12 + $0x20] sm:$0xff]  ;;  %v393_v11 = vld [vmem:[%s16060_s12 + $0x28] sm:$0xff]  ;;  %s15872_s29 = sshll.u32 %s15933_s0, 4  ;;  %s15873_s29 = int_to_ptr.vmem [resolvable:$false] %s15872_s29 }
  0x20   : > { %v394_v12 = vld [vmem:[%s16060_s12 + $0x30] sm:$0xff]  ;;  %v395_v13 = vld [vmem:[%s16060_s12 + $0x38] sm:$0xff]  ;;  %v396_v14 = vld [vmem:[%s16060_s12 + $0x40] sm:$0xff]  ;;  %s15874_s30 = scalar_lea.vmem %s15873_s29, 16384  ;;  %p15875_p0 = scmp.lt.s32.totalorder %s21368_s13, %s15873_s29 }
  0x21   : > { %v397_v15 = vld [vmem:[%s16060_s12 + $0x48] sm:$0xff]  ;;  %v398_v16 = vld [vmem:[%s16060_s12 + $0x50] sm:$0xff]  ;;  %v399_v17 = vld [vmem:[%s16060_s12 + $0x58] sm:$0xff] }
  0x22   : > { %13398 = vmatmul.mubr.msk.f32.vlgmr.msra.gmra.mrb[0].mxu0 %vm449_vm0, %v389_v7  ;;  %v400_v18 = vld [vmem:[%s16060_s12 + $0x60] sm:$0xff]  ;;  %v401_v19 = vld [vmem:[%s16060_s12 + $0x68] sm:$0xff]  ;;  %v402_v20 = vld [vmem:[%s16060_s12 + $0x70] sm:$0xff] }
  0x23   : > { %13400 = vmatprep.mubr.msk.f32.mxu0 %vm449_vm0, %v390_v8  ;;  %v403_v21 = vld [vmem:[%s16060_s12 + $0x78] sm:$0xff]  ;;  %v404_v22 = vld [vmem:[%s16060_s12 + $0x80] sm:$0xff]  ;;  %v405_v23 = vld [vmem:[%s16060_s12 + $0x88] sm:$0xff] }
  0x24   : > { %v406_v24 = vld [vmem:[%s16060_s12 + $0x90] sm:$0xff]  ;;  %v407_v25 = vld [vmem:[%s16060_s12 + $0x98] sm:$0xff]  ;;  %v408_v26 = vld [vmem:[%s16060_s12 + $0xa0] sm:$0xff] }
  0x25   : > { %v409_v27 = vld [vmem:[%s16060_s12 + $0xa8] sm:$0xff]  ;;  %v410_v28 = vld [vmem:[%s16060_s12 + $0xb0] sm:$0xff]  ;;  %v411_v29 = vld [vmem:[%s16060_s12 + $0xb8] sm:$0xff] }
  0x26   : > { %13401 = vmatmul.mubr.msk.f32.gmra.mrb[2].mxu0 %vm449_vm0, %v391_v9  ;;  %v412_v30 = vld [vmem:[%s16060_s12 + $0xc0] sm:$0xff]  ;;  %v413_v31 = vld [vmem:[%s16060_s12 + $0xc8] sm:$0xff]  ;;  %v414_v32 = vld [vmem:[%s16060_s12 + $0xd0] sm:$0xff] }
  0x27   : > { %13403 = vmatprep.mubr.msk.f32.mxu0 %vm449_vm0, %v392_v10  ;;  %v415_v33 = vld [vmem:[%s16060_s12 + $0xd8] sm:$0xff]  ;;  %v416_v34 = vld [vmem:[%s16060_s12 + $0xe0] sm:$0xff]  ;;  %v417_v35 = vld [vmem:[%s16060_s12 + $0xe8] sm:$0xff] }
  0x28   : > { %v418_v36 = vld [vmem:[%s16060_s12 + $0xf0] sm:$0xff]  ;;  %v419_v37 = vld [vmem:[%s16060_s12 + $0xf8] sm:$0xff] }
  0x2a   : > { %13404 = vmatmul.mubr.msk.f32.gmra.mrb[4].mxu0 %vm449_vm0, %v393_v11 }
  0x2b   : > { %13406 = vmatprep.mubr.msk.f32.mxu0 %vm449_vm0, %v394_v12 }
  0x2e   : > { %13407 = vmatmul.mubr.msk.f32.gmra.mrb[6].mxu0 %vm449_vm0, %v395_v13 }
  0x2f   : > { %13409 = vmatprep.mubr.msk.f32.mxu0 %vm449_vm0, %v396_v14 }
  0x32   : > { %13410 = vmatmul.mubr.msk.f32.gmra.mrb[8].mxu0 %vm449_vm0, %v397_v15 }
  0x33   : > { %13412 = vmatprep.mubr.msk.f32.mxu0 %vm449_vm0, %v398_v16 }
  0x36   : > { %13413 = vmatmul.mubr.msk.f32.gmra.mrb[10].mxu0 %vm449_vm0, %v399_v17 }
  0x37   : > { %13415 = vmatprep.mubr.msk.f32.mxu0 %vm449_vm0, %v400_v18 }
  0x3a   : > { %13416 = vmatmul.mubr.msk.f32.gmra.mrb[12].mxu0 %vm449_vm0, %v401_v19 }
  0x3b   : > { %13418 = vmatprep.mubr.msk.f32.mxu0 %vm449_vm0, %v402_v20 }
  0x3e   : > { %13419 = vmatmul.mubr.msk.f32.gmra.mrb[14].mxu0 %vm449_vm0, %v403_v21 }
  0x3f   : > { %13421 = vmatprep.mubr.msk.f32.mxu0 %vm449_vm0, %v404_v22 }
  0x42   : > { %13422 = vmatmul.mubr.msk.f32.gmra.mrb[16].mxu0 %vm449_vm0, %v405_v23 }
  0x43   : > { %13424 = vmatprep.mubr.msk.f32.mxu0 %vm449_vm0, %v406_v24 }
  0x46   : > { %13425 = vmatmul.mubr.msk.f32.gmra.mrb[18].mxu0 %vm449_vm0, %v407_v25 }
  0x47   : > { %13427 = vmatprep.mubr.msk.f32.mxu0 %vm449_vm0, %v408_v26 }
  0x4a   : > { %13428 = vmatmul.mubr.msk.f32.gmra.mrb[20].mxu0 %vm449_vm0, %v409_v27 }
  0x4b   : > { %13430 = vmatprep.mubr.msk.f32.mxu0 %vm449_vm0, %v410_v28 }
  0x4e   : > { %13431 = vmatmul.mubr.msk.f32.gmra.mrb[22].mxu0 %vm449_vm0, %v411_v29 }
  0x4f   : > { %13433 = vmatprep.mubr.msk.f32.mxu0 %vm449_vm0, %v412_v30 }
  0x52   : > { %13434 = vmatmul.mubr.msk.f32.gmra.mrb[24].mxu0 %vm449_vm0, %v413_v31 }
  0x53   : > { %13436 = vmatprep.mubr.msk.f32.mxu0 %vm449_vm0, %v414_v32 }
  0x56   : > { %13437 = vmatmul.mubr.msk.f32.gmra.mrb[26].mxu0 %vm449_vm0, %v415_v33 }
  0x57   : > { %13439 = vmatprep.mubr.msk.f32.mxu0 %vm449_vm0, %v416_v34 }
  0x5a   : > { %13440 = vmatmul.mubr.msk.f32.gmra.mrb[28].mxu0 %vm449_vm0, %v417_v35 }
  0x5b   : > { %13442 = vmatprep.mubr.msk.f32.mxu0 %vm449_vm0, %v418_v36 }
  0x5e   : > { %13443 = vmatmul.mubr.msk.f32.gmra.mrb[30].mxu0 %vm449_vm0, %v419_v37 }
  0xf5   : > { %v13399_v39 = vpop.f32.mrb[0].mxu0 }
  0xf6   : > { %v612_v40 = vpop.f32.mrb[1].mxu0  ;;  %v16137_v44 = vadd.f32 %v13399_v39, %v16129_v38 }
  0xf7   : > { %v16132_v41 = vadd.f32 %v16129_v38, %v612_v40 }
  0xf8   : > { %v774_v49 = vsel %vm449_vm0, %v16137_v44, 0.0 }
  0xf9   : > { %v13402_v42 = vpop.f32.mrb[2].mxu0  ;;  %v771_v43 = vsel %vm449_vm0, %v16132_v41, 0.0 }
  0xfa   : > { %v622_v45 = vpop.f32.mrb[3].mxu0  ;;  %772 = vadd.xlane.f32.xlu0 %v771_v43  ;;  %v16147_v50 = vadd.f32 %v13402_v42, %v16129_v38 }
  0xfb   : > { %v16140_v46 = vadd.f32 %v16129_v38, %v622_v45 }
  0xfc   : > { %v780_v54 = vsel %vm449_vm0, %v16147_v50, 0.0 }
  0xfd   : > { %v13405_v47 = vpop.f32.mrb[4].mxu0  ;;  %v777_v48 = vsel %vm449_vm0, %v16140_v46, 0.0 }
  0xfe   : > { %v632_v51 = vpop.f32.mrb[5].mxu0  ;;  %778 = vadd.xlane.f32.xlu1 %v777_v48  ;;  %775 = vadd.xlane.f32.xlu0 %v774_v49  ;;  %v16157_v56 = vadd.f32 %v13405_v47, %v16129_v38 }
  0xff   : > { %v16150_v52 = vadd.f32 %v16129_v38, %v632_v51 }
 0x100   : > { %v786_v60 = vsel %vm449_vm0, %v16157_v56, 0.0 }
 0x101   : > { %v13408_v53 = vpop.f32.mrb[6].mxu0  ;;  %v783_v55 = vsel %vm449_vm0, %v16150_v52, 0.0 }
 0x102   : > { %v642_v57 = vpop.f32.mrb[7].mxu0  ;;  %781 = vadd.xlane.f32.xlu1 %v780_v54  ;;  %784 = vadd.xlane.f32.xlu0 %v783_v55  ;;  %v16167_v62 = vadd.f32 %v13408_v53, %v16129_v38 }
 0x103   : > { %v16160_v58 = vadd.f32 %v16129_v38, %v642_v57 }
 0x104   : > { %v792_v2 = vsel %vm449_vm0, %v16167_v62, 0.0 }
 0x105   : > { %v13411_v59 = vpop.f32.mrb[8].mxu0  ;;  %v789_v61 = vsel %vm449_vm0, %v16160_v58, 0.0 }
 0x106   : > { %v652_v63 = vpop.f32.mrb[9].mxu0  ;;  %787 = vadd.xlane.f32.xlu1 %v786_v60  ;;  %790 = vadd.xlane.f32.xlu0 %v789_v61  ;;  %v16177_v4 = vadd.f32 %v13411_v59, %v16129_v38 }
 0x107   : > { %v16170_v0 = vadd.f32 %v16129_v38, %v652_v63 }
 0x108   : > { %v798_v8 = vsel %vm449_vm0, %v16177_v4, 0.0 }
 0x109   : > { %v13414_v1 = vpop.f32.mrb[10].mxu0  ;;  %v795_v3 = vsel %vm449_vm0, %v16170_v0, 0.0 }
 0x10a   : > { %v662_v5 = vpop.f32.mrb[11].mxu0  ;;  %793 = vadd.xlane.f32.xlu1 %v792_v2  ;;  %796 = vadd.xlane.f32.xlu0 %v795_v3  ;;  %v16187_v10 = vadd.f32 %v13414_v1, %v16129_v38 }
 0x10b   : > { %v16180_v6 = vadd.f32 %v16129_v38, %v662_v5 }
 0x10c   : > { %v804_v14 = vsel %vm449_vm0, %v16187_v10, 0.0 }
 0x10d   : > { %v13417_v7 = vpop.f32.mrb[12].mxu0  ;;  %v801_v9 = vsel %vm449_vm0, %v16180_v6, 0.0 }
 0x10e   : > { %v672_v11 = vpop.f32.mrb[13].mxu0  ;;  %799 = vadd.xlane.f32.xlu1 %v798_v8  ;;  %802 = vadd.xlane.f32.xlu0 %v801_v9  ;;  %v16197_v16 = vadd.f32 %v13417_v7, %v16129_v38 }
 0x10f   : > { %v16190_v12 = vadd.f32 %v16129_v38, %v672_v11 }
 0x110   : > { %v810_v20 = vsel %vm449_vm0, %v16197_v16, 0.0 }
 0x111   : > { %v13420_v13 = vpop.f32.mrb[14].mxu0  ;;  %v807_v15 = vsel %vm449_vm0, %v16190_v12, 0.0 }
 0x112   : > { %v682_v17 = vpop.f32.mrb[15].mxu0  ;;  %805 = vadd.xlane.f32.xlu1 %v804_v14  ;;  %808 = vadd.xlane.f32.xlu0 %v807_v15  ;;  %v16207_v22 = vadd.f32 %v13420_v13, %v16129_v38 }
 0x113   : > { %v16200_v18 = vadd.f32 %v16129_v38, %v682_v17 }
 0x114   : > { %v816_v26 = vsel %vm449_vm0, %v16207_v22, 0.0 }
 0x115   : > { %v13423_v19 = vpop.f32.mrb[16].mxu0  ;;  %v813_v21 = vsel %vm449_vm0, %v16200_v18, 0.0 }
 0x116   : > { %v692_v23 = vpop.f32.mrb[17].mxu0  ;;  %811 = vadd.xlane.f32.xlu1 %v810_v20  ;;  %814 = vadd.xlane.f32.xlu0 %v813_v21  ;;  %v16217_v28 = vadd.f32 %v13423_v19, %v16129_v38 }
 0x117   : > { %v16210_v24 = vadd.f32 %v16129_v38, %v692_v23 }
 0x118   : > { %v822_v32 = vsel %vm449_vm0, %v16217_v28, 0.0 }
 0x119   : > { %v13426_v25 = vpop.f32.mrb[18].mxu0  ;;  %v819_v27 = vsel %vm449_vm0, %v16210_v24, 0.0 }
 0x11a   : > { %v702_v29 = vpop.f32.mrb[19].mxu0  ;;  %817 = vadd.xlane.f32.xlu1 %v816_v26  ;;  %820 = vadd.xlane.f32.xlu0 %v819_v27  ;;  %v16227_v34 = vadd.f32 %v13426_v25, %v16129_v38 }
 0x11b   : > { %v16220_v30 = vadd.f32 %v16129_v38, %v702_v29 }
 0x11c   : > { %v828_v39 = vsel %vm449_vm0, %v16227_v34, 0.0 }
 0x11d   : > { %v13429_v31 = vpop.f32.mrb[20].mxu0  ;;  %v825_v33 = vsel %vm449_vm0, %v16220_v30, 0.0 }
 0x11e   : > { %v712_v35 = vpop.f32.mrb[21].mxu0  ;;  %823 = vadd.xlane.f32.xlu1 %v822_v32  ;;  %826 = vadd.xlane.f32.xlu0 %v825_v33  ;;  %v16237_v42 = vadd.f32 %v13429_v31, %v16129_v38 }
 0x11f   : > { %v16230_v36 = vadd.f32 %v16129_v38, %v712_v35 }
 0x120   : > { %v834_v48 = vsel %vm449_vm0, %v16237_v42, 0.0 }
 0x121   : > { %v13432_v37 = vpop.f32.mrb[22].mxu0  ;;  %v831_v40 = vsel %vm449_vm0, %v16230_v36, 0.0 }
 0x122   : > { %v722_v43 = vpop.f32.mrb[23].mxu0  ;;  %829 = vadd.xlane.f32.xlu1 %v828_v39  ;;  %832 = vadd.xlane.f32.xlu0 %v831_v40  ;;  %v16247_v51 = vadd.f32 %v13432_v37, %v16129_v38 }
 0x123   : > { %v16240_v45 = vadd.f32 %v16129_v38, %v722_v43 }
 0x124   : > { %v840_v57 = vsel %vm449_vm0, %v16247_v51, 0.0 }
 0x125   : > { %v13435_v47 = vpop.f32.mrb[24].mxu0  ;;  %v837_v49 = vsel %vm449_vm0, %v16240_v45, 0.0 }
 0x126   : > { %v732_v53 = vpop.f32.mrb[25].mxu0  ;;  %835 = vadd.xlane.f32.xlu1 %v834_v48  ;;  %838 = vadd.xlane.f32.xlu0 %v837_v49  ;;  %v16257_v60 = vadd.f32 %v13435_v47, %v16129_v38 }
 0x127   : > { %v16250_v54 = vadd.f32 %v16129_v38, %v732_v53 }
 0x128   : > { %v846_v2 = vsel %vm449_vm0, %v16257_v60, 0.0 }
 0x129   : > { %v13438_v55 = vpop.f32.mrb[26].mxu0  ;;  %v843_v59 = vsel %vm449_vm0, %v16250_v54, 0.0 }
 0x12a   : > { %v742_v61 = vpop.f32.mrb[27].mxu0  ;;  %841 = vadd.xlane.f32.xlu1 %v840_v57  ;;  %844 = vadd.xlane.f32.xlu0 %v843_v59  ;;  %v16267_v5 = vadd.f32 %v13438_v55, %v16129_v38 }
 0x12b   : > { %v16260_v63 = vadd.f32 %v16129_v38, %v742_v61 }
 0x12c   : > { %v852_v11 = vsel %vm449_vm0, %v16267_v5, 0.0 }
 0x12d   : > { %v13441_v1 = vpop.f32.mrb[28].mxu0  ;;  %v849_v3 = vsel %vm449_vm0, %v16260_v63, 0.0 }
 0x12e   : > { %v752_v7 = vpop.f32.mrb[29].mxu0  ;;  %847 = vadd.xlane.f32.xlu1 %v846_v2  ;;  %850 = vadd.xlane.f32.xlu0 %v849_v3  ;;  %v16277_v14 = vadd.f32 %v13441_v1, %v16129_v38 }
 0x12f   : > { %v16270_v8 = vadd.f32 %v16129_v38, %v752_v7 }
 0x130   : > { %v858_v19 = vsel %vm449_vm0, %v16277_v14, 0.0 }
 0x131   : > { %v13444_v9 = vpop.f32.mrb[30].mxu0  ;;  %v855_v13 = vsel %vm449_vm0, %v16270_v8, 0.0 }
 0x132   : > { %v762_v15 = vpop.f32.mrb[31].mxu0  ;;  %853 = vadd.xlane.f32.xlu1 %v852_v11  ;;  %856 = vadd.xlane.f32.xlu0 %v855_v13  ;;  %v16287_v21 = vadd.f32 %v13444_v9, %v16129_v38 }
 0x133   : > { %v16280_v17 = vadd.f32 %v16129_v38, %v762_v15 }
 0x134   : > { %v864_v23 = vsel %vm449_vm0, %v16287_v21, 0.0 }
 0x135   : > { %v861_v20 = vsel %vm449_vm0, %v16280_v17, 0.0 }
 0x136   : > { %859 = vadd.xlane.f32.xlu1 %v858_v19  ;;  %862 = vadd.xlane.f32.xlu0 %v861_v20 }
 0x13a   : > { %865 = vadd.xlane.f32.xlu1 %v864_v23 }
 0x187   : > { %v773_v25 = vpop.xlane.xlu0 %772 }
 0x188   : > { %v868_v26 = vmul.f32 0.03125, %v773_v25 }
 0x18a   : > { %v16292_v27 = vsub.f32 %v16132_v41, %v868_v26 }
 0x18b   : > { %v779_v29 = vpop.xlane.xlu1 %778  ;;  %v776_v31 = vpop.xlane.xlu0 %775 }
 0x18c   : > { %v870_v32 = vmul.f32 0.03125, %v779_v29  ;;  %v869_v33 = vmul.f32 0.03125, %v776_v31  ;;  %v932_v35 = vmul.f32 %v16292_v27, %v16292_v27 }
 0x18e   : > { %v16297_v38 = vsub.f32 %v16140_v46, %v870_v32  ;;  %v16300_v37 = vsub.f32 %v16137_v44, %v869_v33  ;;  %v964_v39 = vsel %vm449_vm0, %v932_v35, 0.0 }
 0x18f   : > { %v782_v40 = vpop.xlane.xlu1 %781  ;;  %965 = vadd.xlane.f32.xlu0 %v964_v39  ;;  %v785_v43 = vpop.xlane.xlu0 %784 }
 0x190   : > { %v871_v41 = vmul.f32 0.03125, %v782_v40  ;;  %v872_v47 = vmul.f32 0.03125, %v785_v43  ;;  %v934_v48 = vmul.f32 %v16297_v38, %v16297_v38  ;;  %v933_v49 = vmul.f32 %v16300_v37, %v16300_v37 }
 0x192   : > { %v16308_v53 = vsub.f32 %v16147_v50, %v871_v41  ;;  %v16311_v46 = vsub.f32 %v16150_v52, %v872_v47  ;;  %v970_v44 = vsel %vm449_vm0, %v934_v48, 0.0  ;;  %v967_v55 = vsel %vm449_vm0, %v933_v49, 0.0 }
 0x193   : > { %v788_v57 = vpop.xlane.xlu1 %787  ;;  %971 = vadd.xlane.f32.xlu0 %v970_v44  ;;  %968 = vadd.xlane.f32.xlu1 %v967_v55  ;;  %v791_v59 = vpop.xlane.xlu0 %790 }
 0x194   : > { %v873_v61 = vmul.f32 0.03125, %v788_v57  ;;  %v874_v1 = vmul.f32 0.03125, %v791_v59  ;;  %v935_v2 = vmul.f32 %v16308_v53, %v16308_v53  ;;  %v936_v50 = vmul.f32 %v16311_v46, %v16311_v46 }
 0x196   : > { %v16320_v3 = vsub.f32 %v16157_v56, %v873_v61  ;;  %v16323_v52 = vsub.f32 %v16160_v58, %v874_v1  ;;  %v973_v7 = vsel %vm449_vm0, %v935_v2, 0.0  ;;  %v976_v9 = vsel %vm449_vm0, %v936_v50, 0.0 }
 0x197   : > { %v794_v11 = vpop.xlane.xlu1 %793  ;;  %974 = vadd.xlane.f32.xlu1 %v973_v7  ;;  %977 = vadd.xlane.f32.xlu0 %v976_v9  ;;  %v797_v13 = vpop.xlane.xlu0 %796 }
 0x198   : > { %v875_v15 = vmul.f32 0.03125, %v794_v11  ;;  %v876_v19 = vmul.f32 0.03125, %v797_v13  ;;  %v937_v20 = vmul.f32 %v16320_v3, %v16320_v3  ;;  %v938_v56 = vmul.f32 %v16323_v52, %v16323_v52 }
 0x19a   : > { %v16332_v23 = vsub.f32 %v16167_v62, %v875_v15  ;;  %v16335_v58 = vsub.f32 %v16170_v0, %v876_v19  ;;  %v979_v25 = vsel %vm449_vm0, %v937_v20, 0.0  ;;  %v982_v26 = vsel %vm449_vm0, %v938_v56, 0.0 }
 0x19b   : > { %v800_v29 = vpop.xlane.xlu1 %799  ;;  %980 = vadd.xlane.f32.xlu1 %v979_v25  ;;  %983 = vadd.xlane.f32.xlu0 %v982_v26  ;;  %v803_v31 = vpop.xlane.xlu0 %802 }
 0x19c   : > { %v877_v32 = vmul.f32 0.03125, %v800_v29  ;;  %v878_v33 = vmul.f32 0.03125, %v803_v31  ;;  %v939_v35 = vmul.f32 %v16332_v23, %v16332_v23  ;;  %v940_v62 = vmul.f32 %v16335_v58, %v16335_v58 }
 0x19e   : > { %v16344_v39 = vsub.f32 %v16177_v4, %v877_v32  ;;  %v16347_v0 = vsub.f32 %v16180_v6, %v878_v33  ;;  %v985_v40 = vsel %vm449_vm0, %v939_v35, 0.0  ;;  %v988_v43 = vsel %vm449_vm0, %v940_v62, 0.0 }
 0x19f   : > { %v806_v41 = vpop.xlane.xlu1 %805  ;;  %986 = vadd.xlane.f32.xlu1 %v985_v40  ;;  %989 = vadd.xlane.f32.xlu0 %v988_v43  ;;  %v809_v47 = vpop.xlane.xlu0 %808 }
 0x1a0   : > { %v879_v48 = vmul.f32 0.03125, %v806_v41  ;;  %v880_v49 = vmul.f32 0.03125, %v809_v47  ;;  %v941_v44 = vmul.f32 %v16344_v39, %v16344_v39  ;;  %v942_v4 = vmul.f32 %v16347_v0, %v16347_v0 }
 0x1a2   : > { %v16356_v55 = vsub.f32 %v16187_v10, %v879_v48  ;;  %v16359_v6 = vsub.f32 %v16190_v12, %v880_v49  ;;  %v991_v57 = vsel %vm449_vm0, %v941_v44, 0.0  ;;  %v994_v59 = vsel %vm449_vm0, %v942_v4, 0.0 }
 0x1a3   : > { %v812_v61 = vpop.xlane.xlu1 %811  ;;  %992 = vadd.xlane.f32.xlu1 %v991_v57  ;;  %995 = vadd.xlane.f32.xlu0 %v994_v59  ;;  %v815_v1 = vpop.xlane.xlu0 %814 }
 0x1a4   : > { %v881_v2 = vmul.f32 0.03125, %v812_v61  ;;  %v882_v50 = vmul.f32 0.03125, %v815_v1  ;;  %v943_v7 = vmul.f32 %v16356_v55, %v16356_v55  ;;  %v944_v10 = vmul.f32 %v16359_v6, %v16359_v6 }
 0x1a6   : > { %v16368_v9 = vsub.f32 %v16197_v16, %v881_v2  ;;  %v16371_v12 = vsub.f32 %v16200_v18, %v882_v50  ;;  %v997_v11 = vsel %vm449_vm0, %v943_v7, 0.0  ;;  %v1000_v13 = vsel %vm449_vm0, %v944_v10, 0.0 }
 0x1a7   : > { %v818_v15 = vpop.xlane.xlu1 %817  ;;  %998 = vadd.xlane.f32.xlu1 %v997_v11  ;;  %1001 = vadd.xlane.f32.xlu0 %v1000_v13  ;;  %v821_v19 = vpop.xlane.xlu0 %820 }
 0x1a8   : > { %v883_v20 = vmul.f32 0.03125, %v818_v15  ;;  %v884_v56 = vmul.f32 0.03125, %v821_v19  ;;  %v945_v25 = vmul.f32 %v16368_v9, %v16368_v9  ;;  %v946_v16 = vmul.f32 %v16371_v12, %v16371_v12 }
 0x1aa   : > { %v16380_v26 = vsub.f32 %v16207_v22, %v883_v20  ;;  %v16383_v18 = vsub.f32 %v16210_v24, %v884_v56  ;;  %v1003_v29 = vsel %vm449_vm0, %v945_v25, 0.0  ;;  %v1006_v31 = vsel %vm449_vm0, %v946_v16, 0.0 }
 0x1ab   : > { %v824_v32 = vpop.xlane.xlu1 %823  ;;  %1004 = vadd.xlane.f32.xlu1 %v1003_v29  ;;  %1007 = vadd.xlane.f32.xlu0 %v1006_v31  ;;  %v827_v33 = vpop.xlane.xlu0 %826 }
 0x1ac   : > { %v885_v35 = vmul.f32 0.03125, %v824_v32  ;;  %v886_v62 = vmul.f32 0.03125, %v827_v33  ;;  %v947_v40 = vmul.f32 %v16380_v26, %v16380_v26  ;;  %v948_v22 = vmul.f32 %v16383_v18, %v16383_v18 }
 0x1ae   : > { %v16392_v43 = vsub.f32 %v16217_v28, %v885_v35  ;;  %v16395_v24 = vsub.f32 %v16220_v30, %v886_v62  ;;  %v1009_v41 = vsel %vm449_vm0, %v947_v40, 0.0  ;;  %v1012_v47 = vsel %vm449_vm0, %v948_v22, 0.0 }
 0x1af   : > { %v830_v48 = vpop.xlane.xlu1 %829  ;;  %1010 = vadd.xlane.f32.xlu1 %v1009_v41  ;;  %1013 = vadd.xlane.f32.xlu0 %v1012_v47  ;;  %v833_v49 = vpop.xlane.xlu0 %832  ;;  %v421_v47 = vld [vmem:[%s21420_s3 + $0x8] sm:$0xff] }
 0x1b0   : > { %v887_v44 = vmul.f32 0.03125, %v830_v48  ;;  %v888_v4 = vmul.f32 0.03125, %v833_v49  ;;  %v949_v57 = vmul.f32 %v16392_v43, %v16392_v43  ;;  %v950_v28 = vmul.f32 %v16395_v24, %v16395_v24 }
 0x1b2   : > { %v16404_v59 = vsub.f32 %v16227_v34, %v887_v44  ;;  %v16407_v30 = vsub.f32 %v16230_v36, %v888_v4  ;;  %v1015_v61 = vsel %vm449_vm0, %v949_v57, 0.0  ;;  %v1018_v1 = vsel %vm449_vm0, %v950_v28, 0.0 }
 0x1b3   : > { %v836_v2 = vpop.xlane.xlu1 %835  ;;  %1016 = vadd.xlane.f32.xlu1 %v1015_v61  ;;  %1019 = vadd.xlane.f32.xlu0 %v1018_v1  ;;  %v839_v50 = vpop.xlane.xlu0 %838 }
 0x1b4   : > { %v889_v7 = vmul.f32 0.03125, %v836_v2  ;;  %v890_v10 = vmul.f32 0.03125, %v839_v50  ;;  %v951_v11 = vmul.f32 %v16404_v59, %v16404_v59  ;;  %v952_v34 = vmul.f32 %v16407_v30, %v16407_v30 }
 0x1b6   : > { %v16416_v13 = vsub.f32 %v16237_v42, %v889_v7  ;;  %v16419_v36 = vsub.f32 %v16240_v45, %v890_v10  ;;  %v1021_v15 = vsel %vm449_vm0, %v951_v11, 0.0  ;;  %v1024_v19 = vsel %vm449_vm0, %v952_v34, 0.0  ;;  %v423_v7 = vld [vmem:[%s21420_s3 + $0x18] sm:$0xff] }
 0x1b7   : > { %v842_v20 = vpop.xlane.xlu1 %841  ;;  %1022 = vadd.xlane.f32.xlu1 %v1021_v15  ;;  %1025 = vadd.xlane.f32.xlu0 %v1024_v19  ;;  %v845_v56 = vpop.xlane.xlu0 %844 }
 0x1b8   : > { %v891_v25 = vmul.f32 0.03125, %v842_v20  ;;  %v892_v16 = vmul.f32 0.03125, %v845_v56  ;;  %v953_v29 = vmul.f32 %v16416_v13, %v16416_v13  ;;  %v954_v42 = vmul.f32 %v16419_v36, %v16419_v36 }
 0x1ba   : > { %v16428_v31 = vsub.f32 %v16247_v51, %v891_v25  ;;  %v16431_v45 = vsub.f32 %v16250_v54, %v892_v16  ;;  %v1027_v32 = vsel %vm449_vm0, %v953_v29, 0.0  ;;  %v1030_v33 = vsel %vm449_vm0, %v954_v42, 0.0  ;;  %v420_v54 = vld [vmem:[%s21420_s3] sm:$0xff] }
 0x1bb   : > { %v848_v35 = vpop.xlane.xlu1 %847  ;;  %1028 = vadd.xlane.f32.xlu1 %v1027_v32  ;;  %1031 = vadd.xlane.f32.xlu0 %v1030_v33  ;;  %v851_v62 = vpop.xlane.xlu0 %850  ;;  %v16453_v61 = vpack.c.bf16 %v421_v47, %v420_v54  ;;  %v430_v47 = vld [vmem:[%s21426_s9] sm:$0xff] }
 0x1bc   : > { %v893_v40 = vmul.f32 0.03125, %v848_v35  ;;  %v894_v22 = vmul.f32 0.03125, %v851_v62  ;;  %v955_v41 = vmul.f32 %v16428_v31, %v16428_v31  ;;  %v956_v51 = vmul.f32 %v16431_v45, %v16431_v45 }
 0x1bd   : > { %21512 = vst [vmem:[#allocation5_spill] sm:$0xff] %v16453_v61  ;;  %14758 = vmatprep.subr.bf16.mxu1 %v16453_v61 }
 0x1be   : > { %v16446_v48 = vsub.f32 %v16257_v60, %v893_v40  ;;  %v16449_v49 = vsub.f32 %v16260_v63, %v894_v22  ;;  %v1033_v44 = vsel %vm449_vm0, %v955_v41, 0.0  ;;  %v1036_v4 = vsel %vm449_vm0, %v956_v51, 0.0  ;;  %v422_v63 = vld [vmem:[%s21420_s3 + $0x10] sm:$0xff]  ;;  %14760 = vmatpush3.bf16.msra.mxu1 %v16453_v61 }
 0x1bf   : > { %v854_v57 = vpop.xlane.xlu1 %853  ;;  %1034 = vadd.xlane.f32.xlu1 %v1033_v44  ;;  %1037 = vadd.xlane.f32.xlu0 %v1036_v4  ;;  %v857_v28 = vpop.xlane.xlu0 %856  ;;  %v16475_v56 = vpack.c.bf16 %v423_v7, %v422_v63  ;;  %v432_v44 = vld [vmem:[%s21426_s9 + $0x10] sm:$0xff]  ;;  %v437_v63 = vld [vmem:[%s21426_s9 + $0x38] sm:$0xff] }
 0x1c0   : > { %v895_v1 = vmul.f32 0.03125, %v854_v57  ;;  %v896_v2 = vmul.f32 0.03125, %v857_v28  ;;  %v957_v50 = vmul.f32 %v16446_v48, %v16446_v48  ;;  %v958_v60 = vmul.f32 %v16449_v49, %v16449_v49  ;;  %v433_v57 = vld [vmem:[%s21426_s9 + $0x18] sm:$0xff] }
 0x1c1   : > { %21513 = vst [vmem:[#allocation6_spill] sm:$0xff] %v16475_v56  ;;  %14762 = vmatprep.subr.bf16.mxu1 %v16475_v56  ;;  %v16517_v28 = vpack.c.bf16 %v433_v57, %v432_v44 }
 0x1c2   : > { %v16467_v10 = vsub.f32 %v16267_v5, %v895_v1  ;;  %v16470_v11 = vsub.f32 %v16270_v8, %v896_v2  ;;  %v1039_v34 = vsel %vm449_vm0, %v957_v50, 0.0  ;;  %v1042_v15 = vsel %vm449_vm0, %v958_v60, 0.0  ;;  %14764 = vmatpush3.bf16.msra.mxu1 %v16475_v56  ;;  %v434_v1 = vld [vmem:[%s21426_s9 + $0x20] sm:$0xff]  ;;  %v435_v2 = vld [vmem:[%s21426_s9 + $0x28] sm:$0xff]  ;;  %v436_v60 = vld [vmem:[%s21426_s9 + $0x30] sm:$0xff] }
 0x1c3   : > { %v860_v19 = vpop.xlane.xlu1 %859  ;;  %1040 = vadd.xlane.f32.xlu1 %v1039_v34  ;;  %1043 = vadd.xlane.f32.xlu0 %v1042_v15  ;;  %v863_v20 = vpop.xlane.xlu0 %862  ;;  %21515 = vst [vmem:[#allocation8_spill] sm:$0xff] %v16517_v28  ;;  %v16528_v50 = vpack.c.bf16 %v435_v2, %v434_v1  ;;  %v16538_v34 = vpack.c.bf16 %v437_v63, %v436_v60  ;;  %v16547_v1 = vld [vmem:[%s21422_s5] ss:$0 sm:$0xff] }
 0x1c4   : > { %v897_v25 = vmul.f32 0.03125, %v860_v19  ;;  %v898_v16 = vmul.f32 0.03125, %v863_v20  ;;  %v959_v5 = vmul.f32 %v16467_v10, %v16467_v10  ;;  %v960_v8 = vmul.f32 %v16470_v11, %v16470_v11 }
 0x1c5   : > { %21516 = vst [vmem:[#allocation9_spill] sm:$0xff] %v16528_v50  ;;  %21517 = vst [vmem:[#allocation10_spill] sm:$0xff] %v16538_v34 }
 0x1c6   : > { %v16483_v29 = vsub.f32 %v16277_v14, %v897_v25  ;;  %v16486_v42 = vsub.f32 %v16280_v17, %v898_v16  ;;  %v1045_v32 = vsel %vm449_vm0, %v959_v5, 0.0  ;;  %v1048_v33 = vsel %vm449_vm0, %v960_v8, 0.0 }
 0x1c7   : > { %v866_v35 = vpop.xlane.xlu1 %865  ;;  %1046 = vadd.xlane.f32.xlu1 %v1045_v32  ;;  %1049 = vadd.xlane.f32.xlu0 %v1048_v33 }
 0x1c8   : > { %v899_v62 = vmul.f32 0.03125, %v866_v35  ;;  %v961_v40 = vmul.f32 %v16483_v29, %v16483_v29  ;;  %v962_v14 = vmul.f32 %v16486_v42, %v16486_v42 }
 0x1ca   : > { %v16496_v22 = vsub.f32 %v16287_v21, %v899_v62  ;;  %v1051_v17 = vsel %vm449_vm0, %v961_v40, 0.0  ;;  %v1054_v41 = vsel %vm449_vm0, %v962_v14, 0.0  ;;  %v431_v21 = vld [vmem:[%s21426_s9 + $0x8] sm:$0xff] }
 0x1cb   : > { %1052 = vadd.xlane.f32.xlu1 %v1051_v17  ;;  %1055 = vadd.xlane.f32.xlu0 %v1054_v41  ;;  %v16512_v4 = vpack.c.bf16 %v431_v21, %v430_v47 }
 0x1cc   : > { %v963_v51 = vmul.f32 %v16496_v22, %v16496_v22 }
 0x1cd   : > { %21514 = vst [vmem:[#allocation7_spill] sm:$0xff] %v16512_v4  ;;  %14766 = vmatprep.subr.bf16.mxu0 %v16512_v4 }
 0x1ce   : > { %v1057_v54 = vsel %vm449_vm0, %v963_v51, 0.0  ;;  %14768 = vmatpush3.bf16.msra.mxu0 %v16512_v4 }
 0x1cf   : > { %1058 = vadd.xlane.f32.xlu1 %v1057_v54  ;;  %14770 = vmatprep.subr.bf16.mxu0 %v16517_v28 }
 0x1d2   : > { %14772 = vmatpush3.bf16.msra.mxu0 %v16517_v28 }
 0x1d3   : > { %14774 = vmatprep.subr.bf16.mxu0 %v16528_v50 }
 0x1d6   : > { %14776 = vmatpush3.bf16.msra.mxu0 %v16528_v50 }
 0x1d7   : > { %14778 = vmatprep.subr.bf16.mxu0 %v16538_v34 }
 0x1da   : > { %14780 = vmatpush3.bf16.msra.mxu0 %v16538_v34 }
 0x1db   : > { %14782 = vmatprep.subr.bf16.mxu0 %v16512_v4 }
 0x21c   : > { %v966_v7 = vpop.xlane.xlu0 %965 }
 0x21d   : > { %v1060_v15 = vmul.f32 0.03125, %v966_v7 }
 0x21f   : > { %v1092_v19 = vadd.f32 1e-06, %v1060_v15 }
 0x220   : > { %v969_v20 = vpop.xlane.xlu1 %968  ;;  %v972_v25 = vpop.xlane.xlu0 %971 }
 0x221   : > { %14983 = vrsqrt.f32 %v1092_v19  ;;  %v1061_v16 = vmul.f32 0.03125, %v969_v20  ;;  %v1062_v5 = vmul.f32 0.03125, %v972_v25  ;;  %v16553_v19 = vld [vmem:[%s21423_s6] ss:$0 sm:$0xff] }
 0x223   : > { %v1093_v8 = vadd.f32 1e-06, %v1061_v16  ;;  %v1094_v32 = vadd.f32 1e-06, %v1062_v5 }
 0x224   : > { %v975_v33 = vpop.xlane.xlu1 %974  ;;  %v978_v35 = vpop.xlane.xlu0 %977 }
 0x225   : > { %14985 = vrsqrt.f32 %v1093_v8  ;;  %v1063_v62 = vmul.f32 0.03125, %v975_v33  ;;  %v1064_v40 = vmul.f32 0.03125, %v978_v35 }
 0x226   : > { %14987 = vrsqrt.f32 %v1094_v32 }
 0x227   : > { %v1095_v14 = vadd.f32 1e-06, %v1063_v62  ;;  %v1096_v17 = vadd.f32 1e-06, %v1064_v40 }
 0x228   : > { %v981_v41 = vpop.xlane.xlu1 %980  ;;  %v984_v51 = vpop.xlane.xlu0 %983 }
 0x229   : > { %14989 = vrsqrt.f32 %v1095_v14  ;;  %v1065_v54 = vmul.f32 0.03125, %v981_v41  ;;  %v1066_v47 = vmul.f32 0.03125, %v984_v51 }
 0x22a   : > { %14991 = vrsqrt.f32 %v1096_v17 }
 0x22b   : > { %v14984_v21 = vpop.eup %14983  ;;  %v1097_v44 = vadd.f32 1e-06, %v1065_v54  ;;  %v1098_v57 = vadd.f32 1e-06, %v1066_v47 }
 0x22c   : > { %v987_v2 = vpop.xlane.xlu1 %986  ;;  %v990_v60 = vpop.xlane.xlu0 %989  ;;  %v1156_v63 = vmul.f32 %v14984_v21, %v16292_v27 }
 0x22d   : > { %14993 = vrsqrt.f32 %v1097_v44  ;;  %v1067_v7 = vmul.f32 0.03125, %v987_v2  ;;  %v1068_v15 = vmul.f32 0.03125, %v990_v60 }
 0x22e   : > { %14995 = vrsqrt.f32 %v1098_v57  ;;  %v1194_v20 = vmul.f32 %v16547_v1, %v1156_v63 }
 0x22f   : > { %v14986_v25 = vpop.eup %14985  ;;  %v1099_v16 = vadd.f32 1e-06, %v1067_v7  ;;  %v1100_v5 = vadd.f32 1e-06, %v1068_v15 }
 0x230   : > { %v14988_v8 = vpop.eup %14987  ;;  %v1157_v32 = vmul.f32 %v14986_v25, %v16300_v37  ;;  %v993_v33 = vpop.xlane.xlu1 %992  ;;  %v1232_v27 = vadd.f32 %v16553_v19, %v1194_v20 }
 0x231   : > { %v996_v35 = vpop.xlane.xlu0 %995  ;;  %v1158_v62 = vmul.f32 %v14988_v8, %v16297_v38  ;;  %v1069_v40 = vmul.f32 0.03125, %v993_v33  ;;  %14997 = vrsqrt.f32 %v1099_v16 }
 0x232   : > { %v1070_v14 = vmul.f32 0.03125, %v996_v35  ;;  %v1296_v17 = vmul.f32 0.70710677, %v1232_v27  ;;  %v1195_v41 = vmul.f32 %v16547_v1, %v1157_v32  ;;  %14999 = vrsqrt.f32 %v1100_v5 }
 0x233   : > { %v14990_v51 = vpop.eup %14989  ;;  %v1101_v54 = vadd.f32 1e-06, %v1069_v40  ;;  %v1196_v47 = vmul.f32 %v16547_v1, %v1158_v62 }
 0x234   : > { %v14992_v21 = vpop.eup %14991  ;;  %v1159_v37 = vmul.f32 %v14990_v51, %v16308_v53  ;;  %v999_v44 = vpop.xlane.xlu1 %998  ;;  %15001 = verf.f32 %v1296_v17  ;;  %v1233_v2 = vadd.f32 %v16553_v19, %v1195_v41  ;;  %v1102_v60 = vadd.f32 1e-06, %v1070_v14 }
 0x235   : > { %v1002_v57 = vpop.xlane.xlu0 %1001  ;;  %v1160_v38 = vmul.f32 %v14992_v21, %v16311_v46  ;;  %v1071_v63 = vmul.f32 0.03125, %v999_v44  ;;  %v1234_v20 = vadd.f32 %v16553_v19, %v1196_v47  ;;  %15003 = vrsqrt.f32 %v1101_v54 }
 0x236   : > { %v1072_v7 = vmul.f32 0.03125, %v1002_v57  ;;  %v1297_v15 = vmul.f32 0.70710677, %v1233_v2  ;;  %v1197_v5 = vmul.f32 %v16547_v1, %v1159_v37 }
 0x237   : > { %v14994_v25 = vpop.eup %14993  ;;  %v1103_v16 = vadd.f32 1e-06, %v1071_v63  ;;  %v1198_v53 = vmul.f32 %v16547_v1, %v1160_v38  ;;  %v1298_v46 = vmul.f32 0.70710677, %v1234_v20 }
 0x238   : > { %v14996_v8 = vpop.eup %14995  ;;  %v1161_v32 = vmul.f32 %v14994_v25, %v16320_v3  ;;  %v1104_v33 = vadd.f32 1e-06, %v1072_v7  ;;  %v1005_v35 = vpop.xlane.xlu1 %1004  ;;  %15005 = verf.f32 %v1297_v15  ;;  %v1235_v41 = vadd.f32 %v16553_v19, %v1197_v5 }
 0x239   : > { %v1008_v62 = vpop.xlane.xlu0 %1007  ;;  %v1162_v40 = vmul.f32 %v14996_v8, %v16323_v52  ;;  %15007 = vrsqrt.f32 %v1102_v60  ;;  %v1073_v14 = vmul.f32 0.03125, %v1005_v35  ;;  %v1236_v51 = vadd.f32 %v16553_v19, %v1198_v53 }
 0x23a   : > { %v1074_v17 = vmul.f32 0.03125, %v1008_v62  ;;  %15009 = vrsqrt.f32 %v1103_v16  ;;  %v1199_v54 = vmul.f32 %v16547_v1, %v1161_v32  ;;  %v1299_v57 = vmul.f32 0.70710677, %v1235_v41 }
 0x23b   : > { %v1105_v47 = vadd.f32 1e-06, %v1073_v14  ;;  %15011 = verf.f32 %v1298_v46  ;;  %v1200_v3 = vmul.f32 %v16547_v1, %v1162_v40  ;;  %v14998_v21 = vpop.eup %14997  ;;  %v1264_v7 = vmul.f32 0.5, %v1232_v27 }
 0x23c   : > { %15013 = vrsqrt.f32 %v1104_v33  ;;  %v1011_v37 = vpop.xlane.xlu1 %1010  ;;  %v15000_v52 = vpop.eup %14999  ;;  %v1106_v38 = vadd.f32 1e-06, %v1074_v17  ;;  %v1300_v25 = vmul.f32 0.70710677, %v1236_v51  ;;  %v1237_v16 = vadd.f32 %v16553_v19, %v1199_v54 }
 0x23d   : > { %v1014_v44 = vpop.xlane.xlu0 %1013  ;;  %v1075_v60 = vmul.f32 0.03125, %v1011_v37  ;;  %15015 = vrsqrt.f32 %v1105_v47  ;;  %v1238_v5 = vadd.f32 %v16553_v19, %v1200_v3  ;;  %v1265_v32 = vmul.f32 0.5, %v1233_v2 }
 0x23e   : > { %v1076_v63 = vmul.f32 0.03125, %v1014_v44  ;;  %v15002_v15 = vpop.eup %15001  ;;  %15017 = verf.f32 %v1299_v57  ;;  %v1163_v33 = vmul.f32 %v14998_v21, %v16332_v23  ;;  %v1164_v35 = vmul.f32 %v15000_v52, %v16335_v58 }
 0x23f   : > { %v1107_v53 = vadd.f32 1e-06, %v1075_v60  ;;  %v1360_v8 = vadd.f32 1.0, %v15002_v15  ;;  %15019 = verf.f32 %v1300_v25  ;;  %v1301_v40 = vmul.f32 0.70710677, %v1237_v16  ;;  %v15004_v27 = vpop.eup %15003 }
 0x240   : > { %v1017_v62 = vpop.xlane.xlu1 %1016  ;;  %15021 = vrsqrt.f32 %v1106_v38  ;;  %v1108_v14 = vadd.f32 1e-06, %v1076_v63  ;;  %v1266_v47 = vmul.f32 0.5, %v1234_v20  ;;  %v1302_v44 = vmul.f32 0.70710677, %v1238_v5 }
 0x241   : > { %v1020_v46 = vpop.xlane.xlu0 %1019  ;;  %v1077_v17 = vmul.f32 0.03125, %v1017_v62  ;;  %15023 = vrsqrt.f32 %v1107_v53  ;;  %v1392_v37 = vmul.f32 %v1360_v8, %v1264_v7  ;;  %v1267_v60 = vmul.f32 0.5, %v1235_v41 }
 0x242   : > { %v15006_v54 = vpop.eup %15005  ;;  %v1078_v3 = vmul.f32 0.03125, %v1020_v46  ;;  %v1268_v23 = vmul.f32 0.5, %v1236_v51  ;;  %15025 = verf.f32 %v1301_v40  ;;  %v1165_v21 = vmul.f32 %v15004_v27, %v16344_v39 }
 0x243   : > { %v15008_v2 = vpop.eup %15007  ;;  %v1361_v57 = vadd.f32 1.0, %v15006_v54  ;;  %13453 = vmatprep.mubr.msk.f32.mxu1 %vm449_vm0, %v1392_v37  ;;  %15027 = verf.f32 %v1302_v44  ;;  %v1201_v20 = vmul.f32 %v16547_v1, %v1163_v33  ;;  %v1202_v63 = vmul.f32 %v16547_v1, %v1164_v35 }
 0x244   : > { %v15010_v58 = vpop.eup %15009  ;;  %v1023_v52 = vpop.xlane.xlu1 %1022  ;;  %15029 = vrsqrt.f32 %v1108_v14  ;;  %v1109_v7 = vadd.f32 1e-06, %v1077_v17  ;;  %v1269_v53 = vmul.f32 0.5, %v1237_v16  ;;  %v1110_v51 = vadd.f32 1e-06, %v1078_v3 }
 0x245   : > { %v1026_v38 = vpop.xlane.xlu0 %1025  ;;  %v15012_v15 = vpop.eup %15011  ;;  %v1079_v25 = vmul.f32 0.03125, %v1023_v52  ;;  %v1393_v8 = vmul.f32 %v1361_v57, %v1265_v32  ;;  %v1239_v39 = vadd.f32 %v16553_v19, %v1201_v20  ;;  %v1166_v46 = vmul.f32 %v15008_v2, %v16347_v0 }
 0x246   : > { %v15014_v41 = vpop.eup %15013  ;;  %v1362_v62 = vadd.f32 1.0, %v15012_v15  ;;  %v1080_v40 = vmul.f32 0.03125, %v1026_v38  ;;  %v1270_v27 = vmul.f32 0.5, %v1238_v5  ;;  %v1240_v54 = vadd.f32 %v16553_v19, %v1202_v63 }
 0x247   : > { %v15016_v33 = vpop.eup %15015  ;;  %v1167_v35 = vmul.f32 %v15010_v58, %v16356_v55  ;;  %13454 = vmatmul.mubr.msk.f32.vlgmr.msra.gmra.mrb[0].mxu1 %vm449_vm0, %v1393_v8  ;;  %v1303_v37 = vmul.f32 0.70710677, %v1239_v39  ;;  %v1203_v32 = vmul.f32 %v16547_v1, %v1165_v21  ;;  %v16588_v44 = vmul.f32 %v15014_v41, %v16359_v6 }
 0x248   : > { %v1029_v14 = vpop.xlane.xlu1 %1028  ;;  %v1394_v17 = vmul.f32 %v1362_v62, %v1266_v47  ;;  %v15018_v3 = vpop.eup %15017  ;;  %15031 = vrsqrt.f32 %v1109_v7  ;;  %v1111_v0 = vadd.f32 1e-06, %v1079_v25  ;;  %v1304_v58 = vmul.f32 0.70710677, %v1240_v54 }
 0x249   : > { %v1032_v16 = vpop.xlane.xlu0 %1031  ;;  %v1081_v5 = vmul.f32 0.03125, %v1029_v14  ;;  %v15020_v2 = vpop.eup %15019  ;;  %15033 = vrsqrt.f32 %v1110_v51  ;;  %v1363_v57 = vadd.f32 1.0, %v15018_v3  ;;  %v16592_v47 = vmul.f32 %v15016_v33, %v16368_v9 }
 0x24a   : > { %13456 = vmatprep.mubr.msk.f32.mxu1 %vm449_vm0, %v1394_v17  ;;  %v1082_v55 = vmul.f32 0.03125, %v1032_v16  ;;  %v15022_v52 = vpop.eup %15021  ;;  %v1112_v38 = vadd.f32 1e-06, %v1080_v40  ;;  %v1364_v21 = vadd.f32 1.0, %v15020_v2  ;;  %15035 = verf.f32 %v1303_v37 }
 0x24b   : > { %v15024_v20 = vpop.eup %15023  ;;  %v1395_v6 = vmul.f32 %v1363_v57, %v1267_v60  ;;  %v16594_v7 = vmul.f32 0.5, %v1239_v39  ;;  %15037 = verf.f32 %v1304_v58  ;;  %v1241_v25 = vadd.f32 %v16553_v19, %v1203_v32 }
 0x24c   : > { %v1035_v63 = vpop.xlane.xlu1 %1034  ;;  %v15026_v41 = vpop.eup %15025  ;;  %15039 = vrsqrt.f32 %v1111_v0  ;;  %v1113_v51 = vadd.f32 1e-06, %v1081_v5  ;;  %v1396_v62 = vmul.f32 %v1364_v21, %v1268_v23  ;;  %v16598_v9 = vmul.f32 %v15022_v52, %v16371_v12 }
 0x24d   : > { %v1038_v15 = vpop.xlane.xlu0 %1037  ;;  %v1083_v8 = vmul.f32 0.03125, %v1035_v63  ;;  %v15028_v14 = vpop.eup %15027  ;;  %v1114_v40 = vadd.f32 1e-06, %v1082_v55  ;;  %13457 = vmatmul.mubr.msk.f32.gmra.mrb[2].mxu1 %vm449_vm0, %v1395_v6  ;;  %v1365_v33 = vadd.f32 1.0, %v15026_v41  ;;  %15041 = vrsqrt.f32 %v1112_v38 }
 0x24e   : > { %v1084_v60 = vmul.f32 0.03125, %v1038_v15  ;;  %v15030_v17 = vpop.eup %15029  ;;  %13459 = vmatprep.mubr.msk.f32.mxu1 %vm449_vm0, %v1396_v62  ;;  %v1366_v39 = vadd.f32 1.0, %v15028_v14  ;;  %v1305_v16 = vmul.f32 0.70710677, %v1241_v25  ;;  %v1204_v37 = vmul.f32 %v16547_v1, %v1166_v46 }
 0x24f   : > { %v1115_v32 = vadd.f32 1e-06, %v1083_v8  ;;  %v1397_v3 = vmul.f32 %v1365_v33, %v1269_v53  ;;  %v1272_v5 = vmul.f32 0.5, %v1240_v54  ;;  %v1205_v12 = vmul.f32 %v16547_v1, %v1167_v35 }
 0x250   : > { %v1041_v23 = vpop.xlane.xlu1 %1040  ;;  %15043 = vrsqrt.f32 %v1113_v51  ;;  %v1116_v2 = vadd.f32 1e-06, %v1084_v60  ;;  %v1398_v57 = vmul.f32 %v1366_v39, %v1270_v27  ;;  %v1242_v52 = vadd.f32 %v16553_v19, %v1204_v37 }
 0x251   : > { %v1044_v0 = vpop.xlane.xlu0 %1043  ;;  %v1085_v55 = vmul.f32 0.03125, %v1041_v23  ;;  %15045 = vrsqrt.f32 %v1114_v40  ;;  %13460 = vmatmul.mubr.msk.f32.gmra.mrb[4].mxu1 %vm449_vm0, %v1397_v3  ;;  %v1243_v38 = vadd.f32 %v16553_v19, %v1205_v12  ;;  %v1171_v53 = vmul.f32 %v15024_v20, %v16380_v26 }
 0x252   : > { %v1086_v58 = vmul.f32 0.03125, %v1044_v0  ;;  %v15032_v46 = vpop.eup %15031  ;;  %v1172_v21 = vmul.f32 %v15030_v17, %v16383_v18  ;;  %13462 = vmatprep.mubr.msk.f32.mxu1 %vm449_vm0, %v1398_v57  ;;  %15047 = verf.f32 %v1305_v16  ;;  %v16610_v63 = vmul.f32 0.5, %v1241_v25 }
 0x253   : > { %v1117_v54 = vadd.f32 1e-06, %v1085_v55  ;;  %v15034_v35 = vpop.eup %15033  ;;  %15049 = vrsqrt.f32 %v1115_v32  ;;  %v1306_v15 = vmul.f32 0.70710677, %v1242_v52  ;;  %v1206_v41 = vmul.f32 %v16547_v1, %v16588_v44 }
 0x254   : > { %v1047_v27 = vpop.xlane.xlu1 %1046  ;;  %v15036_v51 = vpop.eup %15035  ;;  %15051 = vrsqrt.f32 %v1116_v2  ;;  %v1118_v8 = vadd.f32 1e-06, %v1086_v58  ;;  %v1173_v62 = vmul.f32 %v15032_v46, %v16392_v43  ;;  %v1307_v40 = vmul.f32 0.70710677, %v1243_v38 }
 0x255   : > { %v1050_v6 = vpop.xlane.xlu0 %1049  ;;  %v1087_v26 = vmul.f32 0.03125, %v1047_v27  ;;  %v15038_v18 = vpop.eup %15037  ;;  %15053 = vrsqrt.f32 %v1117_v54  ;;  %v1367_v14 = vadd.f32 1.0, %v15036_v51  ;;  %v1207_v25 = vmul.f32 %v16547_v1, %v16592_v47 }
 0x256   : > { %v1088_v20 = vmul.f32 0.03125, %v1050_v6  ;;  %v15040_v60 = vpop.eup %15039  ;;  %v1368_v17 = vadd.f32 1.0, %v15038_v18  ;;  %15055 = verf.f32 %v1306_v15  ;;  %v16618_v44 = vmul.f32 %v15034_v35, %v16395_v24 }
 0x257   : > { %v1119_v33 = vadd.f32 1e-06, %v1087_v26  ;;  %v1399_v39 = vmul.f32 %v1367_v14, %v16594_v7  ;;  %15057 = verf.f32 %v1307_v40  ;;  %v1244_v43 = vadd.f32 %v16553_v19, %v1206_v41  ;;  %v15042_v32 = vpop.eup %15041 }
 0x258   : > { %v1053_v16 = vpop.xlane.xlu1 %1052  ;;  %15059 = vrsqrt.f32 %v1118_v8  ;;  %v1400_v3 = vmul.f32 %v1368_v17, %v1272_v5  ;;  %v1120_v23 = vadd.f32 1e-06, %v1088_v20  ;;  %v1175_v12 = vmul.f32 %v15040_v60, %v16404_v59 }
 0x259   : > { %v1056_v37 = vpop.xlane.xlu0 %1055  ;;  %v1089_v0 = vmul.f32 0.03125, %v1053_v16  ;;  %13463 = vmatmul.mubr.msk.f32.gmra.mrb[6].mxu1 %vm449_vm0, %v1399_v39  ;;  %15061 = vrsqrt.f32 %v1119_v33  ;;  %v1308_v24 = vmul.f32 0.70710677, %v1244_v43  ;;  %v1245_v55 = vadd.f32 %v16553_v19, %v1207_v25 }
 0x25a   : > { %v1090_v47 = vmul.f32 0.03125, %v1056_v37  ;;  %v15044_v2 = vpop.eup %15043  ;;  %13465 = vmatprep.mubr.msk.f32.mxu1 %vm449_vm0, %v1400_v3  ;;  %v1208_v57 = vmul.f32 %v16547_v1, %v16598_v9  ;;  %v1209_v5 = vmul.f32 %v16547_v1, %v1171_v53  ;;  %v1176_v46 = vmul.f32 %v15042_v32, %v16407_v30 }
 0x25b   : > { %v1121_v7 = vadd.f32 1e-06, %v1089_v0  ;;  %v15046_v58 = vpop.eup %15045  ;;  %v1274_v59 = vmul.f32 0.5, %v1242_v52  ;;  %15063 = verf.f32 %v1308_v24  ;;  %v1210_v35 = vmul.f32 %v16547_v1, %v1172_v21 }
 0x25c   : > { %v1059_v54 = vpop.xlane.xlu1 %1058  ;;  %v15048_v27 = vpop.eup %15047  ;;  %15065 = vrsqrt.f32 %v1120_v23  ;;  %v1122_v6 = vadd.f32 1e-06, %v1090_v47  ;;  %v1275_v15 = vmul.f32 0.5, %v1243_v38  ;;  %v1309_v26 = vmul.f32 0.70710677, %v1245_v55 }
 0x25d   : > { %v1091_v41 = vmul.f32 0.03125, %v1059_v54  ;;  %v15050_v51 = vpop.eup %15049  ;;  %v1369_v8 = vadd.f32 1.0, %v15048_v27  ;;  %15067 = vrsqrt.f32 %v1121_v7  ;;  %v1246_v9 = vadd.f32 %v16553_v19, %v1208_v57 }
 0x25e   : > { %v15052_v53 = vpop.eup %15051  ;;  %v1247_v30 = vadd.f32 %v16553_v19, %v1209_v5  ;;  %v1248_v52 = vadd.f32 %v16553_v19, %v1210_v35  ;;  %v1211_v18 = vmul.f32 %v16547_v1, %v1173_v62  ;;  %v1177_v14 = vmul.f32 %v15044_v2, %v16416_v13 }
 0x25f   : > { %v1123_v20 = vadd.f32 1e-06, %v1091_v41  ;;  %v15054_v21 = vpop.eup %15053  ;;  %v1178_v38 = vmul.f32 %v15046_v58, %v16419_v36  ;;  %v1401_v40 = vmul.f32 %v1369_v8, %v16610_v63  ;;  %15069 = verf.f32 %v1309_v26 }
 0x260   : > { %v15056_v60 = vpop.eup %15055  ;;  %v1179_v33 = vmul.f32 %v15050_v51, %v16428_v31  ;;  %15071 = vrsqrt.f32 %v1122_v6  ;;  %v1276_v17 = vmul.f32 0.5, %v1244_v43  ;;  %v1310_v25 = vmul.f32 0.70710677, %v1246_v9 }
 0x261   : > { %v15058_v39 = vpop.eup %15057  ;;  %13466 = vmatmul.mubr.msk.f32.gmra.mrb[8].mxu1 %vm449_vm0, %v1401_v40  ;;  %v1370_v16 = vadd.f32 1.0, %v15056_v60  ;;  %15073 = vrsqrt.f32 %v1123_v20  ;;  %v1311_v62 = vmul.f32 0.70710677, %v1247_v30  ;;  %v1312_v37 = vmul.f32 0.70710677, %v1248_v52 }
 0x262   : > { %v15060_v32 = vpop.eup %15059  ;;  %v1371_v13 = vadd.f32 1.0, %v15058_v39  ;;  %15075 = verf.f32 %v1310_v25  ;;  %v1249_v36 = vadd.f32 %v16553_v19, %v1211_v18  ;;  %v1212_v63 = vmul.f32 %v16547_v1, %v16618_v44 }
 0x263   : > { %v15062_v3 = vpop.eup %15061  ;;  %v1180_v31 = vmul.f32 %v15052_v53, %v16431_v45  ;;  %v1402_v43 = vmul.f32 %v1370_v16, %v1274_v59  ;;  %15077 = verf.f32 %v1311_v62  ;;  %v1213_v23 = vmul.f32 %v16547_v1, %v1175_v12 }
 0x264   : > { %v1181_v0 = vmul.f32 %v15054_v21, %v16446_v48  ;;  %v1403_v47 = vmul.f32 %v1371_v13, %v1275_v15  ;;  %v1277_v24 = vmul.f32 0.5, %v1245_v55  ;;  %15079 = verf.f32 %v1312_v37 }
 0x265   : > { %v15064_v2 = vpop.eup %15063  ;;  %13468 = vmatprep.mubr.msk.f32.mxu1 %vm449_vm0, %v1402_v43  ;;  %v1313_v7 = vmul.f32 0.70710677, %v1249_v36  ;;  %v1250_v57 = vadd.f32 %v16553_v19, %v1212_v63  ;;  %v16649_v44 = vadd.f32 %v16553_v19, %v1213_v23  ;;  %v1214_v45 = vmul.f32 %v16547_v1, %v1176_v46 }
 0x266   : > { %v15066_v5 = vpop.eup %15065  ;;  %13469 = vmatmul.mubr.msk.f32.gmra.mrb[10].mxu1 %vm449_vm0, %v1403_v47  ;;  %v1372_v12 = vadd.f32 1.0, %v15064_v2  ;;  %v1215_v48 = vmul.f32 %v16547_v1, %v1177_v14  ;;  %v1216_v55 = vmul.f32 %v16547_v1, %v1178_v38  ;;  %v1217_v58 = vmul.f32 %v16547_v1, %v1179_v33 }
 0x267   : > { %v15068_v59 = vpop.eup %15067  ;;  %v1182_v54 = vmul.f32 %v15060_v32, %v16449_v49  ;;  %v1278_v35 = vmul.f32 0.5, %v1246_v9  ;;  %15081 = verf.f32 %v1313_v7  ;;  %v1314_v27 = vmul.f32 0.70710677, %v1250_v57 }
 0x268   : > { %v1404_v6 = vmul.f32 %v1372_v12, %v1276_v17  ;;  %v1279_v15 = vmul.f32 0.5, %v1247_v30  ;;  %v1280_v41 = vmul.f32 0.5, %v1248_v52  ;;  %v1315_v46 = vmul.f32 0.70710677, %v16649_v44 }
 0x269   : > { %v15070_v51 = vpop.eup %15069  ;;  %15083 = verf.f32 %v1314_v27  ;;  %v16659_v8 = vadd.f32 %v16553_v19, %v1214_v45  ;;  %v16662_v26 = vadd.f32 %v16553_v19, %v1215_v48  ;;  %v16665_v53 = vadd.f32 %v16553_v19, %v1216_v55 }
 0x26a   : > { %v15072_v49 = vpop.eup %15071  ;;  %13471 = vmatprep.mubr.msk.f32.mxu1 %vm449_vm0, %v1404_v6  ;;  %v1373_v9 = vadd.f32 1.0, %v15070_v51  ;;  %15085 = verf.f32 %v1315_v46  ;;  %v16669_v20 = vadd.f32 %v16553_v19, %v1217_v58  ;;  %v1218_v30 = vmul.f32 %v16547_v1, %v1180_v31 }
 0x26b   : > { %v15074_v52 = vpop.eup %15073  ;;  %v1183_v18 = vmul.f32 %v15062_v3, %v16467_v10  ;;  %v1184_v21 = vmul.f32 %v15066_v5, %v16470_v11  ;;  %v1281_v14 = vmul.f32 0.5, %v1249_v36  ;;  %v1316_v38 = vmul.f32 0.70710677, %v16659_v8 }
 0x26c   : > { %v15076_v40 = vpop.eup %15075  ;;  %v1185_v60 = vmul.f32 %v15068_v59, %v16483_v29  ;;  %v1405_v33 = vmul.f32 %v1373_v9, %v1277_v24  ;;  %v1317_v17 = vmul.f32 0.70710677, %v16662_v26  ;;  %v1318_v25 = vmul.f32 0.70710677, %v16665_v53 }
 0x26d   : > { %v15078_v39 = vpop.eup %15077  ;;  %v1374_v16 = vadd.f32 1.0, %v15076_v40  ;;  %v1282_v62 = vmul.f32 0.5, %v1250_v57  ;;  %15087 = verf.f32 %v1316_v38  ;;  %v1319_v37 = vmul.f32 0.70710677, %v16669_v20 }
 0x26e   : > { %v15080_v10 = vpop.eup %15079  ;;  %13472 = vmatmul.mubr.msk.f32.gmra.mrb[12].mxu1 %vm449_vm0, %v1405_v33  ;;  %v1375_v11 = vadd.f32 1.0, %v15078_v39  ;;  %15089 = verf.f32 %v1317_v17  ;;  %v16681_v32 = vadd.f32 %v16553_v19, %v1218_v30  ;;  %v1219_v29 = vmul.f32 %v16547_v1, %v1181_v0 }
 0x26f   : > { %v1406_v13 = vmul.f32 %v1374_v16, %v1278_v35  ;;  %v1376_v36 = vadd.f32 1.0, %v15080_v10  ;;  %15091 = verf.f32 %v1318_v25  ;;  %v1220_v63 = vmul.f32 %v16547_v1, %v1182_v54 }
 0x270   : > { %v1186_v3 = vmul.f32 %v15072_v49, %v16486_v42  ;;  %v1407_v31 = vmul.f32 %v1375_v11, %v1279_v15  ;;  %15093 = verf.f32 %v1319_v37  ;;  %v1320_v43 = vmul.f32 0.70710677, %v16681_v32 }
 0x271   : > { %v15082_v23 = vpop.eup %15081  ;;  %13474 = vmatprep.mubr.msk.f32.mxu1 %vm449_vm0, %v1406_v13  ;;  %v1408_v47 = vmul.f32 %v1376_v36, %v1280_v41  ;;  %v16689_v24 = vadd.f32 %v16553_v19, %v1219_v29  ;;  %v16692_v0 = vadd.f32 %v16553_v19, %v1220_v63  ;;  %v1221_v2 = vmul.f32 %v16547_v1, %v1183_v18 }
 0x272   : > { %13475 = vmatmul.mubr.msk.f32.gmra.mrb[14].mxu1 %vm449_vm0, %v1407_v31  ;;  %v1377_v7 = vadd.f32 1.0, %v15082_v23  ;;  %15095 = verf.f32 %v1320_v43  ;;  %v1222_v42 = vmul.f32 %v16547_v1, %v1184_v21  ;;  %v1223_v57 = vmul.f32 %v16547_v1, %v1185_v60 }
 0x273   : > { %v15084_v45 = vpop.eup %15083  ;;  %v1187_v5 = vmul.f32 %v15074_v52, %v16496_v22  ;;  %13477 = vmatprep.mubr.msk.f32.mxu1 %vm449_vm0, %v1408_v47  ;;  %v1283_v12 = vmul.f32 0.5, %v16649_v44  ;;  %v1321_v48 = vmul.f32 0.70710677, %v16689_v24  ;;  %v1322_v55 = vmul.f32 0.70710677, %v16692_v0 }
 0x274   : > { %v15086_v58 = vpop.eup %15085  ;;  %v1409_v59 = vmul.f32 %v1377_v7, %v1281_v14  ;;  %v1378_v54 = vadd.f32 1.0, %v15084_v45  ;;  %v1259_v35 = vadd.f32 %v16553_v19, %v1221_v2  ;;  %v1260_v27 = vadd.f32 %v16553_v19, %v1222_v42 }
 0x275   : > { %v1379_v6 = vadd.f32 1.0, %v15086_v58  ;;  %15097 = verf.f32 %v1321_v48  ;;  %v16706_v15 = vadd.f32 %v16553_v19, %v1223_v57  ;;  %v1224_v22 = vmul.f32 %v16547_v1, %v1186_v3 }
 0x276   : > { %13478 = vmatmul.mubr.msk.f32.gmra.mrb[16].mxu1 %vm449_vm0, %v1409_v59  ;;  %v1410_v44 = vmul.f32 %v1378_v54, %v1282_v62  ;;  %15099 = verf.f32 %v1322_v55  ;;  %v1323_v41 = vmul.f32 0.70710677, %v1259_v35  ;;  %v1284_v49 = vmul.f32 0.5, %v16659_v8 }
 0x277   : > { %v15088_v46 = vpop.eup %15087  ;;  %v1411_v51 = vmul.f32 %v1379_v6, %v1283_v12  ;;  %v1324_v9 = vmul.f32 0.70710677, %v1260_v27  ;;  %v1325_v18 = vmul.f32 0.70710677, %v16706_v15  ;;  %v1262_v21 = vadd.f32 %v16553_v19, %v1224_v22 }
 0x278   : > { %v15090_v30 = vpop.eup %15089  ;;  %13480 = vmatprep.mubr.msk.f32.mxu1 %vm449_vm0, %v1410_v44  ;;  %v1380_v52 = vadd.f32 1.0, %v15088_v46  ;;  %15101 = verf.f32 %v1323_v41  ;;  %v1285_v38 = vmul.f32 0.5, %v16662_v26  ;;  %v1225_v60 = vmul.f32 %v16547_v1, %v1187_v5  ;;  %v16750_v41 = vld [vmem:[%s21421_s4] ss:$0 sm:$0xff] }
 0x279   : > { %v15092_v14 = vpop.eup %15091  ;;  %v1381_v40 = vadd.f32 1.0, %v15090_v30  ;;  %15103 = verf.f32 %v1324_v9  ;;  %v1286_v17 = vmul.f32 0.5, %v16665_v53  ;;  %v1326_v62 = vmul.f32 0.70710677, %v1262_v21 }
 0x27a   : > { %v15094_v33 = vpop.eup %15093  ;;  %13481 = vmatmul.mubr.msk.f32.gmra.mrb[18].mxu1 %vm449_vm0, %v1411_v51  ;;  %v1412_v8 = vmul.f32 %v1380_v52, %v1284_v49  ;;  %v1382_v25 = vadd.f32 1.0, %v15092_v14  ;;  %15105 = verf.f32 %v1325_v18  ;;  %v1263_v37 = vadd.f32 %v16553_v19, %v1225_v60 }
 0x27b   : > { %v1413_v39 = vmul.f32 %v1381_v40, %v1285_v38  ;;  %v1383_v16 = vadd.f32 1.0, %v15094_v33  ;;  %v1287_v11 = vmul.f32 0.5, %v16669_v20  ;;  %v1288_v1 = vmul.f32 0.5, %v16681_v32 }
 0x27c   : > { %v15096_v10 = vpop.eup %15095  ;;  %13483 = vmatprep.mubr.msk.f32.mxu1 %vm449_vm0, %v1412_v8  ;;  %v1414_v26 = vmul.f32 %v1382_v25, %v1286_v17  ;;  %15107 = verf.f32 %v1326_v62  ;;  %v1327_v13 = vmul.f32 0.70710677, %v1263_v37  ;;  %v1289_v19 = vmul.f32 0.5, %v16689_v24 }
 0x27d   : > { %v1384_v29 = vadd.f32 1.0, %v15096_v10  ;;  %v1415_v53 = vmul.f32 %v1383_v16, %v1287_v11  ;;  %v1290_v43 = vmul.f32 0.5, %v16692_v0  ;;  %v1291_v57 = vmul.f32 0.5, %v1259_v35 }
 0x27e   : > { %13484 = vmatmul.mubr.msk.f32.gmra.mrb[20].mxu1 %vm449_vm0, %v1413_v39  ;;  %15109 = verf.f32 %v1327_v13  ;;  %v1292_v5 = vmul.f32 0.5, %v1260_v27  ;;  %v1293_v55 = vmul.f32 0.5, %v16706_v15  ;;  %v1294_v59 = vmul.f32 0.5, %v1262_v21  ;;  %v16739_v15 = vld [vmem:[%s21427_s10] sm:$0xf] }
 0x27f   : > { %v15098_v36 = vpop.eup %15097  ;;  %13486 = vmatprep.mubr.msk.f32.mxu1 %vm449_vm0, %v1414_v26  ;;  %v1416_v63 = vmul.f32 %v1384_v29, %v1288_v1  ;;  %v1295_v22 = vmul.f32 0.5, %v1263_v37  ;;  %13565 = vmatprep.subr.msk.mxu1 %vm2170_vm1, %v16739_v15 }
 0x280   : > { %v15100_v3 = vpop.eup %15099  ;;  %v1385_v31 = vadd.f32 1.0, %v15098_v36  ;;  %13566 = vmatpush3.msk.msra.mxu1 %vm2170_vm1, %v16739_v15 }
 0x281   : > { %v1386_v20 = vadd.f32 1.0, %v15100_v3  ;;  %13679 = vmatprep.subr.msk.mxu1 %vm2170_vm1, %v16739_v15 }
 0x282   : > { %v15102_v23 = vpop.eup %15101  ;;  %13487 = vmatmul.mubr.msk.f32.gmra.mrb[22].mxu1 %vm449_vm0, %v1415_v53  ;;  %v1417_v32 = vmul.f32 %v1385_v31, %v1289_v19 }
 0x283   : > { %v15104_v47 = vpop.eup %15103  ;;  %13489 = vmatprep.mubr.msk.f32.mxu1 %vm449_vm0, %v1416_v63  ;;  %v1418_v2 = vmul.f32 %v1386_v20, %v1290_v43  ;;  %v1387_v7 = vadd.f32 1.0, %v15102_v23 }
 0x284   : > { %v15106_v42 = vpop.eup %15105  ;;  %v1388_v45 = vadd.f32 1.0, %v15104_v47 }
 0x285   : > { %v1419_v24 = vmul.f32 %v1387_v7, %v1291_v57  ;;  %v1389_v12 = vadd.f32 1.0, %v15106_v42 }
 0x286   : > { %13490 = vmatmul.mubr.msk.f32.gmra.mrb[24].mxu1 %vm449_vm0, %v1417_v32  ;;  %v15108_v48 = vpop.eup %15107  ;;  %v1420_v0 = vmul.f32 %v1388_v45, %v1292_v5 }
 0x287   : > { %13492 = vmatprep.mubr.msk.f32.mxu1 %vm449_vm0, %v1418_v2  ;;  %v1390_v58 = vadd.f32 1.0, %v15108_v48  ;;  %v1421_v6 = vmul.f32 %v1389_v12, %v1293_v55 }
 0x288   : > { %v15110_v54 = vpop.eup %15109 }
 0x289   : > { %v1422_v35 = vmul.f32 %v1390_v58, %v1294_v59  ;;  %v1391_v27 = vadd.f32 1.0, %v15110_v54 }
 0x28a   : > { %13493 = vmatmul.mubr.msk.f32.gmra.mrb[26].mxu1 %vm449_vm0, %v1419_v24 }
 0x28b   : > { %13495 = vmatprep.mubr.msk.f32.mxu1 %vm449_vm0, %v1420_v0  ;;  %v1423_v44 = vmul.f32 %v1391_v27, %v1295_v22 }
 0x28e   : > { %13496 = vmatmul.mubr.msk.f32.gmra.mrb[28].mxu1 %vm449_vm0, %v1421_v6 }
 0x28f   : > { %13498 = vmatprep.mubr.msk.f32.mxu1 %vm449_vm0, %v1422_v35 }
 0x292   : > { %13499 = vmatmul.mubr.msk.f32.gmra.mrb[30].mxu1 %vm449_vm0, %v1423_v44 }
 0x31a   : > { %v13455_v46 = vpop.f32.mrb[0].mxu1 }
 0x31b   : > { %v1592_v51 = vpop.f32.mrb[1].mxu1  ;;  %v16756_v9 = vadd.f32 %v13455_v46, %v16750_v41 }
 0x31c   : > { %v16753_v49 = vadd.f32 %v16750_v41, %v1592_v51 }
 0x31e   : > { %13517 = vmatprep.mubr.msk.f32.mxu0 %vm1751_vm2, %v16753_v49 }
 0x31f   : > { %13518 = vmatmul.mubr.msk.f32.vlgmr.msra.gmra.mrb[32].mxu0 %vm1751_vm2, %v16756_v9 }
 0x320   : > { %v13458_v30 = vpop.f32.mrb[2].mxu1  ;;  %14784 = vmatpush3.bf16.msra.mxu0 %v16512_v4 }
 0x321   : > { %v1602_v52 = vpop.f32.mrb[3].mxu1  ;;  %14786 = vmatprep.subr.bf16.mxu0 %v16517_v28  ;;  %v16768_v21 = vadd.f32 %v13458_v30, %v16750_v41 }
 0x322   : > { %v16765_v18 = vadd.f32 %v16750_v41, %v1602_v52 }
 0x324   : > { %v13461_v14 = vpop.f32.mrb[4].mxu1  ;;  %13520 = vmatprep.mubr.msk.f32.mxu0 %vm1751_vm2, %v16765_v18  ;;  %14788 = vmatpush3.bf16.msra.mxu0 %v16517_v28 }
 0x325   : > { %v1612_v38 = vpop.f32.mrb[5].mxu1  ;;  %13521 = vmatmul.mubr.msk.f32.gmra.mrb[34].mxu0 %vm1751_vm2, %v16768_v21  ;;  %14790 = vmatprep.subr.bf16.mxu0 %v16528_v50  ;;  %v16780_v60 = vadd.f32 %v13461_v14, %v16750_v41 }
 0x326   : > { %v16777_v40 = vadd.f32 %v16750_v41, %v1612_v38 }
 0x328   : > { %13523 = vmatprep.mubr.msk.f32.mxu0 %vm1751_vm2, %v16777_v40  ;;  %14792 = vmatpush3.bf16.msra.mxu0 %v16528_v50 }
 0x329   : > { %13524 = vmatmul.mubr.msk.f32.gmra.mrb[36].mxu0 %vm1751_vm2, %v16780_v60  ;;  %14794 = vmatprep.subr.bf16.mxu0 %v16538_v34 }
 0x32c   : > { %v13464_v33 = vpop.f32.mrb[6].mxu1  ;;  %14796 = vmatpush3.bf16.msra.mxu0 %v16538_v34 }
 0x32d   : > { %v1622_v8 = vpop.f32.mrb[7].mxu1  ;;  %v16793_v25 = vadd.f32 %v13464_v33, %v16750_v41 }
 0x32e   : > { %v16790_v17 = vadd.f32 %v16750_v41, %v1622_v8 }
 0x330   : > { %13526 = vmatprep.mubr.msk.f32.mxu0 %vm1751_vm2, %v16790_v17 }
 0x331   : > { %13527 = vmatmul.mubr.msk.f32.gmra.mrb[38].mxu0 %vm1751_vm2, %v16793_v25 }
 0x334   : > { %v13467_v39 = vpop.f32.mrb[8].mxu1 }
 0x335   : > { %v1632_v16 = vpop.f32.mrb[9].mxu1  ;;  %v16803_v37 = vadd.f32 %v13467_v39, %v16750_v41 }
 0x336   : > { %v16800_v62 = vadd.f32 %v16750_v41, %v1632_v16 }
 0x338   : > { %13529 = vmatprep.mubr.msk.f32.mxu0 %vm1751_vm2, %v16800_v62 }
 0x339   : > { %v13470_v10 = vpop.f32.mrb[10].mxu1  ;;  %13530 = vmatmul.mubr.msk.f32.gmra.mrb[40].mxu0 %vm1751_vm2, %v16803_v37 }
 0x33a   : > { %v1642_v26 = vpop.f32.mrb[11].mxu1  ;;  %v16813_v1 = vadd.f32 %v13470_v10, %v16750_v41 }
 0x33b   : > { %v16810_v11 = vadd.f32 %v16750_v41, %v1642_v26 }
 0x33d   : > { %13532 = vmatprep.mubr.msk.f32.mxu0 %vm1751_vm2, %v16810_v11 }
 0x33e   : > { %13533 = vmatmul.mubr.msk.f32.gmra.mrb[42].mxu0 %vm1751_vm2, %v16813_v1 }
 0x341   : > { %v13473_v29 = vpop.f32.mrb[12].mxu1 }
 0x342   : > { %v1652_v53 = vpop.f32.mrb[13].mxu1  ;;  %v16823_v36 = vadd.f32 %v13473_v29, %v16750_v41 }
 0x343   : > { %v16820_v13 = vadd.f32 %v16750_v41, %v1652_v53 }
 0x345   : > { %v13476_v63 = vpop.f32.mrb[14].mxu1  ;;  %13535 = vmatprep.mubr.msk.f32.mxu0 %vm1751_vm2, %v16820_v13 }
 0x346   : > { %v1662_v3 = vpop.f32.mrb[15].mxu1  ;;  %13536 = vmatmul.mubr.msk.f32.gmra.mrb[44].mxu0 %vm1751_vm2, %v16823_v36  ;;  %v16833_v31 = vadd.f32 %v13476_v63, %v16750_v41 }
 0x347   : > { %v16830_v19 = vadd.f32 %v16750_v41, %v1662_v3 }
 0x349   : > { %v13479_v43 = vpop.f32.mrb[16].mxu1  ;;  %13538 = vmatprep.mubr.msk.f32.mxu0 %vm1751_vm2, %v16830_v19 }
 0x34a   : > { %v1672_v20 = vpop.f32.mrb[17].mxu1  ;;  %13539 = vmatmul.mubr.msk.f32.gmra.mrb[46].mxu0 %vm1751_vm2, %v16833_v31  ;;  %v16843_v32 = vadd.f32 %v13479_v43, %v16750_v41 }
 0x34b   : > { %v16840_v23 = vadd.f32 %v16750_v41, %v1672_v20 }
 0x34d   : > { %v13482_v47 = vpop.f32.mrb[18].mxu1  ;;  %13541 = vmatprep.mubr.msk.f32.mxu0 %vm1751_vm2, %v16840_v23 }
 0x34e   : > { %v1682_v2 = vpop.f32.mrb[19].mxu1  ;;  %13542 = vmatmul.mubr.msk.f32.gmra.mrb[48].mxu0 %vm1751_vm2, %v16843_v32  ;;  %v16853_v42 = vadd.f32 %v13482_v47, %v16750_v41 }
 0x34f   : > { %v16850_v7 = vadd.f32 %v16750_v41, %v1682_v2 }
 0x351   : > { %v13485_v57 = vpop.f32.mrb[20].mxu1  ;;  %13544 = vmatprep.mubr.msk.f32.mxu0 %vm1751_vm2, %v16850_v7 }
 0x352   : > { %v1692_v45 = vpop.f32.mrb[21].mxu1  ;;  %13545 = vmatmul.mubr.msk.f32.gmra.mrb[50].mxu0 %vm1751_vm2, %v16853_v42  ;;  %v16863_v24 = vadd.f32 %v13485_v57, %v16750_v41 }
 0x353   : > { %v16860_v5 = vadd.f32 %v16750_v41, %v1692_v45 }
 0x355   : > { %v13488_v12 = vpop.f32.mrb[22].mxu1  ;;  %13547 = vmatprep.mubr.msk.f32.mxu0 %vm1751_vm2, %v16860_v5 }
 0x356   : > { %v1702_v48 = vpop.f32.mrb[23].mxu1  ;;  %13548 = vmatmul.mubr.msk.f32.gmra.mrb[52].mxu0 %vm1751_vm2, %v16863_v24  ;;  %v16873_v55 = vadd.f32 %v13488_v12, %v16750_v41 }
 0x357   : > { %v16870_v0 = vadd.f32 %v16750_v41, %v1702_v48 }
 0x359   : > { %v13491_v58 = vpop.f32.mrb[24].mxu1  ;;  %13550 = vmatprep.mubr.msk.f32.mxu0 %vm1751_vm2, %v16870_v0 }
 0x35a   : > { %v1712_v59 = vpop.f32.mrb[25].mxu1  ;;  %13551 = vmatmul.mubr.msk.f32.gmra.mrb[54].mxu0 %vm1751_vm2, %v16873_v55  ;;  %v16883_v6 = vadd.f32 %v13491_v58, %v16750_v41 }
 0x35b   : > { %v16880_v54 = vadd.f32 %v16750_v41, %v1712_v59 }
 0x35d   : > { %v13494_v35 = vpop.f32.mrb[26].mxu1  ;;  %13553 = vmatprep.mubr.msk.f32.mxu0 %vm1751_vm2, %v16880_v54 }
 0x35e   : > { %v1722_v27 = vpop.f32.mrb[27].mxu1  ;;  %13554 = vmatmul.mubr.msk.f32.gmra.mrb[56].mxu0 %vm1751_vm2, %v16883_v6  ;;  %v16893_v44 = vadd.f32 %v13494_v35, %v16750_v41 }
 0x35f   : > { %v16890_v22 = vadd.f32 %v16750_v41, %v1722_v27 }
 0x361   : > { %v13497_v46 = vpop.f32.mrb[28].mxu1  ;;  %13556 = vmatprep.mubr.msk.f32.mxu0 %vm1751_vm2, %v16890_v22 }
 0x362   : > { %v1732_v51 = vpop.f32.mrb[29].mxu1  ;;  %13557 = vmatmul.mubr.msk.f32.gmra.mrb[58].mxu0 %vm1751_vm2, %v16893_v44  ;;  %v16903_v52 = vadd.f32 %v13497_v46, %v16750_v41 }
 0x363   : > { %v16900_v30 = vadd.f32 %v16750_v41, %v1732_v51 }
 0x365   : > { %v13500_v14 = vpop.f32.mrb[30].mxu1  ;;  %13559 = vmatprep.mubr.msk.f32.mxu0 %vm1751_vm2, %v16900_v30 }
 0x366   : > { %v1742_v38 = vpop.f32.mrb[31].mxu1  ;;  %13560 = vmatmul.mubr.msk.f32.gmra.mrb[60].mxu0 %vm1751_vm2, %v16903_v52  ;;  %v16913_v8 = vadd.f32 %v13500_v14, %v16750_v41 }
 0x367   : > { %v16910_v33 = vadd.f32 %v16750_v41, %v1742_v38 }
 0x369   : > { %13562 = vmatprep.mubr.msk.f32.mxu0 %vm1751_vm2, %v16910_v33 }
 0x36a   : > { %13563 = vmatmul.mubr.msk.f32.gmra.mrb[62].mxu0 %vm1751_vm2, %v16913_v8 }
 0x3f2   : > { %v13519_v39 = vpop.f32.mrb[32].mxu0 }
 0x3f3   : > { %v1914_v16 = vpop.f32.mrb[33].mxu0 }
 0x3f4   : > { %13567 = vmatprep.mubr.msk.f32.mxu1 %vm2073_vm3, %v1914_v16 }
 0x3f5   : > { %13568 = vmatmul.mubr.msk.f32.vlgmr.msra.gmra.mrb[32].mxu1 %vm2073_vm3, %v13519_v39 }
 0x3f6   : > { %13680 = vmatpush3.msk.msra.mxu1 %vm2170_vm1, %v16739_v15 }
 0x3f7   : > { %14806 = vmatprep.subr.bf16.mxu1 %v16453_v61 }
 0x3f8   : > { %v13522_v41 = vpop.f32.mrb[34].mxu0 }
 0x3f9   : > { %v1924_v10 = vpop.f32.mrb[35].mxu0 }
 0x3fa   : > { %13570 = vmatprep.mubr.msk.f32.mxu1 %vm2073_vm3, %v1924_v10 }
 0x3fb   : > { %13571 = vmatmul.mubr.msk.f32.gmra.mrb[34].mxu1 %vm2073_vm3, %v13522_v41 }
 0x3fc   : > { %v13525_v26 = vpop.f32.mrb[36].mxu0 }
 0x3fd   : > { %v1934_v29 = vpop.f32.mrb[37].mxu0 }
 0x3fe   : > { %13573 = vmatprep.mubr.msk.f32.mxu1 %vm2073_vm3, %v1934_v29 }
 0x3ff   : > { %13574 = vmatmul.mubr.msk.f32.gmra.mrb[36].mxu1 %vm2073_vm3, %v13525_v26 }
 0x404   : > { %v13528_v53 = vpop.f32.mrb[38].mxu0 }
 0x405   : > { %v1944_v63 = vpop.f32.mrb[39].mxu0 }
 0x406   : > { %13576 = vmatprep.mubr.msk.f32.mxu1 %vm2073_vm3, %v1944_v63  ;;  %v11915_v63 = vld [vmem:[%s21418_s1 + $0x20] sm:$0xff] }
 0x407   : > { %13577 = vmatmul.mubr.msk.f32.gmra.mrb[38].mxu1 %vm2073_vm3, %v13528_v53 }
 0x40c   : > { %v13531_v3 = vpop.f32.mrb[40].mxu0 }
 0x40d   : > { %v1954_v43 = vpop.f32.mrb[41].mxu0 }
 0x40e   : > { %13579 = vmatprep.mubr.msk.f32.mxu1 %vm2073_vm3, %v1954_v43 }
 0x40f   : > { %13580 = vmatmul.mubr.msk.f32.gmra.mrb[40].mxu1 %vm2073_vm3, %v13531_v3  ;;  %v11916_v3 = vld [vmem:[%s21418_s1 + $0x28] sm:$0xff] }
 0x410   : > { %v14797_v43 = vpack.c.bf16 %v11916_v3, %v11915_v63 }
 0x411   : > { %v13534_v20 = vpop.f32.mrb[42].mxu0 }
 0x412   : > { %v1964_v47 = vpop.f32.mrb[43].mxu0  ;;  %14798 = vmatprep.subr.bf16.mxu0 %v14797_v43 }
 0x413   : > { %13582 = vmatprep.mubr.msk.f32.mxu1 %vm2073_vm3, %v1964_v47 }
 0x414   : > { %13583 = vmatmul.mubr.msk.f32.gmra.mrb[42].mxu1 %vm2073_vm3, %v13534_v20 }
 0x419   : > { %v13537_v2 = vpop.f32.mrb[44].mxu0 }
 0x41a   : > { %v1974_v57 = vpop.f32.mrb[45].mxu0 }
 0x41b   : > { %13585 = vmatprep.mubr.msk.f32.mxu1 %vm2073_vm3, %v1974_v57 }
 0x41c   : > { %13586 = vmatmul.mubr.msk.f32.gmra.mrb[44].mxu1 %vm2073_vm3, %v13537_v2 }
 0x41d   : > { %v13540_v45 = vpop.f32.mrb[46].mxu0 }
 0x41e   : > { %v1984_v12 = vpop.f32.mrb[47].mxu0 }
 0x41f   : > { %13588 = vmatprep.mubr.msk.f32.mxu1 %vm2073_vm3, %v1984_v12  ;;  %v11918_v12 = vld [vmem:[%s21418_s1 + $0x38] sm:$0xff] }
 0x420   : > { %13589 = vmatmul.mubr.msk.f32.gmra.mrb[46].mxu1 %vm2073_vm3, %v13540_v45  ;;  %v11917_v45 = vld [vmem:[%s21418_s1 + $0x30] sm:$0xff] }
 0x421   : > { %v13543_v48 = vpop.f32.mrb[48].mxu0 }
 0x422   : > { %v1994_v58 = vpop.f32.mrb[49].mxu0 }
 0x423   : > { %13591 = vmatprep.mubr.msk.f32.mxu1 %vm2073_vm3, %v1994_v58 }
 0x424   : > { %13592 = vmatmul.mubr.msk.f32.gmra.mrb[48].mxu1 %vm2073_vm3, %v13543_v48 }
 0x425   : > { %v13546_v59 = vpop.f32.mrb[50].mxu0 }
 0x426   : > { %v2004_v35 = vpop.f32.mrb[51].mxu0 }
 0x427   : > { %13594 = vmatprep.mubr.msk.f32.mxu1 %vm2073_vm3, %v2004_v35 }
 0x428   : > { %13595 = vmatmul.mubr.msk.f32.gmra.mrb[50].mxu1 %vm2073_vm3, %v13546_v59 }
 0x429   : > { %v13549_v27 = vpop.f32.mrb[52].mxu0 }
 0x42a   : > { %v2014_v46 = vpop.f32.mrb[53].mxu0 }
 0x42b   : > { %13597 = vmatprep.mubr.msk.f32.mxu1 %vm2073_vm3, %v2014_v46 }
 0x42c   : > { %13598 = vmatmul.mubr.msk.f32.gmra.mrb[52].mxu1 %vm2073_vm3, %v13549_v27 }
 0x42d   : > { %v13552_v51 = vpop.f32.mrb[54].mxu0 }
 0x42e   : > { %v2024_v14 = vpop.f32.mrb[55].mxu0 }
 0x42f   : > { %13600 = vmatprep.mubr.msk.f32.mxu1 %vm2073_vm3, %v2024_v14 }
 0x430   : > { %13601 = vmatmul.mubr.msk.f32.gmra.mrb[54].mxu1 %vm2073_vm3, %v13552_v51 }
 0x431   : > { %v13555_v38 = vpop.f32.mrb[56].mxu0 }
 0x432   : > { %v2034_v39 = vpop.f32.mrb[57].mxu0 }
 0x433   : > { %13603 = vmatprep.mubr.msk.f32.mxu1 %vm2073_vm3, %v2034_v39 }
 0x434   : > { %13604 = vmatmul.mubr.msk.f32.gmra.mrb[56].mxu1 %vm2073_vm3, %v13555_v38 }
 0x435   : > { %v13558_v16 = vpop.f32.mrb[58].mxu0 }
 0x436   : > { %v2044_v41 = vpop.f32.mrb[59].mxu0 }
 0x437   : > { %13606 = vmatprep.mubr.msk.f32.mxu1 %vm2073_vm3, %v2044_v41 }
 0x438   : > { %13607 = vmatmul.mubr.msk.f32.gmra.mrb[58].mxu1 %vm2073_vm3, %v13558_v16 }
 0x439   : > { %v13561_v10 = vpop.f32.mrb[60].mxu0 }
 0x43a   : > { %v2054_v26 = vpop.f32.mrb[61].mxu0 }
 0x43b   : > { %13609 = vmatprep.mubr.msk.f32.mxu1 %vm2073_vm3, %v2054_v26 }
 0x43c   : > { %13610 = vmatmul.mubr.msk.f32.gmra.mrb[60].mxu1 %vm2073_vm3, %v13561_v10 }
 0x43d   : > { %v13564_v29 = vpop.f32.mrb[62].mxu0 }
 0x43e   : > { %v2064_v53 = vpop.f32.mrb[63].mxu0 }
 0x43f   : > { %13612 = vmatprep.mubr.msk.f32.mxu1 %vm2073_vm3, %v2064_v53 }
 0x440   : > { %13613 = vmatmul.mubr.msk.f32.gmra.mrb[62].mxu1 %vm2073_vm3, %v13564_v29 }
 0x4c8   : > { %v13569_v20 = vpop.f32.mrb[32].mxu1 }
 0x4c9   : > { %v16961_v47 = vsub.f32 %v16756_v9, %v13569_v20  ;;  %v2240_v2 = vpop.f32.mrb[33].mxu1  ;;  %v14801_v9 = vpack.c.bf16 %v11918_v12, %v11917_v45 }
 0x4ca   : > { %v16964_v57 = vsub.f32 %v16753_v49, %v2240_v2 }
 0x4cb   : > { %v2432_v58 = vmul.f32 %v16961_v47, %v16961_v47 }
 0x4cc   : > { %v2431_v48 = vmul.f32 %v16964_v57, %v16964_v57 }
 0x4ce   : > { %v13572_v59 = vpop.f32.mrb[34].mxu1  ;;  %13631 = vmatprep.mubr.msk.f32.mxu0 %vm1751_vm2, %v2431_v48 }
 0x4cf   : > { %v16978_v49 = vsub.f32 %v16768_v21, %v13572_v59  ;;  %v2250_v35 = vpop.f32.mrb[35].mxu1  ;;  %13632 = vmatmul.mubr.msk.f32.vlgmr.msra.gmra.mrb[64].mxu0 %vm1751_vm2, %v2432_v58 }
 0x4d0   : > { %v16982_v27 = vsub.f32 %v16765_v18, %v2250_v35  ;;  %14800 = vmatpush3.bf16.msra.mxu0 %v14797_v43 }
 0x4d1   : > { %14802 = vmatprep.subr.bf16.mxu0 %v14801_v9  ;;  %v2434_v14 = vmul.f32 %v16978_v49, %v16978_v49 }
 0x4d2   : > { %v2433_v46 = vmul.f32 %v16982_v27, %v16982_v27  ;;  %v13575_v51 = vpop.f32.mrb[36].mxu1 }
 0x4d3   : > { %v16989_v38 = vsub.f32 %v16780_v60, %v13575_v51  ;;  %v2260_v21 = vpop.f32.mrb[37].mxu1 }
 0x4d4   : > { %v16992_v39 = vsub.f32 %v16777_v40, %v2260_v21  ;;  %13634 = vmatprep.mubr.msk.f32.mxu0 %vm1751_vm2, %v2433_v46  ;;  %14804 = vmatpush3.bf16.msra.mxu0 %v14801_v9 }
 0x4d5   : > { %13635 = vmatmul.mubr.msk.f32.gmra.mrb[66].mxu0 %vm1751_vm2, %v2434_v14  ;;  %14814 = vmatprep.subr.bf16.mxu0 %v16512_v4  ;;  %v2436_v16 = vmul.f32 %v16989_v38, %v16989_v38 }
 0x4d6   : > { %v2435_v18 = vmul.f32 %v16992_v39, %v16992_v39 }
 0x4d8   : > { %13637 = vmatprep.mubr.msk.f32.mxu0 %vm1751_vm2, %v2435_v18 }
 0x4d9   : > { %13638 = vmatmul.mubr.msk.f32.gmra.mrb[68].mxu0 %vm1751_vm2, %v2436_v16 }
 0x4da   : > { %v13578_v60 = vpop.f32.mrb[38].mxu1 }
 0x4db   : > { %v17004_v40 = vsub.f32 %v16793_v25, %v13578_v60  ;;  %v2270_v41 = vpop.f32.mrb[39].mxu1 }
 0x4dc   : > { %v17007_v10 = vsub.f32 %v16790_v17, %v2270_v41 }
 0x4dd   : > { %v2438_v29 = vmul.f32 %v17004_v40, %v17004_v40 }
 0x4de   : > { %v2437_v26 = vmul.f32 %v17007_v10, %v17007_v10 }
 0x4e0   : > { %13640 = vmatprep.mubr.msk.f32.mxu0 %vm1751_vm2, %v2437_v26 }
 0x4e1   : > { %13641 = vmatmul.mubr.msk.f32.gmra.mrb[70].mxu0 %vm1751_vm2, %v2438_v29 }
 0x4e2   : > { %v13581_v53 = vpop.f32.mrb[40].mxu1 }
 0x4e3   : > { %v17016_v63 = vsub.f32 %v16803_v37, %v13581_v53  ;;  %v2280_v25 = vpop.f32.mrb[41].mxu1 }
 0x4e4   : > { %v17019_v3 = vsub.f32 %v16800_v62, %v2280_v25 }
 0x4e5   : > { %v2440_v43 = vmul.f32 %v17016_v63, %v17016_v63 }
 0x4e6   : > { %v2439_v17 = vmul.f32 %v17019_v3, %v17019_v3 }
 0x4e7   : > { %v13584_v20 = vpop.f32.mrb[42].mxu1 }
 0x4e8   : > { %v17026_v2 = vsub.f32 %v16813_v1, %v13584_v20  ;;  %v2290_v45 = vpop.f32.mrb[43].mxu1  ;;  %13643 = vmatprep.mubr.msk.f32.mxu0 %vm1751_vm2, %v2439_v17 }
 0x4e9   : > { %v17030_v37 = vsub.f32 %v16810_v11, %v2290_v45  ;;  %13644 = vmatmul.mubr.msk.f32.gmra.mrb[72].mxu0 %vm1751_vm2, %v2440_v43 }
 0x4ea   : > { %v2442_v12 = vmul.f32 %v17026_v2, %v17026_v2 }
 0x4eb   : > { %v2441_v62 = vmul.f32 %v17030_v37, %v17030_v37 }
 0x4ed   : > { %13646 = vmatprep.mubr.msk.f32.mxu0 %vm1751_vm2, %v2441_v62 }
 0x4ee   : > { %13647 = vmatmul.mubr.msk.f32.gmra.mrb[74].mxu0 %vm1751_vm2, %v2442_v12 }
 0x4ef   : > { %v13587_v1 = vpop.f32.mrb[44].mxu1 }
 0x4f0   : > { %v17040_v48 = vsub.f32 %v16823_v36, %v13587_v1  ;;  %v2300_v58 = vpop.f32.mrb[45].mxu1 }
 0x4f1   : > { %v17043_v11 = vsub.f32 %v16820_v13, %v2300_v58 }
 0x4f2   : > { %v2444_v35 = vmul.f32 %v17040_v48, %v17040_v48 }
 0x4f3   : > { %v2443_v9 = vmul.f32 %v17043_v11, %v17043_v11  ;;  %v13590_v59 = vpop.f32.mrb[46].mxu1 }
 0x4f4   : > { %v17050_v46 = vsub.f32 %v16833_v31, %v13590_v59  ;;  %v2310_v51 = vpop.f32.mrb[47].mxu1 }
 0x4f5   : > { %v17053_v14 = vsub.f32 %v16830_v19, %v2310_v51  ;;  %13649 = vmatprep.mubr.msk.f32.mxu0 %vm1751_vm2, %v2443_v9 }
 0x4f6   : > { %13650 = vmatmul.mubr.msk.f32.gmra.mrb[76].mxu0 %vm1751_vm2, %v2444_v35  ;;  %v2446_v21 = vmul.f32 %v17050_v46, %v17050_v46 }
 0x4f7   : > { %v2445_v13 = vmul.f32 %v17053_v14, %v17053_v14  ;;  %v13593_v36 = vpop.f32.mrb[48].mxu1 }
 0x4f8   : > { %v17062_v18 = vsub.f32 %v16843_v32, %v13593_v36  ;;  %v2320_v31 = vpop.f32.mrb[49].mxu1 }
 0x4f9   : > { %v17065_v16 = vsub.f32 %v16840_v23, %v2320_v31  ;;  %13652 = vmatprep.mubr.msk.f32.mxu0 %vm1751_vm2, %v2445_v13 }
 0x4fa   : > { %13653 = vmatmul.mubr.msk.f32.gmra.mrb[78].mxu0 %vm1751_vm2, %v2446_v21  ;;  %v2448_v41 = vmul.f32 %v17062_v18, %v17062_v18 }
 0x4fb   : > { %v2447_v19 = vmul.f32 %v17065_v16, %v17065_v16  ;;  %v13596_v60 = vpop.f32.mrb[50].mxu1 }
 0x4fc   : > { %v17074_v26 = vsub.f32 %v16853_v42, %v13596_v60  ;;  %v2330_v32 = vpop.f32.mrb[51].mxu1 }
 0x4fd   : > { %v17077_v29 = vsub.f32 %v16850_v7, %v2330_v32  ;;  %13655 = vmatprep.mubr.msk.f32.mxu0 %vm1751_vm2, %v2447_v19 }
 0x4fe   : > { %13656 = vmatmul.mubr.msk.f32.gmra.mrb[80].mxu0 %vm1751_vm2, %v2448_v41  ;;  %v2450_v25 = vmul.f32 %v17074_v26, %v17074_v26 }
 0x4ff   : > { %v2449_v23 = vmul.f32 %v17077_v29, %v17077_v29  ;;  %v13599_v53 = vpop.f32.mrb[52].mxu1 }
 0x500   : > { %v17086_v17 = vsub.f32 %v16863_v24, %v13599_v53  ;;  %v2340_v42 = vpop.f32.mrb[53].mxu1 }
 0x501   : > { %v17089_v43 = vsub.f32 %v16860_v5, %v2340_v42  ;;  %13658 = vmatprep.mubr.msk.f32.mxu0 %vm1751_vm2, %v2449_v23  ;;  %v15753_v42 = vld [vmem:[%s16060_s12 + $0x10] sm:$0xff] }
 0x502   : > { %13659 = vmatmul.mubr.msk.f32.gmra.mrb[82].mxu0 %vm1751_vm2, %v2450_v25  ;;  %v2452_v45 = vmul.f32 %v17086_v17, %v17086_v17 }
 0x503   : > { %21518 = vst [vmem:[#allocation11_spill] sm:$0xff] %v17089_v43  ;;  %v2451_v7 = vmul.f32 %v17089_v43, %v17089_v43  ;;  %v13602_v20 = vpop.f32.mrb[54].mxu1 }
 0x504   : > { %v17098_v62 = vsub.f32 %v16873_v55, %v13602_v20  ;;  %v2350_v24 = vpop.f32.mrb[55].mxu1  ;;  %v15755_v20 = vld [vmem:[%s16060_s12 + $0x20] sm:$0xff] }
 0x505   : > { %v17101_v12 = vsub.f32 %v16870_v0, %v2350_v24  ;;  %13661 = vmatprep.mubr.msk.f32.mxu0 %vm1751_vm2, %v2451_v7  ;;  %v15754_v7 = vld [vmem:[%s16060_s12 + $0x18] sm:$0xff]  ;;  %v15757_v24 = vld [vmem:[%s16060_s12 + $0x30] sm:$0xff] }
 0x506   : > { %21519 = vst [vmem:[#allocation12_spill] sm:$0xff] %v17098_v62  ;;  %13662 = vmatmul.mubr.msk.f32.gmra.mrb[84].mxu0 %vm1751_vm2, %v2452_v45  ;;  %v2454_v58 = vmul.f32 %v17098_v62, %v17098_v62  ;;  %v15756_v45 = vld [vmem:[%s16060_s12 + $0x28] sm:$0xff] }
 0x507   : > { %21520 = vst [vmem:[#allocation13_spill] sm:$0xff] %v17101_v12  ;;  %v2453_v5 = vmul.f32 %v17101_v12, %v17101_v12  ;;  %v13605_v1 = vpop.f32.mrb[56].mxu1 }
 0x508   : > { %v17110_v9 = vsub.f32 %v16883_v6, %v13605_v1  ;;  %v2360_v55 = vpop.f32.mrb[57].mxu1  ;;  %v15759_v1 = vld [vmem:[%s16060_s12 + $0x40] sm:$0xff] }
 0x509   : > { %v17113_v59 = vsub.f32 %v16880_v54, %v2360_v55  ;;  %13664 = vmatprep.mubr.msk.f32.mxu0 %vm1751_vm2, %v2453_v5  ;;  %v15758_v5 = vld [vmem:[%s16060_s12 + $0x38] sm:$0xff]  ;;  %v15761_v55 = vld [vmem:[%s16060_s12 + $0x50] sm:$0xff] }
 0x50a   : > { %21521 = vst [vmem:[#allocation14_spill] sm:$0xff] %v17110_v9  ;;  %13665 = vmatmul.mubr.msk.f32.gmra.mrb[86].mxu0 %vm1751_vm2, %v2454_v58  ;;  %v2456_v51 = vmul.f32 %v17110_v9, %v17110_v9  ;;  %v15760_v58 = vld [vmem:[%s16060_s12 + $0x48] sm:$0xff] }
 0x50b   : > { %21522 = vst [vmem:[#allocation15_spill] sm:$0xff] %v17113_v59  ;;  %v2455_v0 = vmul.f32 %v17113_v59, %v17113_v59  ;;  %v13608_v35 = vpop.f32.mrb[58].mxu1 }
 0x50c   : > { %v17122_v13 = vsub.f32 %v16893_v44, %v13608_v35  ;;  %v2370_v6 = vpop.f32.mrb[59].mxu1  ;;  %v15763_v35 = vld [vmem:[%s16060_s12 + $0x60] sm:$0xff] }
 0x50d   : > { %v17125_v36 = vsub.f32 %v16890_v22, %v2370_v6  ;;  %13667 = vmatprep.mubr.msk.f32.mxu0 %vm1751_vm2, %v2455_v0  ;;  %v15762_v0 = vld [vmem:[%s16060_s12 + $0x58] sm:$0xff]  ;;  %v15765_v6 = vld [vmem:[%s16060_s12 + $0x70] sm:$0xff] }
 0x50e   : > { %21523 = vst [vmem:[#allocation16_spill] sm:$0xff] %v17122_v13  ;;  %13668 = vmatmul.mubr.msk.f32.gmra.mrb[88].mxu0 %vm1751_vm2, %v2456_v51  ;;  %v2458_v31 = vmul.f32 %v17122_v13, %v17122_v13  ;;  %v15764_v51 = vld [vmem:[%s16060_s12 + $0x68] sm:$0xff] }
 0x50f   : > { %21524 = vst [vmem:[#allocation17_spill] sm:$0xff] %v17125_v36  ;;  %v2457_v54 = vmul.f32 %v17125_v36, %v17125_v36  ;;  %v13611_v21 = vpop.f32.mrb[60].mxu1 }
 0x510   : > { %v17134_v19 = vsub.f32 %v16903_v52, %v13611_v21  ;;  %v2380_v44 = vpop.f32.mrb[61].mxu1  ;;  %v15767_v21 = vld [vmem:[%s16060_s12 + $0x80] sm:$0xff] }
 0x511   : > { %v17137_v60 = vsub.f32 %v16900_v30, %v2380_v44  ;;  %13670 = vmatprep.mubr.msk.f32.mxu0 %vm1751_vm2, %v2457_v54  ;;  %v15766_v54 = vld [vmem:[%s16060_s12 + $0x78] sm:$0xff]  ;;  %v15769_v44 = vld [vmem:[%s16060_s12 + $0x90] sm:$0xff] }
 0x512   : > { %21525 = vst [vmem:[#allocation18_spill] sm:$0xff] %v17134_v19  ;;  %13671 = vmatmul.mubr.msk.f32.gmra.mrb[90].mxu0 %vm1751_vm2, %v2458_v31  ;;  %v2460_v32 = vmul.f32 %v17134_v19, %v17134_v19  ;;  %v15768_v31 = vld [vmem:[%s16060_s12 + $0x88] sm:$0xff] }
 0x513   : > { %21526 = vst [vmem:[#allocation19_spill] sm:$0xff] %v17137_v60  ;;  %v2459_v22 = vmul.f32 %v17137_v60, %v17137_v60  ;;  %v13614_v41 = vpop.f32.mrb[62].mxu1 }
 0x514   : > { %v17146_v52 = vsub.f32 %v16913_v8, %v13614_v41  ;;  %v2390_v23 = vpop.f32.mrb[63].mxu1  ;;  %v15751_v8 = vld [vmem:[%s16060_s12] sm:$0xff] }
 0x515   : > { %v17149_v30 = vsub.f32 %v16910_v33, %v2390_v23  ;;  %13673 = vmatprep.mubr.msk.f32.mxu0 %vm1751_vm2, %v2459_v22  ;;  %v15752_v33 = vld [vmem:[%s16060_s12 + $0x8] sm:$0xff]  ;;  %v15770_v22 = vld [vmem:[%s16060_s12 + $0x98] sm:$0xff]  ;;  %v15771_v41 = vld [vmem:[%s16060_s12 + $0xa0] sm:$0xff] }
 0x516   : > { %21527 = vst [vmem:[#allocation20_spill] sm:$0xff] %v17146_v52  ;;  %13674 = vmatmul.mubr.msk.f32.gmra.mrb[92].mxu0 %vm1751_vm2, %v2460_v32  ;;  %v2462_v25 = vmul.f32 %v17146_v52, %v17146_v52  ;;  %v15772_v32 = vld [vmem:[%s16060_s12 + $0xa8] sm:$0xff]  ;;  %v15773_v23 = vld [vmem:[%s16060_s12 + $0xb0] sm:$0xff] }
 0x517   : > { %21528 = vst [vmem:[#allocation21_spill] sm:$0xff] %v17149_v30  ;;  %v2461_v53 = vmul.f32 %v17149_v30, %v17149_v30 }
 0x519   : > { %13676 = vmatprep.mubr.msk.f32.mxu0 %vm1751_vm2, %v2461_v53  ;;  %v15774_v53 = vld [vmem:[%s16060_s12 + $0xb8] sm:$0xff] }
 0x51a   : > { %13677 = vmatmul.mubr.msk.f32.gmra.mrb[94].mxu0 %vm1751_vm2, %v2462_v25  ;;  %v15775_v25 = vld [vmem:[%s16060_s12 + $0xc0] sm:$0xff] }
 0x51b   : > { %13737 = vmatprep.mubr.msk.f32.mxu0 %vm449_vm0, %v15751_v8  ;;  %v15776_v8 = vld [vmem:[%s16060_s12 + $0xc8] sm:$0xff] }
 0x51e   : > { %13738 = vmatmul.mubr.msk.f32.vlgmr.msra.gmra.mrb[96].mxu0 %vm449_vm0, %v15752_v33  ;;  %v15777_v33 = vld [vmem:[%s16060_s12 + $0xd0] sm:$0xff] }
 0x51f   : > { %13740 = vmatprep.mubr.msk.f32.mxu0 %vm449_vm0, %v15753_v42  ;;  %14816 = vmatpush3.bf16.msra.mxu0 %v16512_v4  ;;  %v15778_v42 = vld [vmem:[%s16060_s12 + $0xd8] sm:$0xff] }
 0x520   : > { %14818 = vmatprep.subr.bf16.mxu0 %v16517_v28 }
 0x522   : > { %13741 = vmatmul.mubr.msk.f32.gmra.mrb[98].mxu0 %vm449_vm0, %v15754_v7  ;;  %v15779_v7 = vld [vmem:[%s16060_s12 + $0xe0] sm:$0xff] }
 0x523   : > { %13743 = vmatprep.mubr.msk.f32.mxu0 %vm449_vm0, %v15755_v20  ;;  %14820 = vmatpush3.bf16.msra.mxu0 %v16517_v28  ;;  %v15780_v20 = vld [vmem:[%s16060_s12 + $0xe8] sm:$0xff] }
 0x524   : > { %14822 = vmatprep.subr.bf16.mxu0 %v16528_v50 }
 0x526   : > { %13744 = vmatmul.mubr.msk.f32.gmra.mrb[100].mxu0 %vm449_vm0, %v15756_v45  ;;  %v15781_v45 = vld [vmem:[%s16060_s12 + $0xf0] sm:$0xff] }
 0x527   : > { %13746 = vmatprep.mubr.msk.f32.mxu0 %vm449_vm0, %v15757_v24  ;;  %14824 = vmatpush3.bf16.msra.mxu0 %v16528_v50  ;;  %v15782_v24 = vld [vmem:[%s16060_s12 + $0xf8] sm:$0xff] }
 0x528   : > { %14826 = vmatprep.subr.bf16.mxu0 %v16538_v34 }
 0x52a   : > { %13747 = vmatmul.mubr.msk.f32.gmra.mrb[102].mxu0 %vm449_vm0, %v15758_v5 }
 0x52b   : > { %13749 = vmatprep.mubr.msk.f32.mxu0 %vm449_vm0, %v15759_v1  ;;  %14828 = vmatpush3.bf16.msra.mxu0 %v16538_v34 }
 0x52c   : > { %14830 = vmatprep.subr.bf16.mxu0 %v16512_v4 }
 0x52e   : > { %13750 = vmatmul.mubr.msk.f32.gmra.mrb[104].mxu0 %vm449_vm0, %v15760_v58 }
 0x52f   : > { %13752 = vmatprep.mubr.msk.f32.mxu0 %vm449_vm0, %v15761_v55 }
 0x532   : > { %13753 = vmatmul.mubr.msk.f32.gmra.mrb[106].mxu0 %vm449_vm0, %v15762_v0 }
 0x533   : > { %13755 = vmatprep.mubr.msk.f32.mxu0 %vm449_vm0, %v15763_v35 }
 0x536   : > { %13756 = vmatmul.mubr.msk.f32.gmra.mrb[108].mxu0 %vm449_vm0, %v15764_v51 }
 0x537   : > { %13758 = vmatprep.mubr.msk.f32.mxu0 %vm449_vm0, %v15765_v6 }
 0x53a   : > { %13759 = vmatmul.mubr.msk.f32.gmra.mrb[110].mxu0 %vm449_vm0, %v15766_v54 }
 0x53b   : > { %13761 = vmatprep.mubr.msk.f32.mxu0 %vm449_vm0, %v15767_v21 }
 0x53e   : > { %13762 = vmatmul.mubr.msk.f32.gmra.mrb[112].mxu0 %vm449_vm0, %v15768_v31 }
 0x53f   : > { %13764 = vmatprep.mubr.msk.f32.mxu0 %vm449_vm0, %v15769_v44 }
 0x542   : > { %13765 = vmatmul.mubr.msk.f32.gmra.mrb[114].mxu0 %vm449_vm0, %v15770_v22 }
 0x543   : > { %13767 = vmatprep.mubr.msk.f32.mxu0 %vm449_vm0, %v15771_v41 }
 0x546   : > { %13768 = vmatmul.mubr.msk.f32.gmra.mrb[116].mxu0 %vm449_vm0, %v15772_v32 }
 0x547   : > { %13770 = vmatprep.mubr.msk.f32.mxu0 %vm449_vm0, %v15773_v23 }
 0x54a   : > { %13771 = vmatmul.mubr.msk.f32.gmra.mrb[118].mxu0 %vm449_vm0, %v15774_v53 }
 0x54b   : > { %13773 = vmatprep.mubr.msk.f32.mxu0 %vm449_vm0, %v15775_v25 }
 0x54e   : > { %13774 = vmatmul.mubr.msk.f32.gmra.mrb[120].mxu0 %vm449_vm0, %v15776_v8 }
 0x54f   : > { %13776 = vmatprep.mubr.msk.f32.mxu0 %vm449_vm0, %v15777_v33 }
 0x552   : > { %13777 = vmatmul.mubr.msk.f32.gmra.mrb[122].mxu0 %vm449_vm0, %v15778_v42 }
 0x553   : > { %13779 = vmatprep.mubr.msk.f32.mxu0 %vm449_vm0, %v15779_v7 }
 0x556   : > { %13780 = vmatmul.mubr.msk.f32.gmra.mrb[124].mxu0 %vm449_vm0, %v15780_v20 }
 0x557   : > { %13782 = vmatprep.mubr.msk.f32.mxu0 %vm449_vm0, %v15781_v45 }
 0x55a   : > { %13783 = vmatmul.mubr.msk.f32.gmra.mrb[126].mxu0 %vm449_vm0, %v15782_v24 }
 0x5a2   : > { %v13633_v5 = vpop.f32.mrb[64].mxu0 }
 0x5a3   : > { %v2631_v1 = vadd.f32 1e-06, %v13633_v5  ;;  %v2625_v58 = vpop.f32.mrb[65].mxu0 }
 0x5a4   : > { %v2626_v55 = vadd.f32 1e-06, %v2625_v58 }
 0x5a6   : > { %15111 = vrsqrt.f32 %v2626_v55 }
 0x5a7   : > { %15113 = vrsqrt.f32 %v2631_v1 }
 0x5a8   : > { %v13636_v0 = vpop.f32.mrb[66].mxu0 }
 0x5a9   : > { %v2641_v35 = vadd.f32 1e-06, %v13636_v0  ;;  %v2635_v51 = vpop.f32.mrb[67].mxu0 }
 0x5aa   : > { %v2636_v6 = vadd.f32 1e-06, %v2635_v51 }
 0x5ac   : > { %15115 = vrsqrt.f32 %v2636_v6  ;;  %v13639_v54 = vpop.f32.mrb[68].mxu0 }
 0x5ad   : > { %15117 = vrsqrt.f32 %v2641_v35  ;;  %v2651_v21 = vadd.f32 1e-06, %v13639_v54  ;;  %v2645_v31 = vpop.f32.mrb[69].mxu0 }
 0x5ae   : > { %v2646_v44 = vadd.f32 1e-06, %v2645_v31 }
 0x5b0   : > { %v15112_v22 = vpop.eup %15111  ;;  %15119 = vrsqrt.f32 %v2646_v44 }
 0x5b1   : > { %v15114_v41 = vpop.eup %15113  ;;  %15121 = vrsqrt.f32 %v2651_v21  ;;  %13681 = vmatprep.mubr.msk.f32.mxu1 %vm2073_vm3, %v15112_v22 }
 0x5b2   : > { %13682 = vmatmul.mubr.msk.f32.vlgmr.msra.gmra.mrb[64].mxu1 %vm2073_vm3, %v15114_v41 }
 0x5b3   : > { %14808 = vmatpush3.bf16.msra.mxu1 %v16453_v61 }
 0x5b4   : > { %v13642_v32 = vpop.f32.mrb[70].mxu0  ;;  %14810 = vmatprep.subr.bf16.mxu1 %v16475_v56 }
 0x5b5   : > { %v2661_v23 = vadd.f32 1e-06, %v13642_v32  ;;  %v2655_v53 = vpop.f32.mrb[71].mxu0 }
 0x5b6   : > { %v15116_v25 = vpop.eup %15115  ;;  %v2656_v8 = vadd.f32 1e-06, %v2655_v53 }
 0x5b7   : > { %v15118_v33 = vpop.eup %15117  ;;  %13684 = vmatprep.mubr.msk.f32.mxu1 %vm2073_vm3, %v15116_v25  ;;  %14812 = vmatpush3.bf16.msra.mxu1 %v16475_v56 }
 0x5b8   : > { %15123 = vrsqrt.f32 %v2656_v8  ;;  %13685 = vmatmul.mubr.msk.f32.gmra.mrb[66].mxu1 %vm2073_vm3, %v15118_v33  ;;  %13905 = vmatprep.subr.msk.mxu1 %vm2170_vm1, %v16739_v15 }
 0x5b9   : > { %15125 = vrsqrt.f32 %v2661_v23 }
 0x5ba   : > { %v15120_v42 = vpop.eup %15119 }
 0x5bb   : > { %v15122_v7 = vpop.eup %15121  ;;  %13687 = vmatprep.mubr.msk.f32.mxu1 %vm2073_vm3, %v15120_v42 }
 0x5bc   : > { %v13645_v20 = vpop.f32.mrb[72].mxu0  ;;  %13688 = vmatmul.mubr.msk.f32.gmra.mrb[68].mxu1 %vm2073_vm3, %v15122_v7 }
 0x5bd   : > { %v2671_v45 = vadd.f32 1e-06, %v13645_v20  ;;  %v2665_v24 = vpop.f32.mrb[73].mxu0 }
 0x5be   : > { %v2666_v5 = vadd.f32 1e-06, %v2665_v24 }
 0x5c0   : > { %15127 = vrsqrt.f32 %v2666_v5 }
 0x5c1   : > { %15129 = vrsqrt.f32 %v2671_v45  ;;  %v13648_v1 = vpop.f32.mrb[74].mxu0 }
 0x5c2   : > { %v15124_v58 = vpop.eup %15123  ;;  %v2681_v55 = vadd.f32 1e-06, %v13648_v1  ;;  %v2675_v0 = vpop.f32.mrb[75].mxu0 }
 0x5c3   : > { %v15126_v35 = vpop.eup %15125  ;;  %v2676_v51 = vadd.f32 1e-06, %v2675_v0  ;;  %13690 = vmatprep.mubr.msk.f32.mxu1 %vm2073_vm3, %v15124_v58 }
 0x5c4   : > { %13691 = vmatmul.mubr.msk.f32.gmra.mrb[70].mxu1 %vm2073_vm3, %v15126_v35 }
 0x5c5   : > { %15131 = vrsqrt.f32 %v2676_v51 }
 0x5c6   : > { %15133 = vrsqrt.f32 %v2681_v55 }
 0x5c9   : > { %v13651_v15 = vpop.f32.mrb[76].mxu0 }
 0x5ca   : > { %v15128_v6 = vpop.eup %15127  ;;  %v2691_v54 = vadd.f32 1e-06, %v13651_v15  ;;  %v2685_v21 = vpop.f32.mrb[77].mxu0 }
 0x5cb   : > { %v15130_v31 = vpop.eup %15129  ;;  %v2686_v44 = vadd.f32 1e-06, %v2685_v21  ;;  %13693 = vmatprep.mubr.msk.f32.mxu1 %vm2073_vm3, %v15128_v6 }
 0x5cc   : > { %13694 = vmatmul.mubr.msk.f32.gmra.mrb[72].mxu1 %vm2073_vm3, %v15130_v31 }
 0x5cd   : > { %15135 = vrsqrt.f32 %v2686_v44  ;;  %v13654_v22 = vpop.f32.mrb[78].mxu0 }
 0x5ce   : > { %15137 = vrsqrt.f32 %v2691_v54  ;;  %v2701_v41 = vadd.f32 1e-06, %v13654_v22  ;;  %v2695_v32 = vpop.f32.mrb[79].mxu0 }
 0x5cf   : > { %v15132_v23 = vpop.eup %15131  ;;  %v2696_v53 = vadd.f32 1e-06, %v2695_v32 }
 0x5d0   : > { %v15134_v25 = vpop.eup %15133  ;;  %13696 = vmatprep.mubr.msk.f32.mxu1 %vm2073_vm3, %v15132_v23 }
 0x5d1   : > { %15139 = vrsqrt.f32 %v2696_v53  ;;  %v13657_v8 = vpop.f32.mrb[80].mxu0  ;;  %13697 = vmatmul.mubr.msk.f32.gmra.mrb[74].mxu1 %vm2073_vm3, %v15134_v25 }
 0x5d2   : > { %15141 = vrsqrt.f32 %v2701_v41  ;;  %v2711_v33 = vadd.f32 1e-06, %v13657_v8  ;;  %v2705_v42 = vpop.f32.mrb[81].mxu0 }
 0x5d3   : > { %v2706_v7 = vadd.f32 1e-06, %v2705_v42 }
 0x5d5   : > { %15143 = vrsqrt.f32 %v2706_v7  ;;  %v13660_v20 = vpop.f32.mrb[82].mxu0 }
 0x5d6   : > { %15145 = vrsqrt.f32 %v2711_v33  ;;  %v2721_v45 = vadd.f32 1e-06, %v13660_v20  ;;  %v2715_v24 = vpop.f32.mrb[83].mxu0 }
 0x5d7   : > { %v15136_v5 = vpop.eup %15135  ;;  %v2716_v1 = vadd.f32 1e-06, %v2715_v24 }
 0x5d8   : > { %v15138_v58 = vpop.eup %15137  ;;  %13699 = vmatprep.mubr.msk.f32.mxu1 %vm2073_vm3, %v15136_v5 }
 0x5d9   : > { %15147 = vrsqrt.f32 %v2716_v1  ;;  %v13663_v55 = vpop.f32.mrb[84].mxu0  ;;  %13700 = vmatmul.mubr.msk.f32.gmra.mrb[76].mxu1 %vm2073_vm3, %v15138_v58 }
 0x5da   : > { %15149 = vrsqrt.f32 %v2721_v45  ;;  %v2731_v0 = vadd.f32 1e-06, %v13663_v55  ;;  %v2725_v35 = vpop.f32.mrb[85].mxu0 }
 0x5db   : > { %v15140_v51 = vpop.eup %15139  ;;  %v2726_v15 = vadd.f32 1e-06, %v2725_v35 }
 0x5dc   : > { %v15142_v6 = vpop.eup %15141  ;;  %13702 = vmatprep.mubr.msk.f32.mxu1 %vm2073_vm3, %v15140_v51 }
 0x5dd   : > { %15151 = vrsqrt.f32 %v2726_v15  ;;  %v13666_v54 = vpop.f32.mrb[86].mxu0  ;;  %13703 = vmatmul.mubr.msk.f32.gmra.mrb[78].mxu1 %vm2073_vm3, %v15142_v6 }
 0x5de   : > { %15153 = vrsqrt.f32 %v2731_v0  ;;  %v2741_v21 = vadd.f32 1e-06, %v13666_v54  ;;  %v2735_v31 = vpop.f32.mrb[87].mxu0 }
 0x5df   : > { %v15144_v44 = vpop.eup %15143  ;;  %v2736_v22 = vadd.f32 1e-06, %v2735_v31 }
 0x5e0   : > { %v15146_v41 = vpop.eup %15145  ;;  %13705 = vmatprep.mubr.msk.f32.mxu1 %vm2073_vm3, %v15144_v44 }
 0x5e1   : > { %15155 = vrsqrt.f32 %v2736_v22  ;;  %v13669_v32 = vpop.f32.mrb[88].mxu0  ;;  %13706 = vmatmul.mubr.msk.f32.gmra.mrb[80].mxu1 %vm2073_vm3, %v15146_v41 }
 0x5e2   : > { %15157 = vrsqrt.f32 %v2741_v21  ;;  %v2751_v23 = vadd.f32 1e-06, %v13669_v32  ;;  %v2745_v53 = vpop.f32.mrb[89].mxu0  ;;  %v17265_v32 = vld [vmem:[%s21419_s2] ss:$0 sm:$0xff] }
 0x5e3   : > { %v15148_v25 = vpop.eup %15147  ;;  %v2746_v8 = vadd.f32 1e-06, %v2745_v53 }
 0x5e4   : > { %v15150_v33 = vpop.eup %15149  ;;  %13708 = vmatprep.mubr.msk.f32.mxu1 %vm2073_vm3, %v15148_v25 }
 0x5e5   : > { %15159 = vrsqrt.f32 %v2746_v8  ;;  %v13672_v42 = vpop.f32.mrb[90].mxu0  ;;  %13709 = vmatmul.mubr.msk.f32.gmra.mrb[82].mxu1 %vm2073_vm3, %v15150_v33 }
 0x5e6   : > { %15161 = vrsqrt.f32 %v2751_v23  ;;  %v2761_v7 = vadd.f32 1e-06, %v13672_v42  ;;  %v2755_v20 = vpop.f32.mrb[91].mxu0 }
 0x5e7   : > { %v15152_v45 = vpop.eup %15151  ;;  %v2756_v24 = vadd.f32 1e-06, %v2755_v20 }
 0x5e8   : > { %v15154_v5 = vpop.eup %15153  ;;  %13711 = vmatprep.mubr.msk.f32.mxu1 %vm2073_vm3, %v15152_v45 }
 0x5e9   : > { %15163 = vrsqrt.f32 %v2756_v24  ;;  %v13675_v1 = vpop.f32.mrb[92].mxu0  ;;  %13712 = vmatmul.mubr.msk.f32.gmra.mrb[84].mxu1 %vm2073_vm3, %v15154_v5 }
 0x5ea   : > { %15165 = vrsqrt.f32 %v2761_v7  ;;  %v2771_v58 = vadd.f32 1e-06, %v13675_v1  ;;  %v2765_v55 = vpop.f32.mrb[93].mxu0 }
 0x5eb   : > { %v15156_v0 = vpop.eup %15155  ;;  %v2766_v35 = vadd.f32 1e-06, %v2765_v55 }
 0x5ec   : > { %v15158_v51 = vpop.eup %15157  ;;  %13714 = vmatprep.mubr.msk.f32.mxu1 %vm2073_vm3, %v15156_v0 }
 0x5ed   : > { %15167 = vrsqrt.f32 %v2766_v35  ;;  %v13678_v15 = vpop.f32.mrb[94].mxu0  ;;  %13715 = vmatmul.mubr.msk.f32.gmra.mrb[86].mxu1 %vm2073_vm3, %v15158_v51 }
 0x5ee   : > { %15169 = vrsqrt.f32 %v2771_v58  ;;  %v2781_v6 = vadd.f32 1e-06, %v13678_v15  ;;  %v2775_v54 = vpop.f32.mrb[95].mxu0 }
 0x5ef   : > { %v15160_v21 = vpop.eup %15159  ;;  %v2776_v31 = vadd.f32 1e-06, %v2775_v54 }
 0x5f0   : > { %v15162_v44 = vpop.eup %15161  ;;  %13717 = vmatprep.mubr.msk.f32.mxu1 %vm2073_vm3, %v15160_v21 }
 0x5f1   : > { %15171 = vrsqrt.f32 %v2776_v31  ;;  %13718 = vmatmul.mubr.msk.f32.gmra.mrb[88].mxu1 %vm2073_vm3, %v15162_v44  ;;  %v13739_v22 = vpop.f32.mrb[96].mxu0 }
 0x5f2   : > { %15173 = vrsqrt.f32 %v2781_v6  ;;  %v3348_v41 = vpop.f32.mrb[97].mxu0  ;;  %v17268_v23 = vadd.f32 %v17265_v32, %v13739_v22 }
 0x5f3   : > { %v15164_v53 = vpop.eup %15163  ;;  %v17271_v25 = vadd.f32 %v17265_v32, %v3348_v41 }
 0x5f4   : > { %v15166_v8 = vpop.eup %15165  ;;  %13720 = vmatprep.mubr.msk.f32.mxu1 %vm2073_vm3, %v15164_v53  ;;  %v3510_v33 = vsel %vm449_vm0, %v17268_v23, 0.0 }
 0x5f5   : > { %13721 = vmatmul.mubr.msk.f32.gmra.mrb[90].mxu1 %vm2073_vm3, %v15166_v8  ;;  %3511 = vadd.xlane.f32.xlu1 %v3510_v33  ;;  %v13742_v42 = vpop.f32.mrb[98].mxu0  ;;  %v3507_v7 = vsel %vm449_vm0, %v17271_v25, 0.0 }
 0x5f6   : > { %v3358_v20 = vpop.f32.mrb[99].mxu0  ;;  %3508 = vadd.xlane.f32.xlu0 %v3507_v7  ;;  %v17280_v45 = vadd.f32 %v17265_v32, %v13742_v42 }
 0x5f7   : > { %v15168_v24 = vpop.eup %15167  ;;  %v17283_v5 = vadd.f32 %v17265_v32, %v3358_v20 }
 0x5f8   : > { %v15170_v1 = vpop.eup %15169  ;;  %13723 = vmatprep.mubr.msk.f32.mxu1 %vm2073_vm3, %v15168_v24  ;;  %v3516_v58 = vsel %vm449_vm0, %v17280_v45, 0.0 }
 0x5f9   : > { %13724 = vmatmul.mubr.msk.f32.gmra.mrb[92].mxu1 %vm2073_vm3, %v15170_v1  ;;  %3517 = vadd.xlane.f32.xlu1 %v3516_v58  ;;  %v13745_v55 = vpop.f32.mrb[100].mxu0  ;;  %v3513_v0 = vsel %vm449_vm0, %v17283_v5, 0.0 }
 0x5fa   : > { %v3368_v35 = vpop.f32.mrb[101].mxu0  ;;  %3514 = vadd.xlane.f32.xlu0 %v3513_v0  ;;  %v17292_v51 = vadd.f32 %v17265_v32, %v13745_v55 }
 0x5fb   : > { %v15172_v15 = vpop.eup %15171  ;;  %v17295_v6 = vadd.f32 %v17265_v32, %v3368_v35 }
 0x5fc   : > { %v15174_v54 = vpop.eup %15173  ;;  %13726 = vmatprep.mubr.msk.f32.mxu1 %vm2073_vm3, %v15172_v15  ;;  %v3522_v21 = vsel %vm449_vm0, %v17292_v51, 0.0 }
 0x5fd   : > { %3523 = vadd.xlane.f32.xlu1 %v3522_v21  ;;  %13727 = vmatmul.mubr.msk.f32.gmra.mrb[94].mxu1 %vm2073_vm3, %v15174_v54  ;;  %v13748_v31 = vpop.f32.mrb[102].mxu0  ;;  %v3519_v44 = vsel %vm449_vm0, %v17295_v6, 0.0 }
 0x5fe   : > { %v3378_v22 = vpop.f32.mrb[103].mxu0  ;;  %3520 = vadd.xlane.f32.xlu0 %v3519_v44  ;;  %v17304_v41 = vadd.f32 %v17265_v32, %v13748_v31 }
 0x5ff   : > { %v17307_v53 = vadd.f32 %v17265_v32, %v3378_v22 }
 0x600   : > { %v3528_v8 = vsel %vm449_vm0, %v17304_v41, 0.0 }
 0x601   : > { %3529 = vadd.xlane.f32.xlu1 %v3528_v8  ;;  %v13751_v33 = vpop.f32.mrb[104].mxu0  ;;  %v3525_v42 = vsel %vm449_vm0, %v17307_v53, 0.0 }
 0x602   : > { %v3388_v7 = vpop.f32.mrb[105].mxu0  ;;  %3526 = vadd.xlane.f32.xlu0 %v3525_v42  ;;  %v17314_v20 = vadd.f32 %v17265_v32, %v13751_v33 }
 0x603   : > { %v17317_v24 = vadd.f32 %v17265_v32, %v3388_v7 }
 0x604   : > { %v3534_v1 = vsel %vm449_vm0, %v17314_v20, 0.0 }
 0x605   : > { %3535 = vadd.xlane.f32.xlu1 %v3534_v1  ;;  %v13754_v58 = vpop.f32.mrb[106].mxu0  ;;  %v3531_v55 = vsel %vm449_vm0, %v17317_v24, 0.0 }
 0x606   : > { %v3398_v0 = vpop.f32.mrb[107].mxu0  ;;  %3532 = vadd.xlane.f32.xlu0 %v3531_v55  ;;  %v17324_v35 = vadd.f32 %v17265_v32, %v13754_v58 }
 0x607   : > { %v17327_v15 = vadd.f32 %v17265_v32, %v3398_v0 }
 0x608   : > { %v3540_v54 = vsel %vm449_vm0, %v17324_v35, 0.0 }
 0x609   : > { %3541 = vadd.xlane.f32.xlu1 %v3540_v54  ;;  %v13757_v21 = vpop.f32.mrb[108].mxu0  ;;  %v3537_v31 = vsel %vm449_vm0, %v17327_v15, 0.0 }
 0x60a   : > { %v3408_v44 = vpop.f32.mrb[109].mxu0  ;;  %3538 = vadd.xlane.f32.xlu0 %v3537_v31  ;;  %v17334_v22 = vadd.f32 %v17265_v32, %v13757_v21 }
 0x60b   : > { %v17337_v8 = vadd.f32 %v17265_v32, %v3408_v44 }
 0x60c   : > { %v3546_v33 = vsel %vm449_vm0, %v17334_v22, 0.0 }
 0x60d   : > { %3547 = vadd.xlane.f32.xlu1 %v3546_v33  ;;  %v13760_v42 = vpop.f32.mrb[110].mxu0  ;;  %v3543_v7 = vsel %vm449_vm0, %v17337_v8, 0.0 }
 0x60e   : > { %v3418_v1 = vpop.f32.mrb[111].mxu0  ;;  %3544 = vadd.xlane.f32.xlu0 %v3543_v7  ;;  %v17344_v58 = vadd.f32 %v17265_v32, %v13760_v42 }
 0x60f   : > { %v17347_v55 = vadd.f32 %v17265_v32, %v3418_v1 }
 0x610   : > { %v3552_v0 = vsel %vm449_vm0, %v17344_v58, 0.0 }
 0x611   : > { %3553 = vadd.xlane.f32.xlu1 %v3552_v0  ;;  %v13763_v54 = vpop.f32.mrb[112].mxu0  ;;  %v3549_v21 = vsel %vm449_vm0, %v17347_v55, 0.0 }
 0x612   : > { %v3428_v31 = vpop.f32.mrb[113].mxu0  ;;  %3550 = vadd.xlane.f32.xlu0 %v3549_v21  ;;  %v17354_v44 = vadd.f32 %v17265_v32, %v13763_v54 }
 0x613   : > { %v17357_v33 = vadd.f32 %v17265_v32, %v3428_v31 }
 0x614   : > { %v3558_v42 = vsel %vm449_vm0, %v17354_v44, 0.0 }
 0x615   : > { %3559 = vadd.xlane.f32.xlu1 %v3558_v42  ;;  %v13766_v7 = vpop.f32.mrb[114].mxu0  ;;  %v3555_v1 = vsel %vm449_vm0, %v17357_v33, 0.0 }
 0x616   : > { %v3438_v0 = vpop.f32.mrb[115].mxu0  ;;  %3556 = vadd.xlane.f32.xlu0 %v3555_v1  ;;  %v17364_v56 = vadd.f32 %v17265_v32, %v13766_v7 }
 0x617   : > { %v17367_v21 = vadd.f32 %v17265_v32, %v3438_v0 }
 0x618   : > { %v3564_v54 = vsel %vm449_vm0, %v17364_v56, 0.0 }
 0x619   : > { %3565 = vadd.xlane.f32.xlu1 %v3564_v54  ;;  %v13769_v31 = vpop.f32.mrb[116].mxu0  ;;  %v3561_v42 = vsel %vm449_vm0, %v17367_v21, 0.0 }
 0x61a   : > { %v3448_v61 = vpop.f32.mrb[117].mxu0  ;;  %3562 = vadd.xlane.f32.xlu0 %v3561_v42  ;;  %v17374_v34 = vadd.f32 %v17265_v32, %v13769_v31 }
 0x61b   : > { %v17377_v1 = vadd.f32 %v17265_v32, %v3448_v61 }
 0x61c   : > { %v3570_v7 = vsel %vm449_vm0, %v17374_v34, 0.0 }
 0x61d   : > { %3571 = vadd.xlane.f32.xlu1 %v3570_v7  ;;  %v13772_v0 = vpop.f32.mrb[118].mxu0  ;;  %v3567_v54 = vsel %vm449_vm0, %v17377_v1, 0.0 }
 0x61e   : > { %v3458_v50 = vpop.f32.mrb[119].mxu0  ;;  %3568 = vadd.xlane.f32.xlu0 %v3567_v54  ;;  %v17384_v28 = vadd.f32 %v17265_v32, %v13772_v0 }
 0x61f   : > { %v17387_v42 = vadd.f32 %v17265_v32, %v3458_v50 }
 0x620   : > { %v3576_v61 = vsel %vm449_vm0, %v17384_v28, 0.0 }
 0x621   : > { %3577 = vadd.xlane.f32.xlu1 %v3576_v61  ;;  %v13775_v31 = vpop.f32.mrb[120].mxu0  ;;  %v3573_v7 = vsel %vm449_vm0, %v17387_v42, 0.0 }
 0x622   : > { %v3468_v4 = vpop.f32.mrb[121].mxu0  ;;  %3574 = vadd.xlane.f32.xlu0 %v3573_v7  ;;  %v17394_v30 = vadd.f32 %v17265_v32, %v13775_v31 }
 0x623   : > { %v17397_v54 = vadd.f32 %v17265_v32, %v3468_v4 }
 0x624   : > { %v3582_v50 = vsel %vm449_vm0, %v17394_v30, 0.0 }
 0x625   : > { %3583 = vadd.xlane.f32.xlu1 %v3582_v50  ;;  %v13778_v0 = vpop.f32.mrb[122].mxu0  ;;  %v3579_v61 = vsel %vm449_vm0, %v17397_v54, 0.0 }
 0x626   : > { %v3478_v52 = vpop.f32.mrb[123].mxu0  ;;  %3580 = vadd.xlane.f32.xlu0 %v3579_v61  ;;  %v17404_v60 = vadd.f32 %v17265_v32, %v13778_v0 }
 0x627   : > { %v17407_v7 = vadd.f32 %v17265_v32, %v3478_v52 }
 0x628   : > { %v3588_v4 = vsel %vm449_vm0, %v17404_v60, 0.0 }
 0x629   : > { %3589 = vadd.xlane.f32.xlu1 %v3588_v4  ;;  %v13781_v31 = vpop.f32.mrb[124].mxu0  ;;  %v3585_v50 = vsel %vm449_vm0, %v17407_v7, 0.0 }
 0x62a   : > { %v3488_v19 = vpop.f32.mrb[125].mxu0  ;;  %3586 = vadd.xlane.f32.xlu0 %v3585_v50  ;;  %v17414_v36 = vadd.f32 %v17265_v32, %v13781_v31 }
 0x62b   : > { %v17417_v61 = vadd.f32 %v17265_v32, %v3488_v19 }
 0x62c   : > { %v3594_v52 = vsel %vm449_vm0, %v17414_v36, 0.0 }
 0x62d   : > { %21529 = vst [vmem:[#allocation22_spill] sm:$0xff] %v17417_v61  ;;  %3595 = vadd.xlane.f32.xlu1 %v3594_v52  ;;  %v13784_v0 = vpop.f32.mrb[126].mxu0  ;;  %v3591_v4 = vsel %vm449_vm0, %v17417_v61, 0.0 }
 0x62e   : > { %v3498_v13 = vpop.f32.mrb[127].mxu0  ;;  %3592 = vadd.xlane.f32.xlu0 %v3591_v4  ;;  %v17424_v59 = vadd.f32 %v17265_v32, %v13784_v0 }
 0x62f   : > { %v17427_v31 = vadd.f32 %v17265_v32, %v3498_v13  ;;  %v17440_v13 = vld [vmem:[%s21424_s7] ss:$0 sm:$0xff] }
 0x630   : > { %21530 = vst [vmem:[#allocation23_spill] sm:$0xff] %v17424_v59  ;;  %v3600_v19 = vsel %vm449_vm0, %v17424_v59, 0.0 }
 0x631   : > { %21531 = vst [vmem:[#allocation24_spill] sm:$0xff] %v17427_v31  ;;  %3601 = vadd.xlane.f32.xlu1 %v3600_v19  ;;  %v3597_v50 = vsel %vm449_vm0, %v17427_v31, 0.0 }
 0x632   : > { %3598 = vadd.xlane.f32.xlu0 %v3597_v50 }
 0x682   : > { %v3512_v52 = vpop.xlane.xlu1 %3511 }
 0x683   : > { %v3604_v9 = vmul.f32 0.03125, %v3512_v52  ;;  %v3509_v12 = vpop.xlane.xlu0 %3508 }
 0x684   : > { %v3603_v4 = vmul.f32 0.03125, %v3509_v12 }
 0x685   : > { %v17435_v0 = vsub.f32 %v17268_v23, %v3604_v9  ;;  %v13683_v32 = vpop.f32.mrb[64].mxu1  ;;  %v17453_v23 = vld [vmem:[%s21425_s8] ss:$0 sm:$0xff] }
 0x686   : > { %v17443_v19 = vsub.f32 %v17271_v25, %v3603_v4  ;;  %v3518_v62 = vpop.xlane.xlu1 %3517  ;;  %v3138_v50 = vmul.f32 %v13683_v32, %v16961_v47  ;;  %v2978_v31 = vpop.f32.mrb[65].mxu1 }
 0x687   : > { %21532 = vst [vmem:[#allocation25_spill] sm:$0xff] %v17435_v0  ;;  %v3606_v52 = vmul.f32 0.03125, %v3518_v62  ;;  %v3515_v12 = vpop.xlane.xlu0 %3514  ;;  %v3668_v9 = vmul.f32 %v17435_v0, %v17435_v0  ;;  %v3137_v59 = vmul.f32 %v2978_v31, %v16964_v57 }
 0x688   : > { %21533 = vst [vmem:[#allocation26_spill] sm:$0xff] %v17443_v19  ;;  %v3605_v25 = vmul.f32 0.03125, %v3515_v12  ;;  %v3667_v4 = vmul.f32 %v17443_v19, %v17443_v19  ;;  %v3176_v47 = vmul.f32 %v17440_v13, %v3138_v50 }
 0x689   : > { %v17460_v32 = vsub.f32 %v17280_v45, %v3606_v52  ;;  %v3702_v62 = vsel %vm449_vm0, %v3668_v9, 0.0  ;;  %v3175_v0 = vmul.f32 %v17440_v13, %v3137_v59 }
 0x68a   : > { %v17465_v43 = vsub.f32 %v17283_v5, %v3605_v25  ;;  %v3524_v61 = vpop.xlane.xlu1 %3523  ;;  %3703 = vadd.xlane.f32.xlu1 %v3702_v62  ;;  %v3699_v57 = vsel %vm449_vm0, %v3667_v4, 0.0  ;;  %v3214_v31 = vadd.f32 %v17453_v23, %v3176_v47 }
 0x68b   : > { %v3608_v12 = vmul.f32 0.03125, %v3524_v61  ;;  %3700 = vadd.xlane.f32.xlu0 %v3699_v57  ;;  %v3521_v19 = vpop.xlane.xlu0 %3520  ;;  %v3670_v45 = vmul.f32 %v17460_v32, %v17460_v32  ;;  %v3213_v50 = vadd.f32 %v17453_v23, %v3175_v0  ;;  %v13686_v52 = vpop.f32.mrb[66].mxu1 }
 0x68c   : > { %v3607_v9 = vmul.f32 0.03125, %v3521_v19  ;;  %v3669_v59 = vmul.f32 %v17465_v43, %v17465_v43  ;;  %v3140_v5 = vmul.f32 %v13686_v52, %v16978_v49  ;;  %v2988_v25 = vpop.f32.mrb[67].mxu1  ;;  %3246 = vst.msk [vmem:[%s17475_s14 + $0x10] sm:$0xff] %vm1751_vm2, %v3214_v31 }
 0x68d   : > { %v17480_v61 = vsub.f32 %v17292_v51, %v3608_v12  ;;  %v3708_v4 = vsel %vm449_vm0, %v3670_v45, 0.0  ;;  %v3139_v0 = vmul.f32 %v2988_v25, %v16982_v27  ;;  %3245 = vst.msk [vmem:[%s17475_s14] sm:$0xff] %vm1751_vm2, %v3213_v50 }
 0x68e   : > { %v17487_v19 = vsub.f32 %v17295_v6, %v3607_v9  ;;  %v3530_v49 = vpop.xlane.xlu1 %3529  ;;  %3709 = vadd.xlane.f32.xlu1 %v3708_v4  ;;  %v3705_v47 = vsel %vm449_vm0, %v3669_v59, 0.0  ;;  %v3178_v62 = vmul.f32 %v17440_v13, %v3140_v5 }
 0x68f   : > { %v3610_v57 = vmul.f32 0.03125, %v3530_v49  ;;  %3706 = vadd.xlane.f32.xlu0 %v3705_v47  ;;  %v3527_v31 = vpop.xlane.xlu0 %3526  ;;  %v3672_v51 = vmul.f32 %v17480_v61, %v17480_v61  ;;  %v3177_v12 = vmul.f32 %v17440_v13, %v3139_v0  ;;  %v13689_v27 = vpop.f32.mrb[68].mxu1 }
 0x690   : > { %v3609_v45 = vmul.f32 0.03125, %v3527_v31  ;;  %v3671_v6 = vmul.f32 %v17487_v19, %v17487_v19  ;;  %v3216_v50 = vadd.f32 %v17453_v23, %v3178_v62  ;;  %v3142_v52 = vmul.f32 %v13689_v27, %v16989_v38  ;;  %v2998_v9 = vpop.f32.mrb[69].mxu1 }
 0x691   : > { %v17499_v59 = vsub.f32 %v17304_v41, %v3610_v57  ;;  %v3714_v5 = vsel %vm449_vm0, %v3672_v51, 0.0  ;;  %v3215_v25 = vadd.f32 %v17453_v23, %v3177_v12  ;;  %v3141_v4 = vmul.f32 %v2998_v9, %v16992_v39 }
 0x692   : > { %v17505_v0 = vsub.f32 %v17307_v53, %v3609_v45  ;;  %v3536_v49 = vpop.xlane.xlu1 %3535  ;;  %3715 = vadd.xlane.f32.xlu1 %v3714_v5  ;;  %v3711_v47 = vsel %vm449_vm0, %v3671_v6, 0.0  ;;  %v3180_v38 = vmul.f32 %v17440_v13, %v3142_v52  ;;  %3248 = vst.msk [vmem:[%s17475_s14 + $0x30] sm:$0xff] %vm1751_vm2, %v3216_v50 }
 0x693   : > { %v3612_v62 = vmul.f32 0.03125, %v3536_v49  ;;  %3712 = vadd.xlane.f32.xlu0 %v3711_v47  ;;  %v3533_v41 = vpop.xlane.xlu0 %3532  ;;  %v3674_v57 = vmul.f32 %v17499_v59, %v17499_v59  ;;  %v3179_v39 = vmul.f32 %v17440_v13, %v3141_v4  ;;  %3247 = vst.msk [vmem:[%s17475_s14 + $0x20] sm:$0xff] %vm1751_vm2, %v3215_v25 }
 0x694   : > { %v3611_v53 = vmul.f32 0.03125, %v3533_v41  ;;  %v3673_v31 = vmul.f32 %v17505_v0, %v17505_v0  ;;  %v3218_v51 = vadd.f32 %v17453_v23, %v3180_v38 }
 0x695   : > { %v17520_v12 = vsub.f32 %v17314_v20, %v3612_v62  ;;  %v3720_v27 = vsel %vm449_vm0, %v3674_v57, 0.0  ;;  %v3217_v45 = vadd.f32 %v17453_v23, %v3179_v39 }
 0x696   : > { %v17525_v6 = vsub.f32 %v17317_v24, %v3611_v53  ;;  %v3542_v50 = vpop.xlane.xlu1 %3541  ;;  %3721 = vadd.xlane.f32.xlu1 %v3720_v27  ;;  %v3717_v52 = vsel %vm449_vm0, %v3673_v31, 0.0  ;;  %3250 = vst.msk [vmem:[%s17475_s14 + $0x50] sm:$0xff] %vm1751_vm2, %v3218_v51 }
 0x697   : > { %v3614_v9 = vmul.f32 0.03125, %v3542_v50  ;;  %3718 = vadd.xlane.f32.xlu0 %v3717_v52  ;;  %v3539_v5 = vpop.xlane.xlu0 %3538  ;;  %v3676_v20 = vmul.f32 %v17520_v12, %v17520_v12  ;;  %v13692_v25 = vpop.f32.mrb[70].mxu1  ;;  %3249 = vst.msk [vmem:[%s17475_s14 + $0x40] sm:$0xff] %vm1751_vm2, %v3217_v45 }
 0x698   : > { %v3613_v4 = vmul.f32 0.03125, %v3539_v5  ;;  %v3675_v24 = vmul.f32 %v17525_v6, %v17525_v6  ;;  %v3144_v49 = vmul.f32 %v13692_v25, %v17004_v40  ;;  %v3008_v47 = vpop.f32.mrb[71].mxu1 }
 0x699   : > { %v17538_v38 = vsub.f32 %v17324_v35, %v3614_v9  ;;  %v3726_v62 = vsel %vm449_vm0, %v3676_v20, 0.0  ;;  %v3143_v41 = vmul.f32 %v3008_v47, %v17007_v10 }
 0x69a   : > { %v17543_v57 = vsub.f32 %v17327_v15, %v3613_v4  ;;  %v3548_v39 = vpop.xlane.xlu1 %3547  ;;  %3727 = vadd.xlane.f32.xlu1 %v3726_v62  ;;  %v3723_v53 = vsel %vm449_vm0, %v3675_v24, 0.0  ;;  %v3182_v31 = vmul.f32 %v17440_v13, %v3144_v49 }
 0x69b   : > { %v3616_v51 = vmul.f32 0.03125, %v3548_v39  ;;  %3724 = vadd.xlane.f32.xlu0 %v3723_v53  ;;  %v3545_v40 = vpop.xlane.xlu0 %3544  ;;  %v3678_v35 = vmul.f32 %v17538_v38, %v17538_v38  ;;  %v3181_v27 = vmul.f32 %v17440_v13, %v3143_v41 }
 0x69c   : > { %v3615_v45 = vmul.f32 0.03125, %v3545_v40  ;;  %v3677_v10 = vmul.f32 %v17543_v57, %v17543_v57  ;;  %v3220_v15 = vadd.f32 %v17453_v23, %v3182_v31 }
 0x69d   : > { %v17554_v50 = vsub.f32 %v17334_v22, %v3616_v51  ;;  %v3732_v52 = vsel %vm449_vm0, %v3678_v35, 0.0  ;;  %v3219_v9 = vadd.f32 %v17453_v23, %v3181_v27 }
 0x69e   : > { %v17559_v5 = vsub.f32 %v17337_v8, %v3615_v45  ;;  %v3554_v20 = vpop.xlane.xlu1 %3553  ;;  %3733 = vadd.xlane.f32.xlu1 %v3732_v52  ;;  %v3729_v25 = vsel %vm449_vm0, %v3677_v10, 0.0  ;;  %3252 = vst.msk [vmem:[%s17475_s14 + $0x70] sm:$0xff] %vm1751_vm2, %v3220_v15 }
 0x69f   : > { %v3618_v4 = vmul.f32 0.03125, %v3554_v20  ;;  %3730 = vadd.xlane.f32.xlu0 %v3729_v25  ;;  %v3551_v24 = vpop.xlane.xlu0 %3550  ;;  %v3680_v22 = vmul.f32 %v17554_v50, %v17554_v50  ;;  %v13695_v49 = vpop.f32.mrb[72].mxu1  ;;  %3251 = vst.msk [vmem:[%s17475_s14 + $0x60] sm:$0xff] %vm1751_vm2, %v3219_v9 }
 0x6a0   : > { %v3617_v47 = vmul.f32 0.03125, %v3551_v24  ;;  %v3679_v8 = vmul.f32 %v17559_v5, %v17559_v5  ;;  %v3146_v62 = vmul.f32 %v13695_v49, %v17016_v63  ;;  %v3018_v41 = vpop.f32.mrb[73].mxu1 }
 0x6a1   : > { %v17572_v39 = vsub.f32 %v17344_v58, %v3618_v4  ;;  %v3738_v53 = vsel %vm449_vm0, %v3680_v22, 0.0  ;;  %v3145_v31 = vmul.f32 %v3018_v41, %v17019_v3 }
 0x6a2   : > { %v17577_v51 = vsub.f32 %v17347_v55, %v3617_v47  ;;  %v3560_v40 = vpop.xlane.xlu1 %3559  ;;  %3739 = vadd.xlane.f32.xlu1 %v3738_v53  ;;  %v3735_v35 = vsel %vm449_vm0, %v3679_v8, 0.0  ;;  %v3184_v27 = vmul.f32 %v17440_v13, %v3146_v62 }
 0x6a3   : > { %v3620_v45 = vmul.f32 0.03125, %v3560_v40  ;;  %3736 = vadd.xlane.f32.xlu0 %v3735_v35  ;;  %v3557_v63 = vpop.xlane.xlu0 %3556  ;;  %v3183_v10 = vmul.f32 %v17440_v13, %v3145_v31  ;;  %v3682_v58 = vmul.f32 %v17572_v39, %v17572_v39 }
 0x6a4   : > { %v3619_v15 = vmul.f32 0.03125, %v3557_v63  ;;  %v3222_v3 = vadd.f32 %v17453_v23, %v3184_v27  ;;  %v3681_v55 = vmul.f32 %v17577_v51, %v17577_v51  ;;  %v13698_v52 = vpop.f32.mrb[74].mxu1 }
 0x6a5   : > { %v17588_v9 = vsub.f32 %v17354_v44, %v3620_v45  ;;  %v3221_v20 = vadd.f32 %v17453_v23, %v3183_v10  ;;  %v3744_v25 = vsel %vm449_vm0, %v3682_v58, 0.0  ;;  %v3148_v4 = vmul.f32 %v13698_v52, %v17026_v2  ;;  %v3028_v24 = vpop.f32.mrb[75].mxu1 }
 0x6a6   : > { %v17594_v22 = vsub.f32 %v17357_v33, %v3619_v15  ;;  %v3566_v49 = vpop.xlane.xlu1 %3565  ;;  %3745 = vadd.xlane.f32.xlu1 %v3744_v25  ;;  %v3741_v47 = vsel %vm449_vm0, %v3681_v55, 0.0  ;;  %v3147_v8 = vmul.f32 %v3028_v24, %v17030_v37  ;;  %3254 = vst.msk [vmem:[%s17475_s14 + $0x90] sm:$0xff] %vm1751_vm2, %v3222_v3 }
 0x6a7   : > { %v3622_v44 = vmul.f32 0.03125, %v3566_v49  ;;  %3742 = vadd.xlane.f32.xlu0 %v3741_v47  ;;  %v3563_v62 = vpop.xlane.xlu0 %3562  ;;  %v3186_v41 = vmul.f32 %v17440_v13, %v3148_v4  ;;  %v3684_v2 = vmul.f32 %v17588_v9, %v17588_v9  ;;  %3253 = vst.msk [vmem:[%s17475_s14 + $0x80] sm:$0xff] %vm1751_vm2, %v3221_v20 }
 0x6a8   : > { %v3621_v33 = vmul.f32 0.03125, %v3563_v62  ;;  %v3185_v53 = vmul.f32 %v17440_v13, %v3147_v8  ;;  %v3683_v31 = vmul.f32 %v17594_v22, %v17594_v22 }
 0x6a9   : > { %v17609_v37 = vsub.f32 %v17364_v56, %v3622_v44  ;;  %v3224_v40 = vadd.f32 %v17453_v23, %v3186_v41  ;;  %v3750_v35 = vsel %vm449_vm0, %v3684_v2, 0.0 }
 0x6aa   : > { %v17614_v27 = vsub.f32 %v17367_v21, %v3621_v33  ;;  %v3223_v45 = vadd.f32 %v17453_v23, %v3185_v53  ;;  %v3572_v63 = vpop.xlane.xlu1 %3571  ;;  %3751 = vadd.xlane.f32.xlu1 %v3750_v35  ;;  %v3747_v10 = vsel %vm449_vm0, %v3683_v31, 0.0 }
 0x6ab   : > { %v3624_v58 = vmul.f32 0.03125, %v3572_v63  ;;  %3748 = vadd.xlane.f32.xlu0 %v3747_v10  ;;  %v3569_v15 = vpop.xlane.xlu0 %3568  ;;  %v3686_v56 = vmul.f32 %v17609_v37, %v17609_v37  ;;  %3256 = vst.msk [vmem:[%s17475_s14 + $0xb0] sm:$0xff] %vm1751_vm2, %v3224_v40 }
 0x6ac   : > { %v3623_v3 = vmul.f32 0.03125, %v3569_v15  ;;  %v13701_v55 = vpop.f32.mrb[76].mxu1  ;;  %v3685_v21 = vmul.f32 %v17614_v27, %v17614_v27  ;;  %3255 = vst.msk [vmem:[%s17475_s14 + $0xa0] sm:$0xff] %vm1751_vm2, %v3223_v45 }
 0x6ad   : > { %v17627_v52 = vsub.f32 %v17374_v34, %v3624_v58  ;;  %v3150_v20 = vmul.f32 %v13701_v55, %v17040_v48  ;;  %v3038_v25 = vpop.f32.mrb[77].mxu1  ;;  %v3756_v4 = vsel %vm449_vm0, %v3686_v56, 0.0 }
 0x6ae   : > { %v17632_v24 = vsub.f32 %v17377_v1, %v3623_v3  ;;  %v3149_v49 = vmul.f32 %v3038_v25, %v17043_v11  ;;  %v3578_v47 = vpop.xlane.xlu1 %3577  ;;  %3757 = vadd.xlane.f32.xlu1 %v3756_v4  ;;  %v3753_v8 = vsel %vm449_vm0, %v3685_v21, 0.0 }
 0x6af   : > { %v3188_v44 = vmul.f32 %v17440_v13, %v3150_v20  ;;  %v3626_v62 = vmul.f32 0.03125, %v3578_v47  ;;  %3754 = vadd.xlane.f32.xlu0 %v3753_v8  ;;  %v3575_v34 = vpop.xlane.xlu0 %3574  ;;  %v3688_v48 = vmul.f32 %v17627_v52, %v17627_v52 }
 0x6b0   : > { %v3187_v41 = vmul.f32 %v17440_v13, %v3149_v49  ;;  %v3625_v2 = vmul.f32 0.03125, %v3575_v34  ;;  %v13704_v33 = vpop.f32.mrb[78].mxu1  ;;  %v3687_v1 = vmul.f32 %v17632_v24, %v17632_v24 }
 0x6b1   : > { %v3226_v11 = vadd.f32 %v17453_v23, %v3188_v44  ;;  %v17644_v53 = vsub.f32 %v17384_v28, %v3626_v62  ;;  %v3152_v31 = vmul.f32 %v13704_v33, %v17050_v46  ;;  %v3048_v40 = vpop.f32.mrb[79].mxu1  ;;  %v3762_v35 = vsel %vm449_vm0, %v3688_v48, 0.0 }
 0x6b2   : > { %v3225_v45 = vadd.f32 %v17453_v23, %v3187_v41  ;;  %v17650_v63 = vsub.f32 %v17387_v42, %v3625_v2  ;;  %v3151_v10 = vmul.f32 %v3048_v40, %v17053_v14  ;;  %v3584_v58 = vpop.xlane.xlu1 %3583  ;;  %3763 = vadd.xlane.f32.xlu1 %v3762_v35  ;;  %v3759_v15 = vsel %vm449_vm0, %v3687_v1, 0.0 }
 0x6b3   : > { %v3190_v28 = vmul.f32 %v17440_v13, %v3152_v31  ;;  %v3628_v56 = vmul.f32 0.03125, %v3584_v58  ;;  %3760 = vadd.xlane.f32.xlu0 %v3759_v15  ;;  %v3581_v46 = vpop.xlane.xlu0 %3580  ;;  %v3690_v3 = vmul.f32 %v17644_v53, %v17644_v53  ;;  %3258 = vst.msk [vmem:[%s17475_s14 + $0xd0] sm:$0xff] %vm1751_vm2, %v3226_v11 }
 0x6b4   : > { %v3189_v55 = vmul.f32 %v17440_v13, %v3151_v10  ;;  %v3627_v42 = vmul.f32 0.03125, %v3581_v46  ;;  %v13707_v21 = vpop.f32.mrb[80].mxu1  ;;  %v3689_v14 = vmul.f32 %v17650_v63, %v17650_v63  ;;  %3257 = vst.msk [vmem:[%s17475_s14 + $0xc0] sm:$0xff] %vm1751_vm2, %v3225_v45 }
 0x6b5   : > { %v3228_v20 = vadd.f32 %v17453_v23, %v3190_v28  ;;  %v17666_v25 = vsub.f32 %v17394_v30, %v3628_v56  ;;  %v3154_v4 = vmul.f32 %v13707_v21, %v17062_v18  ;;  %v3058_v49 = vpop.f32.mrb[81].mxu1  ;;  %v3768_v47 = vsel %vm449_vm0, %v3690_v3, 0.0 }
 0x6b6   : > { %v3227_v8 = vadd.f32 %v17453_v23, %v3189_v55  ;;  %v17672_v44 = vsub.f32 %v17397_v54, %v3627_v42  ;;  %v3153_v62 = vmul.f32 %v3058_v49, %v17065_v16  ;;  %v3590_v34 = vpop.xlane.xlu1 %3589  ;;  %3769 = vadd.xlane.f32.xlu1 %v3768_v47  ;;  %v3765_v48 = vsel %vm449_vm0, %v3689_v14, 0.0 }
 0x6b7   : > { %v3192_v30 = vmul.f32 %v17440_v13, %v3154_v4  ;;  %v3630_v41 = vmul.f32 0.03125, %v3590_v34  ;;  %3766 = vadd.xlane.f32.xlu0 %v3765_v48  ;;  %v3587_v18 = vpop.xlane.xlu0 %3586  ;;  %v3692_v2 = vmul.f32 %v17666_v25, %v17666_v25  ;;  %3260 = vst.msk [vmem:[%s17475_s14 + $0xf0] sm:$0xff] %vm1751_vm2, %v3228_v20  ;;  %v21535_v34 = vld [vmem:[#allocation11_spill] sm:$0xff] }
 0x6b8   : > { %v3191_v33 = vmul.f32 %v17440_v13, %v3153_v62  ;;  %v3629_v54 = vmul.f32 0.03125, %v3587_v18  ;;  %v13710_v1 = vpop.f32.mrb[82].mxu1  ;;  %v3691_v16 = vmul.f32 %v17672_v44, %v17672_v44  ;;  %3259 = vst.msk [vmem:[%s17475_s14 + $0xe0] sm:$0xff] %vm1751_vm2, %v3227_v8  ;;  %v21534_v8 = vld [vmem:[#allocation22_spill] sm:$0xff] }
 0x6b9   : > { %v3230_v11 = vadd.f32 %v17453_v23, %v3192_v30  ;;  %v17688_v31 = vsub.f32 %v17404_v60, %v3630_v41  ;;  %v3156_v40 = vmul.f32 %v13710_v1, %v17074_v26  ;;  %v3068_v35 = vpop.f32.mrb[83].mxu1  ;;  %v3774_v45 = vsel %vm449_vm0, %v3692_v2, 0.0 }
 0x6ba   : > { %v3229_v10 = vadd.f32 %v17453_v23, %v3191_v33  ;;  %v17694_v58 = vsub.f32 %v17407_v7, %v3629_v54  ;;  %v3155_v15 = vmul.f32 %v3068_v35, %v17077_v29  ;;  %v3596_v28 = vpop.xlane.xlu1 %3595  ;;  %3775 = vadd.xlane.f32.xlu1 %v3774_v45  ;;  %v3771_v56 = vsel %vm449_vm0, %v3691_v16, 0.0  ;;  %v21537_v45 = vld [vmem:[#allocation12_spill] sm:$0xff] }
 0x6bb   : > { %v3194_v60 = vmul.f32 %v17440_v13, %v3156_v40  ;;  %v3632_v46 = vmul.f32 0.03125, %v3596_v28  ;;  %3772 = vadd.xlane.f32.xlu0 %v3771_v56  ;;  %v3593_v26 = vpop.xlane.xlu0 %3592  ;;  %v3694_v3 = vmul.f32 %v17688_v31, %v17688_v31  ;;  %3262 = vst.msk [vmem:[%s17475_s14 + $0x110] sm:$0xff] %vm1751_vm2, %v3230_v11  ;;  %v21536_v40 = vld [vmem:[#allocation23_spill] sm:$0xff] }
 0x6bc   : > { %v3193_v55 = vmul.f32 %v17440_v13, %v3155_v15  ;;  %v3631_v7 = vmul.f32 0.03125, %v3593_v26  ;;  %v13713_v42 = vpop.f32.mrb[84].mxu1  ;;  %v3693_v29 = vmul.f32 %v17694_v58, %v17694_v58  ;;  %3261 = vst.msk [vmem:[%s17475_s14 + $0x100] sm:$0xff] %vm1751_vm2, %v3229_v10  ;;  %v21539_v26 = vld [vmem:[#allocation13_spill] sm:$0xff] }
 0x6bd   : > { %v3232_v21 = vadd.f32 %v17453_v23, %v3194_v60  ;;  %v17710_v14 = vsub.f32 %v17414_v36, %v3632_v46  ;;  %v3158_v20 = vmul.f32 %v13713_v42, %v17086_v17  ;;  %v3078_v4 = vpop.f32.mrb[85].mxu1  ;;  %v3780_v49 = vsel %vm449_vm0, %v3694_v3, 0.0  ;;  %v21538_v60 = vld [vmem:[#allocation24_spill] sm:$0xff] }
 0x6be   : > { %v3231_v47 = vadd.f32 %v17453_v23, %v3193_v55  ;;  %v17716_v62 = vsub.f32 %v21534_v8, %v3631_v7  ;;  %v3157_v48 = vmul.f32 %v3078_v4, %v21535_v34  ;;  %3781 = vadd.xlane.f32.xlu1 %v3780_v49  ;;  %v3602_v30 = vpop.xlane.xlu1 %3601  ;;  %v3777_v41 = vsel %vm449_vm0, %v3693_v29, 0.0  ;;  %v21540_v49 = vld [vmem:[#allocation14_spill] sm:$0xff] }
 0x6bf   : > { %v3196_v36 = vmul.f32 %v17440_v13, %v3158_v20  ;;  %v3634_v18 = vmul.f32 0.03125, %v3602_v30  ;;  %3778 = vadd.xlane.f32.xlu0 %v3777_v41  ;;  %v3599_v17 = vpop.xlane.xlu0 %3598  ;;  %v3696_v2 = vmul.f32 %v17710_v14, %v17710_v14  ;;  %3264 = vst.msk [vmem:[%s17475_s14 + $0x130] sm:$0xff] %vm1751_vm2, %v3232_v21  ;;  %v21541_v30 = vld [vmem:[#allocation15_spill] sm:$0xff] }
 0x6c0   : > { %v3195_v33 = vmul.f32 %v17440_v13, %v3157_v48  ;;  %v3633_v54 = vmul.f32 0.03125, %v3599_v17  ;;  %v13716_v1 = vpop.f32.mrb[86].mxu1  ;;  %v3695_v16 = vmul.f32 %v17716_v62, %v17716_v62  ;;  %3263 = vst.msk [vmem:[%s17475_s14 + $0x120] sm:$0xff] %vm1751_vm2, %v3231_v47 }
 0x6c1   : > { %v3234_v11 = vadd.f32 %v17453_v23, %v3196_v36  ;;  %v17732_v35 = vsub.f32 %v21536_v40, %v3634_v18  ;;  %v3160_v10 = vmul.f32 %v13716_v1, %v21537_v45  ;;  %v3088_v15 = vpop.f32.mrb[87].mxu1  ;;  %v3786_v28 = vsel %vm449_vm0, %v3696_v2, 0.0  ;;  %v21543_v40 = vld [vmem:[#allocation17_spill] sm:$0xff] }
 0x6c2   : > { %v3233_v56 = vadd.f32 %v17453_v23, %v3195_v33  ;;  %v17738_v46 = vsub.f32 %v21538_v60, %v3633_v54  ;;  %v3159_v3 = vmul.f32 %v3088_v15, %v21539_v26  ;;  %3787 = vadd.xlane.f32.xlu1 %v3786_v28  ;;  %v3783_v55 = vsel %vm449_vm0, %v3695_v16, 0.0  ;;  %v21542_v54 = vld [vmem:[#allocation16_spill] sm:$0xff]  ;;  %v21544_v60 = vld [vmem:[#allocation18_spill] sm:$0xff] }
 0x6c3   : > { %v3198_v7 = vmul.f32 %v17440_v13, %v3160_v10  ;;  %3784 = vadd.xlane.f32.xlu0 %v3783_v55  ;;  %v3698_v42 = vmul.f32 %v17732_v35, %v17732_v35  ;;  %3266 = vst.msk [vmem:[%s17475_s14 + $0x150] sm:$0xff] %vm1751_vm2, %v3234_v11 }
 0x6c4   : > { %v3197_v29 = vmul.f32 %v17440_v13, %v3159_v3  ;;  %v13719_v21 = vpop.f32.mrb[88].mxu1  ;;  %v3697_v20 = vmul.f32 %v17738_v46, %v17738_v46  ;;  %3265 = vst.msk [vmem:[%s17475_s14 + $0x140] sm:$0xff] %vm1751_vm2, %v3233_v56 }
 0x6c5   : > { %v3236_v4 = vadd.f32 %v17453_v23, %v3198_v7  ;;  %v3162_v47 = vmul.f32 %v13719_v21, %v21540_v49  ;;  %v3098_v8 = vpop.f32.mrb[89].mxu1  ;;  %v3792_v34 = vsel %vm449_vm0, %v3698_v42, 0.0  ;;  %v21545_v7 = vld [vmem:[#allocation19_spill] sm:$0xff]  ;;  %v21546_v49 = vld [vmem:[#allocation20_spill] sm:$0xff] }
 0x6c6   : > { %v3235_v48 = vadd.f32 %v17453_v23, %v3197_v29  ;;  %v3161_v41 = vmul.f32 %v3098_v8, %v21541_v30  ;;  %3793 = vadd.xlane.f32.xlu1 %v3792_v34  ;;  %v3789_v36 = vsel %vm449_vm0, %v3697_v20, 0.0 }
 0x6c7   : > { %v3200_v18 = vmul.f32 %v17440_v13, %v3162_v47  ;;  %3790 = vadd.xlane.f32.xlu0 %v3789_v36  ;;  %3268 = vst.msk [vmem:[%s17475_s14 + $0x170] sm:$0xff] %vm1751_vm2, %v3236_v4 }
 0x6c8   : > { %v3199_v17 = vmul.f32 %v17440_v13, %v3161_v41  ;;  %v13722_v2 = vpop.f32.mrb[90].mxu1  ;;  %3267 = vst.msk [vmem:[%s17475_s14 + $0x160] sm:$0xff] %vm1751_vm2, %v3235_v48  ;;  %v21547_v48 = vld [vmem:[#allocation21_spill] sm:$0xff] }
 0x6c9   : > { %v3238_v33 = vadd.f32 %v17453_v23, %v3200_v18  ;;  %v3164_v1 = vmul.f32 %v13722_v2, %v21542_v54  ;;  %v3108_v16 = vpop.f32.mrb[91].mxu1 }
 0x6ca   : > { %v3237_v11 = vadd.f32 %v17453_v23, %v3199_v17  ;;  %v3163_v45 = vmul.f32 %v3108_v16, %v21543_v40 }
 0x6cb   : > { %v3202_v10 = vmul.f32 %v17440_v13, %v3164_v1  ;;  %3270 = vst.msk [vmem:[%s17475_s14 + $0x190] sm:$0xff] %vm1751_vm2, %v3238_v33 }
 0x6cc   : > { %v3201_v15 = vmul.f32 %v17440_v13, %v3163_v45  ;;  %v13725_v28 = vpop.f32.mrb[92].mxu1  ;;  %3269 = vst.msk [vmem:[%s17475_s14 + $0x180] sm:$0xff] %vm1751_vm2, %v3237_v11 }
 0x6cd   : > { %v3240_v56 = vadd.f32 %v17453_v23, %v3202_v10  ;;  %v3166_v26 = vmul.f32 %v13725_v28, %v21544_v60  ;;  %v3118_v3 = vpop.f32.mrb[93].mxu1 }
 0x6ce   : > { %v3239_v55 = vadd.f32 %v17453_v23, %v3201_v15  ;;  %v3165_v42 = vmul.f32 %v3118_v3, %v21545_v7 }
 0x6cf   : > { %v3204_v29 = vmul.f32 %v17440_v13, %v3166_v26  ;;  %3272 = vst.msk [vmem:[%s17475_s14 + $0x1b0] sm:$0xff] %vm1751_vm2, %v3240_v56 }
 0x6d0   : > { %v3203_v21 = vmul.f32 %v17440_v13, %v3165_v42  ;;  %v13728_v20 = vpop.f32.mrb[94].mxu1  ;;  %3271 = vst.msk [vmem:[%s17475_s14 + $0x1a0] sm:$0xff] %vm1751_vm2, %v3239_v55 }
 0x6d1   : > { %v3242_v4 = vadd.f32 %v17453_v23, %v3204_v29  ;;  %v3168_v47 = vmul.f32 %v13728_v20, %v21546_v49  ;;  %v3128_v8 = vpop.f32.mrb[95].mxu1 }
 0x6d2   : > { %v3241_v34 = vadd.f32 %v17453_v23, %v3203_v21  ;;  %v3167_v30 = vmul.f32 %v3128_v8, %v21547_v48 }
 0x6d3   : > { %v3206_v41 = vmul.f32 %v17440_v13, %v3168_v47  ;;  %3274 = vst.msk [vmem:[%s17475_s14 + $0x1d0] sm:$0xff] %vm1751_vm2, %v3242_v4  ;;  %v21548_v47 = vld [vmem:[#allocation25_spill] sm:$0xff] }
 0x6d4   : > { %v3205_v36 = vmul.f32 %v17440_v13, %v3167_v30  ;;  %3273 = vst.msk [vmem:[%s17475_s14 + $0x1c0] sm:$0xff] %vm1751_vm2, %v3241_v34  ;;  %v21549_v30 = vld [vmem:[#allocation26_spill] sm:$0xff] }
 0x6d5   : > { %v3244_v18 = vadd.f32 %v17453_v23, %v3206_v41 }
 0x6d6   : > { %v3243_v17 = vadd.f32 %v17453_v23, %v3205_v36 }
 0x6d7   : > { %3276 = vst.msk [vmem:[%s17475_s14 + $0x1f0] sm:$0xff] %vm1751_vm2, %v3244_v18 }
 0x6d8   : > { %3275 = vst.msk [vmem:[%s17475_s14 + $0x1e0] sm:$0xff] %vm1751_vm2, %v3243_v17  ;;  %v17805_v17 = vld [vmem:[%s21422_s5] ss:$0 sm:$0xff] }
 0x717   : > { %v3704_v2 = vpop.xlane.xlu1 %3703 }
 0x718   : > { %v3796_v33 = vmul.f32 0.03125, %v3704_v2  ;;  %v3701_v54 = vpop.xlane.xlu0 %3700 }
 0x719   : > { %v3795_v1 = vmul.f32 0.03125, %v3701_v54 }
 0x71a   : > { %v3828_v16 = vadd.f32 1e-06, %v3796_v33 }
 0x71b   : > { %v3827_v11 = vadd.f32 1e-06, %v3795_v1  ;;  %v3710_v40 = vpop.xlane.xlu1 %3709 }
 0x71c   : > { %15175 = vrsqrt.f32 %v3828_v16  ;;  %v3798_v45 = vmul.f32 0.03125, %v3710_v40  ;;  %v3707_v13 = vpop.xlane.xlu0 %3706  ;;  %v17812_v40 = vld [vmem:[%s21423_s6] ss:$0 sm:$0xff] }
 0x71d   : > { %15177 = vrsqrt.f32 %v3827_v11  ;;  %v3797_v10 = vmul.f32 0.03125, %v3707_v13 }
 0x71e   : > { %v3830_v15 = vadd.f32 1e-06, %v3798_v45 }
 0x71f   : > { %v3829_v28 = vadd.f32 1e-06, %v3797_v10  ;;  %v3716_v56 = vpop.xlane.xlu1 %3715 }
 0x720   : > { %15179 = vrsqrt.f32 %v3830_v15  ;;  %v3800_v23 = vmul.f32 0.03125, %v3716_v56  ;;  %v3713_v60 = vpop.xlane.xlu0 %3712 }
 0x721   : > { %15181 = vrsqrt.f32 %v3829_v28  ;;  %v3799_v26 = vmul.f32 0.03125, %v3713_v60 }
 0x722   : > { %v3832_v3 = vadd.f32 1e-06, %v3800_v23 }
 0x723   : > { %v3831_v55 = vadd.f32 1e-06, %v3799_v26  ;;  %v3722_v7 = vpop.xlane.xlu1 %3721 }
 0x724   : > { %15183 = vrsqrt.f32 %v3832_v3  ;;  %v3802_v42 = vmul.f32 0.03125, %v3722_v7  ;;  %v3719_v29 = vpop.xlane.xlu0 %3718 }
 0x725   : > { %15185 = vrsqrt.f32 %v3831_v55  ;;  %v3801_v21 = vmul.f32 0.03125, %v3719_v29 }
 0x726   : > { %v15176_v20 = vpop.eup %15175  ;;  %v3834_v4 = vadd.f32 1e-06, %v3802_v42 }
 0x727   : > { %v15178_v49 = vpop.eup %15177  ;;  %v3892_v8 = vmul.f32 %v15176_v20, %v21548_v47  ;;  %v3833_v34 = vadd.f32 1e-06, %v3801_v21  ;;  %v3728_v48 = vpop.xlane.xlu1 %3727 }
 0x728   : > { %v3891_v41 = vmul.f32 %v15178_v49, %v21549_v30  ;;  %15187 = vrsqrt.f32 %v3834_v4  ;;  %v3804_v36 = vmul.f32 0.03125, %v3728_v48  ;;  %v3725_v18 = vpop.xlane.xlu0 %3724 }
 0x729   : > { %v3924_v2 = vmul.f32 %v17805_v17, %v3892_v8  ;;  %15189 = vrsqrt.f32 %v3833_v34  ;;  %v3803_v33 = vmul.f32 0.03125, %v3725_v18 }
 0x72a   : > { %v15180_v54 = vpop.eup %15179  ;;  %v3836_v1 = vadd.f32 1e-06, %v3804_v36  ;;  %v3923_v16 = vmul.f32 %v17805_v17, %v3891_v41 }
 0x72b   : > { %v15182_v11 = vpop.eup %15181  ;;  %v3956_v45 = vadd.f32 %v17812_v40, %v3924_v2  ;;  %v3894_v13 = vmul.f32 %v15180_v54, %v17460_v32  ;;  %v3835_v10 = vadd.f32 1e-06, %v3803_v33  ;;  %v3734_v15 = vpop.xlane.xlu1 %3733 }
 0x72c   : > { %v3893_v28 = vmul.f32 %v15182_v11, %v17465_v43  ;;  %v3806_v56 = vmul.f32 0.03125, %v3734_v15  ;;  %v3731_v23 = vpop.xlane.xlu0 %3730  ;;  %v3955_v60 = vadd.f32 %v17812_v40, %v3923_v16 }
 0x72d   : > { %v4020_v26 = vmul.f32 0.70710677, %v3956_v45  ;;  %15191 = vrsqrt.f32 %v3835_v10  ;;  %v3805_v3 = vmul.f32 0.03125, %v3731_v23  ;;  %v3926_v43 = vmul.f32 %v17805_v17, %v3894_v13 }
 0x72e   : > { %v15184_v55 = vpop.eup %15183  ;;  %15193 = vrsqrt.f32 %v3836_v1  ;;  %v4019_v7 = vmul.f32 0.70710677, %v3955_v60  ;;  %v3925_v42 = vmul.f32 %v17805_v17, %v3893_v28  ;;  %v3838_v21 = vadd.f32 1e-06, %v3806_v56 }
 0x72f   : > { %v15186_v29 = vpop.eup %15185  ;;  %15195 = verf.f32 %v4020_v26  ;;  %v3896_v32 = vmul.f32 %v15184_v55, %v17480_v61  ;;  %v3740_v20 = vpop.xlane.xlu1 %3739  ;;  %v3837_v34 = vadd.f32 1e-06, %v3805_v3  ;;  %v3958_v30 = vadd.f32 %v17812_v40, %v3926_v43 }
 0x730   : > { %v3895_v4 = vmul.f32 %v15186_v29, %v17487_v19  ;;  %v3808_v49 = vmul.f32 0.03125, %v3740_v20  ;;  %v3737_v47 = vpop.xlane.xlu0 %3736  ;;  %v3957_v8 = vadd.f32 %v17812_v40, %v3925_v42  ;;  %15197 = verf.f32 %v4019_v7 }
 0x731   : > { %v3807_v48 = vmul.f32 0.03125, %v3737_v47  ;;  %v3928_v41 = vmul.f32 %v17805_v17, %v3896_v32  ;;  %15199 = vrsqrt.f32 %v3838_v21  ;;  %v4022_v54 = vmul.f32 0.70710677, %v3958_v30 }
 0x732   : > { %v15188_v36 = vpop.eup %15187  ;;  %v4021_v18 = vmul.f32 0.70710677, %v3957_v8  ;;  %v3840_v1 = vadd.f32 1e-06, %v3808_v49  ;;  %v3927_v13 = vmul.f32 %v17805_v17, %v3895_v4  ;;  %15201 = vrsqrt.f32 %v3837_v34 }
 0x733   : > { %v15190_v61 = vpop.eup %15189  ;;  %v3898_v2 = vmul.f32 %v15188_v36, %v17499_v59  ;;  %v3746_v33 = vpop.xlane.xlu1 %3745  ;;  %v3839_v10 = vadd.f32 1e-06, %v3807_v48  ;;  %v3960_v28 = vadd.f32 %v17812_v40, %v3928_v41  ;;  %v3987_v55 = vmul.f32 0.5, %v3955_v60 }
 0x734   : > { %v3897_v19 = vmul.f32 %v15190_v61, %v17505_v0  ;;  %v3810_v16 = vmul.f32 0.03125, %v3746_v33  ;;  %v3743_v11 = vpop.xlane.xlu0 %3742  ;;  %15203 = verf.f32 %v4021_v18  ;;  %v3959_v23 = vadd.f32 %v17812_v40, %v3927_v13 }
 0x735   : > { %v3809_v15 = vmul.f32 0.03125, %v3743_v11  ;;  %v3988_v0 = vmul.f32 0.5, %v3956_v45  ;;  %15205 = verf.f32 %v4022_v54  ;;  %v3930_v7 = vmul.f32 %v17805_v17, %v3898_v2 }
 0x736   : > { %v3842_v56 = vadd.f32 1e-06, %v3810_v16  ;;  %v3929_v59 = vmul.f32 %v17805_v17, %v3897_v19  ;;  %15207 = vrsqrt.f32 %v3840_v1  ;;  %v3989_v20 = vmul.f32 0.5, %v3957_v8 }
 0x737   : > { %v15192_v26 = vpop.eup %15191  ;;  %v3752_v3 = vpop.xlane.xlu1 %3751  ;;  %v3841_v29 = vadd.f32 1e-06, %v3809_v15  ;;  %15209 = vrsqrt.f32 %v3839_v10  ;;  %v4023_v47 = vmul.f32 0.70710677, %v3959_v23  ;;  %v4024_v48 = vmul.f32 0.70710677, %v3960_v28 }
 0x738   : > { %v15194_v42 = vpop.eup %15193  ;;  %v3812_v32 = vmul.f32 0.03125, %v3752_v3  ;;  %v3749_v21 = vpop.xlane.xlu0 %3748  ;;  %v3899_v4 = vmul.f32 %v15192_v26, %v17525_v6  ;;  %15211 = vrsqrt.f32 %v3842_v56  ;;  %v3961_v45 = vadd.f32 %v17812_v40, %v3929_v59 }
 0x739   : > { %v15196_v43 = vpop.eup %15195  ;;  %v3811_v49 = vmul.f32 0.03125, %v3749_v21  ;;  %v3990_v36 = vmul.f32 0.5, %v3958_v30  ;;  %15213 = verf.f32 %v4023_v47  ;;  %v3962_v18 = vadd.f32 %v17812_v40, %v3930_v7 }
 0x73a   : > { %v3844_v34 = vadd.f32 1e-06, %v3812_v32  ;;  %v15198_v61 = vpop.eup %15197  ;;  %v3900_v8 = vmul.f32 %v15194_v42, %v17520_v12  ;;  %15215 = vrsqrt.f32 %v3841_v29  ;;  %v4084_v33 = vadd.f32 1.0, %v15196_v43 }
 0x73b   : > { %v3843_v60 = vadd.f32 1e-06, %v3811_v49  ;;  %v3758_v41 = vpop.xlane.xlu1 %3757  ;;  %v15200_v54 = vpop.eup %15199  ;;  %v4083_v1 = vadd.f32 1.0, %v15198_v61  ;;  %v3931_v16 = vmul.f32 %v17805_v17, %v3899_v4  ;;  %v17837_v13 = vmul.f32 0.5, %v3960_v28  ;;  %v17852_v61 = vld [vmem:[%s21427_s10] sm:$0xf] }
 0x73c   : > { %v3814_v2 = vmul.f32 0.03125, %v3758_v41  ;;  %v3755_v6 = vpop.xlane.xlu0 %3754  ;;  %15217 = vrsqrt.f32 %v3844_v34  ;;  %v4025_v30 = vmul.f32 0.70710677, %v3961_v45  ;;  %v15202_v10 = vpop.eup %15201  ;;  %v3991_v12 = vmul.f32 0.5, %v3959_v23 }
 0x73d   : > { %v3813_v19 = vmul.f32 0.03125, %v3755_v6  ;;  %15219 = verf.f32 %v4024_v48  ;;  %v4115_v56 = vmul.f32 %v4083_v1, %v3987_v55  ;;  %v4026_v59 = vmul.f32 0.70710677, %v3962_v18 }
 0x73e   : > { %v3846_v11 = vadd.f32 1e-06, %v3814_v2  ;;  %15221 = vrsqrt.f32 %v3843_v60  ;;  %v15204_v26 = vpop.eup %15203  ;;  %v4116_v29 = vmul.f32 %v4084_v33, %v3988_v0  ;;  %v3963_v43 = vadd.f32 %v17812_v40, %v3931_v16 }
 0x73f   : > { %v3764_v15 = vpop.xlane.xlu1 %3763  ;;  %v3845_v3 = vadd.f32 1e-06, %v3813_v19  ;;  %v15206_v32 = vpop.eup %15205  ;;  %13793 = vmatprep.mubr.msk.f32.mxu1 %vm449_vm0, %v4115_v56  ;;  %v4085_v28 = vadd.f32 1.0, %v15204_v26  ;;  %v3932_v4 = vmul.f32 %v17805_v17, %v3900_v8  ;;  %v3902_v55 = vmul.f32 %v15200_v54, %v17538_v38 }
 0x740   : > { %15223 = vrsqrt.f32 %v3846_v11  ;;  %v3816_v7 = vmul.f32 0.03125, %v3764_v15  ;;  %v3761_v42 = vpop.xlane.xlu0 %3760  ;;  %v15208_v49 = vpop.eup %15207  ;;  %v3901_v23 = vmul.f32 %v15202_v10, %v17543_v57  ;;  %13794 = vmatmul.mubr.msk.f32.vlgmr.msra.gmra.mrb[96].mxu1 %vm449_vm0, %v4116_v29  ;;  %v4086_v47 = vadd.f32 1.0, %v15206_v32 }
 0x741   : > { %v3815_v21 = vmul.f32 0.03125, %v3761_v42  ;;  %15225 = verf.f32 %v4025_v30  ;;  %v15210_v34 = vpop.eup %15209  ;;  %v4117_v48 = vmul.f32 %v4085_v28, %v3989_v20  ;;  %v17845_v60 = vmul.f32 0.5, %v3961_v45  ;;  %13906 = vmatpush3.msk.msra.mxu1 %vm2170_vm1, %v17852_v61 }
 0x742   : > { %v17847_v41 = vmul.f32 0.5, %v3962_v18  ;;  %15227 = verf.f32 %v4026_v59  ;;  %v15212_v38 = vpop.eup %15211  ;;  %v3848_v57 = vadd.f32 1e-06, %v3816_v7  ;;  %v4118_v6 = vmul.f32 %v4086_v47, %v3990_v36  ;;  %14019 = vmatprep.subr.msk.mxu1 %vm2170_vm1, %v17852_v61 }
 0x743   : > { %v3770_v0 = vpop.xlane.xlu1 %3769  ;;  %15229 = vrsqrt.f32 %v3845_v3  ;;  %v15214_v20 = vpop.eup %15213  ;;  %v3847_v45 = vadd.f32 1e-06, %v3815_v21  ;;  %13796 = vmatprep.mubr.msk.f32.mxu1 %vm449_vm0, %v4117_v48  ;;  %v4027_v33 = vmul.f32 0.70710677, %v3963_v43  ;;  %v3964_v54 = vadd.f32 %v17812_v40, %v3932_v4 }
 0x744   : > { %v3818_v8 = vmul.f32 0.03125, %v3770_v0  ;;  %v3767_v2 = vpop.xlane.xlu0 %3766  ;;  %v15216_v19 = vpop.eup %15215  ;;  %13797 = vmatmul.mubr.msk.f32.gmra.mrb[98].mxu1 %vm449_vm0, %v4118_v6  ;;  %v4087_v16 = vadd.f32 1.0, %v15214_v20  ;;  %v3933_v11 = vmul.f32 %v17805_v17, %v3901_v23  ;;  %v3934_v36 = vmul.f32 %v17805_v17, %v3902_v55 }
 0x745   : > { %v3817_v18 = vmul.f32 0.03125, %v3767_v2  ;;  %v3904_v10 = vmul.f32 %v15208_v49, %v17554_v50  ;;  %v3903_v15 = vmul.f32 %v15210_v34, %v17559_v5  ;;  %v17865_v59 = vmul.f32 0.5, %v3963_v43 }
 0x746   : > { %v3850_v1 = vadd.f32 1e-06, %v3818_v8  ;;  %v15218_v30 = vpop.eup %15217  ;;  %15231 = verf.f32 %v4027_v33  ;;  %v4119_v42 = vmul.f32 %v4087_v16, %v3991_v12  ;;  %v4028_v4 = vmul.f32 0.70710677, %v3964_v54 }
 0x747   : > { %v3776_v56 = vpop.xlane.xlu1 %3775  ;;  %v15220_v26 = vpop.eup %15219  ;;  %15233 = vrsqrt.f32 %v3848_v57  ;;  %v3849_v3 = vadd.f32 1e-06, %v3817_v18  ;;  %v3965_v5 = vadd.f32 %v17812_v40, %v3933_v11  ;;  %v3966_v43 = vadd.f32 %v17812_v40, %v3934_v36 }
 0x748   : > { %v3820_v7 = vmul.f32 0.03125, %v3776_v56  ;;  %v3773_v29 = vpop.xlane.xlu0 %3772  ;;  %v15222_v32 = vpop.eup %15221  ;;  %15235 = vrsqrt.f32 %v3847_v45  ;;  %v4088_v28 = vadd.f32 1.0, %v15220_v26  ;;  %13799 = vmatprep.mubr.msk.f32.mxu1 %vm449_vm0, %v4119_v42  ;;  %v17871_v49 = vmul.f32 %v15212_v38, %v17572_v39 }
 0x749   : > { %v3819_v21 = vmul.f32 0.03125, %v3773_v29  ;;  %15237 = vrsqrt.f32 %v3850_v1  ;;  %v3905_v12 = vmul.f32 %v15216_v19, %v17577_v51  ;;  %v17876_v0 = vmul.f32 %v15218_v30, %v17588_v9 }
 0x74a   : > { %v15224_v55 = vpop.eup %15223  ;;  %v3852_v50 = vadd.f32 1e-06, %v3820_v7  ;;  %v4120_v23 = vmul.f32 %v4088_v28, %v17837_v13  ;;  %15239 = verf.f32 %v4028_v4  ;;  %v4029_v38 = vmul.f32 0.70710677, %v3965_v5 }
 0x74b   : > { %v3782_v47 = vpop.xlane.xlu1 %3781  ;;  %v15226_v34 = vpop.eup %15225  ;;  %15241 = vrsqrt.f32 %v3849_v3  ;;  %v3851_v48 = vadd.f32 1e-06, %v3819_v21  ;;  %v3935_v51 = vmul.f32 %v17805_v17, %v3903_v15  ;;  %v3996_v45 = vmul.f32 0.5, %v3964_v54 }
 0x74c   : > { %v3822_v57 = vmul.f32 0.03125, %v3782_v47  ;;  %v3779_v8 = vpop.xlane.xlu0 %3778  ;;  %v15228_v2 = vpop.eup %15227  ;;  %13800 = vmatmul.mubr.msk.f32.gmra.mrb[100].mxu1 %vm449_vm0, %v4120_v23  ;;  %v4089_v6 = vadd.f32 1.0, %v15226_v34  ;;  %15243 = vrsqrt.f32 %v3852_v50  ;;  %v4030_v18 = vmul.f32 0.70710677, %v3966_v43 }
 0x74d   : > { %v3821_v39 = vmul.f32 0.03125, %v3779_v8  ;;  %v15230_v20 = vpop.eup %15229  ;;  %v4090_v13 = vadd.f32 1.0, %v15228_v2  ;;  %v3907_v9 = vmul.f32 %v15222_v32, %v17594_v22  ;;  %15245 = verf.f32 %v4029_v38 }
 0x74e   : > { %v3854_v33 = vadd.f32 1e-06, %v3822_v57  ;;  %v4121_v19 = vmul.f32 %v4089_v6, %v17845_v60  ;;  %v17883_v16 = vmul.f32 %v15224_v55, %v17609_v37  ;;  %15247 = vrsqrt.f32 %v3851_v48 }
 0x74f   : > { %v3788_v1 = vpop.xlane.xlu1 %3787  ;;  %v4122_v11 = vmul.f32 %v4090_v13, %v17847_v41  ;;  %v3853_v54 = vadd.f32 1e-06, %v3821_v39  ;;  %v3967_v22 = vadd.f32 %v17812_v40, %v3935_v51  ;;  %v3936_v26 = vmul.f32 %v17805_v17, %v3904_v10 }
 0x750   : > { %v3824_v36 = vmul.f32 0.03125, %v3788_v1  ;;  %v3785_v30 = vpop.xlane.xlu0 %3784  ;;  %v15232_v15 = vpop.eup %15231  ;;  %13802 = vmatprep.mubr.msk.f32.mxu1 %vm449_vm0, %v4121_v19  ;;  %v3909_v3 = vmul.f32 %v15230_v20, %v17614_v27  ;;  %15249 = verf.f32 %v4030_v18  ;;  %v3937_v41 = vmul.f32 %v17805_v17, %v3905_v12 }
 0x751   : > { %v3823_v56 = vmul.f32 0.03125, %v3785_v30  ;;  %v15234_v60 = vpop.eup %15233  ;;  %13803 = vmatmul.mubr.msk.f32.gmra.mrb[102].mxu1 %vm449_vm0, %v4122_v11  ;;  %v4091_v37 = vadd.f32 1.0, %v15232_v15  ;;  %15251 = vrsqrt.f32 %v3854_v33  ;;  %v3997_v32 = vmul.f32 0.5, %v3965_v5 }
 0x752   : > { %v15236_v7 = vpop.eup %15235  ;;  %v3856_v42 = vadd.f32 1e-06, %v3824_v36  ;;  %v4031_v21 = vmul.f32 0.70710677, %v3967_v22  ;;  %v3998_v23 = vmul.f32 0.5, %v3966_v43  ;;  %15253 = vrsqrt.f32 %v3853_v54 }
 0x753   : > { %v3794_v29 = vpop.xlane.xlu1 %3793  ;;  %v15238_v28 = vpop.eup %15237  ;;  %v4123_v4 = vmul.f32 %v4091_v37, %v17865_v59  ;;  %v3855_v55 = vadd.f32 1e-06, %v3823_v56  ;;  %v3968_v34 = vadd.f32 %v17812_v40, %v3936_v26  ;;  %v3969_v12 = vadd.f32 %v17812_v40, %v3937_v41 }
 0x754   : > { %v3826_v10 = vmul.f32 0.03125, %v3794_v29  ;;  %v3791_v50 = vpop.xlane.xlu0 %3790  ;;  %v15240_v27 = vpop.eup %15239  ;;  %15255 = verf.f32 %v4031_v21  ;;  %v3938_v59 = vmul.f32 %v17805_v17, %v17871_v49  ;;  %v3912_v8 = vmul.f32 %v15234_v60, %v17627_v52 }
 0x755   : > { %v3825_v47 = vmul.f32 0.03125, %v3791_v50  ;;  %v15242_v48 = vpop.eup %15241  ;;  %13805 = vmatprep.mubr.msk.f32.mxu1 %vm449_vm0, %v4123_v4  ;;  %v4092_v57 = vadd.f32 1.0, %v15240_v27  ;;  %v3911_v43 = vmul.f32 %v15236_v7, %v17632_v24  ;;  %15257 = vrsqrt.f32 %v3856_v42 }
 0x756   : > { %v3858_v5 = vadd.f32 1e-06, %v3826_v10  ;;  %v4032_v2 = vmul.f32 0.70710677, %v3968_v34  ;;  %v15244_v6 = vpop.eup %15243  ;;  %v17901_v39 = vmul.f32 %v15238_v28, %v17644_v53  ;;  %15259 = vrsqrt.f32 %v3855_v55 }
 0x757   : > { %v4124_v38 = vmul.f32 %v4092_v57, %v3996_v45  ;;  %v3857_v51 = vadd.f32 1e-06, %v3825_v47  ;;  %v15246_v20 = vpop.eup %15245  ;;  %v4033_v13 = vmul.f32 0.70710677, %v3969_v12  ;;  %v3970_v18 = vadd.f32 %v17812_v40, %v3938_v59 }
 0x758   : > { %15261 = vrsqrt.f32 %v3858_v5  ;;  %v3939_v49 = vmul.f32 %v17805_v17, %v3907_v9  ;;  %v15248_v33 = vpop.eup %15247  ;;  %v4093_v52 = vadd.f32 1.0, %v15246_v20  ;;  %v3940_v24 = vmul.f32 %v17805_v17, %v17876_v0 }
 0x759   : > { %13806 = vmatmul.mubr.msk.f32.gmra.mrb[104].mxu1 %vm449_vm0, %v4124_v38  ;;  %15263 = verf.f32 %v4032_v2  ;;  %v3941_v53 = vmul.f32 %v17805_v17, %v3909_v3  ;;  %v3913_v45 = vmul.f32 %v15242_v48, %v17650_v63  ;;  %v3999_v19 = vmul.f32 0.5, %v3967_v22 }
 0x75a   : > { %15265 = verf.f32 %v4033_v13  ;;  %v4034_v1 = vmul.f32 0.70710677, %v3970_v18  ;;  %v15250_v11 = vpop.eup %15249  ;;  %v4125_v36 = vmul.f32 %v4093_v52, %v3997_v32  ;;  %v3971_v9 = vadd.f32 %v17812_v40, %v3939_v49 }
 0x75b   : > { %15267 = vrsqrt.f32 %v3857_v51  ;;  %v3972_v30 = vadd.f32 %v17812_v40, %v3940_v24  ;;  %v15252_v15 = vpop.eup %15251  ;;  %v4094_v54 = vadd.f32 1.0, %v15250_v11  ;;  %v17913_v56 = vadd.f32 %v17812_v40, %v3941_v53 }
 0x75c   : > { %15269 = verf.f32 %v4034_v1  ;;  %v3942_v0 = vmul.f32 %v17805_v17, %v17883_v16  ;;  %v3916_v63 = vmul.f32 %v15244_v6, %v17666_v25  ;;  %13808 = vmatprep.mubr.msk.f32.mxu1 %vm449_vm0, %v4125_v36  ;;  %v4000_v22 = vmul.f32 0.5, %v3968_v34  ;;  %v15254_v3 = vpop.eup %15253 }
 0x75d   : > { %v4035_v26 = vmul.f32 0.70710677, %v3971_v9  ;;  %v4036_v60 = vmul.f32 0.70710677, %v3972_v30  ;;  %v3915_v37 = vmul.f32 %v15248_v33, %v17672_v44  ;;  %v4126_v41 = vmul.f32 %v4094_v54, %v3998_v23 }
 0x75e   : > { %v4001_v7 = vmul.f32 0.5, %v3969_v12  ;;  %v4037_v42 = vmul.f32 0.70710677, %v17913_v56  ;;  %v15256_v29 = vpop.eup %15255  ;;  %v3918_v32 = vmul.f32 %v15252_v15, %v17688_v31  ;;  %v17923_v16 = vadd.f32 %v17812_v40, %v3942_v0 }
 0x75f   : > { %15271 = verf.f32 %v4035_v26  ;;  %v3943_v25 = vmul.f32 %v17805_v17, %v3911_v43  ;;  %v15258_v21 = vpop.eup %15257  ;;  %13809 = vmatmul.mubr.msk.f32.gmra.mrb[106].mxu1 %vm449_vm0, %v4126_v41  ;;  %v4095_v28 = vadd.f32 1.0, %v15256_v29  ;;  %v3944_v44 = vmul.f32 %v17805_v17, %v3912_v8 }
 0x760   : > { %15273 = verf.f32 %v4036_v60  ;;  %v3945_v4 = vmul.f32 %v17805_v17, %v3913_v45  ;;  %v15260_v55 = vpop.eup %15259  ;;  %v4002_v10 = vmul.f32 0.5, %v3970_v18  ;;  %v4038_v31 = vmul.f32 0.70710677, %v17923_v16 }
 0x761   : > { %15275 = verf.f32 %v4037_v42  ;;  %v17931_v50 = vadd.f32 %v17812_v40, %v3943_v25  ;;  %v3917_v27 = vmul.f32 %v15254_v3, %v17694_v58  ;;  %v4127_v47 = vmul.f32 %v4095_v28, %v3999_v19 }
 0x762   : > { %v15262_v23 = vpop.eup %15261  ;;  %v17935_v34 = vadd.f32 %v17812_v40, %v3944_v44  ;;  %v17938_v12 = vadd.f32 %v17812_v40, %v3945_v4  ;;  %v4003_v57 = vmul.f32 0.5, %v3971_v9  ;;  %v4004_v5 = vmul.f32 0.5, %v3972_v30 }
 0x763   : > { %v15264_v48 = vpop.eup %15263  ;;  %15277 = verf.f32 %v4038_v31  ;;  %v4039_v59 = vmul.f32 0.70710677, %v17931_v50  ;;  %v3920_v43 = vmul.f32 %v15258_v21, %v17710_v14  ;;  %v3919_v2 = vmul.f32 %v15260_v55, %v17716_v62  ;;  %13811 = vmatprep.mubr.msk.f32.mxu1 %vm449_vm0, %v4127_v47 }
 0x764   : > { %v15266_v8 = vpop.eup %15265  ;;  %v4096_v58 = vadd.f32 1.0, %v15264_v48  ;;  %v4040_v6 = vmul.f32 0.70710677, %v17935_v34  ;;  %v4041_v20 = vmul.f32 0.70710677, %v17938_v12  ;;  %v3946_v13 = vmul.f32 %v17805_v17, %v17901_v39 }
 0x765   : > { %v15268_v38 = vpop.eup %15267  ;;  %v4097_v51 = vadd.f32 1.0, %v15266_v8  ;;  %15279 = verf.f32 %v4039_v59  ;;  %v3947_v14 = vmul.f32 %v17805_v17, %v3915_v37  ;;  %v3948_v62 = vmul.f32 %v17805_v17, %v3916_v63 }
 0x766   : > { %v15270_v18 = vpop.eup %15269  ;;  %v4128_v49 = vmul.f32 %v4096_v58, %v4000_v22  ;;  %15281 = verf.f32 %v4040_v6  ;;  %v17951_v24 = vadd.f32 %v17812_v40, %v3946_v13  ;;  %v3949_v45 = vmul.f32 %v17805_v17, %v3917_v27 }
 0x767   : > { %v4129_v33 = vmul.f32 %v4097_v51, %v4001_v7  ;;  %v4098_v52 = vadd.f32 1.0, %v15270_v18  ;;  %15283 = verf.f32 %v4041_v20  ;;  %v17955_v53 = vadd.f32 %v17812_v40, %v3947_v14 }
 0x768   : > { %13812 = vmatmul.mubr.msk.f32.gmra.mrb[108].mxu1 %vm449_vm0, %v4128_v49  ;;  %v17958_v39 = vadd.f32 %v17812_v40, %v3948_v62  ;;  %v3950_v19 = vmul.f32 %v17805_v17, %v3918_v32  ;;  %v3922_v11 = vmul.f32 %v15262_v23, %v17732_v35  ;;  %v3921_v36 = vmul.f32 %v15268_v38, %v17738_v46 }
 0x769   : > { %v15272_v1 = vpop.eup %15271  ;;  %13814 = vmatprep.mubr.msk.f32.mxu1 %vm449_vm0, %v4129_v33  ;;  %v4005_v9 = vmul.f32 0.5, %v17913_v56  ;;  %v4042_v30 = vmul.f32 0.70710677, %v17951_v24  ;;  %v4130_v54 = vmul.f32 %v4098_v52, %v4002_v10  ;;  %v4043_v63 = vmul.f32 0.70710677, %v17955_v53 }
 0x76a   : > { %v15274_v15 = vpop.eup %15273  ;;  %v4099_v0 = vadd.f32 1.0, %v15272_v1  ;;  %v3951_v22 = vmul.f32 %v17805_v17, %v3919_v2  ;;  %v4044_v35 = vmul.f32 0.70710677, %v17958_v39  ;;  %v17971_v46 = vadd.f32 %v17812_v40, %v3949_v45 }
 0x76b   : > { %v15276_v26 = vpop.eup %15275  ;;  %v4100_v60 = vadd.f32 1.0, %v15274_v15  ;;  %15285 = verf.f32 %v4042_v30  ;;  %v17975_v37 = vadd.f32 %v17812_v40, %v3950_v19  ;;  %v4006_v7 = vmul.f32 0.5, %v17923_v16 }
 0x76c   : > { %13815 = vmatmul.mubr.msk.f32.gmra.mrb[110].mxu1 %vm449_vm0, %v4130_v54  ;;  %v4131_v56 = vmul.f32 %v4099_v0, %v4003_v57  ;;  %v4101_v3 = vadd.f32 1.0, %v15276_v26  ;;  %15287 = verf.f32 %v4043_v63  ;;  %v4045_v42 = vmul.f32 0.70710677, %v17971_v46 }
 0x76d   : > { %v15278_v41 = vpop.eup %15277  ;;  %15289 = verf.f32 %v4044_v35  ;;  %v4132_v29 = vmul.f32 %v4100_v60, %v4004_v5  ;;  %v4046_v21 = vmul.f32 0.70710677, %v17975_v37  ;;  %v3983_v44 = vadd.f32 %v17812_v40, %v3951_v22 }
 0x76e   : > { %13817 = vmatprep.mubr.msk.f32.mxu1 %vm449_vm0, %v4131_v56  ;;  %v4133_v32 = vmul.f32 %v4101_v3, %v4005_v9  ;;  %v4102_v25 = vadd.f32 1.0, %v15278_v41  ;;  %15291 = verf.f32 %v4045_v42  ;;  %v3952_v4 = vmul.f32 %v17805_v17, %v3920_v43 }
 0x76f   : > { %v15280_v28 = vpop.eup %15279  ;;  %v3953_v55 = vmul.f32 %v17805_v17, %v3921_v36  ;;  %v4007_v31 = vmul.f32 0.5, %v17931_v50  ;;  %v3954_v27 = vmul.f32 %v17805_v17, %v3922_v11  ;;  %15293 = verf.f32 %v4046_v21  ;;  %v18014_v21 = vld [vmem:[%s21421_s4] ss:$0 sm:$0xff] }
 0x770   : > { %v15282_v10 = vpop.eup %15281  ;;  %13818 = vmatmul.mubr.msk.f32.gmra.mrb[112].mxu1 %vm449_vm0, %v4132_v29  ;;  %v4134_v16 = vmul.f32 %v4102_v25, %v4006_v7  ;;  %v4103_v23 = vadd.f32 1.0, %v15280_v28  ;;  %v4047_v57 = vmul.f32 0.70710677, %v3983_v44  ;;  %v3984_v5 = vadd.f32 %v17812_v40, %v3952_v4 }
 0x771   : > { %v15284_v47 = vpop.eup %15283  ;;  %13820 = vmatprep.mubr.msk.f32.mxu1 %vm449_vm0, %v4133_v32  ;;  %v4104_v48 = vadd.f32 1.0, %v15282_v10  ;;  %v3985_v43 = vadd.f32 %v17812_v40, %v3953_v55  ;;  %v3986_v2 = vadd.f32 %v17812_v40, %v3954_v27  ;;  %v4009_v58 = vmul.f32 0.5, %v17938_v12 }
 0x772   : > { %v4135_v59 = vmul.f32 %v4103_v23, %v4007_v31  ;;  %v4105_v8 = vadd.f32 1.0, %v15284_v47  ;;  %15295 = verf.f32 %v4047_v57  ;;  %v4048_v50 = vmul.f32 0.70710677, %v3984_v5  ;;  %v21551_v23 = vld [vmem:[#allocation8_spill] sm:$0xff]  ;;  %v21552_v47 = vld [vmem:[#allocation9_spill] sm:$0xff] }
 0x773   : > { %v4008_v17 = vmul.f32 0.5, %v17935_v34  ;;  %v4049_v6 = vmul.f32 0.70710677, %v3985_v43  ;;  %v4050_v20 = vmul.f32 0.70710677, %v3986_v2  ;;  %v4011_v12 = vmul.f32 0.5, %v17955_v53 }
 0x774   : > { %13821 = vmatmul.mubr.msk.f32.gmra.mrb[114].mxu1 %vm449_vm0, %v4134_v16  ;;  %v4137_v51 = vmul.f32 %v4105_v8, %v4009_v58  ;;  %15297 = verf.f32 %v4048_v50  ;;  %v4010_v62 = vmul.f32 0.5, %v17951_v24  ;;  %v4013_v11 = vmul.f32 0.5, %v17971_v46  ;;  %v21550_v16 = vld [vmem:[#allocation7_spill] sm:$0xff] }
 0x775   : > { %v15286_v38 = vpop.eup %15285  ;;  %13823 = vmatprep.mubr.msk.f32.mxu1 %vm449_vm0, %v4135_v59  ;;  %v4136_v18 = vmul.f32 %v4104_v48, %v4008_v17  ;;  %15299 = verf.f32 %v4049_v6  ;;  %v4012_v53 = vmul.f32 0.5, %v17958_v39  ;;  %v4015_v0 = vmul.f32 0.5, %v3983_v44  ;;  %v21553_v59 = vld [vmem:[#allocation10_spill] sm:$0xff] }
 0x776   : > { %v15288_v13 = vpop.eup %15287  ;;  %v4106_v49 = vadd.f32 1.0, %v15286_v38  ;;  %15301 = verf.f32 %v4050_v20  ;;  %v4014_v22 = vmul.f32 0.5, %v17975_v37  ;;  %v4017_v56 = vmul.f32 0.5, %v3985_v43 }
 0x777   : > { %v15290_v40 = vpop.eup %15289  ;;  %v4107_v14 = vadd.f32 1.0, %v15288_v13  ;;  %v4016_v3 = vmul.f32 0.5, %v3984_v5  ;;  %v4018_v29 = vmul.f32 0.5, %v3986_v2 }
 0x778   : > { %13824 = vmatmul.mubr.msk.f32.gmra.mrb[116].mxu1 %vm449_vm0, %v4136_v18  ;;  %v15292_v34 = vpop.eup %15291  ;;  %v4138_v52 = vmul.f32 %v4106_v49, %v4010_v62  ;;  %v4108_v45 = vadd.f32 1.0, %v15290_v40 }
 0x779   : > { %13826 = vmatprep.mubr.msk.f32.mxu1 %vm449_vm0, %v4137_v51  ;;  %v4139_v33 = vmul.f32 %v4107_v14, %v4011_v12  ;;  %v4109_v19 = vadd.f32 1.0, %v15292_v34  ;;  %v15294_v1 = vpop.eup %15293 }
 0x77a   : > { %v4140_v24 = vmul.f32 %v4108_v45, %v4012_v53  ;;  %v4110_v30 = vadd.f32 1.0, %v15294_v1 }
 0x77b   : > { %v4141_v9 = vmul.f32 %v4109_v19, %v4013_v11 }
 0x77c   : > { %13827 = vmatmul.mubr.msk.f32.gmra.mrb[118].mxu1 %vm449_vm0, %v4138_v52  ;;  %v15296_v36 = vpop.eup %15295  ;;  %v4142_v35 = vmul.f32 %v4110_v30, %v4014_v22 }
 0x77d   : > { %13829 = vmatprep.mubr.msk.f32.mxu1 %vm449_vm0, %v4139_v33  ;;  %v4111_v15 = vadd.f32 1.0, %v15296_v36 }
 0x77e   : > { %v15298_v54 = vpop.eup %15297 }
 0x77f   : > { %v15300_v63 = vpop.eup %15299  ;;  %v4143_v26 = vmul.f32 %v4111_v15, %v4015_v0  ;;  %v4112_v39 = vadd.f32 1.0, %v15298_v54 }
 0x780   : > { %13830 = vmatmul.mubr.msk.f32.gmra.mrb[120].mxu1 %vm449_vm0, %v4140_v24  ;;  %v4113_v60 = vadd.f32 1.0, %v15300_v63  ;;  %v15302_v46 = vpop.eup %15301 }
 0x781   : > { %13832 = vmatprep.mubr.msk.f32.mxu1 %vm449_vm0, %v4141_v9  ;;  %v4144_v7 = vmul.f32 %v4112_v39, %v4016_v3  ;;  %v4114_v42 = vadd.f32 1.0, %v15302_v46 }
 0x782   : > { %v4145_v41 = vmul.f32 %v4113_v60, %v4017_v56 }
 0x783   : > { %v4146_v37 = vmul.f32 %v4114_v42, %v4018_v29 }
 0x784   : > { %13833 = vmatmul.mubr.msk.f32.gmra.mrb[122].mxu1 %vm449_vm0, %v4142_v35 }
 0x785   : > { %13835 = vmatprep.mubr.msk.f32.mxu1 %vm449_vm0, %v4143_v26 }
 0x788   : > { %13836 = vmatmul.mubr.msk.f32.gmra.mrb[124].mxu1 %vm449_vm0, %v4144_v7 }
 0x789   : > { %13838 = vmatprep.mubr.msk.f32.mxu1 %vm449_vm0, %v4145_v41 }
 0x78c   : > { %13839 = vmatmul.mubr.msk.f32.gmra.mrb[126].mxu1 %vm449_vm0, %v4146_v37 }
 0x813   : > { %v13795_v32 = vpop.f32.mrb[96].mxu1 }
 0x814   : > { %v4309_v25 = vpop.f32.mrb[97].mxu1  ;;  %v18020_v44 = vadd.f32 %v18014_v21, %v13795_v32 }
 0x815   : > { %v18017_v28 = vadd.f32 %v18014_v21, %v4309_v25 }
 0x817   : > { %v13798_v4 = vpop.f32.mrb[98].mxu1  ;;  %13857 = vmatprep.mubr.msk.f32.mxu0 %vm1751_vm2, %v18017_v28 }
 0x818   : > { %v4319_v55 = vpop.f32.mrb[99].mxu1  ;;  %13858 = vmatmul.mubr.msk.f32.vlgmr.msra.gmra.mrb[128].mxu0 %vm1751_vm2, %v18020_v44  ;;  %v18031_v31 = vadd.f32 %v18014_v21, %v13798_v4 }
 0x819   : > { %v18027_v10 = vadd.f32 %v18014_v21, %v4319_v55  ;;  %14832 = vmatpush3.bf16.msra.mxu0 %v21550_v16 }
 0x81a   : > { %14834 = vmatprep.subr.bf16.mxu0 %v21551_v23 }
 0x81b   : > { %13860 = vmatprep.mubr.msk.f32.mxu0 %vm1751_vm2, %v18027_v10 }
 0x81c   : > { %13861 = vmatmul.mubr.msk.f32.gmra.mrb[130].mxu0 %vm1751_vm2, %v18031_v31 }
 0x81d   : > { %14836 = vmatpush3.bf16.msra.mxu0 %v21551_v23 }
 0x81e   : > { %14838 = vmatprep.subr.bf16.mxu0 %v21552_v47 }
 0x81f   : > { %v13801_v27 = vpop.f32.mrb[100].mxu1 }
 0x820   : > { %v4329_v48 = vpop.f32.mrb[101].mxu1  ;;  %v18044_v5 = vadd.f32 %v18014_v21, %v13801_v27 }
 0x821   : > { %v18041_v57 = vadd.f32 %v18014_v21, %v4329_v48  ;;  %14840 = vmatpush3.bf16.msra.mxu0 %v21552_v47 }
 0x822   : > { %14842 = vmatprep.subr.bf16.mxu0 %v21553_v59 }
 0x823   : > { %13863 = vmatprep.mubr.msk.f32.mxu0 %vm1751_vm2, %v18041_v57 }
 0x824   : > { %v13804_v8 = vpop.f32.mrb[102].mxu1  ;;  %13864 = vmatmul.mubr.msk.f32.gmra.mrb[132].mxu0 %vm1751_vm2, %v18044_v5 }
 0x825   : > { %v4339_v43 = vpop.f32.mrb[103].mxu1  ;;  %14844 = vmatpush3.bf16.msra.mxu0 %v21553_v59  ;;  %v18057_v58 = vadd.f32 %v18014_v21, %v13804_v8 }
 0x826   : > { %v18053_v2 = vadd.f32 %v18014_v21, %v4339_v43 }
 0x828   : > { %13866 = vmatprep.mubr.msk.f32.mxu0 %vm1751_vm2, %v18053_v2 }
 0x829   : > { %13867 = vmatmul.mubr.msk.f32.gmra.mrb[134].mxu0 %vm1751_vm2, %v18057_v58 }
 0x82c   : > { %v13807_v50 = vpop.f32.mrb[104].mxu1 }
 0x82d   : > { %v4349_v17 = vpop.f32.mrb[105].mxu1  ;;  %v18067_v38 = vadd.f32 %v18014_v21, %v13807_v50 }
 0x82e   : > { %v18064_v6 = vadd.f32 %v18014_v21, %v4349_v17 }
 0x830   : > { %13869 = vmatprep.mubr.msk.f32.mxu0 %vm1751_vm2, %v18064_v6 }
 0x831   : > { %13870 = vmatmul.mubr.msk.f32.gmra.mrb[136].mxu0 %vm1751_vm2, %v18067_v38 }
 0x832   : > { %v13810_v51 = vpop.f32.mrb[106].mxu1 }
 0x833   : > { %v4359_v20 = vpop.f32.mrb[107].mxu1  ;;  %v18077_v18 = vadd.f32 %v18014_v21, %v13810_v51  ;;  %v21554_v51 = vld [vmem:[#allocation5_spill] sm:$0xff] }
 0x834   : > { %v18074_v13 = vadd.f32 %v18014_v21, %v4359_v20 }
 0x836   : > { %13872 = vmatprep.mubr.msk.f32.mxu0 %vm1751_vm2, %v18074_v13 }
 0x837   : > { %13873 = vmatmul.mubr.msk.f32.gmra.mrb[138].mxu0 %vm1751_vm2, %v18077_v18 }
 0x83b   : > { %v13813_v49 = vpop.f32.mrb[108].mxu1 }
 0x83c   : > { %v4369_v40 = vpop.f32.mrb[109].mxu1  ;;  %v18087_v14 = vadd.f32 %v18014_v21, %v13813_v49 }
 0x83d   : > { %v18084_v12 = vadd.f32 %v18014_v21, %v4369_v40 }
 0x83f   : > { %v13816_v62 = vpop.f32.mrb[110].mxu1  ;;  %13875 = vmatprep.mubr.msk.f32.mxu0 %vm1751_vm2, %v18084_v12 }
 0x840   : > { %v4379_v34 = vpop.f32.mrb[111].mxu1  ;;  %13876 = vmatmul.mubr.msk.f32.gmra.mrb[140].mxu0 %vm1751_vm2, %v18087_v14  ;;  %v18097_v52 = vadd.f32 %v18014_v21, %v13816_v62 }
 0x841   : > { %v18094_v33 = vadd.f32 %v18014_v21, %v4379_v34 }
 0x843   : > { %v13819_v45 = vpop.f32.mrb[112].mxu1  ;;  %13878 = vmatprep.mubr.msk.f32.mxu0 %vm1751_vm2, %v18094_v33 }
 0x844   : > { %v4389_v19 = vpop.f32.mrb[113].mxu1  ;;  %13879 = vmatmul.mubr.msk.f32.gmra.mrb[142].mxu0 %vm1751_vm2, %v18097_v52  ;;  %v18107_v11 = vadd.f32 %v18014_v21, %v13819_v45 }
 0x845   : > { %v18104_v1 = vadd.f32 %v18014_v21, %v4389_v19 }
 0x847   : > { %v13822_v53 = vpop.f32.mrb[114].mxu1  ;;  %13881 = vmatprep.mubr.msk.f32.mxu0 %vm1751_vm2, %v18104_v1 }
 0x848   : > { %v4399_v36 = vpop.f32.mrb[115].mxu1  ;;  %13882 = vmatmul.mubr.msk.f32.gmra.mrb[144].mxu0 %vm1751_vm2, %v18107_v11  ;;  %v18117_v24 = vadd.f32 %v18014_v21, %v13822_v53 }
 0x849   : > { %v18114_v9 = vadd.f32 %v18014_v21, %v4399_v36 }
 0x84b   : > { %v13825_v30 = vpop.f32.mrb[116].mxu1  ;;  %13884 = vmatprep.mubr.msk.f32.mxu0 %vm1751_vm2, %v18114_v9 }
 0x84c   : > { %v4409_v15 = vpop.f32.mrb[117].mxu1  ;;  %13885 = vmatmul.mubr.msk.f32.gmra.mrb[146].mxu0 %vm1751_vm2, %v18117_v24  ;;  %v18127_v0 = vadd.f32 %v18014_v21, %v13825_v30 }
 0x84d   : > { %v18124_v54 = vadd.f32 %v18014_v21, %v4409_v15 }
 0x84f   : > { %v13828_v63 = vpop.f32.mrb[118].mxu1  ;;  %13887 = vmatprep.mubr.msk.f32.mxu0 %vm1751_vm2, %v18124_v54 }
 0x850   : > { %v4419_v22 = vpop.f32.mrb[119].mxu1  ;;  %13888 = vmatmul.mubr.msk.f32.gmra.mrb[148].mxu0 %vm1751_vm2, %v18127_v0  ;;  %v18137_v60 = vadd.f32 %v18014_v21, %v13828_v63 }
 0x851   : > { %v18134_v26 = vadd.f32 %v18014_v21, %v4419_v22 }
 0x853   : > { %v13831_v35 = vpop.f32.mrb[120].mxu1  ;;  %13890 = vmatprep.mubr.msk.f32.mxu0 %vm1751_vm2, %v18134_v26 }
 0x854   : > { %v4429_v39 = vpop.f32.mrb[121].mxu1  ;;  %13891 = vmatmul.mubr.msk.f32.gmra.mrb[150].mxu0 %vm1751_vm2, %v18137_v60  ;;  %v18147_v56 = vadd.f32 %v18014_v21, %v13831_v35 }
 0x855   : > { %v18144_v46 = vadd.f32 %v18014_v21, %v4429_v39 }
 0x857   : > { %v13834_v3 = vpop.f32.mrb[122].mxu1  ;;  %13893 = vmatprep.mubr.msk.f32.mxu0 %vm1751_vm2, %v18144_v46 }
 0x858   : > { %v4439_v41 = vpop.f32.mrb[123].mxu1  ;;  %13894 = vmatmul.mubr.msk.f32.gmra.mrb[152].mxu0 %vm1751_vm2, %v18147_v56  ;;  %v18157_v42 = vadd.f32 %v18014_v21, %v13834_v3 }
 0x859   : > { %v18154_v7 = vadd.f32 %v18014_v21, %v4439_v41 }
 0x85b   : > { %v13837_v29 = vpop.f32.mrb[124].mxu1  ;;  %13896 = vmatprep.mubr.msk.f32.mxu0 %vm1751_vm2, %v18154_v7 }
 0x85c   : > { %v4449_v37 = vpop.f32.mrb[125].mxu1  ;;  %13897 = vmatmul.mubr.msk.f32.gmra.mrb[154].mxu0 %vm1751_vm2, %v18157_v42  ;;  %v18167_v25 = vadd.f32 %v18014_v21, %v13837_v29 }
 0x85d   : > { %v18164_v32 = vadd.f32 %v18014_v21, %v4449_v37 }
 0x85f   : > { %v13840_v4 = vpop.f32.mrb[126].mxu1  ;;  %13899 = vmatprep.mubr.msk.f32.mxu0 %vm1751_vm2, %v18164_v32 }
 0x860   : > { %v4459_v55 = vpop.f32.mrb[127].mxu1  ;;  %13900 = vmatmul.mubr.msk.f32.gmra.mrb[156].mxu0 %vm1751_vm2, %v18167_v25  ;;  %v18177_v48 = vadd.f32 %v18014_v21, %v13840_v4 }
 0x861   : > { %v18174_v27 = vadd.f32 %v18014_v21, %v4459_v55 }
 0x863   : > { %13902 = vmatprep.mubr.msk.f32.mxu0 %vm1751_vm2, %v18174_v27 }
 0x864   : > { %13903 = vmatmul.mubr.msk.f32.gmra.mrb[158].mxu0 %vm1751_vm2, %v18177_v48 }
 0x8eb   : > { %v13859_v8 = vpop.f32.mrb[128].mxu0 }
 0x8ec   : > { %v4630_v43 = vpop.f32.mrb[129].mxu0 }
 0x8ed   : > { %13907 = vmatprep.mubr.msk.f32.mxu1 %vm2073_vm3, %v4630_v43 }
 0x8ee   : > { %13908 = vmatmul.mubr.msk.f32.vlgmr.msra.gmra.mrb[128].mxu1 %vm2073_vm3, %v13859_v8 }
 0x8ef   : > { %v13862_v50 = vpop.f32.mrb[130].mxu0  ;;  %14020 = vmatpush3.msk.msra.mxu1 %vm2170_vm1, %v17852_v61 }
 0x8f0   : > { %v4640_v17 = vpop.f32.mrb[131].mxu0  ;;  %14854 = vmatprep.subr.bf16.mxu1 %v21554_v51 }
 0x8f1   : > { %13910 = vmatprep.mubr.msk.f32.mxu1 %vm2073_vm3, %v4640_v17 }
 0x8f2   : > { %13911 = vmatmul.mubr.msk.f32.gmra.mrb[130].mxu1 %vm2073_vm3, %v13862_v50 }
 0x8f7   : > { %v13865_v21 = vpop.f32.mrb[132].mxu0 }
 0x8f8   : > { %v4650_v20 = vpop.f32.mrb[133].mxu0 }
 0x8f9   : > { %13913 = vmatprep.mubr.msk.f32.mxu1 %vm2073_vm3, %v4650_v20  ;;  %v12113_v20 = vld [vmem:[%s21418_s1 + $0x40] sm:$0xff] }
 0x8fa   : > { %13914 = vmatmul.mubr.msk.f32.gmra.mrb[132].mxu1 %vm2073_vm3, %v13865_v21 }
 0x8fc   : > { %v13868_v49 = vpop.f32.mrb[134].mxu0 }
 0x8fd   : > { %v4660_v40 = vpop.f32.mrb[135].mxu0 }
 0x8fe   : > { %13916 = vmatprep.mubr.msk.f32.mxu1 %vm2073_vm3, %v4660_v40 }
 0x8ff   : > { %13917 = vmatmul.mubr.msk.f32.gmra.mrb[134].mxu1 %vm2073_vm3, %v13868_v49  ;;  %v12114_v49 = vld [vmem:[%s21418_s1 + $0x48] sm:$0xff] }
 0x900   : > { %v14845_v40 = vpack.c.bf16 %v12114_v49, %v12113_v20 }
 0x902   : > { %14846 = vmatprep.subr.bf16.mxu0 %v14845_v40 }
 0x904   : > { %v13871_v61 = vpop.f32.mrb[136].mxu0 }
 0x905   : > { %v4670_v62 = vpop.f32.mrb[137].mxu0 }
 0x906   : > { %13919 = vmatprep.mubr.msk.f32.mxu1 %vm2073_vm3, %v4670_v62 }
 0x907   : > { %13920 = vmatmul.mubr.msk.f32.gmra.mrb[136].mxu1 %vm2073_vm3, %v13871_v61 }
 0x90a   : > { %v13874_v34 = vpop.f32.mrb[138].mxu0 }
 0x90b   : > { %v4680_v45 = vpop.f32.mrb[139].mxu0 }
 0x90c   : > { %13922 = vmatprep.mubr.msk.f32.mxu1 %vm2073_vm3, %v4680_v45 }
 0x90d   : > { %13923 = vmatmul.mubr.msk.f32.gmra.mrb[138].mxu1 %vm2073_vm3, %v13874_v34 }
 0x913   : > { %v13877_v19 = vpop.f32.mrb[140].mxu0 }
 0x914   : > { %v4690_v53 = vpop.f32.mrb[141].mxu0 }
 0x915   : > { %13925 = vmatprep.mubr.msk.f32.mxu1 %vm2073_vm3, %v4690_v53  ;;  %v12116_v53 = vld [vmem:[%s21418_s1 + $0x58] sm:$0xff] }
 0x916   : > { %13926 = vmatmul.mubr.msk.f32.gmra.mrb[140].mxu1 %vm2073_vm3, %v13877_v19  ;;  %v12115_v19 = vld [vmem:[%s21418_s1 + $0x50] sm:$0xff] }
 0x917   : > { %v13880_v36 = vpop.f32.mrb[142].mxu0 }
 0x918   : > { %v4700_v30 = vpop.f32.mrb[143].mxu0 }
 0x919   : > { %13928 = vmatprep.mubr.msk.f32.mxu1 %vm2073_vm3, %v4700_v30 }
 0x91a   : > { %13929 = vmatmul.mubr.msk.f32.gmra.mrb[142].mxu1 %vm2073_vm3, %v13880_v36 }
 0x91b   : > { %v13883_v15 = vpop.f32.mrb[144].mxu0 }
 0x91c   : > { %v4710_v63 = vpop.f32.mrb[145].mxu0 }
 0x91d   : > { %13931 = vmatprep.mubr.msk.f32.mxu1 %vm2073_vm3, %v4710_v63  ;;  %v14849_v63 = vpack.c.bf16 %v12116_v53, %v12115_v19 }
 0x91e   : > { %13932 = vmatmul.mubr.msk.f32.gmra.mrb[144].mxu1 %vm2073_vm3, %v13883_v15 }
 0x91f   : > { %v13886_v22 = vpop.f32.mrb[146].mxu0 }
 0x920   : > { %v4720_v35 = vpop.f32.mrb[147].mxu0 }
 0x921   : > { %13934 = vmatprep.mubr.msk.f32.mxu1 %vm2073_vm3, %v4720_v35 }
 0x922   : > { %13935 = vmatmul.mubr.msk.f32.gmra.mrb[146].mxu1 %vm2073_vm3, %v13886_v22 }
 0x923   : > { %v13889_v39 = vpop.f32.mrb[148].mxu0 }
 0x924   : > { %v4730_v3 = vpop.f32.mrb[149].mxu0 }
 0x925   : > { %13937 = vmatprep.mubr.msk.f32.mxu1 %vm2073_vm3, %v4730_v3 }
 0x926   : > { %13938 = vmatmul.mubr.msk.f32.gmra.mrb[148].mxu1 %vm2073_vm3, %v13889_v39 }
 0x927   : > { %v13892_v41 = vpop.f32.mrb[150].mxu0 }
 0x928   : > { %v4740_v29 = vpop.f32.mrb[151].mxu0 }
 0x929   : > { %13940 = vmatprep.mubr.msk.f32.mxu1 %vm2073_vm3, %v4740_v29 }
 0x92a   : > { %13941 = vmatmul.mubr.msk.f32.gmra.mrb[150].mxu1 %vm2073_vm3, %v13892_v41 }
 0x92b   : > { %v13895_v37 = vpop.f32.mrb[152].mxu0 }
 0x92c   : > { %v4750_v4 = vpop.f32.mrb[153].mxu0 }
 0x92d   : > { %13943 = vmatprep.mubr.msk.f32.mxu1 %vm2073_vm3, %v4750_v4 }
 0x92e   : > { %13944 = vmatmul.mubr.msk.f32.gmra.mrb[152].mxu1 %vm2073_vm3, %v13895_v37 }
 0x92f   : > { %v13898_v55 = vpop.f32.mrb[154].mxu0 }
 0x930   : > { %v4760_v8 = vpop.f32.mrb[155].mxu0 }
 0x931   : > { %13946 = vmatprep.mubr.msk.f32.mxu1 %vm2073_vm3, %v4760_v8 }
 0x932   : > { %13947 = vmatmul.mubr.msk.f32.gmra.mrb[154].mxu1 %vm2073_vm3, %v13898_v55 }
 0x933   : > { %v13901_v43 = vpop.f32.mrb[156].mxu0 }
 0x934   : > { %v4770_v50 = vpop.f32.mrb[157].mxu0 }
 0x935   : > { %13949 = vmatprep.mubr.msk.f32.mxu1 %vm2073_vm3, %v4770_v50 }
 0x936   : > { %13950 = vmatmul.mubr.msk.f32.gmra.mrb[156].mxu1 %vm2073_vm3, %v13901_v43 }
 0x937   : > { %v13904_v17 = vpop.f32.mrb[158].mxu0 }
 0x938   : > { %v4780_v21 = vpop.f32.mrb[159].mxu0 }
 0x939   : > { %13952 = vmatprep.mubr.msk.f32.mxu1 %vm2073_vm3, %v4780_v21 }
 0x93a   : > { %13953 = vmatmul.mubr.msk.f32.gmra.mrb[158].mxu1 %vm2073_vm3, %v13904_v17 }
 0x9c1   : > { %v13909_v61 = vpop.f32.mrb[128].mxu1 }
 0x9c2   : > { %v18225_v62 = vsub.f32 %v18020_v44, %v13909_v61  ;;  %v4951_v34 = vpop.f32.mrb[129].mxu1 }
 0x9c3   : > { %v18228_v45 = vsub.f32 %v18017_v28, %v4951_v34 }
 0x9c4   : > { %21555 = vst [vmem:[#allocation22_spill] sm:$0xff] %v18225_v62  ;;  %v5143_v44 = vmul.f32 %v18225_v62, %v18225_v62 }
 0x9c5   : > { %21556 = vst [vmem:[#allocation11_spill] sm:$0xff] %v18228_v45  ;;  %v5142_v36 = vmul.f32 %v18228_v45, %v18228_v45  ;;  %v13912_v30 = vpop.f32.mrb[130].mxu1 }
 0x9c6   : > { %v18241_v15 = vsub.f32 %v18031_v31, %v13912_v30  ;;  %v4961_v28 = vpop.f32.mrb[131].mxu1 }
 0x9c7   : > { %v18244_v22 = vsub.f32 %v18027_v10, %v4961_v28  ;;  %13971 = vmatprep.mubr.msk.f32.mxu0 %vm1751_vm2, %v5142_v36 }
 0x9c8   : > { %21557 = vst [vmem:[#allocation23_spill] sm:$0xff] %v18241_v15  ;;  %13972 = vmatmul.mubr.msk.f32.vlgmr.msra.gmra.mrb[160].mxu0 %vm1751_vm2, %v5143_v44  ;;  %v5145_v39 = vmul.f32 %v18241_v15, %v18241_v15 }
 0x9c9   : > { %21558 = vst [vmem:[#allocation12_spill] sm:$0xff] %v18244_v22  ;;  %v5144_v35 = vmul.f32 %v18244_v22, %v18244_v22  ;;  %14848 = vmatpush3.bf16.msra.mxu0 %v14845_v40 }
 0x9ca   : > { %14850 = vmatprep.subr.bf16.mxu0 %v14849_v63 }
 0x9cb   : > { %13974 = vmatprep.mubr.msk.f32.mxu0 %vm1751_vm2, %v5144_v35 }
 0x9cc   : > { %13975 = vmatmul.mubr.msk.f32.gmra.mrb[162].mxu0 %vm1751_vm2, %v5145_v39 }
 0x9cd   : > { %v13915_v31 = vpop.f32.mrb[132].mxu1  ;;  %14852 = vmatpush3.bf16.msra.mxu0 %v14849_v63 }
 0x9ce   : > { %v18255_v10 = vsub.f32 %v18044_v5, %v13915_v31  ;;  %v4971_v3 = vpop.f32.mrb[133].mxu1  ;;  %14862 = vmatprep.subr.bf16.mxu0 %v21550_v16 }
 0x9cf   : > { %v18258_v41 = vsub.f32 %v18041_v57, %v4971_v3 }
 0x9d0   : > { %21559 = vst [vmem:[#allocation24_spill] sm:$0xff] %v18255_v10  ;;  %v5147_v37 = vmul.f32 %v18255_v10, %v18255_v10 }
 0x9d1   : > { %21560 = vst [vmem:[#allocation13_spill] sm:$0xff] %v18258_v41  ;;  %v5146_v29 = vmul.f32 %v18258_v41, %v18258_v41 }
 0x9d2   : > { %v13918_v4 = vpop.f32.mrb[134].mxu1 }
 0x9d3   : > { %v18266_v55 = vsub.f32 %v18057_v58, %v13918_v4  ;;  %v4981_v8 = vpop.f32.mrb[135].mxu1  ;;  %13977 = vmatprep.mubr.msk.f32.mxu0 %vm1751_vm2, %v5146_v29 }
 0x9d4   : > { %v18270_v5 = vsub.f32 %v18053_v2, %v4981_v8  ;;  %13978 = vmatmul.mubr.msk.f32.gmra.mrb[164].mxu0 %vm1751_vm2, %v5147_v37 }
 0x9d5   : > { %21561 = vst [vmem:[#allocation14_spill] sm:$0xff] %v18266_v55  ;;  %v5149_v43 = vmul.f32 %v18266_v55, %v18266_v55 }
 0x9d6   : > { %21562 = vst [vmem:[#allocation15_spill] sm:$0xff] %v18270_v5  ;;  %v5148_v57 = vmul.f32 %v18270_v5, %v18270_v5 }
 0x9d8   : > { %13980 = vmatprep.mubr.msk.f32.mxu0 %vm1751_vm2, %v5148_v57 }
 0x9d9   : > { %13981 = vmatmul.mubr.msk.f32.gmra.mrb[166].mxu0 %vm1751_vm2, %v5149_v43 }
 0x9da   : > { %v13921_v58 = vpop.f32.mrb[136].mxu1 }
 0x9db   : > { %v18280_v50 = vsub.f32 %v18067_v38, %v13921_v58  ;;  %v4991_v17 = vpop.f32.mrb[137].mxu1 }
 0x9dc   : > { %v18283_v2 = vsub.f32 %v18064_v6, %v4991_v17 }
 0x9dd   : > { %21563 = vst [vmem:[#allocation16_spill] sm:$0xff] %v18280_v50  ;;  %v5151_v20 = vmul.f32 %v18280_v50, %v18280_v50 }
 0x9de   : > { %21564 = vst [vmem:[#allocation17_spill] sm:$0xff] %v18283_v2  ;;  %v5150_v21 = vmul.f32 %v18283_v2, %v18283_v2 }
 0x9e0   : > { %13983 = vmatprep.mubr.msk.f32.mxu0 %vm1751_vm2, %v5150_v21  ;;  %v13924_v49 = vpop.f32.mrb[138].mxu1 }
 0x9e1   : > { %13984 = vmatmul.mubr.msk.f32.gmra.mrb[168].mxu0 %vm1751_vm2, %v5151_v20  ;;  %v18292_v40 = vsub.f32 %v18077_v18, %v13924_v49  ;;  %v5001_v38 = vpop.f32.mrb[139].mxu1 }
 0x9e2   : > { %v18295_v61 = vsub.f32 %v18074_v13, %v5001_v38 }
 0x9e3   : > { %21565 = vst [vmem:[#allocation18_spill] sm:$0xff] %v18292_v40  ;;  %v5153_v34 = vmul.f32 %v18292_v40, %v18292_v40 }
 0x9e4   : > { %21566 = vst [vmem:[#allocation19_spill] sm:$0xff] %v18295_v61  ;;  %v5152_v6 = vmul.f32 %v18295_v61, %v18295_v61 }
 0x9e6   : > { %13986 = vmatprep.mubr.msk.f32.mxu0 %vm1751_vm2, %v5152_v6 }
 0x9e7   : > { %13987 = vmatmul.mubr.msk.f32.gmra.mrb[170].mxu0 %vm1751_vm2, %v5153_v34 }
 0x9e9   : > { %v13927_v19 = vpop.f32.mrb[140].mxu1 }
 0x9ea   : > { %v18304_v53 = vsub.f32 %v18087_v14, %v13927_v19  ;;  %v5011_v18 = vpop.f32.mrb[141].mxu1 }
 0x9eb   : > { %v18307_v36 = vsub.f32 %v18084_v12, %v5011_v18 }
 0x9ec   : > { %21567 = vst [vmem:[#allocation20_spill] sm:$0xff] %v18304_v53  ;;  %v5155_v44 = vmul.f32 %v18304_v53, %v18304_v53 }
 0x9ed   : > { %21568 = vst [vmem:[#allocation21_spill] sm:$0xff] %v18307_v36  ;;  %v5154_v13 = vmul.f32 %v18307_v36, %v18307_v36  ;;  %v13930_v30 = vpop.f32.mrb[142].mxu1 }
 0x9ee   : > { %v18314_v28 = vsub.f32 %v18097_v52, %v13930_v30  ;;  %v5021_v63 = vpop.f32.mrb[143].mxu1 }
 0x9ef   : > { %v18317_v35 = vsub.f32 %v18094_v33, %v5021_v63  ;;  %13989 = vmatprep.mubr.msk.f32.mxu0 %vm1751_vm2, %v5154_v13 }
 0x9f0   : > { %21569 = vst [vmem:[#allocation25_spill] sm:$0xff] %v18314_v28  ;;  %13990 = vmatmul.mubr.msk.f32.gmra.mrb[172].mxu0 %vm1751_vm2, %v5155_v44  ;;  %v5157_v39 = vmul.f32 %v18314_v28, %v18314_v28 }
 0x9f1   : > { %21570 = vst [vmem:[#allocation26_spill] sm:$0xff] %v18317_v35  ;;  %v5156_v12 = vmul.f32 %v18317_v35, %v18317_v35  ;;  %v13933_v14 = vpop.f32.mrb[144].mxu1 }
 0x9f2   : > { %v18326_v31 = vsub.f32 %v18107_v11, %v13933_v14  ;;  %v5031_v52 = vpop.f32.mrb[145].mxu1 }
 0x9f3   : > { %v18329_v3 = vsub.f32 %v18104_v1, %v5031_v52  ;;  %13992 = vmatprep.mubr.msk.f32.mxu0 %vm1751_vm2, %v5156_v12 }
 0x9f4   : > { %21571 = vst [vmem:[#allocation5_spill] sm:$0xff] %v18326_v31  ;;  %13993 = vmatmul.mubr.msk.f32.gmra.mrb[174].mxu0 %vm1751_vm2, %v5157_v39  ;;  %v5159_v37 = vmul.f32 %v18326_v31, %v18326_v31 }
 0x9f5   : > { %21572 = vst [vmem:[#allocation27_spill] sm:$0xff] %v18329_v3  ;;  %v5158_v33 = vmul.f32 %v18329_v3, %v18329_v3  ;;  %v13936_v29 = vpop.f32.mrb[146].mxu1 }
 0x9f6   : > { %v18338_v4 = vsub.f32 %v18117_v24, %v13936_v29  ;;  %v5041_v11 = vpop.f32.mrb[147].mxu1 }
 0x9f7   : > { %v18341_v8 = vsub.f32 %v18114_v9, %v5041_v11  ;;  %13995 = vmatprep.mubr.msk.f32.mxu0 %vm1751_vm2, %v5158_v33 }
 0x9f8   : > { %21573 = vst [vmem:[#allocation28_spill] sm:$0xff] %v18338_v4  ;;  %13996 = vmatmul.mubr.msk.f32.gmra.mrb[176].mxu0 %vm1751_vm2, %v5159_v37  ;;  %v5161_v43 = vmul.f32 %v18338_v4, %v18338_v4 }
 0x9f9   : > { %21574 = vst [vmem:[#allocation29_spill] sm:$0xff] %v18341_v8  ;;  %v5160_v1 = vmul.f32 %v18341_v8, %v18341_v8  ;;  %v13939_v57 = vpop.f32.mrb[148].mxu1 }
 0x9fa   : > { %v18350_v58 = vsub.f32 %v18127_v0, %v13939_v57  ;;  %v5051_v24 = vpop.f32.mrb[149].mxu1  ;;  %v15790_v57 = vld [vmem:[%s16060_s12 + $0x10] sm:$0xff] }
 0x9fb   : > { %v18353_v17 = vsub.f32 %v18124_v54, %v5051_v24  ;;  %13998 = vmatprep.mubr.msk.f32.mxu0 %vm1751_vm2, %v5160_v1  ;;  %v15792_v24 = vld [vmem:[%s16060_s12 + $0x20] sm:$0xff] }
 0x9fc   : > { %21575 = vst [vmem:[#allocation30_spill] sm:$0xff] %v18350_v58  ;;  %13999 = vmatmul.mubr.msk.f32.gmra.mrb[178].mxu0 %vm1751_vm2, %v5161_v43  ;;  %v5163_v20 = vmul.f32 %v18350_v58, %v18350_v58  ;;  %v15791_v43 = vld [vmem:[%s16060_s12 + $0x18] sm:$0xff] }
 0x9fd   : > { %21576 = vst [vmem:[#allocation31_spill] sm:$0xff] %v18353_v17  ;;  %v5162_v9 = vmul.f32 %v18353_v17, %v18353_v17  ;;  %v13942_v21 = vpop.f32.mrb[150].mxu1 }
 0x9fe   : > { %v18362_v49 = vsub.f32 %v18137_v60, %v13942_v21  ;;  %v5061_v0 = vpop.f32.mrb[151].mxu1  ;;  %v15794_v21 = vld [vmem:[%s16060_s12 + $0x30] sm:$0xff] }
 0x9ff   : > { %v18365_v38 = vsub.f32 %v18134_v26, %v5061_v0  ;;  %14001 = vmatprep.mubr.msk.f32.mxu0 %vm1751_vm2, %v5162_v9  ;;  %v15793_v9 = vld [vmem:[%s16060_s12 + $0x28] sm:$0xff]  ;;  %v15796_v0 = vld [vmem:[%s16060_s12 + $0x40] sm:$0xff] }
 0xa00   : > { %21577 = vst [vmem:[#allocation32_spill] sm:$0xff] %v18362_v49  ;;  %14002 = vmatmul.mubr.msk.f32.gmra.mrb[180].mxu0 %vm1751_vm2, %v5163_v20  ;;  %v5165_v34 = vmul.f32 %v18362_v49, %v18362_v49  ;;  %v15795_v20 = vld [vmem:[%s16060_s12 + $0x38] sm:$0xff] }
 0xa01   : > { %21578 = vst [vmem:[#allocation33_spill] sm:$0xff] %v18365_v38  ;;  %v5164_v54 = vmul.f32 %v18365_v38, %v18365_v38  ;;  %v13945_v6 = vpop.f32.mrb[152].mxu1 }
 0xa02   : > { %v18374_v19 = vsub.f32 %v18147_v56, %v13945_v6  ;;  %v5071_v60 = vpop.f32.mrb[153].mxu1  ;;  %v15798_v6 = vld [vmem:[%s16060_s12 + $0x50] sm:$0xff] }
 0xa03   : > { %v18377_v18 = vsub.f32 %v18144_v46, %v5071_v60  ;;  %14004 = vmatprep.mubr.msk.f32.mxu0 %vm1751_vm2, %v5164_v54  ;;  %v15797_v54 = vld [vmem:[%s16060_s12 + $0x48] sm:$0xff]  ;;  %v15800_v60 = vld [vmem:[%s16060_s12 + $0x60] sm:$0xff] }
 0xa04   : > { %21579 = vst [vmem:[#allocation34_spill] sm:$0xff] %v18374_v19  ;;  %14005 = vmatmul.mubr.msk.f32.gmra.mrb[182].mxu0 %vm1751_vm2, %v5165_v34  ;;  %v5167_v30 = vmul.f32 %v18374_v19, %v18374_v19  ;;  %v15799_v34 = vld [vmem:[%s16060_s12 + $0x58] sm:$0xff] }
 0xa05   : > { %21580 = vst [vmem:[#allocation35_spill] sm:$0xff] %v18377_v18  ;;  %v5166_v26 = vmul.f32 %v18377_v18, %v18377_v18  ;;  %v13948_v13 = vpop.f32.mrb[154].mxu1 }
 0xa06   : > { %v18386_v44 = vsub.f32 %v18157_v42, %v13948_v13  ;;  %v5081_v56 = vpop.f32.mrb[155].mxu1  ;;  %v15802_v13 = vld [vmem:[%s16060_s12 + $0x70] sm:$0xff] }
 0xa07   : > { %v18389_v63 = vsub.f32 %v18154_v7, %v5081_v56  ;;  %14007 = vmatprep.mubr.msk.f32.mxu0 %vm1751_vm2, %v5166_v26  ;;  %v15801_v26 = vld [vmem:[%s16060_s12 + $0x68] sm:$0xff]  ;;  %v15804_v56 = vld [vmem:[%s16060_s12 + $0x80] sm:$0xff] }
 0xa08   : > { %21581 = vst [vmem:[#allocation36_spill] sm:$0xff] %v18386_v44  ;;  %14008 = vmatmul.mubr.msk.f32.gmra.mrb[184].mxu0 %vm1751_vm2, %v5167_v30  ;;  %v5169_v14 = vmul.f32 %v18386_v44, %v18386_v44  ;;  %v15803_v30 = vld [vmem:[%s16060_s12 + $0x78] sm:$0xff] }
 0xa09   : > { %21582 = vst [vmem:[#allocation37_spill] sm:$0xff] %v18389_v63  ;;  %v5168_v46 = vmul.f32 %v18389_v63, %v18389_v63  ;;  %v13951_v12 = vpop.f32.mrb[156].mxu1 }
 0xa0a   : > { %v18398_v39 = vsub.f32 %v18167_v25, %v13951_v12  ;;  %v5091_v42 = vpop.f32.mrb[157].mxu1  ;;  %v15806_v12 = vld [vmem:[%s16060_s12 + $0x90] sm:$0xff] }
 0xa0b   : > { %v18401_v52 = vsub.f32 %v18164_v32, %v5091_v42  ;;  %14010 = vmatprep.mubr.msk.f32.mxu0 %vm1751_vm2, %v5168_v46  ;;  %v15805_v46 = vld [vmem:[%s16060_s12 + $0x88] sm:$0xff]  ;;  %v15808_v42 = vld [vmem:[%s16060_s12 + $0xa0] sm:$0xff] }
 0xa0c   : > { %21583 = vst [vmem:[#allocation38_spill] sm:$0xff] %v18398_v39  ;;  %14011 = vmatmul.mubr.msk.f32.gmra.mrb[186].mxu0 %vm1751_vm2, %v5169_v14  ;;  %v5171_v29 = vmul.f32 %v18398_v39, %v18398_v39  ;;  %v15807_v14 = vld [vmem:[%s16060_s12 + $0x98] sm:$0xff] }
 0xa0d   : > { %21584 = vst [vmem:[#allocation39_spill] sm:$0xff] %v18401_v52  ;;  %v5170_v7 = vmul.f32 %v18401_v52, %v18401_v52  ;;  %v13954_v33 = vpop.f32.mrb[158].mxu1 }
 0xa0e   : > { %v18410_v25 = vsub.f32 %v18177_v48, %v13954_v33  ;;  %v5101_v37 = vpop.f32.mrb[159].mxu1  ;;  %v15788_v48 = vld [vmem:[%s16060_s12] sm:$0xff]  ;;  %v15810_v33 = vld [vmem:[%s16060_s12 + $0xb0] sm:$0xff] }
 0xa0f   : > { %v18413_v32 = vsub.f32 %v18174_v27, %v5101_v37  ;;  %14013 = vmatprep.mubr.msk.f32.mxu0 %vm1751_vm2, %v5170_v7  ;;  %v15789_v27 = vld [vmem:[%s16060_s12 + $0x8] sm:$0xff]  ;;  %v15812_v37 = vld [vmem:[%s16060_s12 + $0xc0] sm:$0xff] }
 0xa10   : > { %21585 = vst [vmem:[#allocation40_spill] sm:$0xff] %v18410_v25  ;;  %14014 = vmatmul.mubr.msk.f32.gmra.mrb[188].mxu0 %vm1751_vm2, %v5171_v29  ;;  %v5173_v1 = vmul.f32 %v18410_v25, %v18410_v25  ;;  %v15809_v7 = vld [vmem:[%s16060_s12 + $0xa8] sm:$0xff]  ;;  %v15811_v29 = vld [vmem:[%s16060_s12 + $0xb8] sm:$0xff] }
 0xa11   : > { %21586 = vst [vmem:[#allocation41_spill] sm:$0xff] %v18413_v32  ;;  %v5172_v11 = vmul.f32 %v18413_v32, %v18413_v32 }
 0xa13   : > { %14016 = vmatprep.mubr.msk.f32.mxu0 %vm1751_vm2, %v5172_v11  ;;  %v15813_v11 = vld [vmem:[%s16060_s12 + $0xc8] sm:$0xff] }
 0xa14   : > { %14017 = vmatmul.mubr.msk.f32.gmra.mrb[190].mxu0 %vm1751_vm2, %v5173_v1  ;;  %v15814_v1 = vld [vmem:[%s16060_s12 + $0xd0] sm:$0xff] }
 0xa15   : > { %14077 = vmatprep.mubr.msk.f32.mxu0 %vm449_vm0, %v15788_v48  ;;  %v15815_v48 = vld [vmem:[%s16060_s12 + $0xd8] sm:$0xff] }
 0xa18   : > { %14078 = vmatmul.mubr.msk.f32.vlgmr.msra.gmra.mrb[192].mxu0 %vm449_vm0, %v15789_v27  ;;  %v15816_v27 = vld [vmem:[%s16060_s12 + $0xe0] sm:$0xff] }
 0xa19   : > { %14080 = vmatprep.mubr.msk.f32.mxu0 %vm449_vm0, %v15790_v57  ;;  %14864 = vmatpush3.bf16.msra.mxu0 %v21550_v16  ;;  %v15817_v57 = vld [vmem:[%s16060_s12 + $0xe8] sm:$0xff] }
 0xa1a   : > { %14866 = vmatprep.subr.bf16.mxu0 %v21551_v23 }
 0xa1c   : > { %14081 = vmatmul.mubr.msk.f32.gmra.mrb[194].mxu0 %vm449_vm0, %v15791_v43  ;;  %v15818_v43 = vld [vmem:[%s16060_s12 + $0xf0] sm:$0xff] }
 0xa1d   : > { %14083 = vmatprep.mubr.msk.f32.mxu0 %vm449_vm0, %v15792_v24  ;;  %14868 = vmatpush3.bf16.msra.mxu0 %v21551_v23  ;;  %v15819_v24 = vld [vmem:[%s16060_s12 + $0xf8] sm:$0xff] }
 0xa1e   : > { %14870 = vmatprep.subr.bf16.mxu0 %v21552_v47 }
 0xa20   : > { %14084 = vmatmul.mubr.msk.f32.gmra.mrb[196].mxu0 %vm449_vm0, %v15793_v9 }
 0xa21   : > { %14086 = vmatprep.mubr.msk.f32.mxu0 %vm449_vm0, %v15794_v21  ;;  %14872 = vmatpush3.bf16.msra.mxu0 %v21552_v47 }
 0xa22   : > { %14874 = vmatprep.subr.bf16.mxu0 %v21553_v59 }
 0xa24   : > { %14087 = vmatmul.mubr.msk.f32.gmra.mrb[198].mxu0 %vm449_vm0, %v15795_v20 }
 0xa25   : > { %14089 = vmatprep.mubr.msk.f32.mxu0 %vm449_vm0, %v15796_v0  ;;  %14876 = vmatpush3.bf16.msra.mxu0 %v21553_v59 }
 0xa26   : > { %14878 = vmatprep.subr.bf16.mxu0 %v21550_v16 }
 0xa28   : > { %14090 = vmatmul.mubr.msk.f32.gmra.mrb[200].mxu0 %vm449_vm0, %v15797_v54 }
 0xa29   : > { %14092 = vmatprep.mubr.msk.f32.mxu0 %vm449_vm0, %v15798_v6 }
 0xa2c   : > { %14093 = vmatmul.mubr.msk.f32.gmra.mrb[202].mxu0 %vm449_vm0, %v15799_v34 }
 0xa2d   : > { %14095 = vmatprep.mubr.msk.f32.mxu0 %vm449_vm0, %v15800_v60 }
 0xa30   : > { %14096 = vmatmul.mubr.msk.f32.gmra.mrb[204].mxu0 %vm449_vm0, %v15801_v26 }
 0xa31   : > { %14098 = vmatprep.mubr.msk.f32.mxu0 %vm449_vm0, %v15802_v13 }
 0xa34   : > { %14099 = vmatmul.mubr.msk.f32.gmra.mrb[206].mxu0 %vm449_vm0, %v15803_v30 }
 0xa35   : > { %14101 = vmatprep.mubr.msk.f32.mxu0 %vm449_vm0, %v15804_v56 }
 0xa38   : > { %14102 = vmatmul.mubr.msk.f32.gmra.mrb[208].mxu0 %vm449_vm0, %v15805_v46 }
 0xa39   : > { %14104 = vmatprep.mubr.msk.f32.mxu0 %vm449_vm0, %v15806_v12 }
 0xa3c   : > { %14105 = vmatmul.mubr.msk.f32.gmra.mrb[210].mxu0 %vm449_vm0, %v15807_v14 }
 0xa3d   : > { %14107 = vmatprep.mubr.msk.f32.mxu0 %vm449_vm0, %v15808_v42 }
 0xa40   : > { %14108 = vmatmul.mubr.msk.f32.gmra.mrb[212].mxu0 %vm449_vm0, %v15809_v7 }
 0xa41   : > { %14110 = vmatprep.mubr.msk.f32.mxu0 %vm449_vm0, %v15810_v33 }
 0xa44   : > { %14111 = vmatmul.mubr.msk.f32.gmra.mrb[214].mxu0 %vm449_vm0, %v15811_v29 }
 0xa45   : > { %14113 = vmatprep.mubr.msk.f32.mxu0 %vm449_vm0, %v15812_v37  ;;  %v21587_v37 = vld [vmem:[#allocation6_spill] sm:$0xff] }
 0xa48   : > { %14114 = vmatmul.mubr.msk.f32.gmra.mrb[216].mxu0 %vm449_vm0, %v15813_v11 }
 0xa49   : > { %14116 = vmatprep.mubr.msk.f32.mxu0 %vm449_vm0, %v15814_v1  ;;  %v15820_v1 = vld [vmem:[%s21427_s10] sm:$0xf] }
 0xa4c   : > { %14117 = vmatmul.mubr.msk.f32.gmra.mrb[218].mxu0 %vm449_vm0, %v15815_v48 }
 0xa4d   : > { %14119 = vmatprep.mubr.msk.f32.mxu0 %vm449_vm0, %v15816_v27 }
 0xa50   : > { %14120 = vmatmul.mubr.msk.f32.gmra.mrb[220].mxu0 %vm449_vm0, %v15817_v57 }
 0xa51   : > { %14122 = vmatprep.mubr.msk.f32.mxu0 %vm449_vm0, %v15818_v43 }
 0xa54   : > { %14123 = vmatmul.mubr.msk.f32.gmra.mrb[222].mxu0 %vm449_vm0, %v15819_v24 }
 0xa9b   : > { %v13973_v9 = vpop.f32.mrb[160].mxu0 }
 0xa9c   : > { %v5342_v21 = vadd.f32 1e-06, %v13973_v9  ;;  %v5336_v20 = vpop.f32.mrb[161].mxu0 }
 0xa9d   : > { %v5337_v0 = vadd.f32 1e-06, %v5336_v20 }
 0xa9f   : > { %15303 = vrsqrt.f32 %v5337_v0  ;;  %v13976_v54 = vpop.f32.mrb[162].mxu0 }
 0xaa0   : > { %15305 = vrsqrt.f32 %v5342_v21  ;;  %v5352_v6 = vadd.f32 1e-06, %v13976_v54  ;;  %v5346_v34 = vpop.f32.mrb[163].mxu0 }
 0xaa1   : > { %v5347_v60 = vadd.f32 1e-06, %v5346_v34 }
 0xaa3   : > { %15307 = vrsqrt.f32 %v5347_v60 }
 0xaa4   : > { %15309 = vrsqrt.f32 %v5352_v6 }
 0xaa7   : > { %v13979_v26 = vpop.f32.mrb[164].mxu0 }
 0xaa8   : > { %v5362_v13 = vadd.f32 1e-06, %v13979_v26  ;;  %v5356_v30 = vpop.f32.mrb[165].mxu0 }
 0xaa9   : > { %v5357_v56 = vadd.f32 1e-06, %v5356_v30  ;;  %v15304_v46 = vpop.eup %15303 }
 0xaaa   : > { %v15306_v12 = vpop.eup %15305  ;;  %14021 = vmatprep.mubr.msk.f32.mxu1 %vm2073_vm3, %v15304_v46 }
 0xaab   : > { %15311 = vrsqrt.f32 %v5357_v56  ;;  %14022 = vmatmul.mubr.msk.f32.vlgmr.msra.gmra.mrb[160].mxu1 %vm2073_vm3, %v15306_v12 }
 0xaac   : > { %15313 = vrsqrt.f32 %v5362_v13  ;;  %v13982_v14 = vpop.f32.mrb[166].mxu0  ;;  %14856 = vmatpush3.bf16.msra.mxu1 %v21554_v51 }
 0xaad   : > { %v5372_v42 = vadd.f32 1e-06, %v13982_v14  ;;  %v5366_v7 = vpop.f32.mrb[167].mxu0  ;;  %v15308_v33 = vpop.eup %15307  ;;  %14858 = vmatprep.subr.bf16.mxu1 %v21587_v37 }
 0xaae   : > { %v5367_v29 = vadd.f32 1e-06, %v5366_v7  ;;  %v15310_v11 = vpop.eup %15309  ;;  %14024 = vmatprep.mubr.msk.f32.mxu1 %vm2073_vm3, %v15308_v33 }
 0xaaf   : > { %14025 = vmatmul.mubr.msk.f32.gmra.mrb[162].mxu1 %vm2073_vm3, %v15310_v11 }
 0xab0   : > { %15315 = vrsqrt.f32 %v5367_v29  ;;  %14860 = vmatpush3.bf16.msra.mxu1 %v21587_v37 }
 0xab1   : > { %15317 = vrsqrt.f32 %v5372_v42  ;;  %14245 = vmatprep.subr.msk.mxu1 %vm2170_vm1, %v15820_v1 }
 0xab4   : > { %v13985_v48 = vpop.f32.mrb[168].mxu0 }
 0xab5   : > { %v15312_v27 = vpop.eup %15311  ;;  %v5382_v57 = vadd.f32 1e-06, %v13985_v48  ;;  %v5376_v43 = vpop.f32.mrb[169].mxu0 }
 0xab6   : > { %v15314_v24 = vpop.eup %15313  ;;  %v5377_v9 = vadd.f32 1e-06, %v5376_v43  ;;  %14027 = vmatprep.mubr.msk.f32.mxu1 %vm2073_vm3, %v15312_v27 }
 0xab7   : > { %14028 = vmatmul.mubr.msk.f32.gmra.mrb[164].mxu1 %vm2073_vm3, %v15314_v24 }
 0xab8   : > { %15319 = vrsqrt.f32 %v5377_v9 }
 0xab9   : > { %15321 = vrsqrt.f32 %v5382_v57 }
 0xaba   : > { %v15316_v21 = vpop.eup %15315  ;;  %v13988_v0 = vpop.f32.mrb[170].mxu0 }
 0xabb   : > { %v15318_v20 = vpop.eup %15317  ;;  %14030 = vmatprep.mubr.msk.f32.mxu1 %vm2073_vm3, %v15316_v21  ;;  %v5392_v54 = vadd.f32 1e-06, %v13988_v0  ;;  %v5386_v6 = vpop.f32.mrb[171].mxu0 }
 0xabc   : > { %14031 = vmatmul.mubr.msk.f32.gmra.mrb[166].mxu1 %vm2073_vm3, %v15318_v20  ;;  %v5387_v34 = vadd.f32 1e-06, %v5386_v6 }
 0xabe   : > { %15323 = vrsqrt.f32 %v5387_v34 }
 0xabf   : > { %15325 = vrsqrt.f32 %v5392_v54 }
 0xac2   : > { %v15320_v60 = vpop.eup %15319 }
 0xac3   : > { %v15322_v26 = vpop.eup %15321  ;;  %v13991_v13 = vpop.f32.mrb[172].mxu0  ;;  %14033 = vmatprep.mubr.msk.f32.mxu1 %vm2073_vm3, %v15320_v60 }
 0xac4   : > { %v5402_v30 = vadd.f32 1e-06, %v13991_v13  ;;  %v5396_v56 = vpop.f32.mrb[173].mxu0  ;;  %14034 = vmatmul.mubr.msk.f32.gmra.mrb[168].mxu1 %vm2073_vm3, %v15322_v26 }
 0xac5   : > { %v5397_v46 = vadd.f32 1e-06, %v5396_v56 }
 0xac7   : > { %15327 = vrsqrt.f32 %v5397_v46  ;;  %v13994_v12 = vpop.f32.mrb[174].mxu0 }
 0xac8   : > { %15329 = vrsqrt.f32 %v5402_v30  ;;  %v5412_v14 = vadd.f32 1e-06, %v13994_v12  ;;  %v5406_v42 = vpop.f32.mrb[175].mxu0  ;;  %v15324_v7 = vpop.eup %15323 }
 0xac9   : > { %v5407_v33 = vadd.f32 1e-06, %v5406_v42  ;;  %v15326_v29 = vpop.eup %15325  ;;  %14036 = vmatprep.mubr.msk.f32.mxu1 %vm2073_vm3, %v15324_v7 }
 0xaca   : > { %14037 = vmatmul.mubr.msk.f32.gmra.mrb[170].mxu1 %vm2073_vm3, %v15326_v29 }
 0xacb   : > { %15331 = vrsqrt.f32 %v5407_v33  ;;  %v13997_v11 = vpop.f32.mrb[176].mxu0 }
 0xacc   : > { %15333 = vrsqrt.f32 %v5412_v14  ;;  %v5422_v1 = vadd.f32 1e-06, %v13997_v11  ;;  %v5416_v48 = vpop.f32.mrb[177].mxu0 }
 0xacd   : > { %v5417_v27 = vadd.f32 1e-06, %v5416_v48 }
 0xacf   : > { %15335 = vrsqrt.f32 %v5417_v27  ;;  %v14000_v57 = vpop.f32.mrb[178].mxu0 }
 0xad0   : > { %15337 = vrsqrt.f32 %v5422_v1  ;;  %v5432_v43 = vadd.f32 1e-06, %v14000_v57  ;;  %v5426_v24 = vpop.f32.mrb[179].mxu0 }
 0xad1   : > { %v15328_v9 = vpop.eup %15327  ;;  %v5427_v21 = vadd.f32 1e-06, %v5426_v24 }
 0xad2   : > { %v15330_v20 = vpop.eup %15329  ;;  %14039 = vmatprep.mubr.msk.f32.mxu1 %vm2073_vm3, %v15328_v9 }
 0xad3   : > { %15339 = vrsqrt.f32 %v5427_v21  ;;  %v14003_v0 = vpop.f32.mrb[180].mxu0  ;;  %14040 = vmatmul.mubr.msk.f32.gmra.mrb[172].mxu1 %vm2073_vm3, %v15330_v20 }
 0xad4   : > { %15341 = vrsqrt.f32 %v5432_v43  ;;  %v5442_v54 = vadd.f32 1e-06, %v14003_v0  ;;  %v5436_v6 = vpop.f32.mrb[181].mxu0 }
 0xad5   : > { %v15332_v34 = vpop.eup %15331  ;;  %v5437_v60 = vadd.f32 1e-06, %v5436_v6 }
 0xad6   : > { %v15334_v26 = vpop.eup %15333  ;;  %14042 = vmatprep.mubr.msk.f32.mxu1 %vm2073_vm3, %v15332_v34 }
 0xad7   : > { %15343 = vrsqrt.f32 %v5437_v60  ;;  %v14006_v13 = vpop.f32.mrb[182].mxu0  ;;  %14043 = vmatmul.mubr.msk.f32.gmra.mrb[174].mxu1 %vm2073_vm3, %v15334_v26 }
 0xad8   : > { %15345 = vrsqrt.f32 %v5442_v54  ;;  %v5452_v30 = vadd.f32 1e-06, %v14006_v13  ;;  %v5446_v56 = vpop.f32.mrb[183].mxu0 }
 0xad9   : > { %v15336_v46 = vpop.eup %15335  ;;  %v5447_v12 = vadd.f32 1e-06, %v5446_v56 }
 0xada   : > { %v15338_v14 = vpop.eup %15337  ;;  %14045 = vmatprep.mubr.msk.f32.mxu1 %vm2073_vm3, %v15336_v46 }
 0xadb   : > { %15347 = vrsqrt.f32 %v5447_v12  ;;  %v14009_v42 = vpop.f32.mrb[184].mxu0  ;;  %14046 = vmatmul.mubr.msk.f32.gmra.mrb[176].mxu1 %vm2073_vm3, %v15338_v14  ;;  %v18531_v14 = vld [vmem:[%s21419_s2] ss:$0 sm:$0xff] }
 0xadc   : > { %15349 = vrsqrt.f32 %v5452_v30  ;;  %v5462_v7 = vadd.f32 1e-06, %v14009_v42  ;;  %v5456_v33 = vpop.f32.mrb[185].mxu0 }
 0xadd   : > { %v15340_v29 = vpop.eup %15339  ;;  %v5457_v11 = vadd.f32 1e-06, %v5456_v33 }
 0xade   : > { %v15342_v1 = vpop.eup %15341  ;;  %14048 = vmatprep.mubr.msk.f32.mxu1 %vm2073_vm3, %v15340_v29 }
 0xadf   : > { %15351 = vrsqrt.f32 %v5457_v11  ;;  %v14012_v48 = vpop.f32.mrb[186].mxu0  ;;  %14049 = vmatmul.mubr.msk.f32.gmra.mrb[178].mxu1 %vm2073_vm3, %v15342_v1 }
 0xae0   : > { %15353 = vrsqrt.f32 %v5462_v7  ;;  %v5472_v27 = vadd.f32 1e-06, %v14012_v48  ;;  %v5466_v57 = vpop.f32.mrb[187].mxu0 }
 0xae1   : > { %v15344_v43 = vpop.eup %15343  ;;  %v5467_v24 = vadd.f32 1e-06, %v5466_v57 }
 0xae2   : > { %v15346_v9 = vpop.eup %15345  ;;  %14051 = vmatprep.mubr.msk.f32.mxu1 %vm2073_vm3, %v15344_v43 }
 0xae3   : > { %15355 = vrsqrt.f32 %v5467_v24  ;;  %v14015_v21 = vpop.f32.mrb[188].mxu0  ;;  %14052 = vmatmul.mubr.msk.f32.gmra.mrb[180].mxu1 %vm2073_vm3, %v15346_v9 }
 0xae4   : > { %15357 = vrsqrt.f32 %v5472_v27  ;;  %v5482_v20 = vadd.f32 1e-06, %v14015_v21  ;;  %v5476_v0 = vpop.f32.mrb[189].mxu0 }
 0xae5   : > { %v15348_v54 = vpop.eup %15347  ;;  %v5477_v6 = vadd.f32 1e-06, %v5476_v0 }
 0xae6   : > { %v15350_v34 = vpop.eup %15349  ;;  %14054 = vmatprep.mubr.msk.f32.mxu1 %vm2073_vm3, %v15348_v54 }
 0xae7   : > { %15359 = vrsqrt.f32 %v5477_v6  ;;  %v14018_v60 = vpop.f32.mrb[190].mxu0  ;;  %14055 = vmatmul.mubr.msk.f32.gmra.mrb[182].mxu1 %vm2073_vm3, %v15350_v34 }
 0xae8   : > { %15361 = vrsqrt.f32 %v5482_v20  ;;  %v5492_v26 = vadd.f32 1e-06, %v14018_v60  ;;  %v5486_v13 = vpop.f32.mrb[191].mxu0 }
 0xae9   : > { %v15352_v30 = vpop.eup %15351  ;;  %v5487_v56 = vadd.f32 1e-06, %v5486_v13 }
 0xaea   : > { %v15354_v46 = vpop.eup %15353  ;;  %14057 = vmatprep.mubr.msk.f32.mxu1 %vm2073_vm3, %v15352_v30 }
 0xaeb   : > { %15363 = vrsqrt.f32 %v5487_v56  ;;  %14058 = vmatmul.mubr.msk.f32.gmra.mrb[184].mxu1 %vm2073_vm3, %v15354_v46  ;;  %v14079_v12 = vpop.f32.mrb[192].mxu0 }
 0xaec   : > { %15365 = vrsqrt.f32 %v5492_v26  ;;  %v18534_v42 = vadd.f32 %v18531_v14, %v14079_v12  ;;  %v6176_v7 = vpop.f32.mrb[193].mxu0 }
 0xaed   : > { %v15356_v33 = vpop.eup %15355  ;;  %v18537_v29 = vadd.f32 %v18531_v14, %v6176_v7 }
 0xaee   : > { %v15358_v11 = vpop.eup %15357  ;;  %14060 = vmatprep.mubr.msk.f32.mxu1 %vm2073_vm3, %v15356_v33  ;;  %v6338_v1 = vsel %vm449_vm0, %v18534_v42, 0.0 }
 0xaef   : > { %14061 = vmatmul.mubr.msk.f32.gmra.mrb[186].mxu1 %vm2073_vm3, %v15358_v11  ;;  %6339 = vadd.xlane.f32.xlu1 %v6338_v1  ;;  %v14082_v48 = vpop.f32.mrb[194].mxu0  ;;  %v6335_v27 = vsel %vm449_vm0, %v18537_v29, 0.0 }
 0xaf0   : > { %v18546_v57 = vadd.f32 %v18531_v14, %v14082_v48  ;;  %v6186_v43 = vpop.f32.mrb[195].mxu0  ;;  %6336 = vadd.xlane.f32.xlu0 %v6335_v27 }
 0xaf1   : > { %v15360_v24 = vpop.eup %15359  ;;  %v18549_v9 = vadd.f32 %v18531_v14, %v6186_v43 }
 0xaf2   : > { %v15362_v21 = vpop.eup %15361  ;;  %14063 = vmatprep.mubr.msk.f32.mxu1 %vm2073_vm3, %v15360_v24  ;;  %v6344_v20 = vsel %vm449_vm0, %v18546_v57, 0.0 }
 0xaf3   : > { %14064 = vmatmul.mubr.msk.f32.gmra.mrb[188].mxu1 %vm2073_vm3, %v15362_v21  ;;  %6345 = vadd.xlane.f32.xlu1 %v6344_v20  ;;  %v14085_v0 = vpop.f32.mrb[196].mxu0  ;;  %v6341_v54 = vsel %vm449_vm0, %v18549_v9, 0.0 }
 0xaf4   : > { %v18558_v6 = vadd.f32 %v18531_v14, %v14085_v0  ;;  %v6196_v34 = vpop.f32.mrb[197].mxu0  ;;  %6342 = vadd.xlane.f32.xlu0 %v6341_v54 }
 0xaf5   : > { %v15364_v60 = vpop.eup %15363  ;;  %v18561_v26 = vadd.f32 %v18531_v14, %v6196_v34 }
 0xaf6   : > { %v15366_v13 = vpop.eup %15365  ;;  %14066 = vmatprep.mubr.msk.f32.mxu1 %vm2073_vm3, %v15364_v60  ;;  %v6350_v30 = vsel %vm449_vm0, %v18558_v6, 0.0 }
 0xaf7   : > { %6351 = vadd.xlane.f32.xlu1 %v6350_v30  ;;  %14067 = vmatmul.mubr.msk.f32.gmra.mrb[190].mxu1 %vm2073_vm3, %v15366_v13  ;;  %v14088_v56 = vpop.f32.mrb[198].mxu0  ;;  %v6347_v46 = vsel %vm449_vm0, %v18561_v26, 0.0 }
 0xaf8   : > { %v18570_v12 = vadd.f32 %v18531_v14, %v14088_v56  ;;  %v6206_v7 = vpop.f32.mrb[199].mxu0  ;;  %6348 = vadd.xlane.f32.xlu0 %v6347_v46 }
 0xaf9   : > { %v18573_v33 = vadd.f32 %v18531_v14, %v6206_v7 }
 0xafa   : > { %v6356_v11 = vsel %vm449_vm0, %v18570_v12, 0.0 }
 0xafb   : > { %6357 = vadd.xlane.f32.xlu1 %v6356_v11  ;;  %v14091_v1 = vpop.f32.mrb[200].mxu0  ;;  %v6353_v48 = vsel %vm449_vm0, %v18573_v33, 0.0 }
 0xafc   : > { %v18580_v27 = vadd.f32 %v18531_v14, %v14091_v1  ;;  %v6216_v43 = vpop.f32.mrb[201].mxu0  ;;  %6354 = vadd.xlane.f32.xlu0 %v6353_v48 }
 0xafd   : > { %v18583_v24 = vadd.f32 %v18531_v14, %v6216_v43 }
 0xafe   : > { %v6362_v21 = vsel %vm449_vm0, %v18580_v27, 0.0 }
 0xaff   : > { %6363 = vadd.xlane.f32.xlu1 %v6362_v21  ;;  %v14094_v20 = vpop.f32.mrb[202].mxu0  ;;  %v6359_v0 = vsel %vm449_vm0, %v18583_v24, 0.0 }
 0xb00   : > { %v18590_v54 = vadd.f32 %v18531_v14, %v14094_v20  ;;  %v6226_v34 = vpop.f32.mrb[203].mxu0  ;;  %6360 = vadd.xlane.f32.xlu0 %v6359_v0 }
 0xb01   : > { %v18593_v60 = vadd.f32 %v18531_v14, %v6226_v34 }
 0xb02   : > { %v6368_v13 = vsel %vm449_vm0, %v18590_v54, 0.0 }
 0xb03   : > { %6369 = vadd.xlane.f32.xlu1 %v6368_v13  ;;  %v14097_v30 = vpop.f32.mrb[204].mxu0  ;;  %v6365_v56 = vsel %vm449_vm0, %v18593_v60, 0.0 }
 0xb04   : > { %v18600_v46 = vadd.f32 %v18531_v14, %v14097_v30  ;;  %v6236_v7 = vpop.f32.mrb[205].mxu0  ;;  %6366 = vadd.xlane.f32.xlu0 %v6365_v56 }
 0xb05   : > { %v18603_v11 = vadd.f32 %v18531_v14, %v6236_v7 }
 0xb06   : > { %v6374_v1 = vsel %vm449_vm0, %v18600_v46, 0.0 }
 0xb07   : > { %6375 = vadd.xlane.f32.xlu1 %v6374_v1  ;;  %v14100_v48 = vpop.f32.mrb[206].mxu0  ;;  %v6371_v43 = vsel %vm449_vm0, %v18603_v11, 0.0 }
 0xb08   : > { %v18610_v21 = vadd.f32 %v18531_v14, %v14100_v48  ;;  %v6246_v20 = vpop.f32.mrb[207].mxu0  ;;  %6372 = vadd.xlane.f32.xlu0 %v6371_v43 }
 0xb09   : > { %v18613_v0 = vadd.f32 %v18531_v14, %v6246_v20 }
 0xb0a   : > { %v6380_v34 = vsel %vm449_vm0, %v18610_v21, 0.0 }
 0xb0b   : > { %6381 = vadd.xlane.f32.xlu1 %v6380_v34  ;;  %v14103_v13 = vpop.f32.mrb[208].mxu0  ;;  %v6377_v30 = vsel %vm449_vm0, %v18613_v0, 0.0 }
 0xb0c   : > { %v18620_v56 = vadd.f32 %v18531_v14, %v14103_v13  ;;  %v6256_v7 = vpop.f32.mrb[209].mxu0  ;;  %6378 = vadd.xlane.f32.xlu0 %v6377_v30 }
 0xb0d   : > { %v18623_v1 = vadd.f32 %v18531_v14, %v6256_v7 }
 0xb0e   : > { %v6386_v48 = vsel %vm449_vm0, %v18620_v56, 0.0 }
 0xb0f   : > { %6387 = vadd.xlane.f32.xlu1 %v6386_v48  ;;  %v14106_v43 = vpop.f32.mrb[210].mxu0  ;;  %v6383_v20 = vsel %vm449_vm0, %v18623_v1, 0.0 }
 0xb10   : > { %v18630_v34 = vadd.f32 %v18531_v14, %v14106_v43  ;;  %v6266_v25 = vpop.f32.mrb[211].mxu0  ;;  %6384 = vadd.xlane.f32.xlu0 %v6383_v20 }
 0xb11   : > { %v18633_v13 = vadd.f32 %v18531_v14, %v6266_v25 }
 0xb12   : > { %v6392_v30 = vsel %vm449_vm0, %v18630_v34, 0.0 }
 0xb13   : > { %6393 = vadd.xlane.f32.xlu1 %v6392_v30  ;;  %v14109_v7 = vpop.f32.mrb[212].mxu0  ;;  %v6389_v48 = vsel %vm449_vm0, %v18633_v13, 0.0 }
 0xb14   : > { %v18640_v32 = vadd.f32 %v18531_v14, %v14109_v7  ;;  %v6276_v39 = vpop.f32.mrb[213].mxu0  ;;  %6390 = vadd.xlane.f32.xlu0 %v6389_v48 }
 0xb15   : > { %v18643_v43 = vadd.f32 %v18531_v14, %v6276_v39 }
 0xb16   : > { %v6398_v25 = vsel %vm449_vm0, %v18640_v32, 0.0 }
 0xb17   : > { %6399 = vadd.xlane.f32.xlu1 %v6398_v25  ;;  %v14112_v20 = vpop.f32.mrb[214].mxu0  ;;  %v6395_v30 = vsel %vm449_vm0, %v18643_v43, 0.0 }
 0xb18   : > { %v18650_v52 = vadd.f32 %v18531_v14, %v14112_v20  ;;  %v6286_v44 = vpop.f32.mrb[215].mxu0  ;;  %6396 = vadd.xlane.f32.xlu0 %v6395_v30 }
 0xb19   : > { %v18653_v7 = vadd.f32 %v18531_v14, %v6286_v44 }
 0xb1a   : > { %v6404_v39 = vsel %vm449_vm0, %v18650_v52, 0.0 }
 0xb1b   : > { %6405 = vadd.xlane.f32.xlu1 %v6404_v39  ;;  %v14115_v48 = vpop.f32.mrb[216].mxu0  ;;  %v6401_v25 = vsel %vm449_vm0, %v18653_v7, 0.0 }
 0xb1c   : > { %v18660_v63 = vadd.f32 %v18531_v14, %v14115_v48  ;;  %v6296_v19 = vpop.f32.mrb[217].mxu0  ;;  %6402 = vadd.xlane.f32.xlu0 %v6401_v25 }
 0xb1d   : > { %v18663_v20 = vadd.f32 %v18531_v14, %v6296_v19 }
 0xb1e   : > { %v6410_v44 = vsel %vm449_vm0, %v18660_v63, 0.0 }
 0xb1f   : > { %6411 = vadd.xlane.f32.xlu1 %v6410_v44  ;;  %v14118_v30 = vpop.f32.mrb[218].mxu0  ;;  %v6407_v39 = vsel %vm449_vm0, %v18663_v20, 0.0 }
 0xb20   : > { %v18670_v18 = vadd.f32 %v18531_v14, %v14118_v30  ;;  %v6306_v49 = vpop.f32.mrb[219].mxu0  ;;  %6408 = vadd.xlane.f32.xlu0 %v6407_v39 }
 0xb21   : > { %v18673_v48 = vadd.f32 %v18531_v14, %v6306_v49 }
 0xb22   : > { %v6416_v19 = vsel %vm449_vm0, %v18670_v18, 0.0 }
 0xb23   : > { %6417 = vadd.xlane.f32.xlu1 %v6416_v19  ;;  %v14121_v25 = vpop.f32.mrb[220].mxu0  ;;  %v6413_v44 = vsel %vm449_vm0, %v18673_v48, 0.0 }
 0xb24   : > { %v18680_v38 = vadd.f32 %v18531_v14, %v14121_v25  ;;  %v6316_v58 = vpop.f32.mrb[221].mxu0  ;;  %6414 = vadd.xlane.f32.xlu0 %v6413_v44 }
 0xb25   : > { %v18683_v30 = vadd.f32 %v18531_v14, %v6316_v58 }
 0xb26   : > { %v6422_v49 = vsel %vm449_vm0, %v18680_v38, 0.0 }
 0xb27   : > { %6423 = vadd.xlane.f32.xlu1 %v6422_v49  ;;  %v14124_v39 = vpop.f32.mrb[222].mxu0  ;;  %v6419_v19 = vsel %vm449_vm0, %v18683_v30, 0.0 }
 0xb28   : > { %v18690_v17 = vadd.f32 %v18531_v14, %v14124_v39  ;;  %v6326_v4 = vpop.f32.mrb[223].mxu0  ;;  %6420 = vadd.xlane.f32.xlu0 %v6419_v19 }
 0xb29   : > { %v18693_v25 = vadd.f32 %v18531_v14, %v6326_v4 }
 0xb2a   : > { %v6428_v58 = vsel %vm449_vm0, %v18690_v17, 0.0 }
 0xb2b   : > { %6429 = vadd.xlane.f32.xlu1 %v6428_v58  ;;  %v6425_v44 = vsel %vm449_vm0, %v18693_v25, 0.0 }
 0xb2c   : > { %6426 = vadd.xlane.f32.xlu0 %v6425_v44 }
 0xb7c   : > { %v6340_v49 = vpop.xlane.xlu1 %6339 }
 0xb7d   : > { %v6432_v8 = vmul.f32 0.03125, %v6340_v49  ;;  %v6337_v31 = vpop.xlane.xlu0 %6336 }
 0xb7e   : > { %v6431_v3 = vmul.f32 0.03125, %v6337_v31  ;;  %v18702_v28 = vpop.f32.mrb[160].mxu1 }
 0xb7f   : > { %v18700_v39 = vsub.f32 %v18534_v42, %v6432_v8  ;;  %21588 = vst [vmem:[#allocation6_spill] sm:$0xff] %v18702_v28  ;;  %v18707_v19 = vpop.f32.mrb[161].mxu1 }
 0xb80   : > { %v18705_v4 = vsub.f32 %v18537_v29, %v6431_v3  ;;  %v6346_v14 = vpop.xlane.xlu1 %6345  ;;  %21589 = vst [vmem:[#allocation42_spill] sm:$0xff] %v18707_v19 }
 0xb81   : > { %v6434_v58 = vmul.f32 0.03125, %v6346_v14  ;;  %v6343_v35 = vpop.xlane.xlu0 %6342  ;;  %v6496_v44 = vmul.f32 %v18700_v39, %v18700_v39 }
 0xb82   : > { %v6433_v53 = vmul.f32 0.03125, %v6343_v35  ;;  %v6495_v31 = vmul.f32 %v18705_v4, %v18705_v4  ;;  %v18717_v49 = vpop.f32.mrb[162].mxu1 }
 0xb83   : > { %v18714_v8 = vsub.f32 %v18546_v57, %v6434_v58  ;;  %v6530_v42 = vsel %vm449_vm0, %v6496_v44, 0.0  ;;  %21590 = vst [vmem:[#allocation43_spill] sm:$0xff] %v18717_v49  ;;  %v18723_v36 = vpop.f32.mrb[163].mxu1 }
 0xb84   : > { %v18720_v3 = vsub.f32 %v18549_v9, %v6433_v53  ;;  %v6352_v29 = vpop.xlane.xlu1 %6351  ;;  %6531 = vadd.xlane.f32.xlu1 %v6530_v42  ;;  %v6527_v14 = vsel %vm449_vm0, %v6495_v31, 0.0  ;;  %21591 = vst [vmem:[#allocation44_spill] sm:$0xff] %v18723_v36 }
 0xb85   : > { %v6436_v35 = vmul.f32 0.03125, %v6352_v29  ;;  %6528 = vadd.xlane.f32.xlu0 %v6527_v14  ;;  %v6349_v40 = vpop.xlane.xlu0 %6348  ;;  %v6498_v57 = vmul.f32 %v18714_v8, %v18714_v8 }
 0xb86   : > { %v6435_v58 = vmul.f32 0.03125, %v6349_v40  ;;  %v6497_v44 = vmul.f32 %v18720_v3, %v18720_v3 }
 0xb87   : > { %v18730_v61 = vsub.f32 %v18558_v6, %v6436_v35  ;;  %v6536_v53 = vsel %vm449_vm0, %v6498_v57, 0.0 }
 0xb88   : > { %v18734_v9 = vsub.f32 %v18561_v26, %v6435_v58  ;;  %v6358_v31 = vpop.xlane.xlu1 %6357  ;;  %6537 = vadd.xlane.f32.xlu1 %v6536_v53  ;;  %v6533_v42 = vsel %vm449_vm0, %v6497_v44, 0.0 }
 0xb89   : > { %v6438_v29 = vmul.f32 0.03125, %v6358_v31  ;;  %6534 = vadd.xlane.f32.xlu0 %v6533_v42  ;;  %v6355_v14 = vpop.xlane.xlu0 %6354  ;;  %v6500_v40 = vmul.f32 %v18730_v61, %v18730_v61 }
 0xb8a   : > { %v6437_v50 = vmul.f32 0.03125, %v6355_v14  ;;  %v6499_v6 = vmul.f32 %v18734_v9, %v18734_v9  ;;  %v18741_v35 = vpop.f32.mrb[164].mxu1 }
 0xb8b   : > { %21592 = vst [vmem:[#allocation45_spill] sm:$0xff] %v18741_v35  ;;  %v18744_v57 = vsub.f32 %v18570_v12, %v6438_v29  ;;  %v6542_v26 = vsel %vm449_vm0, %v6500_v40, 0.0  ;;  %v18747_v58 = vpop.f32.mrb[165].mxu1 }
 0xb8c   : > { %21593 = vst [vmem:[#allocation46_spill] sm:$0xff] %v18747_v58  ;;  %v18750_v44 = vsub.f32 %v18573_v33, %v6437_v50  ;;  %v6364_v53 = vpop.xlane.xlu1 %6363  ;;  %6543 = vadd.xlane.f32.xlu1 %v6542_v26  ;;  %v6539_v31 = vsel %vm449_vm0, %v6499_v6, 0.0 }
 0xb8d   : > { %v6440_v42 = vmul.f32 0.03125, %v6364_v53  ;;  %6540 = vadd.xlane.f32.xlu0 %v6539_v31  ;;  %v6361_v14 = vpop.xlane.xlu0 %6360  ;;  %v6502_v2 = vmul.f32 %v18744_v57, %v18744_v57 }
 0xb8e   : > { %v6439_v55 = vmul.f32 0.03125, %v6361_v14  ;;  %v6501_v12 = vmul.f32 %v18750_v44, %v18750_v44 }
 0xb8f   : > { %v18758_v29 = vsub.f32 %v18580_v27, %v6440_v42  ;;  %v6548_v50 = vsel %vm449_vm0, %v6502_v2, 0.0  ;;  %v18761_v33 = vpop.f32.mrb[166].mxu1 }
 0xb90   : > { %21594 = vst [vmem:[#allocation47_spill] sm:$0xff] %v18761_v33  ;;  %v18764_v40 = vsub.f32 %v18583_v24, %v6439_v55  ;;  %v6370_v6 = vpop.xlane.xlu1 %6369  ;;  %6549 = vadd.xlane.f32.xlu1 %v6548_v50  ;;  %v6545_v26 = vsel %vm449_vm0, %v6501_v12, 0.0  ;;  %v18767_v53 = vpop.f32.mrb[167].mxu1 }
 0xb91   : > { %21595 = vst [vmem:[#allocation48_spill] sm:$0xff] %v18767_v53  ;;  %v6442_v31 = vmul.f32 0.03125, %v6370_v6  ;;  %6546 = vadd.xlane.f32.xlu0 %v6545_v26  ;;  %v6367_v14 = vpop.xlane.xlu0 %6366  ;;  %v6504_v27 = vmul.f32 %v18758_v29, %v18758_v29 }
 0xb92   : > { %v6441_v42 = vmul.f32 0.03125, %v6367_v14  ;;  %v6503_v2 = vmul.f32 %v18764_v40, %v18764_v40 }
 0xb93   : > { %v18774_v33 = vsub.f32 %v18590_v54, %v6442_v31  ;;  %v6554_v55 = vsel %vm449_vm0, %v6504_v27, 0.0 }
 0xb94   : > { %v18778_v24 = vsub.f32 %v18593_v60, %v6441_v42  ;;  %v6376_v12 = vpop.xlane.xlu1 %6375  ;;  %6555 = vadd.xlane.f32.xlu1 %v6554_v55  ;;  %v6551_v50 = vsel %vm449_vm0, %v6503_v2, 0.0 }
 0xb95   : > { %v6444_v6 = vmul.f32 0.03125, %v6376_v12  ;;  %6552 = vadd.xlane.f32.xlu0 %v6551_v50  ;;  %v6373_v26 = vpop.xlane.xlu0 %6372  ;;  %v6506_v14 = vmul.f32 %v18774_v33, %v18774_v33 }
 0xb96   : > { %v6443_v53 = vmul.f32 0.03125, %v6373_v26  ;;  %v6505_v54 = vmul.f32 %v18778_v24, %v18778_v24 }
 0xb97   : > { %v18786_v31 = vsub.f32 %v18600_v46, %v6444_v6  ;;  %v6560_v60 = vsel %vm449_vm0, %v6506_v14, 0.0  ;;  %v18789_v27 = vpop.f32.mrb[168].mxu1 }
 0xb98   : > { %21596 = vst [vmem:[#allocation49_spill] sm:$0xff] %v18789_v27  ;;  %v18792_v42 = vsub.f32 %v18603_v11, %v6443_v53  ;;  %v6382_v2 = vpop.xlane.xlu1 %6381  ;;  %6561 = vadd.xlane.f32.xlu1 %v6560_v60  ;;  %v6557_v55 = vsel %vm449_vm0, %v6505_v54, 0.0  ;;  %v18795_v12 = vpop.f32.mrb[169].mxu1 }
 0xb99   : > { %21597 = vst [vmem:[#allocation50_spill] sm:$0xff] %v18795_v12  ;;  %v6446_v50 = vmul.f32 0.03125, %v6382_v2  ;;  %6558 = vadd.xlane.f32.xlu0 %v6557_v55  ;;  %v6379_v26 = vpop.xlane.xlu0 %6378  ;;  %v6508_v46 = vmul.f32 %v18786_v31, %v18786_v31 }
 0xb9a   : > { %v6445_v6 = vmul.f32 0.03125, %v6379_v26  ;;  %v6507_v14 = vmul.f32 %v18792_v42, %v18792_v42 }
 0xb9b   : > { %v18802_v27 = vsub.f32 %v18610_v21, %v6446_v50  ;;  %v6566_v11 = vsel %vm449_vm0, %v6508_v46, 0.0 }
 0xb9c   : > { %v18806_v53 = vsub.f32 %v18613_v0, %v6445_v6  ;;  %v6388_v54 = vpop.xlane.xlu1 %6387  ;;  %6567 = vadd.xlane.f32.xlu1 %v6566_v11  ;;  %v6563_v60 = vsel %vm449_vm0, %v6507_v14, 0.0 }
 0xb9d   : > { %v6448_v2 = vmul.f32 0.03125, %v6388_v54  ;;  %6564 = vadd.xlane.f32.xlu0 %v6563_v60  ;;  %v6385_v55 = vpop.xlane.xlu0 %6384  ;;  %v6510_v26 = vmul.f32 %v18802_v27, %v18802_v27  ;;  %v18813_v50 = vpop.f32.mrb[170].mxu1 }
 0xb9e   : > { %v6447_v12 = vmul.f32 0.03125, %v6385_v55  ;;  %v6509_v21 = vmul.f32 %v18806_v53, %v18806_v53  ;;  %21598 = vst [vmem:[#allocation51_spill] sm:$0xff] %v18813_v50  ;;  %v18819_v6 = vpop.f32.mrb[171].mxu1 }
 0xb9f   : > { %v18816_v46 = vsub.f32 %v18620_v56, %v6448_v2  ;;  %v6572_v0 = vsel %vm449_vm0, %v6510_v26, 0.0  ;;  %21599 = vst [vmem:[#allocation52_spill] sm:$0xff] %v18819_v6 }
 0xba0   : > { %v18822_v14 = vsub.f32 %v18623_v1, %v6447_v12  ;;  %v6394_v11 = vpop.xlane.xlu1 %6393  ;;  %6573 = vadd.xlane.f32.xlu1 %v6572_v0  ;;  %v6569_v54 = vsel %vm449_vm0, %v6509_v21, 0.0 }
 0xba1   : > { %v6450_v60 = vmul.f32 0.03125, %v6394_v11  ;;  %6570 = vadd.xlane.f32.xlu0 %v6569_v54  ;;  %v6391_v55 = vpop.xlane.xlu0 %6390  ;;  %v6512_v50 = vmul.f32 %v18816_v46, %v18816_v46 }
 0xba2   : > { %v6449_v5 = vmul.f32 0.03125, %v6391_v55  ;;  %v6511_v56 = vmul.f32 %v18822_v14, %v18822_v14 }
 0xba3   : > { %v18830_v2 = vsub.f32 %v18630_v34, %v6450_v60  ;;  %v6578_v1 = vsel %vm449_vm0, %v6512_v50, 0.0 }
 0xba4   : > { %v18834_v12 = vsub.f32 %v18633_v13, %v6449_v5  ;;  %v6400_v26 = vpop.xlane.xlu1 %6399  ;;  %6579 = vadd.xlane.f32.xlu1 %v6578_v1  ;;  %v6575_v21 = vsel %vm449_vm0, %v6511_v56, 0.0 }
 0xba5   : > { %v6452_v0 = vmul.f32 0.03125, %v6400_v26  ;;  %6576 = vadd.xlane.f32.xlu0 %v6575_v21  ;;  %v6397_v11 = vpop.xlane.xlu0 %6396  ;;  %v6514_v54 = vmul.f32 %v18830_v2, %v18830_v2 }
 0xba6   : > { %v6451_v55 = vmul.f32 0.03125, %v6397_v11  ;;  %v18839_v6 = vpop.f32.mrb[172].mxu1  ;;  %v6513_v34 = vmul.f32 %v18834_v12, %v18834_v12 }
 0xba7   : > { %21600 = vst [vmem:[#allocation53_spill] sm:$0xff] %v18839_v6  ;;  %v18844_v50 = vsub.f32 %v18640_v32, %v6452_v0  ;;  %v18846_v5 = vpop.f32.mrb[173].mxu1  ;;  %v6584_v13 = vsel %vm449_vm0, %v6514_v54, 0.0 }
 0xba8   : > { %21601 = vst [vmem:[#allocation54_spill] sm:$0xff] %v18846_v5  ;;  %v18850_v60 = vsub.f32 %v18643_v43, %v6451_v55  ;;  %v6406_v56 = vpop.xlane.xlu1 %6405  ;;  %6585 = vadd.xlane.f32.xlu1 %v6584_v13  ;;  %v6581_v1 = vsel %vm449_vm0, %v6513_v34, 0.0 }
 0xba9   : > { %v6454_v26 = vmul.f32 0.03125, %v6406_v56  ;;  %6582 = vadd.xlane.f32.xlu0 %v6581_v1  ;;  %v6403_v21 = vpop.xlane.xlu0 %6402  ;;  %v6516_v11 = vmul.f32 %v18844_v50, %v18844_v50 }
 0xbaa   : > { %v6453_v6 = vmul.f32 0.03125, %v6403_v21  ;;  %v18855_v32 = vpop.f32.mrb[174].mxu1  ;;  %v6515_v0 = vmul.f32 %v18850_v60, %v18850_v60 }
 0xbab   : > { %21602 = vst [vmem:[#allocation55_spill] sm:$0xff] %v18855_v32  ;;  %v18860_v54 = vsub.f32 %v18650_v52, %v6454_v26  ;;  %v18862_v43 = vpop.f32.mrb[175].mxu1  ;;  %v6590_v55 = vsel %vm449_vm0, %v6516_v11, 0.0 }
 0xbac   : > { %21603 = vst [vmem:[#allocation56_spill] sm:$0xff] %v18862_v43  ;;  %v18866_v34 = vsub.f32 %v18653_v7, %v6453_v6  ;;  %v6412_v13 = vpop.xlane.xlu1 %6411  ;;  %6591 = vadd.xlane.f32.xlu1 %v6590_v55  ;;  %v6587_v56 = vsel %vm449_vm0, %v6515_v0, 0.0 }
 0xbad   : > { %v6456_v1 = vmul.f32 0.03125, %v6412_v13  ;;  %6588 = vadd.xlane.f32.xlu0 %v6587_v56  ;;  %v6409_v21 = vpop.xlane.xlu0 %6408  ;;  %v6518_v32 = vmul.f32 %v18860_v54, %v18860_v54 }
 0xbae   : > { %v6455_v5 = vmul.f32 0.03125, %v6409_v21  ;;  %v18871_v52 = vpop.f32.mrb[176].mxu1  ;;  %v6517_v26 = vmul.f32 %v18866_v34, %v18866_v34 }
 0xbaf   : > { %21604 = vst [vmem:[#allocation57_spill] sm:$0xff] %v18871_v52  ;;  %v18876_v11 = vsub.f32 %v18660_v63, %v6456_v1  ;;  %v18878_v7 = vpop.f32.mrb[177].mxu1  ;;  %v6596_v6 = vsel %vm449_vm0, %v6518_v32, 0.0 }
 0xbb0   : > { %21605 = vst [vmem:[#allocation58_spill] sm:$0xff] %v18878_v7  ;;  %v18882_v0 = vsub.f32 %v18663_v20, %v6455_v5  ;;  %v6418_v55 = vpop.xlane.xlu1 %6417  ;;  %6597 = vadd.xlane.f32.xlu1 %v6596_v6  ;;  %v6593_v13 = vsel %vm449_vm0, %v6517_v26, 0.0 }
 0xbb1   : > { %v6458_v56 = vmul.f32 0.03125, %v6418_v55  ;;  %6594 = vadd.xlane.f32.xlu0 %v6593_v13  ;;  %v6415_v21 = vpop.xlane.xlu0 %6414  ;;  %v6520_v52 = vmul.f32 %v18876_v11, %v18876_v11 }
 0xbb2   : > { %v6457_v43 = vmul.f32 0.03125, %v6415_v21  ;;  %v18887_v63 = vpop.f32.mrb[178].mxu1  ;;  %v6519_v1 = vmul.f32 %v18882_v0, %v18882_v0 }
 0xbb3   : > { %21606 = vst [vmem:[#allocation59_spill] sm:$0xff] %v18887_v63  ;;  %v18892_v32 = vsub.f32 %v18670_v18, %v6458_v56  ;;  %v18894_v20 = vpop.f32.mrb[179].mxu1  ;;  %v6602_v5 = vsel %vm449_vm0, %v6520_v52, 0.0 }
 0xbb4   : > { %21607 = vst [vmem:[#allocation60_spill] sm:$0xff] %v18894_v20  ;;  %v18898_v26 = vsub.f32 %v18673_v48, %v6457_v43  ;;  %v6424_v6 = vpop.xlane.xlu1 %6423  ;;  %6603 = vadd.xlane.f32.xlu1 %v6602_v5  ;;  %v6599_v55 = vsel %vm449_vm0, %v6519_v1, 0.0 }
 0xbb5   : > { %v6460_v13 = vmul.f32 0.03125, %v6424_v6  ;;  %6600 = vadd.xlane.f32.xlu0 %v6599_v55  ;;  %v6421_v21 = vpop.xlane.xlu0 %6420  ;;  %v6522_v63 = vmul.f32 %v18892_v32, %v18892_v32 }
 0xbb6   : > { %v6459_v7 = vmul.f32 0.03125, %v6421_v21  ;;  %v18903_v18 = vpop.f32.mrb[180].mxu1  ;;  %v6521_v56 = vmul.f32 %v18898_v26, %v18898_v26 }
 0xbb7   : > { %21608 = vst [vmem:[#allocation61_spill] sm:$0xff] %v18903_v18  ;;  %v18908_v52 = vsub.f32 %v18680_v38, %v6460_v13  ;;  %v18910_v48 = vpop.f32.mrb[181].mxu1  ;;  %v6608_v43 = vsel %vm449_vm0, %v6522_v63, 0.0 }
 0xbb8   : > { %21609 = vst [vmem:[#allocation62_spill] sm:$0xff] %v18910_v48  ;;  %v18914_v1 = vsub.f32 %v18683_v30, %v6459_v7  ;;  %6609 = vadd.xlane.f32.xlu1 %v6608_v43  ;;  %v6430_v5 = vpop.xlane.xlu1 %6429  ;;  %v6605_v6 = vsel %vm449_vm0, %v6521_v56, 0.0 }
 0xbb9   : > { %v6462_v55 = vmul.f32 0.03125, %v6430_v5  ;;  %6606 = vadd.xlane.f32.xlu0 %v6605_v6  ;;  %v6427_v21 = vpop.xlane.xlu0 %6426  ;;  %v6524_v18 = vmul.f32 %v18908_v52, %v18908_v52 }
 0xbba   : > { %v6461_v20 = vmul.f32 0.03125, %v6427_v21  ;;  %v18919_v38 = vpop.f32.mrb[182].mxu1  ;;  %v6523_v13 = vmul.f32 %v18914_v1, %v18914_v1 }
 0xbbb   : > { %21610 = vst [vmem:[#allocation63_spill] sm:$0xff] %v18919_v38  ;;  %v18924_v63 = vsub.f32 %v18690_v17, %v6462_v55  ;;  %v18926_v30 = vpop.f32.mrb[183].mxu1  ;;  %v6614_v7 = vsel %vm449_vm0, %v6524_v18, 0.0 }
 0xbbc   : > { %21611 = vst [vmem:[#allocation64_spill] sm:$0xff] %v18926_v30  ;;  %v18930_v56 = vsub.f32 %v18693_v25, %v6461_v20  ;;  %6615 = vadd.xlane.f32.xlu1 %v6614_v7  ;;  %v6611_v43 = vsel %vm449_vm0, %v6523_v13, 0.0 }
 0xbbd   : > { %6612 = vadd.xlane.f32.xlu0 %v6611_v43  ;;  %v6526_v5 = vmul.f32 %v18924_v63, %v18924_v63 }
 0xbbe   : > { %v18935_v6 = vpop.f32.mrb[184].mxu1  ;;  %v6525_v17 = vmul.f32 %v18930_v56, %v18930_v56 }
 0xbbf   : > { %21612 = vst [vmem:[#allocation65_spill] sm:$0xff] %v18935_v6  ;;  %v18939_v55 = vpop.f32.mrb[185].mxu1  ;;  %v6620_v21 = vsel %vm449_vm0, %v6526_v5, 0.0 }
 0xbc0   : > { %21613 = vst [vmem:[#allocation66_spill] sm:$0xff] %v18939_v55  ;;  %6621 = vadd.xlane.f32.xlu1 %v6620_v21  ;;  %v6617_v25 = vsel %vm449_vm0, %v6525_v17, 0.0 }
 0xbc1   : > { %6618 = vadd.xlane.f32.xlu0 %v6617_v25 }
 0xbc2   : > { %v18943_v20 = vpop.f32.mrb[186].mxu1 }
 0xbc3   : > { %21614 = vst [vmem:[#allocation67_spill] sm:$0xff] %v18943_v20  ;;  %v18945_v18 = vpop.f32.mrb[187].mxu1 }
 0xbc4   : > { %21615 = vst [vmem:[#allocation68_spill] sm:$0xff] %v18945_v18 }
 0xbc6   : > { %v18947_v13 = vpop.f32.mrb[188].mxu1 }
 0xbc7   : > { %21616 = vst [vmem:[#allocation69_spill] sm:$0xff] %v18947_v13  ;;  %v18949_v7 = vpop.f32.mrb[189].mxu1 }
 0xbc8   : > { %21617 = vst [vmem:[#allocation70_spill] sm:$0xff] %v18949_v7 }
 0xbca   : > { %v18951_v43 = vpop.f32.mrb[190].mxu1 }
 0xbcb   : > { %21618 = vst [vmem:[#allocation71_spill] sm:$0xff] %v18951_v43  ;;  %v18953_v6 = vpop.f32.mrb[191].mxu1 }
 0xbcc   : > { %21619 = vst [vmem:[#allocation72_spill] sm:$0xff] %v18953_v6 }
 0xc11   : > { %v6532_v38 = vpop.xlane.xlu1 %6531 }
 0xc12   : > { %v6624_v55 = vmul.f32 0.03125, %v6532_v38  ;;  %v6529_v30 = vpop.xlane.xlu0 %6528 }
 0xc13   : > { %v6623_v5 = vmul.f32 0.03125, %v6529_v30 }
 0xc14   : > { %v6656_v21 = vadd.f32 1e-06, %v6624_v55 }
 0xc15   : > { %v6655_v48 = vadd.f32 1e-06, %v6623_v5  ;;  %v6538_v17 = vpop.xlane.xlu1 %6537 }
 0xc16   : > { %15367 = vrsqrt.f32 %v6656_v21  ;;  %v6626_v25 = vmul.f32 0.03125, %v6538_v17  ;;  %v6535_v20 = vpop.xlane.xlu0 %6534 }
 0xc17   : > { %15369 = vrsqrt.f32 %v6655_v48  ;;  %v6625_v18 = vmul.f32 0.03125, %v6535_v20 }
 0xc18   : > { %v6658_v35 = vadd.f32 1e-06, %v6626_v25 }
 0xc19   : > { %v6657_v13 = vadd.f32 1e-06, %v6625_v18  ;;  %v6544_v10 = vpop.xlane.xlu1 %6543 }
 0xc1a   : > { %15371 = vrsqrt.f32 %v6658_v35  ;;  %v6628_v7 = vmul.f32 0.03125, %v6544_v10  ;;  %v6541_v43 = vpop.xlane.xlu0 %6540 }
 0xc1b   : > { %15373 = vrsqrt.f32 %v6657_v13  ;;  %v6627_v6 = vmul.f32 0.03125, %v6541_v43 }
 0xc1c   : > { %v6660_v58 = vadd.f32 1e-06, %v6628_v7 }
 0xc1d   : > { %v6659_v38 = vadd.f32 1e-06, %v6627_v6  ;;  %v6550_v41 = vpop.xlane.xlu1 %6549 }
 0xc1e   : > { %15375 = vrsqrt.f32 %v6660_v58  ;;  %v6630_v30 = vmul.f32 0.03125, %v6550_v41  ;;  %v6547_v55 = vpop.xlane.xlu0 %6546  ;;  %v18960_v58 = vld [vmem:[%s21422_s5] ss:$0 sm:$0xff] }
 0xc1f   : > { %15377 = vrsqrt.f32 %v6659_v38  ;;  %v6629_v5 = vmul.f32 0.03125, %v6547_v55 }
 0xc20   : > { %v15368_v21 = vpop.eup %15367  ;;  %v6662_v17 = vadd.f32 1e-06, %v6630_v30 }
 0xc21   : > { %v15370_v48 = vpop.eup %15369  ;;  %v6720_v20 = vmul.f32 %v15368_v21, %v18700_v39  ;;  %v6661_v18 = vadd.f32 1e-06, %v6629_v5  ;;  %v6556_v25 = vpop.xlane.xlu1 %6555 }
 0xc22   : > { %v6719_v10 = vmul.f32 %v15370_v48, %v18705_v4  ;;  %15379 = vrsqrt.f32 %v6662_v17  ;;  %v6632_v35 = vmul.f32 0.03125, %v6556_v25  ;;  %v6553_v13 = vpop.xlane.xlu0 %6552  ;;  %v18967_v4 = vld [vmem:[%s21423_s6] ss:$0 sm:$0xff] }
 0xc23   : > { %v6752_v41 = vmul.f32 %v18960_v58, %v6720_v20  ;;  %15381 = vrsqrt.f32 %v6661_v18  ;;  %v6631_v6 = vmul.f32 0.03125, %v6553_v13 }
 0xc24   : > { %v15372_v7 = vpop.eup %15371  ;;  %v6664_v43 = vadd.f32 1e-06, %v6632_v35  ;;  %v6751_v39 = vmul.f32 %v18960_v58, %v6719_v10 }
 0xc25   : > { %v15374_v38 = vpop.eup %15373  ;;  %v6784_v30 = vadd.f32 %v18967_v4, %v6752_v41  ;;  %v6722_v55 = vmul.f32 %v15372_v7, %v18714_v8  ;;  %v6663_v5 = vadd.f32 1e-06, %v6631_v6  ;;  %v6562_v21 = vpop.xlane.xlu1 %6561 }
 0xc26   : > { %v6721_v17 = vmul.f32 %v15374_v38, %v18720_v3  ;;  %v6634_v48 = vmul.f32 0.03125, %v6562_v21  ;;  %v6559_v20 = vpop.xlane.xlu0 %6558  ;;  %v6783_v18 = vadd.f32 %v18967_v4, %v6751_v39 }
 0xc27   : > { %v6848_v25 = vmul.f32 0.70710677, %v6784_v30  ;;  %15383 = vrsqrt.f32 %v6663_v5  ;;  %v6633_v10 = vmul.f32 0.03125, %v6559_v20  ;;  %v6754_v3 = vmul.f32 %v18960_v58, %v6722_v55 }
 0xc28   : > { %v15376_v35 = vpop.eup %15375  ;;  %15385 = vrsqrt.f32 %v6664_v43  ;;  %v6847_v13 = vmul.f32 0.70710677, %v6783_v18  ;;  %v6753_v49 = vmul.f32 %v18960_v58, %v6721_v17  ;;  %v6666_v41 = vadd.f32 1e-06, %v6634_v48 }
 0xc29   : > { %v15378_v15 = vpop.eup %15377  ;;  %15387 = verf.f32 %v6848_v25  ;;  %v6724_v8 = vmul.f32 %v15376_v35, %v18730_v61  ;;  %v6568_v6 = vpop.xlane.xlu1 %6567  ;;  %v6665_v21 = vadd.f32 1e-06, %v6633_v10  ;;  %v6786_v43 = vadd.f32 %v18967_v4, %v6754_v3 }
 0xc2a   : > { %v6723_v7 = vmul.f32 %v15378_v15, %v18734_v9  ;;  %v6636_v38 = vmul.f32 0.03125, %v6568_v6  ;;  %v6565_v39 = vpop.xlane.xlu0 %6564  ;;  %v6785_v5 = vadd.f32 %v18967_v4, %v6753_v49  ;;  %15389 = verf.f32 %v6847_v13 }
 0xc2b   : > { %v6635_v20 = vmul.f32 0.03125, %v6565_v39  ;;  %v6756_v17 = vmul.f32 %v18960_v58, %v6724_v8  ;;  %15391 = vrsqrt.f32 %v6666_v41  ;;  %v6850_v35 = vmul.f32 0.70710677, %v6786_v43 }
 0xc2c   : > { %v15380_v19 = vpop.eup %15379  ;;  %v6849_v25 = vmul.f32 0.70710677, %v6785_v5  ;;  %v6668_v9 = vadd.f32 1e-06, %v6636_v38  ;;  %v6755_v10 = vmul.f32 %v18960_v58, %v6723_v7  ;;  %15393 = vrsqrt.f32 %v6665_v21 }
 0xc2d   : > { %v15382_v61 = vpop.eup %15381  ;;  %v6726_v48 = vmul.f32 %v15380_v19, %v18744_v57  ;;  %v6574_v55 = vpop.xlane.xlu1 %6573  ;;  %v6667_v3 = vadd.f32 1e-06, %v6635_v20  ;;  %v6788_v8 = vadd.f32 %v18967_v4, %v6756_v17  ;;  %v6815_v36 = vmul.f32 0.5, %v6783_v18 }
 0xc2e   : > { %v6725_v15 = vmul.f32 %v15382_v61, %v18750_v44  ;;  %v6638_v6 = vmul.f32 0.03125, %v6574_v55  ;;  %v6571_v49 = vpop.xlane.xlu0 %6570  ;;  %15395 = verf.f32 %v6849_v25  ;;  %v6787_v45 = vadd.f32 %v18967_v4, %v6755_v10 }
 0xc2f   : > { %v6637_v39 = vmul.f32 0.03125, %v6571_v49  ;;  %v6816_v44 = vmul.f32 0.5, %v6784_v30  ;;  %15397 = verf.f32 %v6850_v35  ;;  %v6758_v38 = vmul.f32 %v18960_v58, %v6726_v48 }
 0xc30   : > { %v6670_v13 = vadd.f32 1e-06, %v6638_v6  ;;  %v6757_v19 = vmul.f32 %v18960_v58, %v6725_v15  ;;  %15399 = vrsqrt.f32 %v6668_v9  ;;  %v6817_v55 = vmul.f32 0.5, %v6785_v5 }
 0xc31   : > { %v15384_v57 = vpop.eup %15383  ;;  %v6580_v41 = vpop.xlane.xlu1 %6579  ;;  %v6669_v7 = vadd.f32 1e-06, %v6637_v39  ;;  %15401 = vrsqrt.f32 %v6667_v3  ;;  %v6851_v49 = vmul.f32 0.70710677, %v6787_v45  ;;  %v6852_v10 = vmul.f32 0.70710677, %v6788_v8 }
 0xc32   : > { %v15386_v61 = vpop.eup %15385  ;;  %v6640_v21 = vmul.f32 0.03125, %v6580_v41  ;;  %v6577_v20 = vpop.xlane.xlu0 %6576  ;;  %v6727_v25 = vmul.f32 %v15384_v57, %v18764_v40  ;;  %15403 = vrsqrt.f32 %v6670_v13  ;;  %v6789_v30 = vadd.f32 %v18967_v4, %v6757_v19 }
 0xc33   : > { %v15388_v17 = vpop.eup %15387  ;;  %v6639_v6 = vmul.f32 0.03125, %v6577_v20  ;;  %v6818_v48 = vmul.f32 0.5, %v6786_v43  ;;  %15405 = verf.f32 %v6851_v49  ;;  %v6790_v9 = vadd.f32 %v18967_v4, %v6758_v38 }
 0xc34   : > { %v6672_v15 = vadd.f32 1e-06, %v6640_v21  ;;  %v15390_v39 = vpop.eup %15389  ;;  %v6728_v5 = vmul.f32 %v15386_v61, %v18758_v29  ;;  %15407 = vrsqrt.f32 %v6669_v7  ;;  %v6912_v3 = vadd.f32 1.0, %v15388_v17 }
 0xc35   : > { %v6671_v18 = vadd.f32 1e-06, %v6639_v6  ;;  %v6586_v35 = vpop.xlane.xlu1 %6585  ;;  %v15392_v57 = vpop.eup %15391  ;;  %v6911_v21 = vadd.f32 1.0, %v15390_v39  ;;  %v6759_v20 = vmul.f32 %v18960_v58, %v6727_v25  ;;  %v18992_v6 = vmul.f32 0.5, %v6788_v8 }
 0xc36   : > { %v6642_v41 = vmul.f32 0.03125, %v6586_v35  ;;  %v6583_v40 = vpop.xlane.xlu0 %6582  ;;  %15409 = vrsqrt.f32 %v6672_v15  ;;  %v6853_v43 = vmul.f32 0.70710677, %v6789_v30  ;;  %v15394_v49 = vpop.eup %15393  ;;  %v6819_v29 = vmul.f32 0.5, %v6787_v45 }
 0xc37   : > { %v6641_v13 = vmul.f32 0.03125, %v6583_v40  ;;  %15411 = verf.f32 %v6852_v10  ;;  %v6943_v22 = vmul.f32 %v6911_v21, %v6815_v36  ;;  %v6854_v61 = vmul.f32 0.70710677, %v6790_v9 }
 0xc38   : > { %v6674_v19 = vadd.f32 1e-06, %v6642_v41  ;;  %15413 = vrsqrt.f32 %v6671_v18  ;;  %v15396_v7 = vpop.eup %15395  ;;  %v6944_v40 = vmul.f32 %v6912_v3, %v6816_v44  ;;  %v6791_v10 = vadd.f32 %v18967_v4, %v6759_v20 }
 0xc39   : > { %v6592_v38 = vpop.xlane.xlu1 %6591  ;;  %v6673_v17 = vadd.f32 1e-06, %v6641_v13  ;;  %v15398_v39 = vpop.eup %15397  ;;  %14133 = vmatprep.mubr.msk.f32.mxu1 %vm449_vm0, %v6943_v22  ;;  %v6913_v8 = vadd.f32 1.0, %v15396_v7  ;;  %v6760_v41 = vmul.f32 %v18960_v58, %v6728_v5  ;;  %v6730_v36 = vmul.f32 %v15392_v57, %v18774_v33  ;;  %v19007_v5 = vld [vmem:[%s21427_s10] sm:$0xf] }
 0xc3a   : > { %15415 = vrsqrt.f32 %v6674_v19  ;;  %v6644_v35 = vmul.f32 0.03125, %v6592_v38  ;;  %v6589_v15 = vpop.xlane.xlu0 %6588  ;;  %v15400_v18 = vpop.eup %15399  ;;  %v6729_v45 = vmul.f32 %v15394_v49, %v18778_v24  ;;  %14134 = vmatmul.mubr.msk.f32.vlgmr.msra.gmra.mrb[192].mxu1 %vm449_vm0, %v6944_v40  ;;  %v6914_v13 = vadd.f32 1.0, %v15398_v39 }
 0xc3b   : > { %v6643_v25 = vmul.f32 0.03125, %v6589_v15  ;;  %15417 = verf.f32 %v6853_v43  ;;  %v15402_v21 = vpop.eup %15401  ;;  %v6945_v3 = vmul.f32 %v6913_v8, %v6817_v55  ;;  %v19000_v19 = vmul.f32 0.5, %v6789_v30  ;;  %14246 = vmatpush3.msk.msra.mxu1 %vm2170_vm1, %v19007_v5 }
 0xc3c   : > { %v19002_v22 = vmul.f32 0.5, %v6790_v9  ;;  %15419 = verf.f32 %v6854_v61  ;;  %v15404_v33 = vpop.eup %15403  ;;  %v6676_v24 = vadd.f32 1e-06, %v6644_v35  ;;  %v6946_v43 = vmul.f32 %v6914_v13, %v6818_v48  ;;  %14359 = vmatprep.subr.msk.mxu1 %vm2170_vm1, %v19007_v5 }
 0xc3d   : > { %v6598_v44 = vpop.xlane.xlu1 %6597  ;;  %15421 = vrsqrt.f32 %v6673_v17  ;;  %v15406_v55 = vpop.eup %15405  ;;  %v6675_v30 = vadd.f32 1e-06, %v6643_v25  ;;  %14136 = vmatprep.mubr.msk.f32.mxu1 %vm449_vm0, %v6945_v3  ;;  %v6855_v49 = vmul.f32 0.70710677, %v6791_v10  ;;  %v6792_v38 = vadd.f32 %v18967_v4, %v6760_v41 }
 0xc3e   : > { %v6646_v57 = vmul.f32 0.03125, %v6598_v44  ;;  %v6595_v20 = vpop.xlane.xlu0 %6594  ;;  %v15408_v61 = vpop.eup %15407  ;;  %14137 = vmatmul.mubr.msk.f32.gmra.mrb[194].mxu1 %vm449_vm0, %v6946_v43  ;;  %v6915_v17 = vadd.f32 1.0, %v15406_v55  ;;  %v6761_v35 = vmul.f32 %v18960_v58, %v6729_v45  ;;  %v6762_v48 = vmul.f32 %v18960_v58, %v6730_v36 }
 0xc3f   : > { %v6645_v9 = vmul.f32 0.03125, %v6595_v20  ;;  %v6732_v40 = vmul.f32 %v15400_v18, %v18786_v31  ;;  %v6731_v39 = vmul.f32 %v15402_v21, %v18792_v42  ;;  %v19020_v8 = vmul.f32 0.5, %v6791_v10 }
 0xc40   : > { %v6678_v7 = vadd.f32 1e-06, %v6646_v57  ;;  %v15410_v15 = vpop.eup %15409  ;;  %15423 = verf.f32 %v6855_v49  ;;  %v6947_v3 = vmul.f32 %v6915_v17, %v6819_v29  ;;  %v6856_v36 = vmul.f32 0.70710677, %v6792_v38 }
 0xc41   : > { %v6604_v25 = vpop.xlane.xlu1 %6603  ;;  %v15412_v13 = vpop.eup %15411  ;;  %15425 = vrsqrt.f32 %v6676_v24  ;;  %v6677_v41 = vadd.f32 1e-06, %v6645_v9  ;;  %v6793_v42 = vadd.f32 %v18967_v4, %v6761_v35  ;;  %v6794_v10 = vadd.f32 %v18967_v4, %v6762_v48 }
 0xc42   : > { %v6648_v44 = vmul.f32 0.03125, %v6604_v25  ;;  %v6601_v57 = vpop.xlane.xlu0 %6600  ;;  %v15414_v20 = vpop.eup %15413  ;;  %15427 = vrsqrt.f32 %v6675_v30  ;;  %v6916_v43 = vadd.f32 1.0, %v15412_v13  ;;  %14139 = vmatprep.mubr.msk.f32.mxu1 %vm449_vm0, %v6947_v3  ;;  %v19026_v18 = vmul.f32 %v15404_v33, %v18802_v27 }
 0xc43   : > { %v6647_v45 = vmul.f32 0.03125, %v6601_v57  ;;  %15429 = vrsqrt.f32 %v6678_v7  ;;  %v6733_v29 = vmul.f32 %v15408_v61, %v18806_v53  ;;  %v19031_v9 = vmul.f32 %v15410_v15, %v18816_v46 }
 0xc44   : > { %v15416_v55 = vpop.eup %15415  ;;  %v6680_v31 = vadd.f32 1e-06, %v6648_v44  ;;  %v6948_v21 = vmul.f32 %v6916_v43, %v18992_v6  ;;  %15431 = verf.f32 %v6856_v36  ;;  %v6857_v33 = vmul.f32 0.70710677, %v6793_v42 }
 0xc45   : > { %v6610_v24 = vpop.xlane.xlu1 %6609  ;;  %v15418_v30 = vpop.eup %15417  ;;  %15433 = vrsqrt.f32 %v6677_v41  ;;  %v6679_v49 = vadd.f32 1e-06, %v6647_v45  ;;  %v6763_v53 = vmul.f32 %v18960_v58, %v6731_v39  ;;  %v6824_v25 = vmul.f32 0.5, %v6792_v38 }
 0xc46   : > { %v6650_v7 = vmul.f32 0.03125, %v6610_v24  ;;  %v6607_v17 = vpop.xlane.xlu0 %6606  ;;  %v15420_v35 = vpop.eup %15419  ;;  %14140 = vmatmul.mubr.msk.f32.gmra.mrb[196].mxu1 %vm449_vm0, %v6948_v21  ;;  %v6917_v48 = vadd.f32 1.0, %v15418_v30  ;;  %15435 = vrsqrt.f32 %v6680_v31  ;;  %v6858_v13 = vmul.f32 0.70710677, %v6794_v10 }
 0xc47   : > { %v6649_v27 = vmul.f32 0.03125, %v6607_v17  ;;  %v15422_v61 = vpop.eup %15421  ;;  %v6918_v6 = vadd.f32 1.0, %v15420_v35  ;;  %v6735_v46 = vmul.f32 %v15414_v20, %v18822_v14  ;;  %15437 = verf.f32 %v6857_v33 }
 0xc48   : > { %v6682_v15 = vadd.f32 1e-06, %v6650_v7  ;;  %v6949_v41 = vmul.f32 %v6917_v48, %v19000_v19  ;;  %v19038_v3 = vmul.f32 %v15416_v55, %v18830_v2  ;;  %15439 = vrsqrt.f32 %v6679_v49 }
 0xc49   : > { %v6616_v44 = vpop.xlane.xlu1 %6615  ;;  %v6950_v57 = vmul.f32 %v6918_v6, %v19002_v22  ;;  %v6681_v38 = vadd.f32 1e-06, %v6649_v27  ;;  %v6795_v14 = vadd.f32 %v18967_v4, %v6763_v53  ;;  %v6764_v20 = vmul.f32 %v18960_v58, %v6732_v40 }
 0xc4a   : > { %v6652_v45 = vmul.f32 0.03125, %v6616_v44  ;;  %v6613_v39 = vpop.xlane.xlu0 %6612  ;;  %v15424_v43 = vpop.eup %15423  ;;  %14142 = vmatprep.mubr.msk.f32.mxu1 %vm449_vm0, %v6949_v41  ;;  %v6737_v31 = vmul.f32 %v15422_v61, %v18834_v12  ;;  %15441 = verf.f32 %v6858_v13  ;;  %v6765_v22 = vmul.f32 %v18960_v58, %v6733_v29 }
 0xc4b   : > { %v6651_v36 = vmul.f32 0.03125, %v6613_v39  ;;  %v15426_v19 = vpop.eup %15425  ;;  %14143 = vmatmul.mubr.msk.f32.gmra.mrb[198].mxu1 %vm449_vm0, %v6950_v57  ;;  %v6919_v2 = vadd.f32 1.0, %v15424_v43  ;;  %15443 = vrsqrt.f32 %v6682_v15  ;;  %v6825_v30 = vmul.f32 0.5, %v6793_v42 }
 0xc4c   : > { %v15428_v55 = vpop.eup %15427  ;;  %v6684_v21 = vadd.f32 1e-06, %v6652_v45  ;;  %v6859_v49 = vmul.f32 0.70710677, %v6795_v14  ;;  %v6826_v27 = vmul.f32 0.5, %v6794_v10  ;;  %15445 = vrsqrt.f32 %v6681_v38 }
 0xc4d   : > { %v6622_v24 = vpop.xlane.xlu1 %6621  ;;  %v15430_v7 = vpop.eup %15429  ;;  %v6951_v17 = vmul.f32 %v6919_v2, %v19020_v8  ;;  %v6683_v35 = vadd.f32 1e-06, %v6651_v36  ;;  %v6796_v53 = vadd.f32 %v18967_v4, %v6764_v20  ;;  %v6797_v29 = vadd.f32 %v18967_v4, %v6765_v22 }
 0xc4e   : > { %v6654_v40 = vmul.f32 0.03125, %v6622_v24  ;;  %v6619_v48 = vpop.xlane.xlu0 %6618  ;;  %v15432_v12 = vpop.eup %15431  ;;  %15447 = verf.f32 %v6859_v49  ;;  %v6766_v8 = vmul.f32 %v18960_v58, %v19026_v18  ;;  %v6740_v13 = vmul.f32 %v15426_v19, %v18844_v50 }
 0xc4f   : > { %v6653_v33 = vmul.f32 0.03125, %v6619_v48  ;;  %v15434_v61 = vpop.eup %15433  ;;  %14145 = vmatprep.mubr.msk.f32.mxu1 %vm449_vm0, %v6951_v17  ;;  %v6920_v6 = vadd.f32 1.0, %v15432_v12  ;;  %v6739_v10 = vmul.f32 %v15428_v55, %v18850_v60  ;;  %15449 = vrsqrt.f32 %v6684_v21 }
 0xc50   : > { %v6686_v42 = vadd.f32 1e-06, %v6654_v40  ;;  %v6860_v15 = vmul.f32 0.70710677, %v6796_v53  ;;  %v15436_v41 = vpop.eup %15435  ;;  %v19056_v44 = vmul.f32 %v15430_v7, %v18860_v54  ;;  %15451 = vrsqrt.f32 %v6683_v35 }
 0xc51   : > { %v6952_v57 = vmul.f32 %v6920_v6, %v6824_v25  ;;  %v6685_v45 = vadd.f32 1e-06, %v6653_v33  ;;  %v15438_v39 = vpop.eup %15437  ;;  %v6861_v43 = vmul.f32 0.70710677, %v6797_v29  ;;  %v6798_v38 = vadd.f32 %v18967_v4, %v6766_v8 }
 0xc52   : > { %15453 = vrsqrt.f32 %v6686_v42  ;;  %v6767_v18 = vmul.f32 %v18960_v58, %v6735_v46  ;;  %v15440_v36 = vpop.eup %15439  ;;  %v6921_v50 = vadd.f32 1.0, %v15438_v39  ;;  %v6768_v60 = vmul.f32 %v18960_v58, %v19031_v9 }
 0xc53   : > { %14146 = vmatmul.mubr.msk.f32.gmra.mrb[200].mxu1 %vm449_vm0, %v6952_v57  ;;  %15455 = verf.f32 %v6860_v15  ;;  %v6769_v54 = vmul.f32 %v18960_v58, %v6737_v31  ;;  %v6741_v25 = vmul.f32 %v15434_v61, %v18866_v34  ;;  %v6827_v20 = vmul.f32 0.5, %v6795_v14 }
 0xc54   : > { %15457 = verf.f32 %v6861_v43  ;;  %v6862_v19 = vmul.f32 0.70710677, %v6798_v38  ;;  %v15442_v2 = vpop.eup %15441  ;;  %v6953_v22 = vmul.f32 %v6921_v50, %v6825_v30  ;;  %v6799_v46 = vadd.f32 %v18967_v4, %v6767_v18 }
 0xc55   : > { %15459 = vrsqrt.f32 %v6685_v45  ;;  %v6800_v55 = vadd.f32 %v18967_v4, %v6768_v60  ;;  %v15444_v21 = vpop.eup %15443  ;;  %v6922_v24 = vadd.f32 1.0, %v15442_v2  ;;  %v19068_v49 = vadd.f32 %v18967_v4, %v6769_v54 }
 0xc56   : > { %15461 = verf.f32 %v6862_v19  ;;  %v6770_v9 = vmul.f32 %v18960_v58, %v19038_v3  ;;  %v6744_v34 = vmul.f32 %v15436_v41, %v18876_v11  ;;  %14148 = vmatprep.mubr.msk.f32.mxu1 %vm449_vm0, %v6953_v22  ;;  %v6828_v14 = vmul.f32 0.5, %v6796_v53  ;;  %v15446_v7 = vpop.eup %15445 }
 0xc57   : > { %v6863_v31 = vmul.f32 0.70710677, %v6799_v46  ;;  %v6864_v30 = vmul.f32 0.70710677, %v6800_v55  ;;  %v6743_v17 = vmul.f32 %v15440_v36, %v18882_v0  ;;  %v6954_v35 = vmul.f32 %v6922_v24, %v6826_v27 }
 0xc58   : > { %v6829_v40 = vmul.f32 0.5, %v6797_v29  ;;  %v6865_v48 = vmul.f32 0.70710677, %v19068_v49  ;;  %v15448_v12 = vpop.eup %15447  ;;  %v6746_v33 = vmul.f32 %v15444_v21, %v18892_v32  ;;  %v19078_v3 = vadd.f32 %v18967_v4, %v6770_v9 }
 0xc59   : > { %15463 = verf.f32 %v6863_v31  ;;  %v6771_v11 = vmul.f32 %v18960_v58, %v6739_v10  ;;  %v15450_v61 = vpop.eup %15449  ;;  %14149 = vmatmul.mubr.msk.f32.gmra.mrb[202].mxu1 %vm449_vm0, %v6954_v35  ;;  %v6923_v53 = vadd.f32 1.0, %v15448_v12  ;;  %v6772_v0 = vmul.f32 %v18960_v58, %v6740_v13 }
 0xc5a   : > { %15465 = verf.f32 %v6864_v30  ;;  %v6773_v27 = vmul.f32 %v18960_v58, %v6741_v25  ;;  %v15452_v29 = vpop.eup %15451  ;;  %v6830_v6 = vmul.f32 0.5, %v6798_v38  ;;  %v6866_v32 = vmul.f32 0.70710677, %v19078_v3 }
 0xc5b   : > { %15467 = verf.f32 %v6865_v48  ;;  %v19086_v42 = vadd.f32 %v18967_v4, %v6771_v11  ;;  %v6745_v10 = vmul.f32 %v15446_v7, %v18898_v26  ;;  %v6955_v15 = vmul.f32 %v6923_v53, %v6827_v20 }
 0xc5c   : > { %v15454_v8 = vpop.eup %15453  ;;  %v19090_v41 = vadd.f32 %v18967_v4, %v6772_v0  ;;  %v19093_v57 = vadd.f32 %v18967_v4, %v6773_v27  ;;  %v6831_v45 = vmul.f32 0.5, %v6799_v46  ;;  %v6832_v39 = vmul.f32 0.5, %v6800_v55 }
 0xc5d   : > { %v15456_v13 = vpop.eup %15455  ;;  %15469 = verf.f32 %v6866_v32  ;;  %v6867_v43 = vmul.f32 0.70710677, %v19086_v42  ;;  %v6748_v18 = vmul.f32 %v15450_v61, %v18908_v52  ;;  %v6747_v36 = vmul.f32 %v15452_v29, %v18914_v1  ;;  %14151 = vmatprep.mubr.msk.f32.mxu1 %vm449_vm0, %v6955_v15 }
 0xc5e   : > { %v15458_v38 = vpop.eup %15457  ;;  %v6924_v26 = vadd.f32 1.0, %v15456_v13  ;;  %v6868_v50 = vmul.f32 0.70710677, %v19090_v41  ;;  %v6869_v25 = vmul.f32 0.70710677, %v19093_v57  ;;  %v6774_v20 = vmul.f32 %v18960_v58, %v19056_v44 }
 0xc5f   : > { %v15460_v60 = vpop.eup %15459  ;;  %v6925_v54 = vadd.f32 1.0, %v15458_v38  ;;  %15471 = verf.f32 %v6867_v43  ;;  %v6775_v52 = vmul.f32 %v18960_v58, %v6743_v17  ;;  %v6776_v1 = vmul.f32 %v18960_v58, %v6744_v34 }
 0xc60   : > { %v15462_v19 = vpop.eup %15461  ;;  %v6956_v2 = vmul.f32 %v6924_v26, %v6828_v14  ;;  %15473 = verf.f32 %v6868_v50  ;;  %v19106_v55 = vadd.f32 %v18967_v4, %v6774_v20  ;;  %v6777_v24 = vmul.f32 %v18960_v58, %v6745_v10 }
 0xc61   : > { %v6957_v22 = vmul.f32 %v6925_v54, %v6829_v40  ;;  %v6926_v46 = vadd.f32 1.0, %v15462_v19  ;;  %15475 = verf.f32 %v6869_v25  ;;  %v19110_v21 = vadd.f32 %v18967_v4, %v6775_v52 }
 0xc62   : > { %14152 = vmatmul.mubr.msk.f32.gmra.mrb[204].mxu1 %vm449_vm0, %v6956_v2  ;;  %v19113_v44 = vadd.f32 %v18967_v4, %v6776_v1  ;;  %v6778_v9 = vmul.f32 %v18960_v58, %v6746_v33  ;;  %v6750_v34 = vmul.f32 %v15454_v8, %v18924_v63  ;;  %v6749_v31 = vmul.f32 %v15460_v60, %v18930_v56 }
 0xc63   : > { %v15464_v14 = vpop.eup %15463  ;;  %14154 = vmatprep.mubr.msk.f32.mxu1 %vm449_vm0, %v6957_v22  ;;  %v6833_v30 = vmul.f32 0.5, %v19068_v49  ;;  %v6870_v7 = vmul.f32 0.70710677, %v19106_v55  ;;  %v6958_v35 = vmul.f32 %v6926_v46, %v6830_v6  ;;  %v6871_v48 = vmul.f32 0.70710677, %v19110_v21 }
 0xc64   : > { %v15466_v17 = vpop.eup %15465  ;;  %v6927_v40 = vadd.f32 1.0, %v15464_v14  ;;  %v6779_v12 = vmul.f32 %v18960_v58, %v6747_v36  ;;  %v6872_v63 = vmul.f32 0.70710677, %v19113_v44  ;;  %v19126_v56 = vadd.f32 %v18967_v4, %v6777_v24 }
 0xc65   : > { %v15468_v11 = vpop.eup %15467  ;;  %v6928_v33 = vadd.f32 1.0, %v15466_v17  ;;  %15477 = verf.f32 %v6870_v7  ;;  %v19130_v53 = vadd.f32 %v18967_v4, %v6778_v9  ;;  %v6834_v27 = vmul.f32 0.5, %v19078_v3 }
 0xc66   : > { %14155 = vmatmul.mubr.msk.f32.gmra.mrb[206].mxu1 %vm449_vm0, %v6958_v35  ;;  %v6959_v49 = vmul.f32 %v6927_v40, %v6831_v45  ;;  %v6929_v61 = vadd.f32 1.0, %v15468_v11  ;;  %15479 = verf.f32 %v6871_v48  ;;  %v6873_v29 = vmul.f32 0.70710677, %v19126_v56 }
 0xc67   : > { %v15470_v0 = vpop.eup %15469  ;;  %15481 = verf.f32 %v6872_v63  ;;  %v6960_v6 = vmul.f32 %v6928_v33, %v6832_v39  ;;  %v6874_v10 = vmul.f32 0.70710677, %v19130_v53  ;;  %v6811_v13 = vadd.f32 %v18967_v4, %v6779_v12 }
 0xc68   : > { %14157 = vmatprep.mubr.msk.f32.mxu1 %vm449_vm0, %v6959_v49  ;;  %v6961_v32 = vmul.f32 %v6929_v61, %v6833_v30  ;;  %v6930_v8 = vadd.f32 1.0, %v15470_v0  ;;  %15483 = verf.f32 %v6873_v29  ;;  %v6780_v45 = vmul.f32 %v18960_v58, %v6748_v18 }
 0xc69   : > { %v15472_v15 = vpop.eup %15471  ;;  %v6781_v43 = vmul.f32 %v18960_v58, %v6749_v31  ;;  %v6835_v36 = vmul.f32 0.5, %v19086_v42  ;;  %v6782_v39 = vmul.f32 %v18960_v58, %v6750_v34  ;;  %15485 = verf.f32 %v6874_v10 }
 0xc6a   : > { %v15474_v38 = vpop.eup %15473  ;;  %14158 = vmatmul.mubr.msk.f32.gmra.mrb[208].mxu1 %vm449_vm0, %v6960_v6  ;;  %v6962_v3 = vmul.f32 %v6930_v8, %v6834_v27  ;;  %v6931_v26 = vadd.f32 1.0, %v15472_v15  ;;  %v6875_v54 = vmul.f32 0.70710677, %v6811_v13  ;;  %v6812_v25 = vadd.f32 %v18967_v4, %v6780_v45 }
 0xc6b   : > { %v15476_v50 = vpop.eup %15475  ;;  %14160 = vmatprep.mubr.msk.f32.mxu1 %vm449_vm0, %v6961_v32  ;;  %v6932_v60 = vadd.f32 1.0, %v15474_v38  ;;  %v6813_v19 = vadd.f32 %v18967_v4, %v6781_v43  ;;  %v6814_v2 = vadd.f32 %v18967_v4, %v6782_v39  ;;  %v6837_v52 = vmul.f32 0.5, %v19093_v57 }
 0xc6c   : > { %v6963_v18 = vmul.f32 %v6931_v26, %v6835_v36  ;;  %v6933_v20 = vadd.f32 1.0, %v15476_v50  ;;  %15487 = verf.f32 %v6875_v54  ;;  %v6876_v42 = vmul.f32 0.70710677, %v6812_v25  ;;  %v19169_v26 = vld [vmem:[%s21421_s4] ss:$0 sm:$0xff] }
 0xc6d   : > { %v6836_v58 = vmul.f32 0.5, %v19090_v41  ;;  %v6877_v1 = vmul.f32 0.70710677, %v6813_v19  ;;  %v6878_v24 = vmul.f32 0.70710677, %v6814_v2  ;;  %v6839_v57 = vmul.f32 0.5, %v19110_v21 }
 0xc6e   : > { %14161 = vmatmul.mubr.msk.f32.gmra.mrb[210].mxu1 %vm449_vm0, %v6962_v3  ;;  %v6965_v46 = vmul.f32 %v6933_v20, %v6837_v52  ;;  %15489 = verf.f32 %v6876_v42  ;;  %v6838_v30 = vmul.f32 0.5, %v19106_v55  ;;  %v6841_v12 = vmul.f32 0.5, %v19126_v56 }
 0xc6f   : > { %v15478_v22 = vpop.eup %15477  ;;  %14163 = vmatprep.mubr.msk.f32.mxu1 %vm449_vm0, %v6963_v18  ;;  %v6964_v14 = vmul.f32 %v6932_v60, %v6836_v58  ;;  %15491 = verf.f32 %v6877_v1  ;;  %v6840_v21 = vmul.f32 0.5, %v19113_v44  ;;  %v6843_v0 = vmul.f32 0.5, %v6811_v13 }
 0xc70   : > { %v15480_v9 = vpop.eup %15479  ;;  %v6934_v34 = vadd.f32 1.0, %v15478_v22  ;;  %15493 = verf.f32 %v6878_v24  ;;  %v6842_v29 = vmul.f32 0.5, %v19130_v53  ;;  %v6845_v10 = vmul.f32 0.5, %v6813_v19 }
 0xc71   : > { %v15482_v4 = vpop.eup %15481  ;;  %v6935_v31 = vadd.f32 1.0, %v15480_v9  ;;  %v6844_v15 = vmul.f32 0.5, %v6812_v25  ;;  %v6846_v38 = vmul.f32 0.5, %v6814_v2 }
 0xc72   : > { %14164 = vmatmul.mubr.msk.f32.gmra.mrb[212].mxu1 %vm449_vm0, %v6964_v14  ;;  %v15484_v41 = vpop.eup %15483  ;;  %v6966_v17 = vmul.f32 %v6934_v34, %v6838_v30  ;;  %v6936_v35 = vadd.f32 1.0, %v15482_v4 }
 0xc73   : > { %14166 = vmatprep.mubr.msk.f32.mxu1 %vm449_vm0, %v6965_v46  ;;  %v6967_v7 = vmul.f32 %v6935_v31, %v6839_v57  ;;  %v6937_v40 = vadd.f32 1.0, %v15484_v41  ;;  %v15486_v48 = vpop.eup %15485 }
 0xc74   : > { %v6968_v55 = vmul.f32 %v6936_v35, %v6840_v21  ;;  %v6938_v63 = vadd.f32 1.0, %v15486_v48 }
 0xc75   : > { %v6969_v33 = vmul.f32 %v6937_v40, %v6841_v12 }
 0xc76   : > { %14167 = vmatmul.mubr.msk.f32.gmra.mrb[214].mxu1 %vm449_vm0, %v6966_v17  ;;  %v15488_v11 = vpop.eup %15487  ;;  %v6970_v32 = vmul.f32 %v6938_v63, %v6842_v29 }
 0xc77   : > { %14169 = vmatprep.mubr.msk.f32.mxu1 %vm449_vm0, %v6967_v7  ;;  %v6939_v49 = vadd.f32 1.0, %v15488_v11 }
 0xc78   : > { %v15490_v61 = vpop.eup %15489 }
 0xc79   : > { %v15492_v27 = vpop.eup %15491  ;;  %v6971_v56 = vmul.f32 %v6939_v49, %v6843_v0  ;;  %v6940_v44 = vadd.f32 1.0, %v15490_v61 }
 0xc7a   : > { %14170 = vmatmul.mubr.msk.f32.gmra.mrb[216].mxu1 %vm449_vm0, %v6968_v55  ;;  %v6941_v6 = vadd.f32 1.0, %v15492_v27  ;;  %v15494_v8 = vpop.eup %15493 }
 0xc7b   : > { %14172 = vmatprep.mubr.msk.f32.mxu1 %vm449_vm0, %v6969_v33  ;;  %v6972_v13 = vmul.f32 %v6940_v44, %v6844_v15  ;;  %v6942_v43 = vadd.f32 1.0, %v15494_v8 }
 0xc7c   : > { %v6973_v45 = vmul.f32 %v6941_v6, %v6845_v10 }
 0xc7d   : > { %v6974_v53 = vmul.f32 %v6942_v43, %v6846_v38 }
 0xc7e   : > { %14173 = vmatmul.mubr.msk.f32.gmra.mrb[218].mxu1 %vm449_vm0, %v6970_v32 }
 0xc7f   : > { %14175 = vmatprep.mubr.msk.f32.mxu1 %vm449_vm0, %v6971_v56 }
 0xc82   : > { %14176 = vmatmul.mubr.msk.f32.gmra.mrb[220].mxu1 %vm449_vm0, %v6972_v13 }
 0xc83   : > { %14178 = vmatprep.mubr.msk.f32.mxu1 %vm449_vm0, %v6973_v45 }
 0xc86   : > { %14179 = vmatmul.mubr.msk.f32.gmra.mrb[222].mxu1 %vm449_vm0, %v6974_v53 }
 0xd0d   : > { %v14135_v3 = vpop.f32.mrb[192].mxu1 }
 0xd0e   : > { %v7137_v36 = vpop.f32.mrb[193].mxu1  ;;  %v19175_v50 = vadd.f32 %v19169_v26, %v14135_v3 }
 0xd0f   : > { %v19172_v39 = vadd.f32 %v19169_v26, %v7137_v36 }
 0xd11   : > { %v14138_v60 = vpop.f32.mrb[194].mxu1  ;;  %14197 = vmatprep.mubr.msk.f32.mxu0 %vm1751_vm2, %v19172_v39 }
 0xd12   : > { %v7147_v54 = vpop.f32.mrb[195].mxu1  ;;  %14198 = vmatmul.mubr.msk.f32.vlgmr.msra.gmra.mrb[224].mxu0 %vm1751_vm2, %v19175_v50  ;;  %v19186_v18 = vadd.f32 %v19169_v26, %v14138_v60 }
 0xd13   : > { %v19182_v25 = vadd.f32 %v19169_v26, %v7147_v54  ;;  %14880 = vmatpush3.bf16.msra.mxu0 %v21550_v16 }
 0xd14   : > { %14882 = vmatprep.subr.bf16.mxu0 %v21551_v23 }
 0xd15   : > { %14200 = vmatprep.mubr.msk.f32.mxu0 %vm1751_vm2, %v19182_v25 }
 0xd16   : > { %14201 = vmatmul.mubr.msk.f32.gmra.mrb[226].mxu0 %vm1751_vm2, %v19186_v18 }
 0xd17   : > { %14884 = vmatpush3.bf16.msra.mxu0 %v21551_v23 }
 0xd18   : > { %14886 = vmatprep.subr.bf16.mxu0 %v21552_v47 }
 0xd19   : > { %v14141_v20 = vpop.f32.mrb[196].mxu1 }
 0xd1a   : > { %v7157_v19 = vpop.f32.mrb[197].mxu1  ;;  %v19199_v52 = vadd.f32 %v19169_v26, %v14141_v20 }
 0xd1b   : > { %v19196_v2 = vadd.f32 %v19169_v26, %v7157_v19  ;;  %14888 = vmatpush3.bf16.msra.mxu0 %v21552_v47 }
 0xd1c   : > { %14890 = vmatprep.subr.bf16.mxu0 %v21553_v59 }
 0xd1d   : > { %14203 = vmatprep.mubr.msk.f32.mxu0 %vm1751_vm2, %v19196_v2 }
 0xd1e   : > { %v14144_v42 = vpop.f32.mrb[198].mxu1  ;;  %14204 = vmatmul.mubr.msk.f32.gmra.mrb[228].mxu0 %vm1751_vm2, %v19199_v52 }
 0xd1f   : > { %v7167_v58 = vpop.f32.mrb[199].mxu1  ;;  %14892 = vmatpush3.bf16.msra.mxu0 %v21553_v59  ;;  %v19212_v22 = vadd.f32 %v19169_v26, %v14144_v42 }
 0xd20   : > { %v19208_v1 = vadd.f32 %v19169_v26, %v7167_v58 }
 0xd22   : > { %14206 = vmatprep.mubr.msk.f32.mxu0 %vm1751_vm2, %v19208_v1 }
 0xd23   : > { %14207 = vmatmul.mubr.msk.f32.gmra.mrb[230].mxu0 %vm1751_vm2, %v19212_v22 }
 0xd26   : > { %v14147_v46 = vpop.f32.mrb[200].mxu1 }
 0xd27   : > { %v7177_v24 = vpop.f32.mrb[201].mxu1  ;;  %v19222_v14 = vadd.f32 %v19169_v26, %v14147_v46 }
 0xd28   : > { %v19219_v9 = vadd.f32 %v19169_v26, %v7177_v24 }
 0xd2a   : > { %14209 = vmatprep.mubr.msk.f32.mxu0 %vm1751_vm2, %v19219_v9 }
 0xd2b   : > { %14210 = vmatmul.mubr.msk.f32.gmra.mrb[232].mxu0 %vm1751_vm2, %v19222_v14 }
 0xd2c   : > { %v14150_v34 = vpop.f32.mrb[202].mxu1 }
 0xd2d   : > { %v7187_v4 = vpop.f32.mrb[203].mxu1  ;;  %v19232_v31 = vadd.f32 %v19169_v26, %v14150_v34 }
 0xd2e   : > { %v19229_v57 = vadd.f32 %v19169_v26, %v7187_v4 }
 0xd30   : > { %14212 = vmatprep.mubr.msk.f32.mxu0 %vm1751_vm2, %v19229_v57 }
 0xd31   : > { %14213 = vmatmul.mubr.msk.f32.gmra.mrb[234].mxu0 %vm1751_vm2, %v19232_v31 }
 0xd35   : > { %v14153_v30 = vpop.f32.mrb[204].mxu1 }
 0xd36   : > { %v7197_v41 = vpop.f32.mrb[205].mxu1  ;;  %v19242_v17 = vadd.f32 %v19169_v26, %v14153_v30 }
 0xd37   : > { %v19239_v7 = vadd.f32 %v19169_v26, %v7197_v41 }
 0xd39   : > { %v14156_v35 = vpop.f32.mrb[206].mxu1  ;;  %14215 = vmatprep.mubr.msk.f32.mxu0 %vm1751_vm2, %v19239_v7 }
 0xd3a   : > { %v7207_v40 = vpop.f32.mrb[207].mxu1  ;;  %14216 = vmatmul.mubr.msk.f32.gmra.mrb[236].mxu0 %vm1751_vm2, %v19242_v17  ;;  %v19252_v12 = vadd.f32 %v19169_v26, %v14156_v35 }
 0xd3b   : > { %v19249_v48 = vadd.f32 %v19169_v26, %v7207_v40 }
 0xd3d   : > { %v14159_v21 = vpop.f32.mrb[208].mxu1  ;;  %14218 = vmatprep.mubr.msk.f32.mxu0 %vm1751_vm2, %v19249_v48 }
 0xd3e   : > { %v7217_v11 = vpop.f32.mrb[209].mxu1  ;;  %14219 = vmatmul.mubr.msk.f32.gmra.mrb[238].mxu0 %vm1751_vm2, %v19252_v12  ;;  %v19262_v55 = vadd.f32 %v19169_v26, %v14159_v21 }
 0xd3f   : > { %v19259_v33 = vadd.f32 %v19169_v26, %v7217_v11 }
 0xd41   : > { %v14162_v63 = vpop.f32.mrb[210].mxu1  ;;  %14221 = vmatprep.mubr.msk.f32.mxu0 %vm1751_vm2, %v19259_v33 }
 0xd42   : > { %v7227_v49 = vpop.f32.mrb[211].mxu1  ;;  %14222 = vmatmul.mubr.msk.f32.gmra.mrb[240].mxu0 %vm1751_vm2, %v19262_v55  ;;  %v19272_v0 = vadd.f32 %v19169_v26, %v14162_v63 }
 0xd43   : > { %v19269_v61 = vadd.f32 %v19169_v26, %v7227_v49 }
 0xd45   : > { %v14165_v27 = vpop.f32.mrb[212].mxu1  ;;  %14224 = vmatprep.mubr.msk.f32.mxu0 %vm1751_vm2, %v19269_v61 }
 0xd46   : > { %v7237_v29 = vpop.f32.mrb[213].mxu1  ;;  %14225 = vmatmul.mubr.msk.f32.gmra.mrb[242].mxu0 %vm1751_vm2, %v19272_v0  ;;  %v19282_v6 = vadd.f32 %v19169_v26, %v14165_v27 }
 0xd47   : > { %v19279_v56 = vadd.f32 %v19169_v26, %v7237_v29 }
 0xd49   : > { %v14168_v32 = vpop.f32.mrb[214].mxu1  ;;  %14227 = vmatprep.mubr.msk.f32.mxu0 %vm1751_vm2, %v19279_v56 }
 0xd4a   : > { %v7247_v44 = vpop.f32.mrb[215].mxu1  ;;  %14228 = vmatmul.mubr.msk.f32.gmra.mrb[244].mxu0 %vm1751_vm2, %v19282_v6  ;;  %v19292_v10 = vadd.f32 %v19169_v26, %v14168_v32 }
 0xd4b   : > { %v19289_v8 = vadd.f32 %v19169_v26, %v7247_v44 }
 0xd4d   : > { %v14171_v15 = vpop.f32.mrb[216].mxu1  ;;  %14230 = vmatprep.mubr.msk.f32.mxu0 %vm1751_vm2, %v19289_v8 }
 0xd4e   : > { %v7257_v45 = vpop.f32.mrb[217].mxu1  ;;  %14231 = vmatmul.mubr.msk.f32.gmra.mrb[246].mxu0 %vm1751_vm2, %v19292_v10  ;;  %v19302_v43 = vadd.f32 %v19169_v26, %v14171_v15 }
 0xd4f   : > { %v19299_v13 = vadd.f32 %v19169_v26, %v7257_v45 }
 0xd51   : > { %v14174_v38 = vpop.f32.mrb[218].mxu1  ;;  %14233 = vmatprep.mubr.msk.f32.mxu0 %vm1751_vm2, %v19299_v13 }
 0xd52   : > { %v7267_v53 = vpop.f32.mrb[219].mxu1  ;;  %14234 = vmatmul.mubr.msk.f32.gmra.mrb[248].mxu0 %vm1751_vm2, %v19302_v43  ;;  %v19312_v36 = vadd.f32 %v19169_v26, %v14174_v38 }
 0xd53   : > { %v19309_v3 = vadd.f32 %v19169_v26, %v7267_v53 }
 0xd55   : > { %v14177_v60 = vpop.f32.mrb[220].mxu1  ;;  %14236 = vmatprep.mubr.msk.f32.mxu0 %vm1751_vm2, %v19309_v3 }
 0xd56   : > { %v7277_v54 = vpop.f32.mrb[221].mxu1  ;;  %14237 = vmatmul.mubr.msk.f32.gmra.mrb[250].mxu0 %vm1751_vm2, %v19312_v36  ;;  %v19322_v19 = vadd.f32 %v19169_v26, %v14177_v60 }
 0xd57   : > { %v19319_v20 = vadd.f32 %v19169_v26, %v7277_v54 }
 0xd59   : > { %v14180_v42 = vpop.f32.mrb[222].mxu1  ;;  %14239 = vmatprep.mubr.msk.f32.mxu0 %vm1751_vm2, %v19319_v20 }
 0xd5a   : > { %v7287_v58 = vpop.f32.mrb[223].mxu1  ;;  %14240 = vmatmul.mubr.msk.f32.gmra.mrb[252].mxu0 %vm1751_vm2, %v19322_v19  ;;  %v19332_v24 = vadd.f32 %v19169_v26, %v14180_v42 }
 0xd5b   : > { %v19329_v46 = vadd.f32 %v19169_v26, %v7287_v58 }
 0xd5d   : > { %14242 = vmatprep.mubr.msk.f32.mxu0 %vm1751_vm2, %v19329_v46 }
 0xd5e   : > { %14243 = vmatmul.mubr.msk.f32.gmra.mrb[254].mxu0 %vm1751_vm2, %v19332_v24 }
 0xde5   : > { %v14199_v34 = vpop.f32.mrb[224].mxu0 }
 0xde6   : > { %v7458_v4 = vpop.f32.mrb[225].mxu0 }
 0xde7   : > { %14247 = vmatprep.mubr.msk.f32.mxu1 %vm2073_vm3, %v7458_v4 }
 0xde8   : > { %14248 = vmatmul.mubr.msk.f32.vlgmr.msra.gmra.mrb[224].mxu1 %vm2073_vm3, %v14199_v34 }
 0xde9   : > { %v14202_v30 = vpop.f32.mrb[226].mxu0  ;;  %14360 = vmatpush3.msk.msra.mxu1 %vm2170_vm1, %v19007_v5 }
 0xdea   : > { %v7468_v41 = vpop.f32.mrb[227].mxu0  ;;  %14902 = vmatprep.subr.bf16.mxu1 %v21554_v51 }
 0xdeb   : > { %14250 = vmatprep.mubr.msk.f32.mxu1 %vm2073_vm3, %v7468_v41 }
 0xdec   : > { %14251 = vmatmul.mubr.msk.f32.gmra.mrb[226].mxu1 %vm2073_vm3, %v14202_v30 }
 0xdf1   : > { %v14205_v26 = vpop.f32.mrb[228].mxu0 }
 0xdf2   : > { %v7478_v35 = vpop.f32.mrb[229].mxu0 }
 0xdf3   : > { %14253 = vmatprep.mubr.msk.f32.mxu1 %vm2073_vm3, %v7478_v35 }
 0xdf4   : > { %14254 = vmatmul.mubr.msk.f32.gmra.mrb[228].mxu1 %vm2073_vm3, %v14205_v26 }
 0xdf6   : > { %v14208_v40 = vpop.f32.mrb[230].mxu0 }
 0xdf7   : > { %v7488_v21 = vpop.f32.mrb[231].mxu0 }
 0xdf8   : > { %14256 = vmatprep.mubr.msk.f32.mxu1 %vm2073_vm3, %v7488_v21 }
 0xdf9   : > { %14257 = vmatmul.mubr.msk.f32.gmra.mrb[230].mxu1 %vm2073_vm3, %v14208_v40 }
 0xdfe   : > { %v14211_v5 = vpop.f32.mrb[232].mxu0 }
 0xdff   : > { %v7498_v11 = vpop.f32.mrb[233].mxu0 }
 0xe00   : > { %14259 = vmatprep.mubr.msk.f32.mxu1 %vm2073_vm3, %v7498_v11  ;;  %v12312_v11 = vld [vmem:[%s21418_s1 + $0x68] sm:$0xff] }
 0xe01   : > { %14260 = vmatmul.mubr.msk.f32.gmra.mrb[232].mxu1 %vm2073_vm3, %v14211_v5  ;;  %v12311_v5 = vld [vmem:[%s21418_s1 + $0x60] sm:$0xff] }
 0xe04   : > { %v14214_v63 = vpop.f32.mrb[234].mxu0 }
 0xe05   : > { %v7508_v49 = vpop.f32.mrb[235].mxu0 }
 0xe06   : > { %14262 = vmatprep.mubr.msk.f32.mxu1 %vm2073_vm3, %v7508_v49 }
 0xe07   : > { %14263 = vmatmul.mubr.msk.f32.gmra.mrb[234].mxu1 %vm2073_vm3, %v14214_v63  ;;  %v14893_v63 = vpack.c.bf16 %v12312_v11, %v12311_v5 }
 0xe09   : > { %14894 = vmatprep.subr.bf16.mxu0 %v14893_v63 }
 0xe0d   : > { %v14217_v27 = vpop.f32.mrb[236].mxu0 }
 0xe0e   : > { %v7518_v29 = vpop.f32.mrb[237].mxu0 }
 0xe0f   : > { %14265 = vmatprep.mubr.msk.f32.mxu1 %vm2073_vm3, %v7518_v29 }
 0xe10   : > { %14266 = vmatmul.mubr.msk.f32.gmra.mrb[236].mxu1 %vm2073_vm3, %v14217_v27 }
 0xe11   : > { %v14220_v32 = vpop.f32.mrb[238].mxu0 }
 0xe12   : > { %v7528_v44 = vpop.f32.mrb[239].mxu0 }
 0xe13   : > { %14268 = vmatprep.mubr.msk.f32.mxu1 %vm2073_vm3, %v7528_v44  ;;  %v12313_v44 = vld [vmem:[%s21418_s1 + $0x70] sm:$0xff] }
 0xe14   : > { %14269 = vmatmul.mubr.msk.f32.gmra.mrb[238].mxu1 %vm2073_vm3, %v14220_v32 }
 0xe15   : > { %v14223_v15 = vpop.f32.mrb[240].mxu0 }
 0xe16   : > { %v7538_v45 = vpop.f32.mrb[241].mxu0 }
 0xe17   : > { %14271 = vmatprep.mubr.msk.f32.mxu1 %vm2073_vm3, %v7538_v45 }
 0xe18   : > { %14272 = vmatmul.mubr.msk.f32.gmra.mrb[240].mxu1 %vm2073_vm3, %v14223_v15  ;;  %v12314_v15 = vld [vmem:[%s21418_s1 + $0x78] sm:$0xff] }
 0xe19   : > { %v14226_v38 = vpop.f32.mrb[242].mxu0 }
 0xe1a   : > { %v7548_v53 = vpop.f32.mrb[243].mxu0 }
 0xe1b   : > { %14274 = vmatprep.mubr.msk.f32.mxu1 %vm2073_vm3, %v7548_v53 }
 0xe1c   : > { %14275 = vmatmul.mubr.msk.f32.gmra.mrb[242].mxu1 %vm2073_vm3, %v14226_v38 }
 0xe1d   : > { %v14229_v60 = vpop.f32.mrb[244].mxu0 }
 0xe1e   : > { %v7558_v54 = vpop.f32.mrb[245].mxu0 }
 0xe1f   : > { %14277 = vmatprep.mubr.msk.f32.mxu1 %vm2073_vm3, %v7558_v54 }
 0xe20   : > { %14278 = vmatmul.mubr.msk.f32.gmra.mrb[244].mxu1 %vm2073_vm3, %v14229_v60  ;;  %v14897_v60 = vpack.c.bf16 %v12314_v15, %v12313_v44 }
 0xe21   : > { %v14232_v42 = vpop.f32.mrb[246].mxu0 }
 0xe22   : > { %v7568_v58 = vpop.f32.mrb[247].mxu0 }
 0xe23   : > { %14280 = vmatprep.mubr.msk.f32.mxu1 %vm2073_vm3, %v7568_v58 }
 0xe24   : > { %14281 = vmatmul.mubr.msk.f32.gmra.mrb[246].mxu1 %vm2073_vm3, %v14232_v42 }
 0xe25   : > { %v14235_v34 = vpop.f32.mrb[248].mxu0 }
 0xe26   : > { %v7578_v4 = vpop.f32.mrb[249].mxu0 }
 0xe27   : > { %14283 = vmatprep.mubr.msk.f32.mxu1 %vm2073_vm3, %v7578_v4 }
 0xe28   : > { %14284 = vmatmul.mubr.msk.f32.gmra.mrb[248].mxu1 %vm2073_vm3, %v14235_v34 }
 0xe29   : > { %v14238_v30 = vpop.f32.mrb[250].mxu0 }
 0xe2a   : > { %v7588_v41 = vpop.f32.mrb[251].mxu0 }
 0xe2b   : > { %14286 = vmatprep.mubr.msk.f32.mxu1 %vm2073_vm3, %v7588_v41 }
 0xe2c   : > { %14287 = vmatmul.mubr.msk.f32.gmra.mrb[250].mxu1 %vm2073_vm3, %v14238_v30 }
 0xe2d   : > { %v14241_v26 = vpop.f32.mrb[252].mxu0 }
 0xe2e   : > { %v7598_v35 = vpop.f32.mrb[253].mxu0 }
 0xe2f   : > { %14289 = vmatprep.mubr.msk.f32.mxu1 %vm2073_vm3, %v7598_v35 }
 0xe30   : > { %14290 = vmatmul.mubr.msk.f32.gmra.mrb[252].mxu1 %vm2073_vm3, %v14241_v26 }
 0xe31   : > { %v14244_v40 = vpop.f32.mrb[254].mxu0 }
 0xe32   : > { %v7608_v21 = vpop.f32.mrb[255].mxu0 }
 0xe33   : > { %14292 = vmatprep.mubr.msk.f32.mxu1 %vm2073_vm3, %v7608_v21 }
 0xe34   : > { %14293 = vmatmul.mubr.msk.f32.gmra.mrb[254].mxu1 %vm2073_vm3, %v14244_v40 }
 0xebb   : > { %v14249_v49 = vpop.f32.mrb[224].mxu1 }
 0xebc   : > { %v19380_v27 = vsub.f32 %v19175_v50, %v14249_v49  ;;  %v7779_v29 = vpop.f32.mrb[225].mxu1 }
 0xebd   : > { %v19383_v32 = vsub.f32 %v19172_v39, %v7779_v29 }
 0xebe   : > { %v7971_v50 = vmul.f32 %v19380_v27, %v19380_v27 }
 0xebf   : > { %v7970_v45 = vmul.f32 %v19383_v32, %v19383_v32  ;;  %v14252_v38 = vpop.f32.mrb[226].mxu1 }
 0xec0   : > { %v19396_v53 = vsub.f32 %v19186_v18, %v14252_v38  ;;  %v7789_v39 = vpop.f32.mrb[227].mxu1 }
 0xec1   : > { %v19399_v54 = vsub.f32 %v19182_v25, %v7789_v39  ;;  %14311 = vmatprep.mubr.msk.f32.mxu0 %vm1751_vm2, %v7970_v45 }
 0xec2   : > { %14312 = vmatmul.mubr.msk.f32.vlgmr.msra.gmra.mrb[0].mxu0 %vm1751_vm2, %v7971_v50  ;;  %v7973_v58 = vmul.f32 %v19396_v53, %v19396_v53 }
 0xec3   : > { %v7972_v42 = vmul.f32 %v19399_v54, %v19399_v54  ;;  %14896 = vmatpush3.bf16.msra.mxu0 %v14893_v63 }
 0xec4   : > { %14898 = vmatprep.subr.bf16.mxu0 %v14897_v60 }
 0xec5   : > { %14314 = vmatprep.mubr.msk.f32.mxu0 %vm1751_vm2, %v7972_v42 }
 0xec6   : > { %14315 = vmatmul.mubr.msk.f32.gmra.mrb[2].mxu0 %vm1751_vm2, %v7973_v58 }
 0xec7   : > { %v14255_v18 = vpop.f32.mrb[228].mxu1  ;;  %14900 = vmatpush3.bf16.msra.mxu0 %v14897_v60 }
 0xec8   : > { %v19410_v25 = vsub.f32 %v19199_v52, %v14255_v18  ;;  %v7799_v34 = vpop.f32.mrb[229].mxu1  ;;  %14910 = vmatprep.subr.bf16.mxu0 %v21550_v16 }
 0xec9   : > { %v19413_v4 = vsub.f32 %v19196_v2, %v7799_v34 }
 0xeca   : > { %v7975_v41 = vmul.f32 %v19410_v25, %v19410_v25 }
 0xecb   : > { %v7974_v30 = vmul.f32 %v19413_v4, %v19413_v4 }
 0xecc   : > { %v14258_v26 = vpop.f32.mrb[230].mxu1 }
 0xecd   : > { %v19421_v35 = vsub.f32 %v19212_v22, %v14258_v26  ;;  %v7809_v40 = vpop.f32.mrb[231].mxu1  ;;  %14317 = vmatprep.mubr.msk.f32.mxu0 %vm1751_vm2, %v7974_v30 }
 0xece   : > { %v19425_v52 = vsub.f32 %v19208_v1, %v7809_v40  ;;  %14318 = vmatmul.mubr.msk.f32.gmra.mrb[4].mxu0 %vm1751_vm2, %v7975_v41 }
 0xecf   : > { %v7977_v21 = vmul.f32 %v19421_v35, %v19421_v35 }
 0xed0   : > { %v7976_v2 = vmul.f32 %v19425_v52, %v19425_v52 }
 0xed2   : > { %14320 = vmatprep.mubr.msk.f32.mxu0 %vm1751_vm2, %v7976_v2 }
 0xed3   : > { %14321 = vmatmul.mubr.msk.f32.gmra.mrb[6].mxu0 %vm1751_vm2, %v7977_v21 }
 0xed4   : > { %v14261_v22 = vpop.f32.mrb[232].mxu1 }
 0xed5   : > { %v19435_v5 = vsub.f32 %v19222_v14, %v14261_v22  ;;  %v7819_v11 = vpop.f32.mrb[233].mxu1 }
 0xed6   : > { %v19438_v1 = vsub.f32 %v19219_v9, %v7819_v11 }
 0xed7   : > { %v7979_v49 = vmul.f32 %v19435_v5, %v19435_v5 }
 0xed8   : > { %v7978_v63 = vmul.f32 %v19438_v1, %v19438_v1 }
 0xeda   : > { %14323 = vmatprep.mubr.msk.f32.mxu0 %vm1751_vm2, %v7978_v63  ;;  %v14264_v29 = vpop.f32.mrb[234].mxu1 }
 0xedb   : > { %14324 = vmatmul.mubr.msk.f32.gmra.mrb[8].mxu0 %vm1751_vm2, %v7979_v49  ;;  %v19447_v44 = vsub.f32 %v19232_v31, %v14264_v29  ;;  %v7829_v14 = vpop.f32.mrb[235].mxu1 }
 0xedc   : > { %v19450_v15 = vsub.f32 %v19229_v57, %v7829_v14 }
 0xedd   : > { %v7981_v45 = vmul.f32 %v19447_v44, %v19447_v44 }
 0xede   : > { %v7980_v9 = vmul.f32 %v19450_v15, %v19450_v15 }
 0xee0   : > { %14326 = vmatprep.mubr.msk.f32.mxu0 %vm1751_vm2, %v7980_v9 }
 0xee1   : > { %14327 = vmatmul.mubr.msk.f32.gmra.mrb[10].mxu0 %vm1751_vm2, %v7981_v45 }
 0xee3   : > { %v14267_v38 = vpop.f32.mrb[236].mxu1 }
 0xee4   : > { %v19459_v50 = vsub.f32 %v19242_v17, %v14267_v38  ;;  %v7839_v31 = vpop.f32.mrb[237].mxu1 }
 0xee5   : > { %v19462_v39 = vsub.f32 %v19239_v7, %v7839_v31 }
 0xee6   : > { %v7983_v42 = vmul.f32 %v19459_v50, %v19459_v50 }
 0xee7   : > { %v7982_v57 = vmul.f32 %v19462_v39, %v19462_v39  ;;  %v14270_v60 = vpop.f32.mrb[238].mxu1 }
 0xee8   : > { %v19469_v58 = vsub.f32 %v19252_v12, %v14270_v60  ;;  %v7849_v18 = vpop.f32.mrb[239].mxu1 }
 0xee9   : > { %v19472_v34 = vsub.f32 %v19249_v48, %v7849_v18  ;;  %14329 = vmatprep.mubr.msk.f32.mxu0 %vm1751_vm2, %v7982_v57 }
 0xeea   : > { %14330 = vmatmul.mubr.msk.f32.gmra.mrb[12].mxu0 %vm1751_vm2, %v7983_v42  ;;  %v7985_v30 = vmul.f32 %v19469_v58, %v19469_v58 }
 0xeeb   : > { %v7984_v7 = vmul.f32 %v19472_v34, %v19472_v34  ;;  %v14273_v17 = vpop.f32.mrb[240].mxu1 }
 0xeec   : > { %v19481_v41 = vsub.f32 %v19262_v55, %v14273_v17  ;;  %v7859_v12 = vpop.f32.mrb[241].mxu1 }
 0xeed   : > { %v19484_v26 = vsub.f32 %v19259_v33, %v7859_v12  ;;  %14332 = vmatprep.mubr.msk.f32.mxu0 %vm1751_vm2, %v7984_v7 }
 0xeee   : > { %14333 = vmatmul.mubr.msk.f32.gmra.mrb[14].mxu0 %vm1751_vm2, %v7985_v30  ;;  %v7987_v2 = vmul.f32 %v19481_v41, %v19481_v41 }
 0xeef   : > { %v7986_v48 = vmul.f32 %v19484_v26, %v19484_v26  ;;  %v14276_v40 = vpop.f32.mrb[242].mxu1 }
 0xef0   : > { %v19493_v21 = vsub.f32 %v19272_v0, %v14276_v40  ;;  %v7869_v55 = vpop.f32.mrb[243].mxu1 }
 0xef1   : > { %v19496_v22 = vsub.f32 %v19269_v61, %v7869_v55  ;;  %14335 = vmatprep.mubr.msk.f32.mxu0 %vm1751_vm2, %v7986_v48 }
 0xef2   : > { %14336 = vmatmul.mubr.msk.f32.gmra.mrb[16].mxu0 %vm1751_vm2, %v7987_v2  ;;  %v7989_v63 = vmul.f32 %v19493_v21, %v19493_v21 }
 0xef3   : > { %v7988_v33 = vmul.f32 %v19496_v22, %v19496_v22  ;;  %v14279_v11 = vpop.f32.mrb[244].mxu1 }
 0xef4   : > { %v19505_v49 = vsub.f32 %v19282_v6, %v14279_v11  ;;  %v7879_v0 = vpop.f32.mrb[245].mxu1 }
 0xef5   : > { %v19508_v29 = vsub.f32 %v19279_v56, %v7879_v0  ;;  %14338 = vmatprep.mubr.msk.f32.mxu0 %vm1751_vm2, %v7988_v33 }
 0xef6   : > { %14339 = vmatmul.mubr.msk.f32.gmra.mrb[18].mxu0 %vm1751_vm2, %v7989_v63  ;;  %v7991_v9 = vmul.f32 %v19505_v49, %v19505_v49 }
 0xef7   : > { %21620 = vst [vmem:[#allocation73_spill] sm:$0xff] %v19508_v29  ;;  %v7990_v61 = vmul.f32 %v19508_v29, %v19508_v29  ;;  %v14282_v14 = vpop.f32.mrb[246].mxu1 }
 0xef8   : > { %v19517_v45 = vsub.f32 %v19292_v10, %v14282_v14  ;;  %v7889_v6 = vpop.f32.mrb[247].mxu1  ;;  %v15829_v14 = vld [vmem:[%s16060_s12 + $0x18] sm:$0xff] }
 0xef9   : > { %v19520_v38 = vsub.f32 %v19289_v8, %v7889_v6  ;;  %14341 = vmatprep.mubr.msk.f32.mxu0 %vm1751_vm2, %v7990_v61  ;;  %v15828_v61 = vld [vmem:[%s16060_s12 + $0x10] sm:$0xff]  ;;  %v15831_v6 = vld [vmem:[%s16060_s12 + $0x28] sm:$0xff] }
 0xefa   : > { %21621 = vst [vmem:[#allocation74_spill] sm:$0xff] %v19517_v45  ;;  %14342 = vmatmul.mubr.msk.f32.gmra.mrb[20].mxu0 %vm1751_vm2, %v7991_v9  ;;  %v7993_v57 = vmul.f32 %v19517_v45, %v19517_v45  ;;  %v15830_v9 = vld [vmem:[%s16060_s12 + $0x20] sm:$0xff] }
 0xefb   : > { %21622 = vst [vmem:[#allocation75_spill] sm:$0xff] %v19520_v38  ;;  %v7992_v56 = vmul.f32 %v19520_v38, %v19520_v38  ;;  %v14285_v31 = vpop.f32.mrb[248].mxu1 }
 0xefc   : > { %v19529_v60 = vsub.f32 %v19302_v43, %v14285_v31  ;;  %v7899_v10 = vpop.f32.mrb[249].mxu1  ;;  %v15833_v31 = vld [vmem:[%s16060_s12 + $0x38] sm:$0xff] }
 0xefd   : > { %v19532_v42 = vsub.f32 %v19299_v13, %v7899_v10  ;;  %14344 = vmatprep.mubr.msk.f32.mxu0 %vm1751_vm2, %v7992_v56  ;;  %v15832_v56 = vld [vmem:[%s16060_s12 + $0x30] sm:$0xff]  ;;  %v15835_v10 = vld [vmem:[%s16060_s12 + $0x48] sm:$0xff] }
 0xefe   : > { %21623 = vst [vmem:[#allocation76_spill] sm:$0xff] %v19529_v60  ;;  %14345 = vmatmul.mubr.msk.f32.gmra.mrb[22].mxu0 %vm1751_vm2, %v7993_v57  ;;  %v7995_v7 = vmul.f32 %v19529_v60, %v19529_v60  ;;  %v15834_v57 = vld [vmem:[%s16060_s12 + $0x40] sm:$0xff] }
 0xeff   : > { %21624 = vst [vmem:[#allocation77_spill] sm:$0xff] %v19532_v42  ;;  %v7994_v8 = vmul.f32 %v19532_v42, %v19532_v42  ;;  %v14288_v18 = vpop.f32.mrb[250].mxu1 }
 0xf00   : > { %v19541_v17 = vsub.f32 %v19312_v36, %v14288_v18  ;;  %v7909_v43 = vpop.f32.mrb[251].mxu1  ;;  %v15837_v18 = vld [vmem:[%s16060_s12 + $0x58] sm:$0xff] }
 0xf01   : > { %v19544_v30 = vsub.f32 %v19309_v3, %v7909_v43  ;;  %14347 = vmatprep.mubr.msk.f32.mxu0 %vm1751_vm2, %v7994_v8  ;;  %v15836_v8 = vld [vmem:[%s16060_s12 + $0x50] sm:$0xff]  ;;  %v15839_v43 = vld [vmem:[%s16060_s12 + $0x68] sm:$0xff] }
 0xf02   : > { %21625 = vst [vmem:[#allocation78_spill] sm:$0xff] %v19541_v17  ;;  %14348 = vmatmul.mubr.msk.f32.gmra.mrb[24].mxu0 %vm1751_vm2, %v7995_v7  ;;  %v7997_v48 = vmul.f32 %v19541_v17, %v19541_v17  ;;  %v15838_v7 = vld [vmem:[%s16060_s12 + $0x60] sm:$0xff] }
 0xf03   : > { %21626 = vst [vmem:[#allocation79_spill] sm:$0xff] %v19544_v30  ;;  %v7996_v13 = vmul.f32 %v19544_v30, %v19544_v30  ;;  %v14291_v12 = vpop.f32.mrb[252].mxu1 }
 0xf04   : > { %v19553_v40 = vsub.f32 %v19322_v19, %v14291_v12  ;;  %v7919_v36 = vpop.f32.mrb[253].mxu1  ;;  %v15841_v12 = vld [vmem:[%s16060_s12 + $0x78] sm:$0xff] }
 0xf05   : > { %v19556_v2 = vsub.f32 %v19319_v20, %v7919_v36  ;;  %14350 = vmatprep.mubr.msk.f32.mxu0 %vm1751_vm2, %v7996_v13  ;;  %v15840_v13 = vld [vmem:[%s16060_s12 + $0x70] sm:$0xff]  ;;  %v15843_v36 = vld [vmem:[%s16060_s12 + $0x88] sm:$0xff] }
 0xf06   : > { %21627 = vst [vmem:[#allocation80_spill] sm:$0xff] %v19553_v40  ;;  %14351 = vmatmul.mubr.msk.f32.gmra.mrb[26].mxu0 %vm1751_vm2, %v7997_v48  ;;  %v7999_v33 = vmul.f32 %v19553_v40, %v19553_v40  ;;  %v15842_v48 = vld [vmem:[%s16060_s12 + $0x80] sm:$0xff] }
 0xf07   : > { %21628 = vst [vmem:[#allocation81_spill] sm:$0xff] %v19556_v2  ;;  %v7998_v3 = vmul.f32 %v19556_v2, %v19556_v2  ;;  %v14294_v55 = vpop.f32.mrb[254].mxu1 }
 0xf08   : > { %v19565_v19 = vsub.f32 %v19332_v24, %v14294_v55  ;;  %v7929_v11 = vpop.f32.mrb[255].mxu1  ;;  %v15826_v24 = vld [vmem:[%s16060_s12] sm:$0xff]  ;;  %v15845_v55 = vld [vmem:[%s16060_s12 + $0x98] sm:$0xff] }
 0xf09   : > { %v19568_v20 = vsub.f32 %v19329_v46, %v7929_v11  ;;  %14353 = vmatprep.mubr.msk.f32.mxu0 %vm1751_vm2, %v7998_v3  ;;  %v15827_v46 = vld [vmem:[%s16060_s12 + $0x8] sm:$0xff]  ;;  %v15844_v3 = vld [vmem:[%s16060_s12 + $0x90] sm:$0xff] }
 0xf0a   : > { %21629 = vst [vmem:[#allocation82_spill] sm:$0xff] %v19565_v19  ;;  %14354 = vmatmul.mubr.msk.f32.gmra.mrb[28].mxu0 %vm1751_vm2, %v7999_v33  ;;  %v8001_v0 = vmul.f32 %v19565_v19, %v19565_v19  ;;  %v15846_v33 = vld [vmem:[%s16060_s12 + $0xa0] sm:$0xff]  ;;  %v15847_v11 = vld [vmem:[%s16060_s12 + $0xa8] sm:$0xff] }
 0xf0b   : > { %21630 = vst [vmem:[#allocation83_spill] sm:$0xff] %v19568_v20  ;;  %v8000_v63 = vmul.f32 %v19568_v20, %v19568_v20 }
 0xf0d   : > { %14356 = vmatprep.mubr.msk.f32.mxu0 %vm1751_vm2, %v8000_v63  ;;  %v15848_v63 = vld [vmem:[%s16060_s12 + $0xb0] sm:$0xff] }
 0xf0e   : > { %14357 = vmatmul.mubr.msk.f32.gmra.mrb[30].mxu0 %vm1751_vm2, %v8001_v0  ;;  %v15849_v0 = vld [vmem:[%s16060_s12 + $0xb8] sm:$0xff] }
 0xf0f   : > { %14417 = vmatprep.mubr.msk.f32.mxu0 %vm449_vm0, %v15826_v24  ;;  %v15850_v24 = vld [vmem:[%s16060_s12 + $0xc0] sm:$0xff] }
 0xf12   : > { %14418 = vmatmul.mubr.msk.f32.vlgmr.msra.gmra.mrb[32].mxu0 %vm449_vm0, %v15827_v46  ;;  %v15851_v46 = vld [vmem:[%s16060_s12 + $0xc8] sm:$0xff] }
 0xf13   : > { %14420 = vmatprep.mubr.msk.f32.mxu0 %vm449_vm0, %v15828_v61  ;;  %14912 = vmatpush3.bf16.msra.mxu0 %v21550_v16  ;;  %v15852_v61 = vld [vmem:[%s16060_s12 + $0xd0] sm:$0xff] }
 0xf14   : > { %14914 = vmatprep.subr.bf16.mxu0 %v21551_v23 }
 0xf16   : > { %14421 = vmatmul.mubr.msk.f32.gmra.mrb[34].mxu0 %vm449_vm0, %v15829_v14  ;;  %v15853_v14 = vld [vmem:[%s16060_s12 + $0xd8] sm:$0xff] }
 0xf17   : > { %14423 = vmatprep.mubr.msk.f32.mxu0 %vm449_vm0, %v15830_v9  ;;  %14916 = vmatpush3.bf16.msra.mxu0 %v21551_v23  ;;  %v15854_v9 = vld [vmem:[%s16060_s12 + $0xe0] sm:$0xff] }
 0xf18   : > { %14918 = vmatprep.subr.bf16.mxu0 %v21552_v47 }
 0xf1a   : > { %14424 = vmatmul.mubr.msk.f32.gmra.mrb[36].mxu0 %vm449_vm0, %v15831_v6  ;;  %v15855_v6 = vld [vmem:[%s16060_s12 + $0xe8] sm:$0xff] }
 0xf1b   : > { %14426 = vmatprep.mubr.msk.f32.mxu0 %vm449_vm0, %v15832_v56  ;;  %14920 = vmatpush3.bf16.msra.mxu0 %v21552_v47  ;;  %v15856_v56 = vld [vmem:[%s16060_s12 + $0xf0] sm:$0xff] }
 0xf1c   : > { %14922 = vmatprep.subr.bf16.mxu0 %v21553_v59 }
 0xf1e   : > { %14427 = vmatmul.mubr.msk.f32.gmra.mrb[38].mxu0 %vm449_vm0, %v15833_v31  ;;  %v15857_v31 = vld [vmem:[%s16060_s12 + $0xf8] sm:$0xff]  ;;  %s15868_s12 = scalar_lea.vmem %s21368_s13, 8192 }
 0xf1f   : > { %14429 = vmatprep.mubr.msk.f32.mxu0 %vm449_vm0, %v15834_v57  ;;  %14924 = vmatpush3.bf16.msra.mxu0 %v21553_v59  ;;  %p15869_p11 = scmp.ne.s32.totalorder %s21368_s13, %s15868_s12  ;;  %p15876_p1 = scmp.lt.s32.totalorder %s15874_s30, %s15868_s12 }
 0xf20   : > { %14926 = vmatprep.subr.bf16.mxu0 %v21550_v16 }
 0xf21   : > { %p15870_p12 = pnand %p15869_p11, %p16034_p5  ;;  %p15877_p2 = por %p15876_p1, %p15875_p0 }
 0xf22   : > { %14430 = vmatmul.mubr.msk.f32.gmra.mrb[40].mxu0 %vm449_vm0, %v15835_v10 }
 0xf23   : > { %14432 = vmatprep.mubr.msk.f32.mxu0 %vm449_vm0, %v15836_v8  ;;  %p15871_p13 = pneg %p15870_p12 }
 0xf25   : > { %p15878_p3 = pnand %p15877_p2, %p15871_p13 }
 0xf26   : > { %14433 = vmatmul.mubr.msk.f32.gmra.mrb[42].mxu0 %vm449_vm0, %v15837_v18 }
 0xf27   : > { %14435 = vmatprep.mubr.msk.f32.mxu0 %vm449_vm0, %v15838_v7 }
 0xf2a   : > { %14436 = vmatmul.mubr.msk.f32.gmra.mrb[44].mxu0 %vm449_vm0, %v15839_v43 }
 0xf2b   : > { %14438 = vmatprep.mubr.msk.f32.mxu0 %vm449_vm0, %v15840_v13 }
 0xf2e   : > { %14439 = vmatmul.mubr.msk.f32.gmra.mrb[46].mxu0 %vm449_vm0, %v15841_v12 }
 0xf2f   : > { %14441 = vmatprep.mubr.msk.f32.mxu0 %vm449_vm0, %v15842_v48 }
 0xf32   : > { %14442 = vmatmul.mubr.msk.f32.gmra.mrb[48].mxu0 %vm449_vm0, %v15843_v36 }
 0xf33   : > { %14444 = vmatprep.mubr.msk.f32.mxu0 %vm449_vm0, %v15844_v3 }
 0xf36   : > { %14445 = vmatmul.mubr.msk.f32.gmra.mrb[50].mxu0 %vm449_vm0, %v15845_v55 }
 0xf37   : > { %14447 = vmatprep.mubr.msk.f32.mxu0 %vm449_vm0, %v15846_v33 }
 0xf3a   : > { %14448 = vmatmul.mubr.msk.f32.gmra.mrb[52].mxu0 %vm449_vm0, %v15847_v11 }
 0xf3b   : > { %14450 = vmatprep.mubr.msk.f32.mxu0 %vm449_vm0, %v15848_v63 }
 0xf3e   : > { %14451 = vmatmul.mubr.msk.f32.gmra.mrb[54].mxu0 %vm449_vm0, %v15849_v0 }
 0xf3f   : > { %14453 = vmatprep.mubr.msk.f32.mxu0 %vm449_vm0, %v15850_v24 }
 0xf42   : > { %14454 = vmatmul.mubr.msk.f32.gmra.mrb[56].mxu0 %vm449_vm0, %v15851_v46 }
 0xf43   : > { %14456 = vmatprep.mubr.msk.f32.mxu0 %vm449_vm0, %v15852_v61 }
 0xf46   : > { %14457 = vmatmul.mubr.msk.f32.gmra.mrb[58].mxu0 %vm449_vm0, %v15853_v14 }
 0xf47   : > { %14459 = vmatprep.mubr.msk.f32.mxu0 %vm449_vm0, %v15854_v9  ;;  %v15858_v9 = vld [vmem:[%s21427_s10] sm:$0xf] }
 0xf4a   : > { %14460 = vmatmul.mubr.msk.f32.gmra.mrb[60].mxu0 %vm449_vm0, %v15855_v6 }
 0xf4b   : > { %14462 = vmatprep.mubr.msk.f32.mxu0 %vm449_vm0, %v15856_v56 }
 0xf4e   : > { %14463 = vmatmul.mubr.msk.f32.gmra.mrb[62].mxu0 %vm449_vm0, %v15857_v31 }
 0xf95   : > { %v14313_v57 = vpop.f32.mrb[0].mxu0 }
 0xf96   : > { %v8170_v10 = vadd.f32 1e-06, %v14313_v57  ;;  %v8164_v8 = vpop.f32.mrb[1].mxu0 }
 0xf97   : > { %v8165_v18 = vadd.f32 1e-06, %v8164_v8 }
 0xf99   : > { %15495 = vrsqrt.f32 %v8165_v18  ;;  %v14316_v7 = vpop.f32.mrb[2].mxu0 }
 0xf9a   : > { %15497 = vrsqrt.f32 %v8170_v10  ;;  %v8180_v43 = vadd.f32 1e-06, %v14316_v7  ;;  %v8174_v13 = vpop.f32.mrb[3].mxu0 }
 0xf9b   : > { %v8175_v12 = vadd.f32 1e-06, %v8174_v13 }
 0xf9d   : > { %15499 = vrsqrt.f32 %v8175_v12 }
 0xf9e   : > { %15501 = vrsqrt.f32 %v8180_v43 }
 0xfa1   : > { %v14319_v48 = vpop.f32.mrb[4].mxu0 }
 0xfa2   : > { %v8190_v36 = vadd.f32 1e-06, %v14319_v48  ;;  %v8184_v3 = vpop.f32.mrb[5].mxu0 }
 0xfa3   : > { %v8185_v55 = vadd.f32 1e-06, %v8184_v3  ;;  %v15496_v33 = vpop.eup %15495 }
 0xfa4   : > { %v15498_v11 = vpop.eup %15497  ;;  %14361 = vmatprep.mubr.msk.f32.mxu1 %vm2073_vm3, %v15496_v33 }
 0xfa5   : > { %15503 = vrsqrt.f32 %v8185_v55  ;;  %14362 = vmatmul.mubr.msk.f32.vlgmr.msra.gmra.mrb[0].mxu1 %vm2073_vm3, %v15498_v11 }
 0xfa6   : > { %15505 = vrsqrt.f32 %v8190_v36  ;;  %v14322_v63 = vpop.f32.mrb[6].mxu0  ;;  %14904 = vmatpush3.bf16.msra.mxu1 %v21554_v51 }
 0xfa7   : > { %v8200_v0 = vadd.f32 1e-06, %v14322_v63  ;;  %v8194_v24 = vpop.f32.mrb[7].mxu0  ;;  %v15500_v46 = vpop.eup %15499  ;;  %14906 = vmatprep.subr.bf16.mxu1 %v21587_v37 }
 0xfa8   : > { %v8195_v61 = vadd.f32 1e-06, %v8194_v24  ;;  %v15502_v14 = vpop.eup %15501  ;;  %14364 = vmatprep.mubr.msk.f32.mxu1 %vm2073_vm3, %v15500_v46 }
 0xfa9   : > { %14365 = vmatmul.mubr.msk.f32.gmra.mrb[2].mxu1 %vm2073_vm3, %v15502_v14 }
 0xfaa   : > { %15507 = vrsqrt.f32 %v8195_v61  ;;  %14908 = vmatpush3.bf16.msra.mxu1 %v21587_v37 }
 0xfab   : > { %15509 = vrsqrt.f32 %v8200_v0  ;;  %14585 = vmatprep.subr.msk.mxu1 %vm2170_vm1, %v15858_v9 }
 0xfae   : > { %v14325_v51 = vpop.f32.mrb[8].mxu0 }
 0xfaf   : > { %v15504_v6 = vpop.eup %15503  ;;  %v8210_v56 = vadd.f32 1e-06, %v14325_v51  ;;  %v8204_v31 = vpop.f32.mrb[9].mxu0 }
 0xfb0   : > { %v15506_v57 = vpop.eup %15505  ;;  %v8205_v10 = vadd.f32 1e-06, %v8204_v31  ;;  %14367 = vmatprep.mubr.msk.f32.mxu1 %vm2073_vm3, %v15504_v6 }
 0xfb1   : > { %14368 = vmatmul.mubr.msk.f32.gmra.mrb[4].mxu1 %vm2073_vm3, %v15506_v57 }
 0xfb2   : > { %15511 = vrsqrt.f32 %v8205_v10 }
 0xfb3   : > { %15513 = vrsqrt.f32 %v8210_v56 }
 0xfb4   : > { %v15508_v8 = vpop.eup %15507  ;;  %v14328_v18 = vpop.f32.mrb[10].mxu0 }
 0xfb5   : > { %v15510_v37 = vpop.eup %15509  ;;  %14370 = vmatprep.mubr.msk.f32.mxu1 %vm2073_vm3, %v15508_v8  ;;  %v8220_v7 = vadd.f32 1e-06, %v14328_v18  ;;  %v8214_v43 = vpop.f32.mrb[11].mxu0 }
 0xfb6   : > { %14371 = vmatmul.mubr.msk.f32.gmra.mrb[6].mxu1 %vm2073_vm3, %v15510_v37  ;;  %v8215_v13 = vadd.f32 1e-06, %v8214_v43 }
 0xfb8   : > { %15515 = vrsqrt.f32 %v8215_v13 }
 0xfb9   : > { %15517 = vrsqrt.f32 %v8220_v7 }
 0xfbc   : > { %v15512_v12 = vpop.eup %15511 }
 0xfbd   : > { %v15514_v48 = vpop.eup %15513  ;;  %v14331_v36 = vpop.f32.mrb[12].mxu0  ;;  %14373 = vmatprep.mubr.msk.f32.mxu1 %vm2073_vm3, %v15512_v12 }
 0xfbe   : > { %v8230_v3 = vadd.f32 1e-06, %v14331_v36  ;;  %v8224_v55 = vpop.f32.mrb[13].mxu0  ;;  %14374 = vmatmul.mubr.msk.f32.gmra.mrb[8].mxu1 %vm2073_vm3, %v15514_v48 }
 0xfbf   : > { %v8225_v33 = vadd.f32 1e-06, %v8224_v55 }
 0xfc1   : > { %15519 = vrsqrt.f32 %v8225_v33  ;;  %v14334_v11 = vpop.f32.mrb[14].mxu0 }
 0xfc2   : > { %15521 = vrsqrt.f32 %v8230_v3  ;;  %v8240_v63 = vadd.f32 1e-06, %v14334_v11  ;;  %v8234_v0 = vpop.f32.mrb[15].mxu0  ;;  %v15516_v24 = vpop.eup %15515 }
 0xfc3   : > { %v8235_v46 = vadd.f32 1e-06, %v8234_v0  ;;  %v15518_v61 = vpop.eup %15517  ;;  %14376 = vmatprep.mubr.msk.f32.mxu1 %vm2073_vm3, %v15516_v24 }
 0xfc4   : > { %14377 = vmatmul.mubr.msk.f32.gmra.mrb[10].mxu1 %vm2073_vm3, %v15518_v61 }
 0xfc5   : > { %15523 = vrsqrt.f32 %v8235_v46  ;;  %v14337_v14 = vpop.f32.mrb[16].mxu0 }
 0xfc6   : > { %15525 = vrsqrt.f32 %v8240_v63  ;;  %v8250_v9 = vadd.f32 1e-06, %v14337_v14  ;;  %v8244_v51 = vpop.f32.mrb[17].mxu0 }
 0xfc7   : > { %v8245_v6 = vadd.f32 1e-06, %v8244_v51 }
 0xfc9   : > { %15527 = vrsqrt.f32 %v8245_v6  ;;  %v14340_v56 = vpop.f32.mrb[18].mxu0 }
 0xfca   : > { %15529 = vrsqrt.f32 %v8250_v9  ;;  %v8260_v31 = vadd.f32 1e-06, %v14340_v56  ;;  %v8254_v57 = vpop.f32.mrb[19].mxu0 }
 0xfcb   : > { %v15520_v10 = vpop.eup %15519  ;;  %v8255_v8 = vadd.f32 1e-06, %v8254_v57 }
 0xfcc   : > { %v15522_v37 = vpop.eup %15521  ;;  %14379 = vmatprep.mubr.msk.f32.mxu1 %vm2073_vm3, %v15520_v10 }
 0xfcd   : > { %15531 = vrsqrt.f32 %v8255_v8  ;;  %v14343_v18 = vpop.f32.mrb[20].mxu0  ;;  %14380 = vmatmul.mubr.msk.f32.gmra.mrb[12].mxu1 %vm2073_vm3, %v15522_v37 }
 0xfce   : > { %15533 = vrsqrt.f32 %v8260_v31  ;;  %v8270_v7 = vadd.f32 1e-06, %v14343_v18  ;;  %v8264_v43 = vpop.f32.mrb[21].mxu0 }
 0xfcf   : > { %v15524_v13 = vpop.eup %15523  ;;  %v8265_v12 = vadd.f32 1e-06, %v8264_v43 }
 0xfd0   : > { %v15526_v48 = vpop.eup %15525  ;;  %14382 = vmatprep.mubr.msk.f32.mxu1 %vm2073_vm3, %v15524_v13 }
 0xfd1   : > { %15535 = vrsqrt.f32 %v8265_v12  ;;  %v14346_v36 = vpop.f32.mrb[22].mxu0  ;;  %14383 = vmatmul.mubr.msk.f32.gmra.mrb[14].mxu1 %vm2073_vm3, %v15526_v48 }
 0xfd2   : > { %15537 = vrsqrt.f32 %v8270_v7  ;;  %v8280_v3 = vadd.f32 1e-06, %v14346_v36  ;;  %v8274_v55 = vpop.f32.mrb[23].mxu0 }
 0xfd3   : > { %v15528_v33 = vpop.eup %15527  ;;  %v8275_v11 = vadd.f32 1e-06, %v8274_v55 }
 0xfd4   : > { %v15530_v63 = vpop.eup %15529  ;;  %14385 = vmatprep.mubr.msk.f32.mxu1 %vm2073_vm3, %v15528_v33 }
 0xfd5   : > { %15539 = vrsqrt.f32 %v8275_v11  ;;  %v14349_v0 = vpop.f32.mrb[24].mxu0  ;;  %14386 = vmatmul.mubr.msk.f32.gmra.mrb[16].mxu1 %vm2073_vm3, %v15530_v63  ;;  %v19686_v63 = vld [vmem:[%s21419_s2] ss:$0 sm:$0xff] }
 0xfd6   : > { %15541 = vrsqrt.f32 %v8280_v3  ;;  %v8290_v24 = vadd.f32 1e-06, %v14349_v0  ;;  %v8284_v46 = vpop.f32.mrb[25].mxu0 }
 0xfd7   : > { %v15532_v61 = vpop.eup %15531  ;;  %v8285_v14 = vadd.f32 1e-06, %v8284_v46 }
 0xfd8   : > { %v15534_v9 = vpop.eup %15533  ;;  %14388 = vmatprep.mubr.msk.f32.mxu1 %vm2073_vm3, %v15532_v61 }
 0xfd9   : > { %15543 = vrsqrt.f32 %v8285_v14  ;;  %v14352_v51 = vpop.f32.mrb[26].mxu0  ;;  %14389 = vmatmul.mubr.msk.f32.gmra.mrb[18].mxu1 %vm2073_vm3, %v15534_v9 }
 0xfda   : > { %15545 = vrsqrt.f32 %v8290_v24  ;;  %v8300_v6 = vadd.f32 1e-06, %v14352_v51  ;;  %v8294_v56 = vpop.f32.mrb[27].mxu0 }
 0xfdb   : > { %v15536_v31 = vpop.eup %15535  ;;  %v8295_v57 = vadd.f32 1e-06, %v8294_v56 }
 0xfdc   : > { %v15538_v10 = vpop.eup %15537  ;;  %14391 = vmatprep.mubr.msk.f32.mxu1 %vm2073_vm3, %v15536_v31 }
 0xfdd   : > { %15547 = vrsqrt.f32 %v8295_v57  ;;  %v14355_v8 = vpop.f32.mrb[28].mxu0  ;;  %14392 = vmatmul.mubr.msk.f32.gmra.mrb[20].mxu1 %vm2073_vm3, %v15538_v10 }
 0xfde   : > { %15549 = vrsqrt.f32 %v8300_v6  ;;  %v8310_v37 = vadd.f32 1e-06, %v14355_v8  ;;  %v8304_v18 = vpop.f32.mrb[29].mxu0 }
 0xfdf   : > { %v15540_v7 = vpop.eup %15539  ;;  %v8305_v43 = vadd.f32 1e-06, %v8304_v18 }
 0xfe0   : > { %v15542_v13 = vpop.eup %15541  ;;  %14394 = vmatprep.mubr.msk.f32.mxu1 %vm2073_vm3, %v15540_v7 }
 0xfe1   : > { %15551 = vrsqrt.f32 %v8305_v43  ;;  %v14358_v12 = vpop.f32.mrb[30].mxu0  ;;  %14395 = vmatmul.mubr.msk.f32.gmra.mrb[22].mxu1 %vm2073_vm3, %v15542_v13 }
 0xfe2   : > { %15553 = vrsqrt.f32 %v8310_v37  ;;  %v8320_v48 = vadd.f32 1e-06, %v14358_v12  ;;  %v8314_v36 = vpop.f32.mrb[31].mxu0 }
 0xfe3   : > { %v15544_v3 = vpop.eup %15543  ;;  %v8315_v55 = vadd.f32 1e-06, %v8314_v36 }
 0xfe4   : > { %v15546_v33 = vpop.eup %15545  ;;  %14397 = vmatprep.mubr.msk.f32.mxu1 %vm2073_vm3, %v15544_v3 }
 0xfe5   : > { %15555 = vrsqrt.f32 %v8315_v55  ;;  %14398 = vmatmul.mubr.msk.f32.gmra.mrb[24].mxu1 %vm2073_vm3, %v15546_v33  ;;  %v14419_v11 = vpop.f32.mrb[32].mxu0 }
 0xfe6   : > { %15557 = vrsqrt.f32 %v8320_v48  ;;  %v19689_v0 = vadd.f32 %v19686_v63, %v14419_v11  ;;  %v8875_v24 = vpop.f32.mrb[33].mxu0 }
 0xfe7   : > { %v15548_v46 = vpop.eup %15547  ;;  %v19692_v61 = vadd.f32 %v19686_v63, %v8875_v24 }
 0xfe8   : > { %v15550_v14 = vpop.eup %15549  ;;  %14400 = vmatprep.mubr.msk.f32.mxu1 %vm2073_vm3, %v15548_v46  ;;  %v9037_v9 = vsel %vm449_vm0, %v19689_v0, 0.0 }
 0xfe9   : > { %14401 = vmatmul.mubr.msk.f32.gmra.mrb[26].mxu1 %vm2073_vm3, %v15550_v14  ;;  %9038 = vadd.xlane.f32.xlu1 %v9037_v9  ;;  %v14422_v51 = vpop.f32.mrb[34].mxu0  ;;  %v9034_v6 = vsel %vm449_vm0, %v19692_v61, 0.0 }
 0xfea   : > { %v19701_v56 = vadd.f32 %v19686_v63, %v14422_v51  ;;  %v8885_v31 = vpop.f32.mrb[35].mxu0  ;;  %9035 = vadd.xlane.f32.xlu0 %v9034_v6 }
 0xfeb   : > { %v15552_v57 = vpop.eup %15551  ;;  %v19704_v10 = vadd.f32 %v19686_v63, %v8885_v31 }
 0xfec   : > { %v15554_v8 = vpop.eup %15553  ;;  %14403 = vmatprep.mubr.msk.f32.mxu1 %vm2073_vm3, %v15552_v57  ;;  %v9043_v37 = vsel %vm449_vm0, %v19701_v56, 0.0 }
 0xfed   : > { %14404 = vmatmul.mubr.msk.f32.gmra.mrb[28].mxu1 %vm2073_vm3, %v15554_v8  ;;  %9044 = vadd.xlane.f32.xlu1 %v9043_v37  ;;  %v14425_v18 = vpop.f32.mrb[36].mxu0  ;;  %v9040_v7 = vsel %vm449_vm0, %v19704_v10, 0.0 }
 0xfee   : > { %v19713_v43 = vadd.f32 %v19686_v63, %v14425_v18  ;;  %v8895_v13 = vpop.f32.mrb[37].mxu0  ;;  %9041 = vadd.xlane.f32.xlu0 %v9040_v7 }
 0xfef   : > { %v15556_v12 = vpop.eup %15555  ;;  %v19716_v48 = vadd.f32 %v19686_v63, %v8895_v13 }
 0xff0   : > { %v15558_v36 = vpop.eup %15557  ;;  %14406 = vmatprep.mubr.msk.f32.mxu1 %vm2073_vm3, %v15556_v12  ;;  %v9049_v3 = vsel %vm449_vm0, %v19713_v43, 0.0 }
 0xff1   : > { %9050 = vadd.xlane.f32.xlu1 %v9049_v3  ;;  %14407 = vmatmul.mubr.msk.f32.gmra.mrb[30].mxu1 %vm2073_vm3, %v15558_v36  ;;  %v14428_v55 = vpop.f32.mrb[38].mxu0  ;;  %v9046_v33 = vsel %vm449_vm0, %v19716_v48, 0.0 }
 0xff2   : > { %v19725_v11 = vadd.f32 %v19686_v63, %v14428_v55  ;;  %v8905_v24 = vpop.f32.mrb[39].mxu0  ;;  %9047 = vadd.xlane.f32.xlu0 %v9046_v33 }
 0xff3   : > { %v19728_v46 = vadd.f32 %v19686_v63, %v8905_v24 }
 0xff4   : > { %v9055_v14 = vsel %vm449_vm0, %v19725_v11, 0.0 }
 0xff5   : > { %9056 = vadd.xlane.f32.xlu1 %v9055_v14  ;;  %v14431_v9 = vpop.f32.mrb[40].mxu0  ;;  %v9052_v51 = vsel %vm449_vm0, %v19728_v46, 0.0 }
 0xff6   : > { %v19735_v6 = vadd.f32 %v19686_v63, %v14431_v9  ;;  %v8915_v31 = vpop.f32.mrb[41].mxu0  ;;  %9053 = vadd.xlane.f32.xlu0 %v9052_v51 }
 0xff7   : > { %v19738_v57 = vadd.f32 %v19686_v63, %v8915_v31 }
 0xff8   : > { %v9061_v8 = vsel %vm449_vm0, %v19735_v6, 0.0 }
 0xff9   : > { %9062 = vadd.xlane.f32.xlu1 %v9061_v8  ;;  %v14434_v37 = vpop.f32.mrb[42].mxu0  ;;  %v9058_v18 = vsel %vm449_vm0, %v19738_v57, 0.0 }
 0xffa   : > { %v19745_v7 = vadd.f32 %v19686_v63, %v14434_v37  ;;  %v8925_v13 = vpop.f32.mrb[43].mxu0  ;;  %9059 = vadd.xlane.f32.xlu0 %v9058_v18 }
 0xffb   : > { %v19748_v12 = vadd.f32 %v19686_v63, %v8925_v13 }
 0xffc   : > { %v9067_v36 = vsel %vm449_vm0, %v19745_v7, 0.0 }
 0xffd   : > { %9068 = vadd.xlane.f32.xlu1 %v9067_v36  ;;  %v14437_v3 = vpop.f32.mrb[44].mxu0  ;;  %v9064_v55 = vsel %vm449_vm0, %v19748_v12, 0.0 }
 0xffe   : > { %v19755_v33 = vadd.f32 %v19686_v63, %v14437_v3  ;;  %v8935_v24 = vpop.f32.mrb[45].mxu0  ;;  %9065 = vadd.xlane.f32.xlu0 %v9064_v55 }
 0xfff   : > { %v19758_v14 = vadd.f32 %v19686_v63, %v8935_v24 }
0x1000   : > { %v9073_v9 = vsel %vm449_vm0, %v19755_v33, 0.0 }
0x1001   : > { %9074 = vadd.xlane.f32.xlu1 %v9073_v9  ;;  %v14440_v51 = vpop.f32.mrb[46].mxu0  ;;  %v9070_v31 = vsel %vm449_vm0, %v19758_v14, 0.0 }
0x1002   : > { %v19765_v8 = vadd.f32 %v19686_v63, %v14440_v51  ;;  %v8945_v37 = vpop.f32.mrb[47].mxu0  ;;  %9071 = vadd.xlane.f32.xlu0 %v9070_v31 }
0x1003   : > { %v19768_v18 = vadd.f32 %v19686_v63, %v8945_v37 }
0x1004   : > { %v9079_v13 = vsel %vm449_vm0, %v19765_v8, 0.0 }
0x1005   : > { %9080 = vadd.xlane.f32.xlu1 %v9079_v13  ;;  %v14443_v36 = vpop.f32.mrb[48].mxu0  ;;  %v9076_v3 = vsel %vm449_vm0, %v19768_v18, 0.0 }
0x1006   : > { %v19775_v55 = vadd.f32 %v19686_v63, %v14443_v36  ;;  %v8955_v24 = vpop.f32.mrb[49].mxu0  ;;  %9077 = vadd.xlane.f32.xlu0 %v9076_v3 }
0x1007   : > { %v19778_v9 = vadd.f32 %v19686_v63, %v8955_v24 }
0x1008   : > { %v9085_v51 = vsel %vm449_vm0, %v19775_v55, 0.0 }
0x1009   : > { %9086 = vadd.xlane.f32.xlu1 %v9085_v51  ;;  %v14446_v31 = vpop.f32.mrb[50].mxu0  ;;  %v9082_v37 = vsel %vm449_vm0, %v19778_v9, 0.0 }
0x100a   : > { %v19785_v13 = vadd.f32 %v19686_v63, %v14446_v31  ;;  %v8965_v59 = vpop.f32.mrb[51].mxu0  ;;  %9083 = vadd.xlane.f32.xlu0 %v9082_v37 }
0x100b   : > { %v19788_v36 = vadd.f32 %v19686_v63, %v8965_v59 }
0x100c   : > { %v9091_v3 = vsel %vm449_vm0, %v19785_v13, 0.0 }
0x100d   : > { %9092 = vadd.xlane.f32.xlu1 %v9091_v3  ;;  %v14449_v24 = vpop.f32.mrb[52].mxu0  ;;  %v9088_v51 = vsel %vm449_vm0, %v19788_v36, 0.0 }
0x100e   : > { %v19795_v47 = vadd.f32 %v19686_v63, %v14449_v24  ;;  %v8975_v23 = vpop.f32.mrb[53].mxu0  ;;  %9089 = vadd.xlane.f32.xlu0 %v9088_v51 }
0x100f   : > { %v19798_v31 = vadd.f32 %v19686_v63, %v8975_v23 }
0x1010   : > { %v9097_v59 = vsel %vm449_vm0, %v19795_v47, 0.0 }
0x1011   : > { %9098 = vadd.xlane.f32.xlu1 %v9097_v59  ;;  %v14452_v37 = vpop.f32.mrb[54].mxu0  ;;  %v9094_v3 = vsel %vm449_vm0, %v19798_v31, 0.0 }
0x1012   : > { %v19805_v16 = vadd.f32 %v19686_v63, %v14452_v37  ;;  %v8985_v20 = vpop.f32.mrb[55].mxu0  ;;  %9095 = vadd.xlane.f32.xlu0 %v9094_v3 }
0x1013   : > { %v19808_v24 = vadd.f32 %v19686_v63, %v8985_v20 }
0x1014   : > { %v9103_v23 = vsel %vm449_vm0, %v19805_v16, 0.0 }
0x1015   : > { %9104 = vadd.xlane.f32.xlu1 %v9103_v23  ;;  %v14455_v51 = vpop.f32.mrb[56].mxu0  ;;  %v9100_v59 = vsel %vm449_vm0, %v19808_v24, 0.0 }
0x1016   : > { %v19815_v19 = vadd.f32 %v19686_v63, %v14455_v51  ;;  %v8995_v2 = vpop.f32.mrb[57].mxu0  ;;  %9101 = vadd.xlane.f32.xlu0 %v9100_v59 }
0x1017   : > { %v19818_v37 = vadd.f32 %v19686_v63, %v8995_v2 }
0x1018   : > { %v9109_v20 = vsel %vm449_vm0, %v19815_v19, 0.0 }
0x1019   : > { %9110 = vadd.xlane.f32.xlu1 %v9109_v20  ;;  %v14458_v3 = vpop.f32.mrb[58].mxu0  ;;  %v9106_v23 = vsel %vm449_vm0, %v19818_v37, 0.0 }
0x101a   : > { %v19825_v40 = vadd.f32 %v19686_v63, %v14458_v3  ;;  %v9005_v28 = vpop.f32.mrb[59].mxu0  ;;  %9107 = vadd.xlane.f32.xlu0 %v9106_v23 }
0x101b   : > { %v19828_v51 = vadd.f32 %v19686_v63, %v9005_v28 }
0x101c   : > { %v9115_v2 = vsel %vm449_vm0, %v19825_v40, 0.0 }
0x101d   : > { %9116 = vadd.xlane.f32.xlu1 %v9115_v2  ;;  %v14461_v59 = vpop.f32.mrb[60].mxu0  ;;  %v9112_v20 = vsel %vm449_vm0, %v19828_v51, 0.0 }
0x101e   : > { %v19835_v62 = vadd.f32 %v19686_v63, %v14461_v59  ;;  %v9015_v30 = vpop.f32.mrb[61].mxu0  ;;  %9113 = vadd.xlane.f32.xlu0 %v9112_v20 }
0x101f   : > { %v19838_v3 = vadd.f32 %v19686_v63, %v9015_v30 }
0x1020   : > { %v9121_v28 = vsel %vm449_vm0, %v19835_v62, 0.0 }
0x1021   : > { %21631 = vst [vmem:[#allocation84_spill] sm:$0xff] %v19838_v3  ;;  %9122 = vadd.xlane.f32.xlu1 %v9121_v28  ;;  %v14464_v23 = vpop.f32.mrb[62].mxu0  ;;  %v9118_v2 = vsel %vm449_vm0, %v19838_v3, 0.0 }
0x1022   : > { %v19845_v17 = vadd.f32 %v19686_v63, %v14464_v23  ;;  %v9025_v42 = vpop.f32.mrb[63].mxu0  ;;  %9119 = vadd.xlane.f32.xlu0 %v9118_v2 }
0x1023   : > { %v19848_v59 = vadd.f32 %v19686_v63, %v9025_v42 }
0x1024   : > { %21632 = vst [vmem:[#allocation85_spill] sm:$0xff] %v19845_v17  ;;  %v9127_v30 = vsel %vm449_vm0, %v19845_v17, 0.0 }
0x1025   : > { %21633 = vst [vmem:[#allocation86_spill] sm:$0xff] %v19848_v59  ;;  %9128 = vadd.xlane.f32.xlu1 %v9127_v30  ;;  %v9124_v20 = vsel %vm449_vm0, %v19848_v59, 0.0 }
0x1026   : > { %9125 = vadd.xlane.f32.xlu0 %v9124_v20 }
0x1076   : > { %v9039_v28 = vpop.xlane.xlu1 %9038 }
0x1077   : > { %v9131_v60 = vmul.f32 0.03125, %v9039_v28  ;;  %v9036_v38 = vpop.xlane.xlu0 %9035 }
0x1078   : > { %v9130_v45 = vmul.f32 0.03125, %v9036_v38  ;;  %v14363_v29 = vpop.f32.mrb[0].mxu1 }
0x1079   : > { %v19855_v23 = vsub.f32 %v19689_v0, %v9131_v60  ;;  %v8677_v63 = vmul.f32 %v14363_v29, %v19380_v27  ;;  %v8517_v17 = vpop.f32.mrb[1].mxu1 }
0x107a   : > { %v19858_v2 = vsub.f32 %v19692_v61, %v9130_v45  ;;  %v9045_v42 = vpop.xlane.xlu1 %9044  ;;  %v8676_v28 = vmul.f32 %v8517_v17, %v19383_v32  ;;  %v19869_v45 = vld [vmem:[%s21424_s7] ss:$0 sm:$0xff] }
0x107b   : > { %v9133_v30 = vmul.f32 0.03125, %v9045_v42  ;;  %v9042_v3 = vpop.xlane.xlu0 %9041  ;;  %v9195_v20 = vmul.f32 %v19855_v23, %v19855_v23  ;;  %v8709_v60 = vmul.f32 %v19869_v45, %v8677_v63  ;;  %v19884_v42 = vld [vmem:[%s21425_s8] ss:$0 sm:$0xff] }
0x107c   : > { %21634 = vst [vmem:[#allocation87_spill] sm:$0xff] %v19858_v2  ;;  %v9132_v59 = vmul.f32 0.03125, %v9042_v3  ;;  %v9194_v38 = vmul.f32 %v19858_v2, %v19858_v2  ;;  %v8708_v0 = vmul.f32 %v19869_v45, %v8676_v28  ;;  %v14366_v61 = vpop.f32.mrb[2].mxu1 }
0x107d   : > { %v19873_v27 = vsub.f32 %v19701_v56, %v9133_v30  ;;  %v9229_v29 = vsel %vm449_vm0, %v9195_v20, 0.0  ;;  %v8741_v56 = vadd.f32 %v19884_v42, %v8709_v60  ;;  %v8679_v63 = vmul.f32 %v14366_v61, %v19396_v53  ;;  %v8527_v30 = vpop.f32.mrb[3].mxu1 }
0x107e   : > { %v19878_v32 = vsub.f32 %v19704_v10, %v9132_v59  ;;  %v9051_v17 = vpop.xlane.xlu1 %9050  ;;  %9230 = vadd.xlane.f32.xlu1 %v9229_v29  ;;  %v9226_v3 = vsel %vm449_vm0, %v9194_v38, 0.0  ;;  %v8740_v28 = vadd.f32 %v19884_v42, %v8708_v0  ;;  %v8678_v38 = vmul.f32 %v8527_v30, %v19399_v54 }
0x107f   : > { %v9135_v20 = vmul.f32 0.03125, %v9051_v17  ;;  %9227 = vadd.xlane.f32.xlu0 %v9226_v3  ;;  %v9048_v10 = vpop.xlane.xlu0 %9047  ;;  %v9197_v59 = vmul.f32 %v19873_v27, %v19873_v27  ;;  %v8711_v60 = vmul.f32 %v19869_v45, %v8679_v63  ;;  %8773 = vst.msk [vmem:[%s17475_s14 + $0x18] sm:$0xff] %vm1751_vm2, %v8741_v56 }
0x1080   : > { %v9134_v29 = vmul.f32 0.03125, %v9048_v10  ;;  %v9196_v2 = vmul.f32 %v19878_v32, %v19878_v32  ;;  %v8710_v17 = vmul.f32 %v19869_v45, %v8678_v38  ;;  %8772 = vst.msk [vmem:[%s17475_s14 + $0x8] sm:$0xff] %vm1751_vm2, %v8740_v28 }
0x1081   : > { %v19898_v53 = vsub.f32 %v19713_v43, %v9135_v20  ;;  %v9235_v61 = vsel %vm449_vm0, %v9197_v59, 0.0  ;;  %v8743_v56 = vadd.f32 %v19884_v42, %v8711_v60 }
0x1082   : > { %v19905_v54 = vsub.f32 %v19716_v48, %v9134_v29  ;;  %v9057_v0 = vpop.xlane.xlu1 %9056  ;;  %9236 = vadd.xlane.f32.xlu1 %v9235_v61  ;;  %v9232_v3 = vsel %vm449_vm0, %v9196_v2, 0.0  ;;  %v8742_v20 = vadd.f32 %v19884_v42, %v8710_v17 }
0x1083   : > { %v9137_v63 = vmul.f32 0.03125, %v9057_v0  ;;  %9233 = vadd.xlane.f32.xlu0 %v9232_v3  ;;  %v9054_v43 = vpop.xlane.xlu0 %9053  ;;  %v9199_v30 = vmul.f32 %v19898_v53, %v19898_v53  ;;  %8775 = vst.msk [vmem:[%s17475_s14 + $0x38] sm:$0xff] %vm1751_vm2, %v8743_v56 }
0x1084   : > { %v9136_v10 = vmul.f32 0.03125, %v9054_v43  ;;  %v9198_v48 = vmul.f32 %v19905_v54, %v19905_v54  ;;  %v14369_v59 = vpop.f32.mrb[4].mxu1  ;;  %8774 = vst.msk [vmem:[%s17475_s14 + $0x28] sm:$0xff] %vm1751_vm2, %v8742_v20 }
0x1085   : > { %v19917_v28 = vsub.f32 %v19725_v11, %v9137_v63  ;;  %v9241_v2 = vsel %vm449_vm0, %v9199_v30, 0.0  ;;  %v8681_v38 = vmul.f32 %v14369_v59, %v19410_v25  ;;  %v8537_v29 = vpop.f32.mrb[5].mxu1 }
0x1086   : > { %v19924_v60 = vsub.f32 %v19728_v46, %v9136_v10  ;;  %v9063_v61 = vpop.xlane.xlu1 %9062  ;;  %9242 = vadd.xlane.f32.xlu1 %v9241_v2  ;;  %v9238_v17 = vsel %vm449_vm0, %v9198_v48, 0.0  ;;  %v8680_v0 = vmul.f32 %v8537_v29, %v19413_v4 }
0x1087   : > { %v9139_v3 = vmul.f32 0.03125, %v9063_v61  ;;  %9239 = vadd.xlane.f32.xlu0 %v9238_v17  ;;  %v9060_v11 = vpop.xlane.xlu0 %9059  ;;  %v9201_v56 = vmul.f32 %v19917_v28, %v19917_v28  ;;  %v8713_v25 = vmul.f32 %v19869_v45, %v8681_v38 }
0x1088   : > { %v9138_v63 = vmul.f32 0.03125, %v9060_v11  ;;  %v9200_v43 = vmul.f32 %v19924_v60, %v19924_v60  ;;  %v8712_v46 = vmul.f32 %v19869_v45, %v8680_v0 }
0x1089   : > { %v19935_v30 = vsub.f32 %v19735_v6, %v9139_v3  ;;  %v9247_v4 = vsel %vm449_vm0, %v9201_v56, 0.0  ;;  %v8745_v20 = vadd.f32 %v19884_v42, %v8713_v25  ;;  %v14372_v10 = vpop.f32.mrb[6].mxu1 }
0x108a   : > { %v19940_v48 = vsub.f32 %v19738_v57, %v9138_v63  ;;  %v9069_v59 = vpop.xlane.xlu1 %9068  ;;  %9248 = vadd.xlane.f32.xlu1 %v9247_v4  ;;  %v9244_v2 = vsel %vm449_vm0, %v9200_v43, 0.0  ;;  %v8744_v38 = vadd.f32 %v19884_v42, %v8712_v46  ;;  %v8683_v29 = vmul.f32 %v14372_v10, %v19421_v35  ;;  %v8547_v6 = vpop.f32.mrb[7].mxu1 }
0x108b   : > { %v9141_v61 = vmul.f32 0.03125, %v9069_v59  ;;  %9245 = vadd.xlane.f32.xlu0 %v9244_v2  ;;  %v9066_v17 = vpop.xlane.xlu0 %9065  ;;  %v9203_v0 = vmul.f32 %v19935_v30, %v19935_v30  ;;  %v8682_v3 = vmul.f32 %v8547_v6, %v19425_v52  ;;  %8777 = vst.msk [vmem:[%s17475_s14 + $0x58] sm:$0xff] %vm1751_vm2, %v8745_v20 }
0x108c   : > { %v9140_v57 = vmul.f32 0.03125, %v9066_v17  ;;  %v9202_v11 = vmul.f32 %v19940_v48, %v19940_v48  ;;  %v8715_v56 = vmul.f32 %v19869_v45, %v8683_v29  ;;  %8776 = vst.msk [vmem:[%s17475_s14 + $0x48] sm:$0xff] %vm1751_vm2, %v8744_v38 }
0x108d   : > { %v19956_v35 = vsub.f32 %v19745_v7, %v9141_v61  ;;  %v9253_v25 = vsel %vm449_vm0, %v9203_v0, 0.0  ;;  %v8714_v63 = vmul.f32 %v19869_v45, %v8682_v3 }
0x108e   : > { %v19961_v52 = vsub.f32 %v19748_v12, %v9140_v57  ;;  %v9075_v43 = vpop.xlane.xlu1 %9074  ;;  %9254 = vadd.xlane.f32.xlu1 %v9253_v25  ;;  %v9250_v46 = vsel %vm449_vm0, %v9202_v11, 0.0  ;;  %v8747_v4 = vadd.f32 %v19884_v42, %v8715_v56 }
0x108f   : > { %v9143_v20 = vmul.f32 0.03125, %v9075_v43  ;;  %9251 = vadd.xlane.f32.xlu0 %v9250_v46  ;;  %v9072_v10 = vpop.xlane.xlu0 %9071  ;;  %v9205_v7 = vmul.f32 %v19956_v35, %v19956_v35  ;;  %v8746_v59 = vadd.f32 %v19884_v42, %v8714_v63 }
0x1090   : > { %v9142_v2 = vmul.f32 0.03125, %v9072_v10  ;;  %v9204_v12 = vmul.f32 %v19961_v52, %v19961_v52  ;;  %8779 = vst.msk [vmem:[%s17475_s14 + $0x78] sm:$0xff] %vm1751_vm2, %v8747_v4 }
0x1091   : > { %v19973_v38 = vsub.f32 %v19755_v33, %v9143_v20  ;;  %v9259_v29 = vsel %vm449_vm0, %v9205_v7, 0.0  ;;  %v14375_v6 = vpop.f32.mrb[8].mxu1  ;;  %8778 = vst.msk [vmem:[%s17475_s14 + $0x68] sm:$0xff] %vm1751_vm2, %v8746_v59 }
0x1092   : > { %v19979_v61 = vsub.f32 %v19758_v14, %v9142_v2  ;;  %v9081_v17 = vpop.xlane.xlu1 %9080  ;;  %9260 = vadd.xlane.f32.xlu1 %v9259_v29  ;;  %v9256_v0 = vsel %vm449_vm0, %v9204_v12, 0.0  ;;  %v8685_v3 = vmul.f32 %v14375_v6, %v19435_v5  ;;  %v8557_v57 = vpop.f32.mrb[9].mxu1 }
0x1093   : > { %v9145_v11 = vmul.f32 0.03125, %v9081_v17  ;;  %9257 = vadd.xlane.f32.xlu0 %v9256_v0  ;;  %v9078_v56 = vpop.xlane.xlu0 %9077  ;;  %v9207_v33 = vmul.f32 %v19973_v38, %v19973_v38  ;;  %v8684_v25 = vmul.f32 %v8557_v57, %v19438_v1 }
0x1094   : > { %v9144_v63 = vmul.f32 0.03125, %v9078_v56  ;;  %v9206_v14 = vmul.f32 %v19979_v61, %v19979_v61  ;;  %v8717_v43 = vmul.f32 %v19869_v45, %v8685_v3 }
0x1095   : > { %v19990_v46 = vsub.f32 %v19765_v8, %v9145_v11  ;;  %v9265_v5 = vsel %vm449_vm0, %v9207_v33, 0.0  ;;  %v8716_v4 = vmul.f32 %v19869_v45, %v8684_v25 }
0x1096   : > { %v19995_v20 = vsub.f32 %v19768_v18, %v9144_v63  ;;  %v9087_v10 = vpop.xlane.xlu1 %9086  ;;  %9266 = vadd.xlane.f32.xlu1 %v9265_v5  ;;  %v9262_v1 = vsel %vm449_vm0, %v9206_v14, 0.0  ;;  %v8749_v7 = vadd.f32 %v19884_v42, %v8717_v43 }
0x1097   : > { %v9147_v59 = vmul.f32 0.03125, %v9087_v10  ;;  %9263 = vadd.xlane.f32.xlu0 %v9262_v1  ;;  %v9084_v2 = vpop.xlane.xlu0 %9083  ;;  %v8748_v8 = vadd.f32 %v19884_v42, %v8716_v4  ;;  %v9209_v12 = vmul.f32 %v19990_v46, %v19990_v46  ;;  %v14378_v6 = vpop.f32.mrb[10].mxu1 }
0x1098   : > { %v9146_v29 = vmul.f32 0.03125, %v9084_v2  ;;  %v9208_v18 = vmul.f32 %v19995_v20, %v19995_v20  ;;  %8781 = vst.msk [vmem:[%s17475_s14 + $0x98] sm:$0xff] %vm1751_vm2, %v8749_v7  ;;  %v8687_v3 = vmul.f32 %v14378_v6, %v19447_v44  ;;  %v8567_v57 = vpop.f32.mrb[11].mxu1 }
0x1099   : > { %v20007_v17 = vsub.f32 %v19775_v55, %v9147_v59  ;;  %v9271_v0 = vsel %vm449_vm0, %v9209_v12, 0.0  ;;  %8780 = vst.msk [vmem:[%s17475_s14 + $0x88] sm:$0xff] %vm1751_vm2, %v8748_v8  ;;  %v8686_v25 = vmul.f32 %v8567_v57, %v19450_v15 }
0x109a   : > { %v20014_v11 = vsub.f32 %v19778_v9, %v9146_v29  ;;  %v9093_v56 = vpop.xlane.xlu1 %9092  ;;  %9272 = vadd.xlane.f32.xlu1 %v9271_v0  ;;  %v9268_v33 = vsel %vm449_vm0, %v9208_v18, 0.0  ;;  %v8719_v14 = vmul.f32 %v19869_v45, %v8687_v3 }
0x109b   : > { %v9149_v63 = vmul.f32 0.03125, %v9093_v56  ;;  %9269 = vadd.xlane.f32.xlu0 %v9268_v33  ;;  %v9090_v55 = vpop.xlane.xlu0 %9089  ;;  %v9211_v44 = vmul.f32 %v20007_v17, %v20007_v17  ;;  %v8718_v5 = vmul.f32 %v19869_v45, %v8686_v25 }
0x109c   : > { %v9148_v43 = vmul.f32 0.03125, %v9090_v55  ;;  %v9210_v9 = vmul.f32 %v20014_v11, %v20014_v11  ;;  %v8751_v15 = vadd.f32 %v19884_v42, %v8719_v14 }
0x109d   : > { %v20025_v4 = vsub.f32 %v19785_v13, %v9149_v63  ;;  %v9277_v10 = vsel %vm449_vm0, %v9211_v44, 0.0  ;;  %v8750_v7 = vadd.f32 %v19884_v42, %v8718_v5 }
0x109e   : > { %v20030_v1 = vsub.f32 %v19788_v36, %v9148_v43  ;;  %v9099_v59 = vpop.xlane.xlu1 %9098  ;;  %9278 = vadd.xlane.f32.xlu1 %v9277_v10  ;;  %v9274_v2 = vsel %vm449_vm0, %v9210_v9, 0.0  ;;  %8783 = vst.msk [vmem:[%s17475_s14 + $0xb8] sm:$0xff] %vm1751_vm2, %v8751_v15 }
0x109f   : > { %v9151_v8 = vmul.f32 0.03125, %v9099_v59  ;;  %9275 = vadd.xlane.f32.xlu0 %v9274_v2  ;;  %v9096_v12 = vpop.xlane.xlu0 %9095  ;;  %v9213_v13 = vmul.f32 %v20025_v4, %v20025_v4  ;;  %8782 = vst.msk [vmem:[%s17475_s14 + $0xa8] sm:$0xff] %vm1751_vm2, %v8750_v7 }
0x10a0   : > { %v9150_v29 = vmul.f32 0.03125, %v9096_v12  ;;  %v14381_v18 = vpop.f32.mrb[12].mxu1  ;;  %v9212_v36 = vmul.f32 %v20030_v1, %v20030_v1 }
0x10a1   : > { %v20043_v6 = vsub.f32 %v19795_v47, %v9151_v8  ;;  %v8689_v0 = vmul.f32 %v14381_v18, %v19459_v50  ;;  %v8577_v3 = vpop.f32.mrb[13].mxu1  ;;  %v9283_v57 = vsel %vm449_vm0, %v9213_v13, 0.0 }
0x10a2   : > { %v20048_v56 = vsub.f32 %v19798_v31, %v9150_v29  ;;  %v8688_v33 = vmul.f32 %v8577_v3, %v19462_v39  ;;  %v9105_v25 = vpop.xlane.xlu1 %9104  ;;  %9284 = vadd.xlane.f32.xlu1 %v9283_v57  ;;  %v9280_v63 = vsel %vm449_vm0, %v9212_v36, 0.0 }
0x10a3   : > { %v8721_v55 = vmul.f32 %v19869_v45, %v8689_v0  ;;  %v9153_v14 = vmul.f32 0.03125, %v9105_v25  ;;  %9281 = vadd.xlane.f32.xlu0 %v9280_v63  ;;  %v9102_v47 = vpop.xlane.xlu0 %9101  ;;  %v9215_v50 = vmul.f32 %v20043_v6, %v20043_v6 }
0x10a4   : > { %v8720_v44 = vmul.f32 %v19869_v45, %v8688_v33  ;;  %v9152_v43 = vmul.f32 0.03125, %v9102_v47  ;;  %v14384_v5 = vpop.f32.mrb[14].mxu1  ;;  %v9214_v31 = vmul.f32 %v20048_v56, %v20048_v56 }
0x10a5   : > { %v8753_v39 = vadd.f32 %v19884_v42, %v8721_v55  ;;  %v20060_v9 = vsub.f32 %v19805_v16, %v9153_v14  ;;  %v8691_v15 = vmul.f32 %v14384_v5, %v19469_v58  ;;  %v8587_v10 = vpop.f32.mrb[15].mxu1  ;;  %v9289_v7 = vsel %vm449_vm0, %v9215_v50, 0.0 }
0x10a6   : > { %v8752_v59 = vadd.f32 %v19884_v42, %v8720_v44  ;;  %v20066_v2 = vsub.f32 %v19808_v24, %v9152_v43  ;;  %v8690_v8 = vmul.f32 %v8587_v10, %v19472_v34  ;;  %v9111_v12 = vpop.xlane.xlu1 %9110  ;;  %9290 = vadd.xlane.f32.xlu1 %v9289_v7  ;;  %v9286_v13 = vsel %vm449_vm0, %v9214_v31, 0.0 }
0x10a7   : > { %v8723_v16 = vmul.f32 %v19869_v45, %v8691_v15  ;;  %v9155_v29 = vmul.f32 0.03125, %v9111_v12  ;;  %9287 = vadd.xlane.f32.xlu0 %v9286_v13  ;;  %v9108_v58 = vpop.xlane.xlu0 %9107  ;;  %v9217_v18 = vmul.f32 %v20060_v9, %v20060_v9  ;;  %8785 = vst.msk [vmem:[%s17475_s14 + $0xd8] sm:$0xff] %vm1751_vm2, %v8753_v39 }
0x10a8   : > { %v8722_v36 = vmul.f32 %v19869_v45, %v8690_v8  ;;  %v9154_v24 = vmul.f32 0.03125, %v9108_v58  ;;  %v14387_v0 = vpop.f32.mrb[16].mxu1  ;;  %v9216_v34 = vmul.f32 %v20066_v2, %v20066_v2  ;;  %8784 = vst.msk [vmem:[%s17475_s14 + $0xc8] sm:$0xff] %vm1751_vm2, %v8752_v59 }
0x10a9   : > { %v8755_v3 = vadd.f32 %v19884_v42, %v8723_v16  ;;  %v20082_v57 = vsub.f32 %v19815_v19, %v9155_v29  ;;  %v8693_v33 = vmul.f32 %v14387_v0, %v19481_v41  ;;  %v8597_v25 = vpop.f32.mrb[17].mxu1  ;;  %v9295_v63 = vsel %vm449_vm0, %v9217_v18, 0.0 }
0x10aa   : > { %v8754_v55 = vadd.f32 %v19884_v42, %v8722_v36  ;;  %v20088_v14 = vsub.f32 %v19818_v37, %v9154_v24  ;;  %v8692_v47 = vmul.f32 %v8597_v25, %v19484_v26  ;;  %v9117_v50 = vpop.xlane.xlu1 %9116  ;;  %9296 = vadd.xlane.f32.xlu1 %v9295_v63  ;;  %v9292_v44 = vsel %vm449_vm0, %v9216_v34, 0.0 }
0x10ab   : > { %v8725_v19 = vmul.f32 %v19869_v45, %v8693_v33  ;;  %v9157_v43 = vmul.f32 0.03125, %v9117_v50  ;;  %9293 = vadd.xlane.f32.xlu0 %v9292_v44  ;;  %v9114_v41 = vpop.xlane.xlu0 %9113  ;;  %v9219_v5 = vmul.f32 %v20082_v57, %v20082_v57  ;;  %8787 = vst.msk [vmem:[%s17475_s14 + $0xf8] sm:$0xff] %vm1751_vm2, %v8755_v3  ;;  %v21636_v44 = vld [vmem:[#allocation73_spill] sm:$0xff] }
0x10ac   : > { %v8724_v31 = vmul.f32 %v19869_v45, %v8692_v47  ;;  %v9156_v37 = vmul.f32 0.03125, %v9114_v41  ;;  %v14390_v39 = vpop.f32.mrb[18].mxu1  ;;  %v9218_v26 = vmul.f32 %v20088_v14, %v20088_v14  ;;  %8786 = vst.msk [vmem:[%s17475_s14 + $0xe8] sm:$0xff] %vm1751_vm2, %v8754_v55  ;;  %v21635_v47 = vld [vmem:[#allocation84_spill] sm:$0xff] }
0x10ad   : > { %v8757_v15 = vadd.f32 %v19884_v42, %v8725_v19  ;;  %v20104_v10 = vsub.f32 %v19825_v40, %v9157_v43  ;;  %v8695_v7 = vmul.f32 %v14390_v39, %v19493_v21  ;;  %v8607_v59 = vpop.f32.mrb[19].mxu1  ;;  %v9301_v8 = vsel %vm449_vm0, %v9219_v5, 0.0 }
0x10ae   : > { %v8756_v12 = vadd.f32 %v19884_v42, %v8724_v31  ;;  %v20110_v13 = vsub.f32 %v19828_v51, %v9156_v37  ;;  %v8694_v16 = vmul.f32 %v8607_v59, %v19496_v22  ;;  %v9123_v29 = vpop.xlane.xlu1 %9122  ;;  %9302 = vadd.xlane.f32.xlu1 %v9301_v8  ;;  %v9298_v58 = vsel %vm449_vm0, %v9218_v26, 0.0  ;;  %v21637_v59 = vld [vmem:[#allocation85_spill] sm:$0xff] }
0x10af   : > { %v8727_v40 = vmul.f32 %v19869_v45, %v8695_v7  ;;  %v9159_v18 = vmul.f32 0.03125, %v9123_v29  ;;  %9299 = vadd.xlane.f32.xlu0 %v9298_v58  ;;  %v9120_v21 = vpop.xlane.xlu0 %9119  ;;  %v9221_v36 = vmul.f32 %v20104_v10, %v20104_v10  ;;  %8789 = vst.msk [vmem:[%s17475_s14 + $0x118] sm:$0xff] %vm1751_vm2, %v8757_v15 }
0x10b0   : > { %v8726_v24 = vmul.f32 %v19869_v45, %v8694_v16  ;;  %v9158_v51 = vmul.f32 0.03125, %v9120_v21  ;;  %v14393_v0 = vpop.f32.mrb[20].mxu1  ;;  %v9220_v22 = vmul.f32 %v20110_v13, %v20110_v13  ;;  %8788 = vst.msk [vmem:[%s17475_s14 + $0x108] sm:$0xff] %vm1751_vm2, %v8756_v12  ;;  %v21638_v12 = vld [vmem:[#allocation74_spill] sm:$0xff] }
0x10b1   : > { %v8759_v34 = vadd.f32 %v19884_v42, %v8727_v40  ;;  %v20126_v3 = vsub.f32 %v19835_v62, %v9159_v18  ;;  %v8697_v33 = vmul.f32 %v14393_v0, %v19505_v49  ;;  %v8617_v25 = vpop.f32.mrb[21].mxu1  ;;  %v9307_v63 = vsel %vm449_vm0, %v9221_v36, 0.0  ;;  %v21639_v18 = vld [vmem:[#allocation86_spill] sm:$0xff]  ;;  %v21640_v36 = vld [vmem:[#allocation75_spill] sm:$0xff] }
0x10b2   : > { %v8758_v55 = vadd.f32 %v19884_v42, %v8726_v24  ;;  %v20132_v50 = vsub.f32 %v21635_v47, %v9158_v51  ;;  %v8696_v19 = vmul.f32 %v8617_v25, %v21636_v44  ;;  %9308 = vadd.xlane.f32.xlu1 %v9307_v63  ;;  %v9129_v43 = vpop.xlane.xlu1 %9128  ;;  %v9304_v41 = vsel %vm449_vm0, %v9220_v22, 0.0 }
0x10b3   : > { %v8729_v62 = vmul.f32 %v19869_v45, %v8697_v33  ;;  %v9161_v5 = vmul.f32 0.03125, %v9129_v43  ;;  %9305 = vadd.xlane.f32.xlu0 %v9304_v41  ;;  %v9126_v49 = vpop.xlane.xlu0 %9125  ;;  %v9223_v31 = vmul.f32 %v20126_v3, %v20126_v3  ;;  %8791 = vst.msk [vmem:[%s17475_s14 + $0x138] sm:$0xff] %vm1751_vm2, %v8759_v34  ;;  %v21642_v41 = vld [vmem:[#allocation77_spill] sm:$0xff] }
0x10b4   : > { %v8728_v37 = vmul.f32 %v19869_v45, %v8696_v19  ;;  %v9160_v39 = vmul.f32 0.03125, %v9126_v49  ;;  %v14396_v26 = vpop.f32.mrb[22].mxu1  ;;  %v9222_v15 = vmul.f32 %v20132_v50, %v20132_v50  ;;  %8790 = vst.msk [vmem:[%s17475_s14 + $0x128] sm:$0xff] %vm1751_vm2, %v8758_v55  ;;  %v21641_v55 = vld [vmem:[#allocation76_spill] sm:$0xff] }
0x10b5   : > { %v8761_v7 = vadd.f32 %v19884_v42, %v8729_v62  ;;  %v20148_v8 = vsub.f32 %v21637_v59, %v9161_v5  ;;  %v8699_v16 = vmul.f32 %v14396_v26, %v21638_v12  ;;  %v8627_v29 = vpop.f32.mrb[23].mxu1  ;;  %v9313_v58 = vsel %vm449_vm0, %v9223_v31, 0.0  ;;  %v21643_v26 = vld [vmem:[#allocation78_spill] sm:$0xff]  ;;  %v21644_v12 = vld [vmem:[#allocation79_spill] sm:$0xff] }
0x10b6   : > { %v8760_v40 = vadd.f32 %v19884_v42, %v8728_v37  ;;  %v20154_v21 = vsub.f32 %v21639_v18, %v9160_v39  ;;  %v8698_v24 = vmul.f32 %v8627_v29, %v21640_v36  ;;  %9314 = vadd.xlane.f32.xlu1 %v9313_v58  ;;  %v9310_v51 = vsel %vm449_vm0, %v9222_v15, 0.0  ;;  %v21645_v18 = vld [vmem:[#allocation22_spill] sm:$0xff] }
0x10b7   : > { %v8731_v0 = vmul.f32 %v19869_v45, %v8699_v16  ;;  %9311 = vadd.xlane.f32.xlu0 %v9310_v51  ;;  %v9225_v22 = vmul.f32 %v20148_v8, %v20148_v8  ;;  %8793 = vst.msk [vmem:[%s17475_s14 + $0x158] sm:$0xff] %vm1751_vm2, %v8761_v7  ;;  %v21646_v36 = vld [vmem:[#allocation6_spill] sm:$0xff] }
0x10b8   : > { %v8730_v34 = vmul.f32 %v19869_v45, %v8698_v24  ;;  %v14399_v33 = vpop.f32.mrb[24].mxu1  ;;  %v9224_v25 = vmul.f32 %v20154_v21, %v20154_v21  ;;  %8792 = vst.msk [vmem:[%s17475_s14 + $0x148] sm:$0xff] %vm1751_vm2, %v8760_v40  ;;  %v5849_v24 = vmul.f32 %v21646_v36, %v21645_v18  ;;  %v21656_v18 = vld [vmem:[#allocation43_spill] sm:$0xff] }
0x10b9   : > { %v8763_v63 = vadd.f32 %v19884_v42, %v8731_v0  ;;  %v8701_v47 = vmul.f32 %v14399_v33, %v21641_v55  ;;  %v8637_v44 = vpop.f32.mrb[25].mxu1  ;;  %v9319_v19 = vsel %vm449_vm0, %v9225_v22, 0.0  ;;  %v21647_v0 = vld [vmem:[#allocation80_spill] sm:$0xff] }
0x10ba   : > { %v8762_v43 = vadd.f32 %v19884_v42, %v8730_v34  ;;  %v8700_v62 = vmul.f32 %v8637_v44, %v21642_v41  ;;  %9320 = vadd.xlane.f32.xlu1 %v9319_v19  ;;  %v9316_v5 = vsel %vm449_vm0, %v9224_v25, 0.0  ;;  %v21648_v25 = vld [vmem:[#allocation81_spill] sm:$0xff]  ;;  %v5881_v19 = vmul.f32 %v19869_v45, %v5849_v24  ;;  %v21650_v41 = vld [vmem:[#allocation44_spill] sm:$0xff] }
0x10bb   : > { %v8733_v49 = vmul.f32 %v19869_v45, %v8701_v47  ;;  %9317 = vadd.xlane.f32.xlu0 %v9316_v5  ;;  %8795 = vst.msk [vmem:[%s17475_s14 + $0x178] sm:$0xff] %vm1751_vm2, %v8763_v63 }
0x10bc   : > { %v8732_v31 = vmul.f32 %v19869_v45, %v8700_v62  ;;  %v14402_v37 = vpop.f32.mrb[26].mxu1  ;;  %8794 = vst.msk [vmem:[%s17475_s14 + $0x168] sm:$0xff] %vm1751_vm2, %v8762_v43  ;;  %v21649_v43 = vld [vmem:[#allocation12_spill] sm:$0xff] }
0x10bd   : > { %v8765_v39 = vadd.f32 %v19884_v42, %v8733_v49  ;;  %v8703_v15 = vmul.f32 %v14402_v37, %v21643_v26  ;;  %v8647_v7 = vpop.f32.mrb[27].mxu1  ;;  %v5850_v62 = vmul.f32 %v21650_v41, %v21649_v43  ;;  %v21651_v49 = vld [vmem:[#allocation82_spill] sm:$0xff]  ;;  %v21652_v26 = vld [vmem:[#allocation83_spill] sm:$0xff] }
0x10be   : > { %v8764_v59 = vadd.f32 %v19884_v42, %v8732_v31  ;;  %v8702_v16 = vmul.f32 %v8647_v7, %v21644_v12  ;;  %v21653_v7 = vld [vmem:[#allocation11_spill] sm:$0xff] }
0x10bf   : > { %v8735_v29 = vmul.f32 %v19869_v45, %v8703_v15  ;;  %8797 = vst.msk [vmem:[%s17475_s14 + $0x198] sm:$0xff] %vm1751_vm2, %v8765_v39  ;;  %v5882_v24 = vmul.f32 %v19869_v45, %v5850_v62  ;;  %v21661_v62 = vld [vmem:[#allocation15_spill] sm:$0xff] }
0x10c0   : > { %v8734_v58 = vmul.f32 %v19869_v45, %v8702_v16  ;;  %v14405_v40 = vpop.f32.mrb[28].mxu1  ;;  %8796 = vst.msk [vmem:[%s17475_s14 + $0x188] sm:$0xff] %vm1751_vm2, %v8764_v59  ;;  %v21654_v59 = vld [vmem:[#allocation42_spill] sm:$0xff] }
0x10c1   : > { %v8767_v51 = vadd.f32 %v19884_v42, %v8735_v29  ;;  %v8705_v22 = vmul.f32 %v14405_v40, %v21647_v0  ;;  %v8657_v34 = vpop.f32.mrb[29].mxu1  ;;  %v5848_v12 = vmul.f32 %v21654_v59, %v21653_v7  ;;  %v21655_v40 = vld [vmem:[#allocation23_spill] sm:$0xff] }
0x10c2   : > { %v8766_v33 = vadd.f32 %v19884_v42, %v8734_v58  ;;  %v8704_v63 = vmul.f32 %v8657_v34, %v21648_v25  ;;  %v5913_v58 = vadd.f32 %v19884_v42, %v5881_v19  ;;  %v5851_v36 = vmul.f32 %v21656_v18, %v21655_v40  ;;  %v21657_v34 = vld [vmem:[#allocation13_spill] sm:$0xff]  ;;  %v21667_v18 = vld [vmem:[#allocation16_spill] sm:$0xff] }
0x10c3   : > { %v8737_v55 = vmul.f32 %v19869_v45, %v8705_v22  ;;  %8799 = vst.msk [vmem:[%s17475_s14 + $0x1b8] sm:$0xff] %vm1751_vm2, %v8767_v51  ;;  %v5880_v22 = vmul.f32 %v19869_v45, %v5848_v12  ;;  %v21665_v12 = vld [vmem:[#allocation17_spill] sm:$0xff] }
0x10c4   : > { %v8736_v47 = vmul.f32 %v19869_v45, %v8704_v63  ;;  %v14408_v44 = vpop.f32.mrb[30].mxu1  ;;  %8798 = vst.msk [vmem:[%s17475_s14 + $0x1a8] sm:$0xff] %vm1751_vm2, %v8766_v33  ;;  %v21658_v33 = vld [vmem:[#allocation46_spill] sm:$0xff]  ;;  %v5883_v63 = vmul.f32 %v19869_v45, %v5851_v36  ;;  %v21668_v36 = vld [vmem:[#allocation49_spill] sm:$0xff] }
0x10c5   : > { %v8769_v5 = vadd.f32 %v19884_v42, %v8737_v55  ;;  %v8707_v31 = vmul.f32 %v14408_v44, %v21651_v49  ;;  %v8667_v37 = vpop.f32.mrb[31].mxu1  ;;  %v5852_v25 = vmul.f32 %v21658_v33, %v21657_v34  ;;  %v5914_v55 = vadd.f32 %v19884_v42, %v5882_v24  ;;  %v21660_v44 = vld [vmem:[#allocation45_spill] sm:$0xff]  ;;  %v21670_v34 = vld [vmem:[#allocation52_spill] sm:$0xff] }
0x10c6   : > { %v8768_v39 = vadd.f32 %v19884_v42, %v8736_v47  ;;  %v8706_v15 = vmul.f32 %v8667_v37, %v21652_v26  ;;  %v21659_v47 = vld [vmem:[#allocation24_spill] sm:$0xff]  ;;  %v5912_v43 = vadd.f32 %v19884_v42, %v5880_v22  ;;  %v21664_v26 = vld [vmem:[#allocation47_spill] sm:$0xff]  ;;  %v5857_v24 = vmul.f32 %v21668_v36, %v21667_v18 }
0x10c7   : > { %v8739_v16 = vmul.f32 %v19869_v45, %v8707_v31  ;;  %8801 = vst.msk [vmem:[%s17475_s14 + $0x1d8] sm:$0xff] %vm1751_vm2, %v8769_v5  ;;  %v5853_v19 = vmul.f32 %v21660_v44, %v21659_v47  ;;  %v5884_v41 = vmul.f32 %v19869_v45, %v5852_v25  ;;  %v21662_v5 = vld [vmem:[#allocation48_spill] sm:$0xff]  ;;  %v5915_v31 = vadd.f32 %v19884_v42, %v5883_v63  ;;  %v21669_v22 = vld [vmem:[#allocation19_spill] sm:$0xff] }
0x10c8   : > { %v8738_v29 = vmul.f32 %v19869_v45, %v8706_v15  ;;  %8800 = vst.msk [vmem:[%s17475_s14 + $0x1c8] sm:$0xff] %vm1751_vm2, %v8768_v39  ;;  %v5854_v49 = vmul.f32 %v21662_v5, %v21661_v62  ;;  %v21663_v39 = vld [vmem:[#allocation14_spill] sm:$0xff]  ;;  %v5858_v33 = vmul.f32 %v21670_v34, %v21669_v22  ;;  %v5889_v63 = vmul.f32 %v19869_v45, %v5857_v24  ;;  %v21672_v47 = vld [vmem:[#allocation51_spill] sm:$0xff] }
0x10c9   : > { %v8771_v51 = vadd.f32 %v19884_v42, %v8739_v16  ;;  %v5885_v37 = vmul.f32 %v19869_v45, %v5853_v19  ;;  %v5855_v15 = vmul.f32 %v21664_v26, %v21663_v39  ;;  %v5916_v7 = vadd.f32 %v19884_v42, %v5884_v41  ;;  %v21666_v16 = vld [vmem:[#allocation50_spill] sm:$0xff]  ;;  %v21673_v41 = vld [vmem:[#allocation21_spill] sm:$0xff]  ;;  %v21680_v18 = vld [vmem:[#allocation55_spill] sm:$0xff] }
0x10ca   : > { %v8770_v0 = vadd.f32 %v19884_v42, %v8738_v29  ;;  %v5886_v59 = vmul.f32 %v19869_v45, %v5854_v49  ;;  %v5856_v29 = vmul.f32 %v21666_v16, %v21665_v12  ;;  %v21674_v62 = vld [vmem:[#allocation54_spill] sm:$0xff]  ;;  %v5921_v49 = vadd.f32 %v19884_v42, %v5889_v63  ;;  %v21676_v39 = vld [vmem:[#allocation53_spill] sm:$0xff]  ;;  %v21678_v12 = vld [vmem:[#allocation56_spill] sm:$0xff] }
0x10cb   : > { %5978 = vrot.lane.b32.xlu1 %v5913_v58, %s15932_s25  ;;  %8803 = vst.msk [vmem:[%s17475_s14 + $0x1f8] sm:$0xff] %vm1751_vm2, %v8771_v51  ;;  %v5917_v58 = vadd.f32 %v19884_v42, %v5885_v37  ;;  %v5887_v40 = vmul.f32 %v19869_v45, %v5855_v15  ;;  %v5860_v5 = vmul.f32 %v21674_v62, %v21673_v41  ;;  %v21675_v37 = vld [vmem:[#allocation20_spill] sm:$0xff]  ;;  %v21682_v22 = vld [vmem:[#allocation58_spill] sm:$0xff]  ;;  %v21683_v63 = vld [vmem:[#allocation5_spill] sm:$0xff] }
0x10cc   : > { %8802 = vst.msk [vmem:[%s17475_s14 + $0x1e8] sm:$0xff] %vm1751_vm2, %v8770_v0  ;;  %v5918_v51 = vadd.f32 %v19884_v42, %v5886_v59  ;;  %v5888_v0 = vmul.f32 %v19869_v45, %v5856_v29  ;;  %v5861_v26 = vmul.f32 %v21676_v39, %v21675_v37  ;;  %v21677_v59 = vld [vmem:[#allocation26_spill] sm:$0xff]  ;;  %v21686_v41 = vld [vmem:[#allocation60_spill] sm:$0xff]  ;;  %v21688_v37 = vld [vmem:[#allocation59_spill] sm:$0xff] }
0x10cd   : > { %v5919_v25 = vadd.f32 %v19884_v42, %v5887_v40  ;;  %v5862_v16 = vmul.f32 %v21678_v12, %v21677_v59  ;;  %v21679_v40 = vld [vmem:[#allocation25_spill] sm:$0xff]  ;;  %v21690_v59 = vld [vmem:[#allocation62_spill] sm:$0xff] }
0x10ce   : > { %v5920_v19 = vadd.f32 %v19884_v42, %v5888_v0  ;;  %v5863_v36 = vmul.f32 %v21680_v18, %v21679_v40  ;;  %v21681_v0 = vld [vmem:[#allocation27_spill] sm:$0xff]  ;;  %v21692_v40 = vld [vmem:[#allocation61_spill] sm:$0xff] }
0x10cf   : > { %5980 = vrot.lane.b32.xlu1 %v5914_v55, %s15932_s25  ;;  %v21671_v55 = vld [vmem:[#allocation18_spill] sm:$0xff]  ;;  %v5864_v34 = vmul.f32 %v21682_v22, %v21681_v0  ;;  %v21694_v0 = vld [vmem:[#allocation64_spill] sm:$0xff] }
0x10d0   : > { %v5859_v44 = vmul.f32 %v21672_v47, %v21671_v55  ;;  %v21684_v55 = vld [vmem:[#allocation57_spill] sm:$0xff] }
0x10d1   : > { %5976 = vrot.lane.b32.xlu0 %v5912_v43, %s15932_s25  ;;  %v5890_v43 = vmul.f32 %v19869_v45, %v5858_v33  ;;  %v5865_v47 = vmul.f32 %v21684_v55, %v21683_v63  ;;  %v21696_v63 = vld [vmem:[#allocation63_spill] sm:$0xff] }
0x10d3   : > { %5982 = vrot.lane.b32.xlu1 %v5915_v31, %s15932_s25  ;;  %v5891_v31 = vmul.f32 %v19869_v45, %v5859_v44  ;;  %v5922_v15 = vadd.f32 %v19884_v42, %v5890_v43  ;;  %v21685_v43 = vld [vmem:[#allocation29_spill] sm:$0xff] }
0x10d4   : > { %v5866_v62 = vmul.f32 %v21686_v41, %v21685_v43  ;;  %v21698_v43 = vld [vmem:[#allocation66_spill] sm:$0xff] }
0x10d5   : > { %5984 = vrot.lane.b32.xlu0 %v5916_v7, %s15932_s25  ;;  %v5892_v7 = vmul.f32 %v19869_v45, %v5860_v5  ;;  %v5923_v29 = vadd.f32 %v19884_v42, %v5891_v31  ;;  %v21687_v31 = vld [vmem:[#allocation28_spill] sm:$0xff] }
0x10d6   : > { %v5867_v39 = vmul.f32 %v21688_v37, %v21687_v31  ;;  %v21700_v31 = vld [vmem:[#allocation65_spill] sm:$0xff] }
0x10d7   : > { %5986 = vrot.lane.b32.xlu1 %v5917_v58, %s15932_s25  ;;  %v5893_v58 = vmul.f32 %v19869_v45, %v5861_v26  ;;  %v5924_v24 = vadd.f32 %v19884_v42, %v5892_v7  ;;  %v21689_v7 = vld [vmem:[#allocation31_spill] sm:$0xff] }
0x10d8   : > { %v5868_v12 = vmul.f32 %v21690_v59, %v21689_v7  ;;  %v21702_v7 = vld [vmem:[#allocation68_spill] sm:$0xff] }
0x10d9   : > { %5988 = vrot.lane.b32.xlu0 %v5918_v51, %s15932_s25  ;;  %v5894_v51 = vmul.f32 %v19869_v45, %v5862_v16  ;;  %v5925_v33 = vadd.f32 %v19884_v42, %v5893_v58  ;;  %v21691_v58 = vld [vmem:[#allocation30_spill] sm:$0xff] }
0x10da   : > { %v5869_v18 = vmul.f32 %v21692_v40, %v21691_v58  ;;  %v21704_v58 = vld [vmem:[#allocation67_spill] sm:$0xff] }
0x10db   : > { %5990 = vrot.lane.b32.xlu1 %v5919_v25, %s15932_s25  ;;  %v5895_v25 = vmul.f32 %v19869_v45, %v5863_v36  ;;  %v5926_v44 = vadd.f32 %v19884_v42, %v5894_v51  ;;  %v21693_v51 = vld [vmem:[#allocation33_spill] sm:$0xff] }
0x10dc   : > { %v5870_v22 = vmul.f32 %v21694_v0, %v21693_v51  ;;  %v21706_v51 = vld [vmem:[#allocation70_spill] sm:$0xff] }
0x10dd   : > { %5992 = vrot.lane.b32.xlu0 %v5920_v19, %s15932_s25  ;;  %v5896_v19 = vmul.f32 %v19869_v45, %v5864_v34  ;;  %v5927_v5 = vadd.f32 %v19884_v42, %v5895_v25  ;;  %v21695_v25 = vld [vmem:[#allocation32_spill] sm:$0xff] }
0x10de   : > { %v5871_v55 = vmul.f32 %v21696_v63, %v21695_v25  ;;  %v21708_v25 = vld [vmem:[#allocation69_spill] sm:$0xff] }
0x10df   : > { %5994 = vrot.lane.b32.xlu1 %v5921_v49, %s15932_s25  ;;  %v5897_v49 = vmul.f32 %v19869_v45, %v5865_v47  ;;  %v5928_v26 = vadd.f32 %v19884_v42, %v5896_v19  ;;  %v21697_v19 = vld [vmem:[#allocation35_spill] sm:$0xff] }
0x10e0   : > { %v5872_v41 = vmul.f32 %v21698_v43, %v21697_v19  ;;  %v21710_v19 = vld [vmem:[#allocation72_spill] sm:$0xff] }
0x10e1   : > { %5996 = vrot.lane.b32.xlu0 %v5922_v15, %s15932_s25  ;;  %v5898_v15 = vmul.f32 %v19869_v45, %v5866_v62  ;;  %v5929_v16 = vadd.f32 %v19884_v42, %v5897_v49  ;;  %v21699_v49 = vld [vmem:[#allocation34_spill] sm:$0xff] }
0x10e2   : > { %v5873_v37 = vmul.f32 %v21700_v31, %v21699_v49  ;;  %v21712_v49 = vld [vmem:[#allocation71_spill] sm:$0xff] }
0x10e3   : > { %5998 = vrot.lane.b32.xlu1 %v5923_v29, %s15932_s25  ;;  %v5899_v29 = vmul.f32 %v19869_v45, %v5867_v39  ;;  %v5930_v36 = vadd.f32 %v19884_v42, %v5898_v15  ;;  %v21701_v15 = vld [vmem:[#allocation37_spill] sm:$0xff] }
0x10e4   : > { %v5874_v59 = vmul.f32 %v21702_v7, %v21701_v15 }
0x10e5   : > { %6000 = vrot.lane.b32.xlu0 %v5924_v24, %s15932_s25  ;;  %v5900_v24 = vmul.f32 %v19869_v45, %v5868_v12  ;;  %v5931_v34 = vadd.f32 %v19884_v42, %v5899_v29  ;;  %v21703_v29 = vld [vmem:[#allocation36_spill] sm:$0xff] }
0x10e6   : > { %v5875_v40 = vmul.f32 %v21704_v58, %v21703_v29 }
0x10e7   : > { %6002 = vrot.lane.b32.xlu1 %v5925_v33, %s15932_s25  ;;  %v5901_v33 = vmul.f32 %v19869_v45, %v5869_v18  ;;  %v5932_v47 = vadd.f32 %v19884_v42, %v5900_v24  ;;  %v21705_v24 = vld [vmem:[#allocation39_spill] sm:$0xff] }
0x10e8   : > { %v5876_v0 = vmul.f32 %v21706_v51, %v21705_v24 }
0x10e9   : > { %6004 = vrot.lane.b32.xlu0 %v5926_v44, %s15932_s25  ;;  %v5902_v44 = vmul.f32 %v19869_v45, %v5870_v22  ;;  %v5933_v62 = vadd.f32 %v19884_v42, %v5901_v33  ;;  %v21707_v33 = vld [vmem:[#allocation38_spill] sm:$0xff] }
0x10ea   : > { %v5877_v63 = vmul.f32 %v21708_v25, %v21707_v33 }
0x10eb   : > { %6006 = vrot.lane.b32.xlu1 %v5927_v5, %s15932_s25  ;;  %v5903_v5 = vmul.f32 %v19869_v45, %v5871_v55  ;;  %v5934_v39 = vadd.f32 %v19884_v42, %v5902_v44  ;;  %v21709_v44 = vld [vmem:[#allocation41_spill] sm:$0xff] }
0x10ec   : > { %v5878_v43 = vmul.f32 %v21710_v19, %v21709_v44 }
0x10ed   : > { %6008 = vrot.lane.b32.xlu0 %v5928_v26, %s15932_s25  ;;  %v5904_v26 = vmul.f32 %v19869_v45, %v5872_v41  ;;  %v5935_v12 = vadd.f32 %v19884_v42, %v5903_v5  ;;  %v21711_v5 = vld [vmem:[#allocation40_spill] sm:$0xff] }
0x10ee   : > { %v5879_v31 = vmul.f32 %v21712_v49, %v21711_v5  ;;  %v21713_v49 = vld [vmem:[#allocation87_spill] sm:$0xff] }
0x10ef   : > { %6010 = vrot.lane.b32.xlu1 %v5929_v16, %s15932_s25  ;;  %v5905_v16 = vmul.f32 %v19869_v45, %v5873_v37  ;;  %v5936_v18 = vadd.f32 %v19884_v42, %v5904_v26 }
0x10f0   : > { %v5911_v15 = vmul.f32 %v19869_v45, %v5879_v31 }
0x10f1   : > { %6012 = vrot.lane.b32.xlu0 %v5930_v36, %s15932_s25  ;;  %v5906_v36 = vmul.f32 %v19869_v45, %v5874_v59  ;;  %v5937_v22 = vadd.f32 %v19884_v42, %v5905_v16 }
0x10f2   : > { %v5943_v59 = vadd.f32 %v19884_v42, %v5911_v15 }
0x10f3   : > { %6014 = vrot.lane.b32.xlu1 %v5931_v34, %s15932_s25  ;;  %v5907_v34 = vmul.f32 %v19869_v45, %v5875_v40  ;;  %v5938_v55 = vadd.f32 %v19884_v42, %v5906_v36 }
0x10f5   : > { %6016 = vrot.lane.b32.xlu0 %v5932_v47, %s15932_s25  ;;  %v5908_v47 = vmul.f32 %v19869_v45, %v5876_v0  ;;  %v5939_v41 = vadd.f32 %v19884_v42, %v5907_v34 }
0x10f7   : > { %6018 = vrot.lane.b32.xlu1 %v5933_v62, %s15932_s25  ;;  %v5909_v62 = vmul.f32 %v19869_v45, %v5877_v63  ;;  %v5940_v37 = vadd.f32 %v19884_v42, %v5908_v47 }
0x10f9   : > { %6020 = vrot.lane.b32.xlu0 %v5934_v39, %s15932_s25  ;;  %v5910_v39 = vmul.f32 %v19869_v45, %v5878_v43  ;;  %v5941_v26 = vadd.f32 %v19884_v42, %v5909_v62 }
0x10fb   : > { %6022 = vrot.lane.b32.xlu1 %v5935_v12, %s15932_s25  ;;  %v5942_v7 = vadd.f32 %v19884_v42, %v5910_v39 }
0x10fd   : > { %6024 = vrot.lane.b32.xlu0 %v5936_v18, %s15932_s25 }
0x10ff   : > { %6026 = vrot.lane.b32.xlu1 %v5937_v22, %s15932_s25 }
0x1101   : > { %6028 = vrot.lane.b32.xlu0 %v5938_v55, %s15932_s25 }
0x1103   : > { %6030 = vrot.lane.b32.xlu1 %v5939_v41, %s15932_s25 }
0x1105   : > { %6032 = vrot.lane.b32.xlu0 %v5940_v37, %s15932_s25 }
0x1107   : > { %6034 = vrot.lane.b32.xlu1 %v5941_v26, %s15932_s25  ;;  %v20381_v26 = vld [vmem:[%s21422_s5] ss:$0 sm:$0xff] }
0x1109   : > { %6036 = vrot.lane.b32.xlu0 %v5942_v7, %s15932_s25 }
0x110b   : > { %6038 = vrot.lane.b32.xlu1 %v5943_v59, %s15932_s25  ;;  %v9231_v12 = vpop.xlane.xlu1 %9230 }
0x110c   : > { %v9323_v16 = vmul.f32 0.03125, %v9231_v12  ;;  %v9228_v29 = vpop.xlane.xlu0 %9227 }
0x110d   : > { %v9322_v58 = vmul.f32 0.03125, %v9228_v29 }
0x110e   : > { %v9355_v40 = vadd.f32 1e-06, %v9323_v16 }
0x110f   : > { %v9354_v18 = vadd.f32 1e-06, %v9322_v58  ;;  %v9237_v36 = vpop.xlane.xlu1 %9236 }
0x1110   : > { %15559 = vrsqrt.f32 %v9355_v40  ;;  %v9325_v45 = vmul.f32 0.03125, %v9237_v36  ;;  %v9234_v24 = vpop.xlane.xlu0 %9233 }
0x1111   : > { %15561 = vrsqrt.f32 %v9354_v18  ;;  %v9324_v22 = vmul.f32 0.03125, %v9234_v24 }
0x1112   : > { %v9357_v51 = vadd.f32 1e-06, %v9325_v45 }
0x1113   : > { %v9243_v0 = vpop.xlane.xlu1 %9242  ;;  %v9356_v63 = vadd.f32 1e-06, %v9324_v22 }
0x1114   : > { %v9327_v34 = vmul.f32 0.03125, %v9243_v0  ;;  %v9240_v42 = vpop.xlane.xlu0 %9239  ;;  %15563 = vrsqrt.f32 %v9357_v51 }
0x1115   : > { %v9326_v44 = vmul.f32 0.03125, %v9240_v42 }
0x1116   : > { %v9359_v33 = vadd.f32 1e-06, %v9327_v34 }
0x1117   : > { %v9249_v25 = vpop.xlane.xlu1 %9248  ;;  %v9358_v7 = vadd.f32 1e-06, %v9326_v44 }
0x1118   : > { %v9329_v55 = vmul.f32 0.03125, %v9249_v25  ;;  %v9246_v47 = vpop.xlane.xlu0 %9245  ;;  %15565 = vrsqrt.f32 %v9359_v33 }
0x1119   : > { %15567 = vrsqrt.f32 %v9356_v63  ;;  %v9328_v59 = vmul.f32 0.03125, %v9246_v47 }
0x111a   : > { %v15560_v19 = vpop.eup %15559  ;;  %v9361_v43 = vadd.f32 1e-06, %v9329_v55 }
0x111b   : > { %v15562_v41 = vpop.eup %15561  ;;  %v9419_v62 = vmul.f32 %v15560_v19, %v19855_v23  ;;  %v9255_v5 = vpop.xlane.xlu1 %9254  ;;  %v20388_v23 = vld [vmem:[%s21423_s6] ss:$0 sm:$0xff]  ;;  %v9360_v45 = vadd.f32 1e-06, %v9328_v59 }
0x111c   : > { %v9418_v31 = vmul.f32 %v15562_v41, %v21713_v49  ;;  %v9331_v37 = vmul.f32 0.03125, %v9255_v5  ;;  %v9252_v39 = vpop.xlane.xlu0 %9251  ;;  %15569 = vrsqrt.f32 %v9361_v43 }
0x111d   : > { %v9451_v15 = vmul.f32 %v20381_v26, %v9419_v62  ;;  %15571 = vrsqrt.f32 %v9358_v7  ;;  %v9330_v63 = vmul.f32 0.03125, %v9252_v39 }
0x111e   : > { %v9450_v12 = vmul.f32 %v20381_v26, %v9418_v31  ;;  %v15564_v58 = vpop.eup %15563  ;;  %v9363_v40 = vadd.f32 1e-06, %v9331_v37 }
0x111f   : > { %v9483_v16 = vadd.f32 %v20388_v23, %v9451_v15  ;;  %v9261_v29 = vpop.xlane.xlu1 %9260  ;;  %v9421_v22 = vmul.f32 %v15564_v58, %v19873_v27  ;;  %v9362_v31 = vadd.f32 1e-06, %v9330_v63 }
0x1120   : > { %v9333_v18 = vmul.f32 0.03125, %v9261_v29  ;;  %v9258_v36 = vpop.xlane.xlu0 %9257  ;;  %v20392_v24 = vadd.f32 %v20388_v23, %v9450_v12  ;;  %15573 = vrsqrt.f32 %v9363_v40 }
0x1121   : > { %v9547_v0 = vmul.f32 0.70710677, %v9483_v16  ;;  %15575 = vrsqrt.f32 %v9360_v45  ;;  %v9453_v43 = vmul.f32 %v20381_v26, %v9421_v22  ;;  %v9332_v39 = vmul.f32 0.03125, %v9258_v36 }
0x1122   : > { %v15566_v51 = vpop.eup %15565  ;;  %v9365_v42 = vadd.f32 1e-06, %v9333_v18  ;;  %v9546_v19 = vmul.f32 0.70710677, %v20392_v24 }
0x1123   : > { %v9267_v34 = vpop.xlane.xlu1 %9266  ;;  %v15568_v55 = vpop.eup %15567  ;;  %v9423_v47 = vmul.f32 %v15566_v51, %v19898_v53  ;;  %15577 = verf.f32 %v9547_v0  ;;  %v9485_v7 = vadd.f32 %v20388_v23, %v9453_v43  ;;  %v9364_v51 = vadd.f32 1e-06, %v9332_v39 }
0x1124   : > { %v9335_v33 = vmul.f32 0.03125, %v9267_v34  ;;  %v9264_v25 = vpop.xlane.xlu0 %9263  ;;  %15579 = vrsqrt.f32 %v9365_v42  ;;  %v9420_v49 = vmul.f32 %v15568_v55, %v19878_v32 }
0x1125   : > { %v9455_v37 = vmul.f32 %v20381_v26, %v9423_v47  ;;  %v9334_v29 = vmul.f32 0.03125, %v9264_v25  ;;  %v9549_v22 = vmul.f32 0.70710677, %v9485_v7 }
0x1126   : > { %v9367_v44 = vadd.f32 1e-06, %v9335_v33  ;;  %v15570_v62 = vpop.eup %15569  ;;  %v9452_v32 = vmul.f32 %v20381_v26, %v9420_v49  ;;  %v20409_v49 = vmul.f32 0.5, %v9485_v7 }
0x1127   : > { %v9273_v41 = vpop.xlane.xlu1 %9272  ;;  %v15572_v15 = vpop.eup %15571  ;;  %v9425_v59 = vmul.f32 %v15570_v62, %v19917_v28  ;;  %v9487_v45 = vadd.f32 %v20388_v23, %v9455_v37  ;;  %v9366_v33 = vadd.f32 1e-06, %v9334_v29  ;;  %v9514_v37 = vmul.f32 0.5, %v20392_v24 }
0x1128   : > { %v9337_v27 = vmul.f32 0.03125, %v9273_v41  ;;  %v9270_v5 = vpop.xlane.xlu0 %9269  ;;  %15581 = vrsqrt.f32 %v9367_v44  ;;  %v9422_v36 = vmul.f32 %v15572_v15, %v19905_v54  ;;  %v9515_v44 = vmul.f32 0.5, %v9483_v16 }
0x1129   : > { %15583 = verf.f32 %v9546_v19  ;;  %v9457_v34 = vmul.f32 %v20381_v26, %v9425_v59  ;;  %v9336_v25 = vmul.f32 0.03125, %v9270_v5  ;;  %v9551_v41 = vmul.f32 0.70710677, %v9487_v45 }
0x112a   : > { %v9369_v53 = vadd.f32 1e-06, %v9337_v27  ;;  %v15574_v18 = vpop.eup %15573  ;;  %v9484_v54 = vadd.f32 %v20388_v23, %v9452_v32  ;;  %v9454_v62 = vmul.f32 %v20381_v26, %v9422_v36 }
0x112b   : > { %v9279_v12 = vpop.xlane.xlu1 %9278  ;;  %v15576_v28 = vpop.eup %15575  ;;  %v9427_v19 = vmul.f32 %v15574_v18, %v19935_v30  ;;  %v9489_v5 = vadd.f32 %v20388_v23, %v9457_v34  ;;  %v9368_v30 = vadd.f32 1e-06, %v9336_v25 }
0x112c   : > { %15585 = vrsqrt.f32 %v9369_v53  ;;  %v9339_v58 = vmul.f32 0.03125, %v9279_v12  ;;  %v9276_v40 = vpop.xlane.xlu0 %9275  ;;  %v9424_v32 = vmul.f32 %v15576_v28, %v19924_v60  ;;  %v20416_v18 = vmul.f32 0.5, %v9484_v54 }
0x112d   : > { %15587 = vrsqrt.f32 %v9362_v31  ;;  %v15578_v47 = vpop.eup %15577  ;;  %v9459_v59 = vmul.f32 %v20381_v26, %v9427_v19  ;;  %v9486_v24 = vadd.f32 %v20388_v23, %v9454_v62 }
0x112e   : > { %v9371_v0 = vadd.f32 1e-06, %v9339_v58  ;;  %v15580_v43 = vpop.eup %15579  ;;  %v9611_v16 = vadd.f32 1.0, %v15578_v47 }
0x112f   : > { %v9285_v42 = vpop.xlane.xlu1 %9284  ;;  %v9429_v12 = vmul.f32 %v15580_v43, %v19956_v35  ;;  %v9491_v47 = vadd.f32 %v20388_v23, %v9459_v59  ;;  %v20424_v43 = vmul.f32 0.5, %v9487_v45 }
0x1130   : > { %15589 = vrsqrt.f32 %v9371_v0  ;;  %v9341_v63 = vmul.f32 0.03125, %v9285_v42  ;;  %v9282_v55 = vpop.xlane.xlu0 %9281 }
0x1131   : > { %15591 = vrsqrt.f32 %v9364_v51  ;;  %v9553_v51 = vmul.f32 0.70710677, %v9489_v5  ;;  %v9461_v60 = vmul.f32 %v20381_v26, %v9429_v12  ;;  %v9340_v62 = vmul.f32 0.03125, %v9282_v55 }
0x1132   : > { %v15582_v27 = vpop.eup %15581  ;;  %15593 = verf.f32 %v9549_v22  ;;  %v9373_v53 = vadd.f32 1e-06, %v9341_v63  ;;  %v9338_v22 = vmul.f32 0.03125, %v9276_v40  ;;  %v20445_v12 = vmul.f32 0.5, %v9491_v47 }
0x1133   : > { %v9291_v31 = vpop.xlane.xlu1 %9290  ;;  %v15584_v39 = vpop.eup %15583  ;;  %15595 = vrsqrt.f32 %v9366_v33  ;;  %v9431_v0 = vmul.f32 %v15582_v27, %v19973_v38  ;;  %v9643_v33 = vmul.f32 %v9611_v16, %v9515_v44  ;;  %v20426_v38 = vmul.f32 0.5, %v9489_v5 }
0x1134   : > { %v9288_v15 = vpop.xlane.xlu0 %9287  ;;  %v9343_v29 = vmul.f32 0.03125, %v9291_v31  ;;  %v9610_v58 = vadd.f32 1.0, %v15584_v39  ;;  %15597 = verf.f32 %v9551_v41  ;;  %v9370_v41 = vadd.f32 1e-06, %v9338_v22 }
0x1135   : > { %15599 = vrsqrt.f32 %v9373_v53  ;;  %v9463_v44 = vmul.f32 %v20381_v26, %v9431_v0  ;;  %v20431_v31 = vmul.f32 0.5, %v9486_v24  ;;  %v9555_v16 = vmul.f32 0.70710677, %v9491_v47 }
0x1136   : > { %v15586_v7 = vpop.eup %15585  ;;  %v9642_v34 = vmul.f32 %v9610_v58, %v9514_v37  ;;  %15601 = vrsqrt.f32 %v9368_v30  ;;  %v9375_v28 = vadd.f32 1e-06, %v9343_v29  ;;  %v20436_v37 = vld [vmem:[%s21427_s10] sm:$0xf]  ;;  %v9493_v30 = vadd.f32 %v20388_v23, %v9461_v60 }
0x1137   : > { %v15588_v36 = vpop.eup %15587  ;;  %v9297_v42 = vpop.xlane.xlu1 %9296  ;;  %v9433_v35 = vmul.f32 %v15586_v7, %v19990_v46  ;;  %v9548_v46 = vmul.f32 0.70710677, %v9484_v54  ;;  %15603 = verf.f32 %v9553_v51  ;;  %v9550_v53 = vmul.f32 0.70710677, %v9486_v24 }
0x1138   : > { %v9345_v25 = vmul.f32 0.03125, %v9297_v42  ;;  %v9294_v63 = vpop.xlane.xlu0 %9293  ;;  %14473 = vmatprep.mubr.msk.f32.mxu1 %vm449_vm0, %v9642_v34  ;;  %v9426_v40 = vmul.f32 %v15588_v36, %v19940_v48  ;;  %15605 = vrsqrt.f32 %v9375_v28  ;;  %v9342_v29 = vmul.f32 0.03125, %v9288_v15 }
0x1139   : > { %14474 = vmatmul.mubr.msk.f32.vlgmr.msra.gmra.mrb[32].mxu1 %vm449_vm0, %v9643_v33  ;;  %v9465_v48 = vmul.f32 %v20381_v26, %v9433_v35  ;;  %15607 = verf.f32 %v9548_v46  ;;  %v9456_v58 = vmul.f32 %v20381_v26, %v9424_v32  ;;  %v9495_v7 = vadd.f32 %v20388_v23, %v9463_v44 }
0x113a   : > { %v15590_v19 = vpop.eup %15589  ;;  %14586 = vmatpush3.msk.msra.mxu1 %vm2170_vm1, %v20436_v37  ;;  %v9377_v5 = vadd.f32 1e-06, %v9345_v25  ;;  %15609 = vrsqrt.f32 %v9370_v41  ;;  %v9372_v36 = vadd.f32 1e-06, %v9340_v62  ;;  %v9557_v15 = vmul.f32 0.70710677, %v9493_v30 }
0x113b   : > { %v9303_v27 = vpop.xlane.xlu1 %9302  ;;  %v15592_v45 = vpop.eup %15591  ;;  %v9435_v54 = vmul.f32 %v15590_v19, %v20007_v17  ;;  %14699 = vmatprep.subr.msk.mxu1 %vm2170_vm1, %v20436_v37  ;;  %v20451_v22 = vadd.f32 %v20388_v23, %v9465_v48  ;;  %v20457_v35 = vmul.f32 0.5, %v9493_v30  ;;  %v9374_v25 = vadd.f32 1e-06, %v9342_v29 }
0x113c   : > { %v9300_v39 = vpop.xlane.xlu0 %9299  ;;  %v15594_v55 = vpop.eup %15593  ;;  %v9428_v17 = vmul.f32 %v15592_v45, %v19961_v52  ;;  %15611 = vrsqrt.f32 %v9377_v5  ;;  %v9347_v52 = vmul.f32 0.03125, %v9303_v27  ;;  %v20460_v47 = vadd.f32 %v20388_v23, %v9456_v58 }
0x113d   : > { %v15596_v59 = vpop.eup %15595  ;;  %v9467_v24 = vmul.f32 %v20381_v26, %v9435_v54  ;;  %v9613_v34 = vadd.f32 1.0, %v15594_v55  ;;  %15613 = verf.f32 %v9555_v16  ;;  %v9458_v60 = vmul.f32 %v20381_v26, %v9426_v40 }
0x113e   : > { %v15598_v0 = vpop.eup %15597  ;;  %v20455_v32 = vmul.f32 %v15596_v59, %v19979_v61  ;;  %v9559_v19 = vmul.f32 0.70710677, %v9495_v7  ;;  %15615 = vrsqrt.f32 %v9372_v36  ;;  %v9344_v46 = vmul.f32 0.03125, %v9294_v63 }
0x113f   : > { %v9309_v51 = vpop.xlane.xlu1 %9308  ;;  %v15600_v33 = vpop.eup %15599  ;;  %v9615_v44 = vadd.f32 1.0, %v15598_v0  ;;  %v9561_v61 = vmul.f32 0.70710677, %v20451_v22  ;;  %v20465_v62 = vadd.f32 %v20388_v23, %v9467_v24  ;;  %v9645_v27 = vmul.f32 %v9613_v34, %v20409_v49 }
0x1140   : > { %v9306_v42 = vpop.xlane.xlu0 %9305  ;;  %v15602_v28 = vpop.eup %15601  ;;  %15617 = verf.f32 %v9550_v53  ;;  %v20468_v48 = vmul.f32 0.5, %v9495_v7  ;;  %v9437_v40 = vmul.f32 %v15600_v33, %v20025_v4  ;;  %v9379_v54 = vadd.f32 1e-06, %v9347_v52 }
0x1141   : > { %15619 = verf.f32 %v9557_v15  ;;  %v15604_v5 = vpop.eup %15603  ;;  %v9432_v63 = vmul.f32 %v15602_v28, %v19995_v20  ;;  %v9552_v55 = vmul.f32 0.70710677, %v20460_v47  ;;  %v20474_v16 = vadd.f32 %v20388_v23, %v9458_v60 }
0x1142   : > { %15621 = vrsqrt.f32 %v9374_v25  ;;  %v15606_v30 = vpop.eup %15605  ;;  %v9376_v49 = vadd.f32 1e-06, %v9344_v46  ;;  %v20477_v53 = vmul.f32 %v9615_v44, %v20424_v43  ;;  %v9349_v59 = vmul.f32 0.03125, %v9309_v51 }
0x1143   : > { %v9315_v41 = vpop.xlane.xlu1 %9314  ;;  %15623 = verf.f32 %v9559_v19  ;;  %v15608_v58 = vpop.eup %15607  ;;  %v9563_v4 = vmul.f32 0.70710677, %v20465_v62  ;;  %v9346_v7 = vmul.f32 0.03125, %v9300_v39  ;;  %v9460_v20 = vmul.f32 %v20381_v26, %v9428_v17 }
0x1144   : > { %v9312_v45 = vpop.xlane.xlu0 %9311  ;;  %15625 = verf.f32 %v9561_v61  ;;  %v15610_v0 = vpop.eup %15609  ;;  %v9469_v24 = vmul.f32 %v20381_v26, %v9437_v40  ;;  %v9612_v34 = vadd.f32 1.0, %v15608_v58  ;;  %v9348_v15 = vmul.f32 0.03125, %v9306_v42 }
0x1145   : > { %15627 = vrsqrt.f32 %v9379_v54  ;;  %v20482_v43 = vadd.f32 1.0, %v15604_v5  ;;  %v9554_v51 = vmul.f32 0.70710677, %v20474_v16  ;;  %v20486_v33 = vadd.f32 %v20388_v23, %v9460_v20 }
0x1146   : > { %v15612_v52 = vpop.eup %15611  ;;  %15629 = verf.f32 %v9552_v55  ;;  %v9439_v17 = vmul.f32 %v15606_v30, %v20043_v6  ;;  %v9644_v25 = vmul.f32 %v9612_v34, %v20416_v18  ;;  %v9381_v60 = vadd.f32 1e-06, %v9349_v59 }
0x1147   : > { %v9321_v29 = vpop.xlane.xlu1 %9320  ;;  %v20488_v39 = vpop.eup %15613  ;;  %v9350_v28 = vmul.f32 0.03125, %v9312_v45  ;;  %v9434_v19 = vmul.f32 %v15610_v0, %v20014_v11  ;;  %15631 = vrsqrt.f32 %v9376_v49  ;;  %v9378_v46 = vadd.f32 1e-06, %v9346_v7 }
0x1148   : > { %v9318_v36 = vpop.xlane.xlu0 %9317  ;;  %v9351_v44 = vmul.f32 0.03125, %v9315_v41  ;;  %v15616_v40 = vpop.eup %15615  ;;  %15633 = verf.f32 %v9563_v4  ;;  %v20496_v54 = vadd.f32 %v20388_v23, %v9469_v24  ;;  %v9441_v6 = vmul.f32 %v15612_v52, %v20060_v9  ;;  %14476 = vmatprep.mubr.msk.f32.mxu1 %vm449_vm0, %v9644_v25 }
0x1149   : > { %v9380_v18 = vadd.f32 1e-06, %v9348_v15  ;;  %14477 = vmatmul.mubr.msk.f32.gmra.mrb[34].mxu1 %vm449_vm0, %v9645_v27  ;;  %15635 = verf.f32 %v9554_v51  ;;  %v9556_v11 = vmul.f32 0.70710677, %v20486_v33  ;;  %v9352_v41 = vmul.f32 0.03125, %v9318_v36 }
0x114a   : > { %v15618_v45 = vpop.eup %15617  ;;  %v9462_v5 = vmul.f32 %v20381_v26, %v20455_v32  ;;  %v9471_v9 = vmul.f32 %v20381_v26, %v9439_v17  ;;  %15637 = vrsqrt.f32 %v9381_v60  ;;  %v9382_v49 = vadd.f32 1e-06, %v9350_v28 }
0x114b   : > { %v5979_v42 = vpop.permute.xlu1 %5978  ;;  %v20506_v55 = vpop.eup %15619  ;;  %v9614_v30 = vadd.f32 1.0, %v15618_v45  ;;  %15639 = vrsqrt.f32 %v9378_v46  ;;  %v9383_v4 = vadd.f32 1e-06, %v9351_v44  ;;  %v9464_v7 = vmul.f32 %v20381_v26, %v9432_v63 }
0x114c   : > { %6074 = vst.msk [vmem:[%s17475_s14 + $0x10] sm:$0xff] %vm6072_vm4, %v5979_v42  ;;  %v5977_v61 = vpop.permute.xlu0 %5976  ;;  %v15622_v58 = vpop.eup %15621  ;;  %v20510_v27 = vadd.f32 %v20388_v23, %v9462_v5  ;;  %v9473_v36 = vmul.f32 %v20381_v26, %v9441_v6  ;;  %15641 = vrsqrt.f32 %v9380_v18  ;;  %v9353_v24 = vmul.f32 0.03125, %v9321_v29 }
0x114d   : > { %6073 = vst.msk [vmem:[%s17475_s14] sm:$0xff] %vm6072_vm4, %v5977_v61  ;;  %v20515_v20 = vpop.eup %15623  ;;  %v9646_v0 = vmul.f32 %v9614_v30, %v20431_v31  ;;  %v9520_v15 = vmul.f32 0.5, %v20460_v47  ;;  %15643 = verf.f32 %v9556_v11  ;;  %v9384_v52 = vadd.f32 1e-06, %v9352_v41 }
0x114e   : > { %v20521_v34 = vpop.eup %15625  ;;  %v9558_v63 = vmul.f32 0.70710677, %v20510_v27  ;;  %v9565_v17 = vmul.f32 0.70710677, %v20496_v54  ;;  %v9436_v25 = vmul.f32 %v15616_v40, %v20030_v1  ;;  %v20528_v31 = vadd.f32 %v20388_v23, %v9471_v9 }
0x114f   : > { %v5981_v59 = vpop.permute.xlu1 %5980  ;;  %v15628_v51 = vpop.eup %15627  ;;  %14479 = vmatprep.mubr.msk.f32.mxu1 %vm449_vm0, %v9646_v0  ;;  %15645 = vrsqrt.f32 %v9382_v49  ;;  %v9438_v47 = vmul.f32 %v15622_v58, %v20048_v56  ;;  %v20535_v28 = vadd.f32 %v20388_v23, %v9464_v7  ;;  %v9466_v1 = vmul.f32 %v20381_v26, %v9434_v19 }
0x1150   : > { %6075 = vst.msk [vmem:[%s17475_s14 + $0x20] sm:$0xff] %vm6072_vm4, %v5981_v59  ;;  %v5985_v32 = vpop.permute.xlu0 %5984  ;;  %v15630_v60 = vpop.eup %15629  ;;  %14480 = vmatmul.mubr.msk.f32.gmra.mrb[36].mxu1 %vm449_vm0, %v20477_v53  ;;  %15647 = verf.f32 %v9558_v63  ;;  %v20541_v46 = vadd.f32 %v20388_v23, %v9473_v36  ;;  %v9385_v61 = vadd.f32 1e-06, %v9353_v24  ;;  %v9443_v53 = vmul.f32 %v15628_v51, %v20082_v57 }
0x1151   : > { %6077 = vst.msk [vmem:[%s17475_s14 + $0x40] sm:$0xff] %vm6072_vm4, %v5985_v32  ;;  %v9616_v44 = vadd.f32 1.0, %v15630_v60  ;;  %15649 = vrsqrt.f32 %v9383_v4  ;;  %v15632_v56 = vpop.eup %15631  ;;  %v9560_v40 = vmul.f32 0.70710677, %v20535_v28  ;;  %v20548_v6 = vadd.f32 %v20388_v23, %v9466_v1 }
0x1152   : > { %15651 = vrsqrt.f32 %v9384_v52  ;;  %v20550_v19 = vpop.eup %15633  ;;  %v9567_v18 = vmul.f32 0.70710677, %v20528_v31  ;;  %v9619_v11 = vadd.f32 1.0, %v20488_v39  ;;  %v9649_v57 = vmul.f32 %v20482_v43, %v20426_v38 }
0x1153   : > { %v5983_v29 = vpop.permute.xlu1 %5982  ;;  %15653 = verf.f32 %v9565_v17  ;;  %v9648_v45 = vmul.f32 %v9616_v44, %v9520_v15  ;;  %v15636_v5 = vpop.eup %15635  ;;  %v9522_v9 = vmul.f32 0.5, %v20474_v16  ;;  %v9562_v30 = vmul.f32 0.70710677, %v20548_v6 }
0x1154   : > { %6076 = vst.msk [vmem:[%s17475_s14 + $0x30] sm:$0xff] %vm6072_vm4, %v5983_v29  ;;  %v5989_v42 = vpop.permute.xlu0 %5988  ;;  %15655 = verf.f32 %v9560_v40  ;;  %v15638_v59 = vpop.eup %15637  ;;  %v9569_v58 = vmul.f32 0.70710677, %v20541_v46  ;;  %v9618_v4 = vadd.f32 1.0, %v15636_v5  ;;  %v9468_v39 = vmul.f32 %v20381_v26, %v9436_v25 }
0x1155   : > { %6079 = vst.msk [vmem:[%s17475_s14 + $0x60] sm:$0xff] %vm6072_vm4, %v5989_v42  ;;  %14482 = vmatprep.mubr.msk.f32.mxu1 %vm449_vm0, %v9648_v45  ;;  %15657 = vrsqrt.f32 %v9385_v61  ;;  %v15640_v38 = vpop.eup %15639  ;;  %v9475_v16 = vmul.f32 %v20381_v26, %v9443_v53  ;;  %v9621_v43 = vadd.f32 1.0, %v20506_v55  ;;  %v9470_v7 = vmul.f32 %v20381_v26, %v9438_v47 }
0x1156   : > { %14483 = vmatmul.mubr.msk.f32.gmra.mrb[38].mxu1 %vm449_vm0, %v9649_v57  ;;  %15659 = verf.f32 %v9562_v30  ;;  %v15642_v32 = vpop.eup %15641  ;;  %v9650_v36 = vmul.f32 %v9618_v4, %v9522_v9  ;;  %v9651_v0 = vmul.f32 %v9619_v11, %v20445_v12  ;;  %v20571_v24 = vadd.f32 %v20388_v23, %v9468_v39 }
0x1157   : > { %v5987_v41 = vpop.permute.xlu1 %5986  ;;  %15661 = verf.f32 %v9567_v18  ;;  %v15644_v52 = vpop.eup %15643  ;;  %v9440_v63 = vmul.f32 %v15632_v56, %v20066_v2  ;;  %v9445_v51 = vmul.f32 %v15638_v59, %v20104_v10  ;;  %v9524_v55 = vmul.f32 0.5, %v20486_v33 }
0x1158   : > { %6078 = vst.msk [vmem:[%s17475_s14 + $0x50] sm:$0xff] %vm6072_vm4, %v5987_v41  ;;  %v5993_v49 = vpop.permute.xlu0 %5992  ;;  %v20579_v17 = vadd.f32 %v20388_v23, %v9470_v7  ;;  %v9442_v12 = vmul.f32 %v15640_v38, %v20088_v14  ;;  %14485 = vmatprep.mubr.msk.f32.mxu1 %vm449_vm0, %v9650_v36  ;;  %v9620_v60 = vadd.f32 1.0, %v15644_v52  ;;  %v9623_v47 = vadd.f32 1.0, %v20515_v20 }
0x1159   : > { %6081 = vst.msk [vmem:[%s17475_s14 + $0x80] sm:$0xff] %vm6072_vm4, %v5993_v49  ;;  %v15646_v29 = vpop.eup %15645  ;;  %v9564_v2 = vmul.f32 0.70710677, %v20571_v24  ;;  %v20588_v33 = vmul.f32 0.5, %v20451_v22  ;;  %15663 = verf.f32 %v9569_v58  ;;  %v20591_v1 = vadd.f32 %v20388_v23, %v9475_v16 }
0x115a   : > { %v15648_v10 = vpop.eup %15647  ;;  %14486 = vmatmul.mubr.msk.f32.gmra.mrb[40].mxu1 %vm449_vm0, %v9651_v0  ;;  %v9653_v14 = vmul.f32 %v9621_v43, %v20457_v35  ;;  %v9652_v44 = vmul.f32 %v9620_v60, %v9524_v55  ;;  %v9526_v20 = vmul.f32 0.5, %v20510_v27  ;;  %v9477_v22 = vmul.f32 %v20381_v26, %v9445_v51 }
0x115b   : > { %v5991_v15 = vpop.permute.xlu1 %5990  ;;  %v15650_v42 = vpop.eup %15649  ;;  %v9622_v61 = vadd.f32 1.0, %v15648_v10  ;;  %15665 = verf.f32 %v9564_v2  ;;  %v9444_v40 = vmul.f32 %v15642_v32, %v20110_v13  ;;  %v9446_v18 = vmul.f32 %v15646_v29, %v20132_v50 }
0x115c   : > { %6080 = vst.msk [vmem:[%s17475_s14 + $0x70] sm:$0xff] %vm6072_vm4, %v5991_v15  ;;  %v5997_v25 = vpop.permute.xlu0 %5996  ;;  %v15652_v53 = vpop.eup %15651  ;;  %v9566_v45 = vmul.f32 0.70710677, %v20579_v17  ;;  %14488 = vmatprep.mubr.msk.f32.mxu1 %vm449_vm0, %v9652_v44  ;;  %v9655_v41 = vmul.f32 %v9623_v47, %v20468_v48  ;;  %v9472_v5 = vmul.f32 %v20381_v26, %v9440_v63  ;;  %v9474_v13 = vmul.f32 %v20381_v26, %v9442_v12 }
0x115d   : > { %6083 = vst.msk [vmem:[%s17475_s14 + $0xa0] sm:$0xff] %vm6072_vm4, %v5997_v25  ;;  %v20602_v11 = vpop.eup %15653  ;;  %v9654_v27 = vmul.f32 %v9622_v61, %v9526_v20  ;;  %v9571_v50 = vmul.f32 0.70710677, %v20591_v1  ;;  %v9447_v9 = vmul.f32 %v15650_v42, %v20126_v3  ;;  %v9528_v30 = vmul.f32 0.5, %v20535_v28 }
0x115e   : > { %v15656_v57 = vpop.eup %15655  ;;  %14489 = vmatmul.mubr.msk.f32.gmra.mrb[42].mxu1 %vm449_vm0, %v9653_v14  ;;  %15667 = verf.f32 %v9566_v45  ;;  %v9448_v48 = vmul.f32 %v15652_v53, %v20154_v21  ;;  %v20617_v58 = vadd.f32 %v20388_v23, %v9472_v5  ;;  %v20620_v39 = vadd.f32 %v20388_v23, %v9474_v13 }
0x115f   : > { %v5995_v56 = vpop.permute.xlu1 %5994  ;;  %v15658_v49 = vpop.eup %15657  ;;  %14491 = vmatprep.mubr.msk.f32.mxu1 %vm449_vm0, %v9654_v27  ;;  %v9624_v59 = vadd.f32 1.0, %v15656_v57  ;;  %v20623_v38 = vadd.f32 %v20388_v23, %v9477_v22  ;;  %v9625_v28 = vadd.f32 1.0, %v20521_v34  ;;  %v9476_v16 = vmul.f32 %v20381_v26, %v9444_v40 }
0x1160   : > { %6082 = vst.msk [vmem:[%s17475_s14 + $0x90] sm:$0xff] %vm6072_vm4, %v5995_v56  ;;  %v6001_v35 = vpop.permute.xlu0 %6000  ;;  %v15660_v3 = vpop.eup %15659  ;;  %v9478_v43 = vmul.f32 %v20381_v26, %v9446_v18  ;;  %v9530_v36 = vmul.f32 0.5, %v20548_v6  ;;  %v9568_v15 = vmul.f32 0.70710677, %v20617_v58  ;;  %v9479_v52 = vmul.f32 %v20381_v26, %v9447_v9 }
0x1161   : > { %6085 = vst.msk [vmem:[%s17475_s14 + $0xc0] sm:$0xff] %vm6072_vm4, %v6001_v35  ;;  %v15662_v7 = vpop.eup %15661  ;;  %v9656_v32 = vmul.f32 %v9624_v59, %v9528_v30  ;;  %v9626_v0 = vadd.f32 1.0, %v15660_v3  ;;  %v9449_v34 = vmul.f32 %v15658_v49, %v20148_v8  ;;  %v9570_v63 = vmul.f32 0.70710677, %v20620_v39 }
0x1162   : > { %14492 = vmatmul.mubr.msk.f32.gmra.mrb[44].mxu1 %vm449_vm0, %v9655_v41  ;;  %v20639_v51 = vadd.f32 %v20388_v23, %v9476_v16  ;;  %15669 = verf.f32 %v9568_v15  ;;  %v20643_v25 = vadd.f32 %v20388_v23, %v9478_v43  ;;  %v9480_v29 = vmul.f32 %v20381_v26, %v9448_v48 }
0x1163   : > { %v5999_v4 = vpop.permute.xlu1 %5998  ;;  %14494 = vmatprep.mubr.msk.f32.mxu1 %vm449_vm0, %v9656_v32  ;;  %v9658_v6 = vmul.f32 %v9626_v0, %v9530_v36  ;;  %v15664_v12 = vpop.eup %15663  ;;  %v9657_v8 = vmul.f32 %v9625_v28, %v20588_v33  ;;  %v9627_v60 = vadd.f32 1.0, %v20550_v19  ;;  %15671 = verf.f32 %v9570_v63 }
0x1164   : > { %6084 = vst.msk [vmem:[%s17475_s14 + $0xb0] sm:$0xff] %vm6072_vm4, %v5999_v4  ;;  %v6005_v21 = vpop.permute.xlu0 %6004  ;;  %v9572_v47 = vmul.f32 0.70710677, %v20639_v51  ;;  %v9531_v14 = vmul.f32 0.5, %v20465_v62  ;;  %v9532_v42 = vmul.f32 0.5, %v20571_v24  ;;  %v20658_v33 = vadd.f32 %v20388_v23, %v9480_v29 }
0x1165   : > { %6087 = vst.msk [vmem:[%s17475_s14 + $0xe0] sm:$0xff] %vm6072_vm4, %v6005_v21  ;;  %v15666_v10 = vpop.eup %15665  ;;  %v9574_v19 = vmul.f32 0.70710677, %v20643_v25  ;;  %v9573_v20 = vmul.f32 0.70710677, %v20623_v38  ;;  %v20662_v62 = vadd.f32 %v20388_v23, %v9479_v52  ;;  %v9481_v24 = vmul.f32 %v20381_v26, %v9449_v34 }
0x1166   : > { %14495 = vmatmul.mubr.msk.f32.gmra.mrb[46].mxu1 %vm449_vm0, %v9657_v8  ;;  %v9628_v44 = vadd.f32 1.0, %v15666_v10  ;;  %15673 = verf.f32 %v9572_v47  ;;  %v9659_v53 = vmul.f32 %v9627_v60, %v9531_v14  ;;  %v9629_v40 = vadd.f32 1.0, %v20602_v11 }
0x1167   : > { %v6003_v55 = vpop.permute.xlu1 %6002  ;;  %15675 = verf.f32 %v9571_v50  ;;  %14497 = vmatprep.mubr.msk.f32.mxu1 %vm449_vm0, %v9658_v6  ;;  %v9534_v45 = vmul.f32 0.5, %v20579_v17  ;;  %v9533_v26 = vmul.f32 0.5, %v20496_v54  ;;  %v9576_v27 = vmul.f32 0.70710677, %v20658_v33 }
0x1168   : > { %6086 = vst.msk [vmem:[%s17475_s14 + $0xd0] sm:$0xff] %vm6072_vm4, %v6003_v55  ;;  %v6009_v2 = vpop.permute.xlu0 %6008  ;;  %v15668_v56 = vpop.eup %15667  ;;  %v9660_v22 = vmul.f32 %v9628_v44, %v9532_v42  ;;  %15677 = verf.f32 %v9574_v19  ;;  %v9575_v11 = vmul.f32 0.70710677, %v20662_v62  ;;  %v20677_v41 = vadd.f32 %v20388_v23, %v9481_v24 }
0x1169   : > { %6089 = vst.msk [vmem:[%s17475_s14 + $0x100] sm:$0xff] %vm6072_vm4, %v6009_v2  ;;  %v9630_v35 = vadd.f32 1.0, %v15668_v56  ;;  %15679 = verf.f32 %v9573_v20  ;;  %v9661_v13 = vmul.f32 %v9629_v40, %v9533_v26  ;;  %v9631_v57 = vadd.f32 1.0, %v15662_v7 }
0x116a   : > { %14498 = vmatmul.mubr.msk.f32.gmra.mrb[48].mxu1 %vm449_vm0, %v9659_v53  ;;  %v9535_v30 = vmul.f32 0.5, %v20528_v31  ;;  %v9536_v23 = vmul.f32 0.5, %v20617_v58  ;;  %15681 = verf.f32 %v9576_v27  ;;  %v9577_v48 = vmul.f32 0.70710677, %v20677_v41 }
0x116b   : > { %v6007_v61 = vpop.permute.xlu1 %6006  ;;  %14500 = vmatprep.mubr.msk.f32.mxu1 %vm449_vm0, %v9660_v22  ;;  %v9662_v17 = vmul.f32 %v9630_v35, %v9534_v45  ;;  %15683 = verf.f32 %v9575_v11  ;;  %v9633_v16 = vadd.f32 1.0, %v15664_v12  ;;  %v9538_v58 = vmul.f32 0.5, %v20620_v39  ;;  %v20736_v11 = vld [vmem:[%s21421_s4] ss:$0 sm:$0xff] }
0x116c   : > { %6088 = vst.msk [vmem:[%s17475_s14 + $0xf0] sm:$0xff] %vm6072_vm4, %v6007_v61  ;;  %v6013_v18 = vpop.permute.xlu0 %6012  ;;  %v15670_v50 = vpop.eup %15669  ;;  %v9663_v28 = vmul.f32 %v9631_v57, %v9535_v30  ;;  %v9537_v7 = vmul.f32 0.5, %v20541_v46  ;;  %15685 = verf.f32 %v9577_v48  ;;  %v9540_v6 = vmul.f32 0.5, %v20639_v51  ;;  %v21716_v57 = vld [vmem:[#allocation9_spill] sm:$0xff] }
0x116d   : > { %6091 = vst.msk [vmem:[%s17475_s14 + $0x120] sm:$0xff] %vm6072_vm4, %v6013_v18  ;;  %v15672_v9 = vpop.eup %15671  ;;  %v9632_v49 = vadd.f32 1.0, %v15670_v50  ;;  %v9539_v46 = vmul.f32 0.5, %v20591_v1  ;;  %v9542_v10 = vmul.f32 0.5, %v20643_v25  ;;  %v9541_v1 = vmul.f32 0.5, %v20623_v38 }
0x116e   : > { %14501 = vmatmul.mubr.msk.f32.gmra.mrb[50].mxu1 %vm449_vm0, %v9661_v13  ;;  %v9634_v59 = vadd.f32 1.0, %v15672_v9  ;;  %v9665_v52 = vmul.f32 %v9633_v16, %v9537_v7  ;;  %v9544_v25 = vmul.f32 0.5, %v20658_v33  ;;  %v9543_v38 = vmul.f32 0.5, %v20662_v62  ;;  %v21715_v13 = vld [vmem:[#allocation8_spill] sm:$0xff] }
0x116f   : > { %v6011_v5 = vpop.permute.xlu1 %6010  ;;  %14503 = vmatprep.mubr.msk.f32.mxu1 %vm449_vm0, %v9662_v17  ;;  %v9664_v21 = vmul.f32 %v9632_v49, %v9536_v23  ;;  %v9545_v33 = vmul.f32 0.5, %v20677_v41 }
0x1170   : > { %6090 = vst.msk [vmem:[%s17475_s14 + $0x110] sm:$0xff] %vm6072_vm4, %v6011_v5  ;;  %v6017_v54 = vpop.permute.xlu0 %6016  ;;  %v15674_v3 = vpop.eup %15673  ;;  %v9666_v32 = vmul.f32 %v9634_v59, %v9538_v58  ;;  %v21714_v5 = vld [vmem:[#allocation7_spill] sm:$0xff] }
0x1171   : > { %6093 = vst.msk [vmem:[%s17475_s14 + $0x140] sm:$0xff] %vm6072_vm4, %v6017_v54  ;;  %v15676_v43 = vpop.eup %15675  ;;  %v9636_v36 = vadd.f32 1.0, %v15674_v3  ;;  %v21717_v54 = vld [vmem:[#allocation10_spill] sm:$0xff] }
0x1172   : > { %14504 = vmatmul.mubr.msk.f32.gmra.mrb[52].mxu1 %vm449_vm0, %v9663_v28  ;;  %v15678_v15 = vpop.eup %15677  ;;  %v9635_v34 = vadd.f32 1.0, %v15676_v43 }
0x1173   : > { %v6015_v4 = vpop.permute.xlu1 %6014  ;;  %14506 = vmatprep.mubr.msk.f32.mxu1 %vm449_vm0, %v9664_v21  ;;  %v15680_v63 = vpop.eup %15679  ;;  %v9668_v55 = vmul.f32 %v9636_v36, %v9540_v6  ;;  %v9638_v29 = vadd.f32 1.0, %v15678_v15 }
0x1174   : > { %6092 = vst.msk [vmem:[%s17475_s14 + $0x130] sm:$0xff] %vm6072_vm4, %v6015_v4  ;;  %v6021_v31 = vpop.permute.xlu0 %6020  ;;  %v15682_v8 = vpop.eup %15681  ;;  %v9667_v60 = vmul.f32 %v9635_v34, %v9539_v46  ;;  %v9637_v47 = vadd.f32 1.0, %v15680_v63 }
0x1175   : > { %6095 = vst.msk [vmem:[%s17475_s14 + $0x160] sm:$0xff] %vm6072_vm4, %v6021_v31  ;;  %v15684_v51 = vpop.eup %15683  ;;  %v9670_v14 = vmul.f32 %v9638_v29, %v9542_v10  ;;  %v9640_v42 = vadd.f32 1.0, %v15682_v8 }
0x1176   : > { %14507 = vmatmul.mubr.msk.f32.gmra.mrb[54].mxu1 %vm449_vm0, %v9665_v52  ;;  %v9669_v19 = vmul.f32 %v9637_v47, %v9541_v1  ;;  %v9639_v20 = vadd.f32 1.0, %v15684_v51  ;;  %v15686_v61 = vpop.eup %15685 }
0x1177   : > { %v6019_v0 = vpop.permute.xlu1 %6018  ;;  %14509 = vmatprep.mubr.msk.f32.mxu1 %vm449_vm0, %v9666_v32  ;;  %v9672_v56 = vmul.f32 %v9640_v42, %v9544_v25  ;;  %v9641_v40 = vadd.f32 1.0, %v15686_v61 }
0x1178   : > { %6094 = vst.msk [vmem:[%s17475_s14 + $0x150] sm:$0xff] %vm6072_vm4, %v6019_v0  ;;  %v6025_v39 = vpop.permute.xlu0 %6024  ;;  %v9671_v22 = vmul.f32 %v9639_v20, %v9543_v38 }
0x1179   : > { %6097 = vst.msk [vmem:[%s17475_s14 + $0x180] sm:$0xff] %vm6072_vm4, %v6025_v39  ;;  %v9673_v45 = vmul.f32 %v9641_v40, %v9545_v33 }
0x117a   : > { %14510 = vmatmul.mubr.msk.f32.gmra.mrb[56].mxu1 %vm449_vm0, %v9667_v60 }
0x117b   : > { %v6023_v12 = vpop.permute.xlu1 %6022  ;;  %14512 = vmatprep.mubr.msk.f32.mxu1 %vm449_vm0, %v9668_v55 }
0x117c   : > { %6096 = vst.msk [vmem:[%s17475_s14 + $0x170] sm:$0xff] %vm6072_vm4, %v6023_v12  ;;  %v6029_v2 = vpop.permute.xlu0 %6028 }
0x117d   : > { %6099 = vst.msk [vmem:[%s17475_s14 + $0x1a0] sm:$0xff] %vm6072_vm4, %v6029_v2 }
0x117e   : > { %14513 = vmatmul.mubr.msk.f32.gmra.mrb[58].mxu1 %vm449_vm0, %v9669_v19 }
0x117f   : > { %v6027_v44 = vpop.permute.xlu1 %6026  ;;  %14515 = vmatprep.mubr.msk.f32.mxu1 %vm449_vm0, %v9670_v14 }
0x1180   : > { %6098 = vst.msk [vmem:[%s17475_s14 + $0x190] sm:$0xff] %vm6072_vm4, %v6027_v44  ;;  %v6033_v24 = vpop.permute.xlu0 %6032 }
0x1181   : > { %6101 = vst.msk [vmem:[%s17475_s14 + $0x1c0] sm:$0xff] %vm6072_vm4, %v6033_v24 }
0x1182   : > { %14516 = vmatmul.mubr.msk.f32.gmra.mrb[60].mxu1 %vm449_vm0, %v9671_v22 }
0x1183   : > { %v6031_v53 = vpop.permute.xlu1 %6030  ;;  %14518 = vmatprep.mubr.msk.f32.mxu1 %vm449_vm0, %v9672_v56 }
0x1184   : > { %6100 = vst.msk [vmem:[%s17475_s14 + $0x1b0] sm:$0xff] %vm6072_vm4, %v6031_v53  ;;  %v6037_v18 = vpop.permute.xlu0 %6036 }
0x1185   : > { %6103 = vst.msk [vmem:[%s17475_s14 + $0x1e0] sm:$0xff] %vm6072_vm4, %v6037_v18 }
0x1186   : > { %14519 = vmatmul.mubr.msk.f32.gmra.mrb[62].mxu1 %vm449_vm0, %v9673_v45 }
0x1187   : > { %v6035_v62 = vpop.permute.xlu1 %6034 }
0x1188   : > { %6102 = vst.msk [vmem:[%s17475_s14 + $0x1d0] sm:$0xff] %vm6072_vm4, %v6035_v62 }
0x118b   : > { %v6039_v35 = vpop.permute.xlu1 %6038 }
0x118c   : > { %6104 = vst.msk [vmem:[%s17475_s14 + $0x1f0] sm:$0xff] %vm6072_vm4, %v6039_v35 }
0x120c   : > { %v14475_v26 = vpop.f32.mrb[32].mxu1 }
0x120d   : > { %v9836_v27 = vpop.f32.mrb[33].mxu1  ;;  %v20742_v17 = vadd.f32 %v20736_v11, %v14475_v26 }
0x120e   : > { %v20739_v41 = vadd.f32 %v20736_v11, %v9836_v27 }
0x1210   : > { %14537 = vmatprep.mubr.msk.f32.mxu0 %vm1751_vm2, %v20739_v41 }
0x1211   : > { %14538 = vmatmul.mubr.msk.f32.vlgmr.msra.gmra.mrb[64].mxu0 %vm1751_vm2, %v20742_v17 }
0x1212   : > { %14928 = vmatpush3.bf16.msra.mxu0 %v21714_v5 }
0x1213   : > { %14930 = vmatprep.subr.bf16.mxu0 %v21715_v13 }
0x1216   : > { %14932 = vmatpush3.bf16.msra.mxu0 %v21715_v13 }
0x1217   : > { %14934 = vmatprep.subr.bf16.mxu0 %v21716_v57 }
0x121a   : > { %14936 = vmatpush3.bf16.msra.mxu0 %v21716_v57 }
0x121b   : > { %14938 = vmatprep.subr.bf16.mxu0 %v21717_v54 }
0x121c   : > { %v14478_v50 = vpop.f32.mrb[34].mxu1 }
0x121d   : > { %v9846_v9 = vpop.f32.mrb[35].mxu1  ;;  %v20759_v23 = vadd.f32 %v20736_v11, %v14478_v50 }
0x121e   : > { %14940 = vmatpush3.bf16.msra.mxu0 %v21717_v54  ;;  %v20756_v30 = vadd.f32 %v20736_v11, %v9846_v9 }
0x1220   : > { %14540 = vmatprep.mubr.msk.f32.mxu0 %vm1751_vm2, %v20756_v30 }
0x1221   : > { %14541 = vmatmul.mubr.msk.f32.gmra.mrb[66].mxu0 %vm1751_vm2, %v20759_v23 }
0x1223   : > { %v14481_v49 = vpop.f32.mrb[36].mxu1 }
0x1224   : > { %v9856_v48 = vpop.f32.mrb[37].mxu1  ;;  %v20769_v4 = vadd.f32 %v20736_v11, %v14481_v49 }
0x1225   : > { %v20766_v59 = vadd.f32 %v20736_v11, %v9856_v48 }
0x1227   : > { %14543 = vmatprep.mubr.msk.f32.mxu0 %vm1751_vm2, %v20766_v59 }
0x1228   : > { %14544 = vmatmul.mubr.msk.f32.gmra.mrb[68].mxu0 %vm1751_vm2, %v20769_v4 }
0x1229   : > { %v14484_v3 = vpop.f32.mrb[38].mxu1 }
0x122a   : > { %v9866_v28 = vpop.f32.mrb[39].mxu1  ;;  %v20779_v16 = vadd.f32 %v20736_v11, %v14484_v3 }
0x122b   : > { %v20776_v21 = vadd.f32 %v20736_v11, %v9866_v28 }
0x122d   : > { %v14487_v31 = vpop.f32.mrb[40].mxu1  ;;  %14546 = vmatprep.mubr.msk.f32.mxu0 %vm1751_vm2, %v20776_v21 }
0x122e   : > { %v9876_v43 = vpop.f32.mrb[41].mxu1  ;;  %14547 = vmatmul.mubr.msk.f32.gmra.mrb[70].mxu0 %vm1751_vm2, %v20779_v16  ;;  %v20789_v7 = vadd.f32 %v20736_v11, %v14487_v31 }
0x122f   : > { %v20786_v58 = vadd.f32 %v20736_v11, %v9876_v43 }
0x1231   : > { %v14490_v32 = vpop.f32.mrb[42].mxu1  ;;  %14549 = vmatprep.mubr.msk.f32.mxu0 %vm1751_vm2, %v20786_v58 }
0x1232   : > { %v9886_v36 = vpop.f32.mrb[43].mxu1  ;;  %14550 = vmatmul.mubr.msk.f32.gmra.mrb[72].mxu0 %vm1751_vm2, %v20789_v7  ;;  %v20799_v15 = vadd.f32 %v20736_v11, %v14490_v32 }
0x1233   : > { %v20796_v0 = vadd.f32 %v20736_v11, %v9886_v36 }
0x1235   : > { %v14493_v52 = vpop.f32.mrb[44].mxu1  ;;  %14552 = vmatprep.mubr.msk.f32.mxu0 %vm1751_vm2, %v20796_v0 }
0x1236   : > { %v9896_v34 = vpop.f32.mrb[45].mxu1  ;;  %14553 = vmatmul.mubr.msk.f32.gmra.mrb[74].mxu0 %vm1751_vm2, %v20799_v15  ;;  %v20809_v63 = vadd.f32 %v20736_v11, %v14493_v52 }
0x1237   : > { %v20806_v39 = vadd.f32 %v20736_v11, %v9896_v34 }
0x1239   : > { %v14496_v6 = vpop.f32.mrb[46].mxu1  ;;  %14555 = vmatprep.mubr.msk.f32.mxu0 %vm1751_vm2, %v20806_v39 }
0x123a   : > { %v9906_v46 = vpop.f32.mrb[47].mxu1  ;;  %14556 = vmatmul.mubr.msk.f32.gmra.mrb[76].mxu0 %vm1751_vm2, %v20809_v63  ;;  %v20819_v29 = vadd.f32 %v20736_v11, %v14496_v6 }
0x123b   : > { %v20816_v55 = vadd.f32 %v20736_v11, %v9906_v46 }
0x123d   : > { %v14499_v12 = vpop.f32.mrb[48].mxu1  ;;  %14558 = vmatprep.mubr.msk.f32.mxu0 %vm1751_vm2, %v20816_v55 }
0x123e   : > { %v9916_v8 = vpop.f32.mrb[49].mxu1  ;;  %14559 = vmatmul.mubr.msk.f32.gmra.mrb[78].mxu0 %vm1751_vm2, %v20819_v29  ;;  %v20829_v47 = vadd.f32 %v20736_v11, %v14499_v12 }
0x123f   : > { %v20826_v60 = vadd.f32 %v20736_v11, %v9916_v8 }
0x1241   : > { %v14502_v2 = vpop.f32.mrb[50].mxu1  ;;  %14561 = vmatprep.mubr.msk.f32.mxu0 %vm1751_vm2, %v20826_v60 }
0x1242   : > { %v9926_v51 = vpop.f32.mrb[51].mxu1  ;;  %14562 = vmatmul.mubr.msk.f32.gmra.mrb[80].mxu0 %vm1751_vm2, %v20829_v47  ;;  %v20839_v1 = vadd.f32 %v20736_v11, %v14502_v2 }
0x1243   : > { %v20836_v10 = vadd.f32 %v20736_v11, %v9926_v51 }
0x1245   : > { %v14505_v14 = vpop.f32.mrb[52].mxu1  ;;  %14564 = vmatprep.mubr.msk.f32.mxu0 %vm1751_vm2, %v20836_v10 }
0x1246   : > { %v9936_v42 = vpop.f32.mrb[53].mxu1  ;;  %14565 = vmatmul.mubr.msk.f32.gmra.mrb[82].mxu0 %vm1751_vm2, %v20839_v1  ;;  %v20849_v19 = vadd.f32 %v20736_v11, %v14505_v14 }
0x1247   : > { %v20846_v44 = vadd.f32 %v20736_v11, %v9936_v42 }
0x1249   : > { %v14508_v20 = vpop.f32.mrb[54].mxu1  ;;  %14567 = vmatprep.mubr.msk.f32.mxu0 %vm1751_vm2, %v20846_v44 }
0x124a   : > { %v9946_v24 = vpop.f32.mrb[55].mxu1  ;;  %14568 = vmatmul.mubr.msk.f32.gmra.mrb[84].mxu0 %vm1751_vm2, %v20849_v19  ;;  %v20859_v25 = vadd.f32 %v20736_v11, %v14508_v20 }
0x124b   : > { %v20856_v61 = vadd.f32 %v20736_v11, %v9946_v24 }
0x124d   : > { %v14511_v38 = vpop.f32.mrb[56].mxu1  ;;  %14570 = vmatprep.mubr.msk.f32.mxu0 %vm1751_vm2, %v20856_v61 }
0x124e   : > { %v9956_v56 = vpop.f32.mrb[57].mxu1  ;;  %14571 = vmatmul.mubr.msk.f32.gmra.mrb[86].mxu0 %vm1751_vm2, %v20859_v25  ;;  %v20869_v22 = vadd.f32 %v20736_v11, %v14511_v38 }
0x124f   : > { %v20866_v53 = vadd.f32 %v20736_v11, %v9956_v56 }
0x1251   : > { %v14514_v40 = vpop.f32.mrb[58].mxu1  ;;  %14573 = vmatprep.mubr.msk.f32.mxu0 %vm1751_vm2, %v20866_v53 }
0x1252   : > { %v9966_v18 = vpop.f32.mrb[59].mxu1  ;;  %14574 = vmatmul.mubr.msk.f32.gmra.mrb[88].mxu0 %vm1751_vm2, %v20869_v22  ;;  %v20879_v62 = vadd.f32 %v20736_v11, %v14514_v40 }
0x1253   : > { %v20876_v33 = vadd.f32 %v20736_v11, %v9966_v18 }
0x1255   : > { %v14517_v45 = vpop.f32.mrb[60].mxu1  ;;  %14576 = vmatprep.mubr.msk.f32.mxu0 %vm1751_vm2, %v20876_v33 }
0x1256   : > { %v9976_v35 = vpop.f32.mrb[61].mxu1  ;;  %14577 = vmatmul.mubr.msk.f32.gmra.mrb[90].mxu0 %vm1751_vm2, %v20879_v62  ;;  %v20889_v27 = vadd.f32 %v20736_v11, %v14517_v45 }
0x1257   : > { %v20886_v26 = vadd.f32 %v20736_v11, %v9976_v35 }
0x1259   : > { %v14520_v5 = vpop.f32.mrb[62].mxu1  ;;  %14579 = vmatprep.mubr.msk.f32.mxu0 %vm1751_vm2, %v20886_v26 }
0x125a   : > { %v9986_v13 = vpop.f32.mrb[63].mxu1  ;;  %14580 = vmatmul.mubr.msk.f32.gmra.mrb[92].mxu0 %vm1751_vm2, %v20889_v27  ;;  %v20899_v54 = vadd.f32 %v20736_v11, %v14520_v5 }
0x125b   : > { %v20896_v57 = vadd.f32 %v20736_v11, %v9986_v13 }
0x125d   : > { %14582 = vmatprep.mubr.msk.f32.mxu0 %vm1751_vm2, %v20896_v57 }
0x125e   : > { %14583 = vmatmul.mubr.msk.f32.gmra.mrb[94].mxu0 %vm1751_vm2, %v20899_v54 }
0x12e4   : > { %v14539_v50 = vpop.f32.mrb[64].mxu0 }
0x12e5   : > { %v10157_v9 = vpop.f32.mrb[65].mxu0 }
0x12e6   : > { %14587 = vmatprep.mubr.msk.f32.mxu1 %vm2073_vm3, %v10157_v9 }
0x12e7   : > { %14588 = vmatmul.mubr.msk.f32.vlgmr.msra.gmra.mrb[64].mxu1 %vm2073_vm3, %v14539_v50 }
0x12e8   : > { %14700 = vmatpush3.msk.msra.mxu1 %vm2170_vm1, %v20436_v37 }
0x12f4   : > { %v14542_v49 = vpop.f32.mrb[66].mxu0 }
0x12f5   : > { %v10167_v48 = vpop.f32.mrb[67].mxu0 }
0x12f6   : > { %14590 = vmatprep.mubr.msk.f32.mxu1 %vm2073_vm3, %v10167_v48 }
0x12f7   : > { %14591 = vmatmul.mubr.msk.f32.gmra.mrb[66].mxu1 %vm2073_vm3, %v14542_v49 }
0x12fb   : > { %v14545_v11 = vpop.f32.mrb[68].mxu0 }
0x12fc   : > { %v10177_v3 = vpop.f32.mrb[69].mxu0 }
0x12fd   : > { %14593 = vmatprep.mubr.msk.f32.mxu1 %vm2073_vm3, %v10177_v3 }
0x12fe   : > { %14594 = vmatmul.mubr.msk.f32.gmra.mrb[68].mxu1 %vm2073_vm3, %v14545_v11 }
0x1301   : > { %v14548_v28 = vpop.f32.mrb[70].mxu0 }
0x1302   : > { %v10187_v31 = vpop.f32.mrb[71].mxu0 }
0x1303   : > { %14596 = vmatprep.mubr.msk.f32.mxu1 %vm2073_vm3, %v10187_v31 }
0x1304   : > { %14597 = vmatmul.mubr.msk.f32.gmra.mrb[70].mxu1 %vm2073_vm3, %v14548_v28 }
0x1305   : > { %v14551_v43 = vpop.f32.mrb[72].mxu0 }
0x1306   : > { %v10197_v37 = vpop.f32.mrb[73].mxu0 }
0x1307   : > { %14599 = vmatprep.mubr.msk.f32.mxu1 %vm2073_vm3, %v10197_v37 }
0x1308   : > { %14600 = vmatmul.mubr.msk.f32.gmra.mrb[72].mxu1 %vm2073_vm3, %v14551_v43 }
0x1309   : > { %v14554_v32 = vpop.f32.mrb[74].mxu0 }
0x130a   : > { %v10207_v36 = vpop.f32.mrb[75].mxu0 }
0x130b   : > { %14602 = vmatprep.mubr.msk.f32.mxu1 %vm2073_vm3, %v10207_v36 }
0x130c   : > { %14603 = vmatmul.mubr.msk.f32.gmra.mrb[74].mxu1 %vm2073_vm3, %v14554_v32 }
0x130d   : > { %v14557_v52 = vpop.f32.mrb[76].mxu0 }
0x130e   : > { %v10217_v34 = vpop.f32.mrb[77].mxu0 }
0x130f   : > { %14605 = vmatprep.mubr.msk.f32.mxu1 %vm2073_vm3, %v10217_v34 }
0x1310   : > { %14606 = vmatmul.mubr.msk.f32.gmra.mrb[76].mxu1 %vm2073_vm3, %v14557_v52 }
0x1311   : > { %v14560_v6 = vpop.f32.mrb[78].mxu0 }
0x1312   : > { %v10227_v46 = vpop.f32.mrb[79].mxu0 }
0x1313   : > { %14608 = vmatprep.mubr.msk.f32.mxu1 %vm2073_vm3, %v10227_v46 }
0x1314   : > { %14609 = vmatmul.mubr.msk.f32.gmra.mrb[78].mxu1 %vm2073_vm3, %v14560_v6 }
0x1315   : > { %v14563_v12 = vpop.f32.mrb[80].mxu0 }
0x1316   : > { %v10237_v8 = vpop.f32.mrb[81].mxu0 }
0x1317   : > { %14611 = vmatprep.mubr.msk.f32.mxu1 %vm2073_vm3, %v10237_v8 }
0x1318   : > { %14612 = vmatmul.mubr.msk.f32.gmra.mrb[80].mxu1 %vm2073_vm3, %v14563_v12 }
0x1319   : > { %v14566_v2 = vpop.f32.mrb[82].mxu0 }
0x131a   : > { %v10247_v51 = vpop.f32.mrb[83].mxu0 }
0x131b   : > { %14614 = vmatprep.mubr.msk.f32.mxu1 %vm2073_vm3, %v10247_v51 }
0x131c   : > { %14615 = vmatmul.mubr.msk.f32.gmra.mrb[82].mxu1 %vm2073_vm3, %v14566_v2 }
0x131d   : > { %v14569_v14 = vpop.f32.mrb[84].mxu0 }
0x131e   : > { %v10257_v42 = vpop.f32.mrb[85].mxu0 }
0x131f   : > { %14617 = vmatprep.mubr.msk.f32.mxu1 %vm2073_vm3, %v10257_v42 }
0x1320   : > { %14618 = vmatmul.mubr.msk.f32.gmra.mrb[84].mxu1 %vm2073_vm3, %v14569_v14 }
0x1321   : > { %v14572_v20 = vpop.f32.mrb[86].mxu0 }
0x1322   : > { %v10267_v24 = vpop.f32.mrb[87].mxu0 }
0x1323   : > { %14620 = vmatprep.mubr.msk.f32.mxu1 %vm2073_vm3, %v10267_v24 }
0x1324   : > { %14621 = vmatmul.mubr.msk.f32.gmra.mrb[86].mxu1 %vm2073_vm3, %v14572_v20 }
0x1325   : > { %v14575_v38 = vpop.f32.mrb[88].mxu0 }
0x1326   : > { %v10277_v56 = vpop.f32.mrb[89].mxu0 }
0x1327   : > { %14623 = vmatprep.mubr.msk.f32.mxu1 %vm2073_vm3, %v10277_v56 }
0x1328   : > { %14624 = vmatmul.mubr.msk.f32.gmra.mrb[88].mxu1 %vm2073_vm3, %v14575_v38 }
0x1329   : > { %v14578_v40 = vpop.f32.mrb[90].mxu0 }
0x132a   : > { %v10287_v18 = vpop.f32.mrb[91].mxu0 }
0x132b   : > { %14626 = vmatprep.mubr.msk.f32.mxu1 %vm2073_vm3, %v10287_v18 }
0x132c   : > { %14627 = vmatmul.mubr.msk.f32.gmra.mrb[90].mxu1 %vm2073_vm3, %v14578_v40 }
0x132d   : > { %v14581_v45 = vpop.f32.mrb[92].mxu0 }
0x132e   : > { %v10297_v35 = vpop.f32.mrb[93].mxu0 }
0x132f   : > { %14629 = vmatprep.mubr.msk.f32.mxu1 %vm2073_vm3, %v10297_v35 }
0x1330   : > { %14630 = vmatmul.mubr.msk.f32.gmra.mrb[92].mxu1 %vm2073_vm3, %v14581_v45 }
0x1331   : > { %v14584_v5 = vpop.f32.mrb[94].mxu0 }
0x1332   : > { %v10307_v13 = vpop.f32.mrb[95].mxu0 }
0x1333   : > { %14632 = vmatprep.mubr.msk.f32.mxu1 %vm2073_vm3, %v10307_v13 }
0x1334   : > { %14633 = vmatmul.mubr.msk.f32.gmra.mrb[94].mxu1 %vm2073_vm3, %v14584_v5 }
0x13ba   : > { %v14589_v50 = vpop.f32.mrb[64].mxu1 }
0x13bb   : > { %v20940_v9 = vsub.f32 %v20742_v17, %v14589_v50  ;;  %v10478_v49 = vpop.f32.mrb[65].mxu1 }
0x13bc   : > { %v20943_v48 = vsub.f32 %v20739_v41, %v10478_v49 }
0x13bd   : > { %v10670_v3 = vmul.f32 %v20940_v9, %v20940_v9 }
0x13be   : > { %v10669_v11 = vmul.f32 %v20943_v48, %v20943_v48 }
0x13c0   : > { %14651 = vmatprep.mubr.msk.f32.mxu0 %vm1751_vm2, %v10669_v11 }
0x13c1   : > { %14652 = vmatmul.mubr.msk.f32.vlgmr.msra.gmra.mrb[96].mxu0 %vm1751_vm2, %v10670_v3 }
0x13ca   : > { %v14592_v28 = vpop.f32.mrb[66].mxu1 }
0x13cb   : > { %v20952_v31 = vsub.f32 %v20759_v23, %v14592_v28  ;;  %v10488_v17 = vpop.f32.mrb[67].mxu1 }
0x13cc   : > { %v20955_v43 = vsub.f32 %v20756_v30, %v10488_v17 }
0x13cd   : > { %v10672_v37 = vmul.f32 %v20952_v31, %v20952_v31 }
0x13ce   : > { %v10671_v41 = vmul.f32 %v20955_v43, %v20955_v43 }
0x13d0   : > { %14654 = vmatprep.mubr.msk.f32.mxu0 %vm1751_vm2, %v10671_v41 }
0x13d1   : > { %v14595_v32 = vpop.f32.mrb[68].mxu1  ;;  %14655 = vmatmul.mubr.msk.f32.gmra.mrb[98].mxu0 %vm1751_vm2, %v10672_v37 }
0x13d2   : > { %v20963_v36 = vsub.f32 %v20769_v4, %v14595_v32  ;;  %v10498_v52 = vpop.f32.mrb[69].mxu1 }
0x13d3   : > { %v20967_v23 = vsub.f32 %v20766_v59, %v10498_v52 }
0x13d4   : > { %v10674_v34 = vmul.f32 %v20963_v36, %v20963_v36 }
0x13d5   : > { %v10673_v30 = vmul.f32 %v20967_v23, %v20967_v23 }
0x13d7   : > { %v14598_v6 = vpop.f32.mrb[70].mxu1  ;;  %14657 = vmatprep.mubr.msk.f32.mxu0 %vm1751_vm2, %v10673_v30 }
0x13d8   : > { %v20975_v46 = vsub.f32 %v20779_v16, %v14598_v6  ;;  %v10508_v4 = vpop.f32.mrb[71].mxu1  ;;  %14658 = vmatmul.mubr.msk.f32.gmra.mrb[100].mxu0 %vm1751_vm2, %v10674_v34 }
0x13d9   : > { %v20979_v12 = vsub.f32 %v20776_v21, %v10508_v4 }
0x13da   : > { %v10676_v2 = vmul.f32 %v20975_v46, %v20975_v46 }
0x13db   : > { %v10675_v59 = vmul.f32 %v20979_v12, %v20979_v12  ;;  %v14601_v8 = vpop.f32.mrb[72].mxu1 }
0x13dc   : > { %v20986_v51 = vsub.f32 %v20789_v7, %v14601_v8  ;;  %v10518_v14 = vpop.f32.mrb[73].mxu1 }
0x13dd   : > { %v20989_v16 = vsub.f32 %v20786_v58, %v10518_v14  ;;  %14660 = vmatprep.mubr.msk.f32.mxu0 %vm1751_vm2, %v10675_v59 }
0x13de   : > { %14661 = vmatmul.mubr.msk.f32.gmra.mrb[102].mxu0 %vm1751_vm2, %v10676_v2  ;;  %v10678_v20 = vmul.f32 %v20986_v51, %v20986_v51 }
0x13df   : > { %v10677_v21 = vmul.f32 %v20989_v16, %v20989_v16  ;;  %v14604_v42 = vpop.f32.mrb[74].mxu1 }
0x13e0   : > { %v20998_v24 = vsub.f32 %v20799_v15, %v14604_v42  ;;  %v10528_v7 = vpop.f32.mrb[75].mxu1 }
0x13e1   : > { %v21001_v38 = vsub.f32 %v20796_v0, %v10528_v7  ;;  %14663 = vmatprep.mubr.msk.f32.mxu0 %vm1751_vm2, %v10677_v21 }
0x13e2   : > { %14664 = vmatmul.mubr.msk.f32.gmra.mrb[104].mxu0 %vm1751_vm2, %v10678_v20  ;;  %v10680_v40 = vmul.f32 %v20998_v24, %v20998_v24 }
0x13e3   : > { %v10679_v58 = vmul.f32 %v21001_v38, %v21001_v38  ;;  %v14607_v56 = vpop.f32.mrb[76].mxu1 }
0x13e4   : > { %v21010_v18 = vsub.f32 %v20809_v63, %v14607_v56  ;;  %v10538_v15 = vpop.f32.mrb[77].mxu1 }
0x13e5   : > { %v21013_v45 = vsub.f32 %v20806_v39, %v10538_v15  ;;  %14666 = vmatprep.mubr.msk.f32.mxu0 %vm1751_vm2, %v10679_v58 }
0x13e6   : > { %14667 = vmatmul.mubr.msk.f32.gmra.mrb[106].mxu0 %vm1751_vm2, %v10680_v40  ;;  %v10682_v5 = vmul.f32 %v21010_v18, %v21010_v18 }
0x13e7   : > { %v10681_v0 = vmul.f32 %v21013_v45, %v21013_v45  ;;  %v14610_v35 = vpop.f32.mrb[78].mxu1 }
0x13e8   : > { %v21022_v13 = vsub.f32 %v20819_v29, %v14610_v35  ;;  %v10548_v63 = vpop.f32.mrb[79].mxu1 }
0x13e9   : > { %v21025_v50 = vsub.f32 %v20816_v55, %v10548_v63  ;;  %14669 = vmatprep.mubr.msk.f32.mxu0 %vm1751_vm2, %v10681_v0 }
0x13ea   : > { %14670 = vmatmul.mubr.msk.f32.gmra.mrb[108].mxu0 %vm1751_vm2, %v10682_v5  ;;  %v10684_v11 = vmul.f32 %v21022_v13, %v21022_v13 }
0x13eb   : > { %v10683_v39 = vmul.f32 %v21025_v50, %v21025_v50  ;;  %v14613_v49 = vpop.f32.mrb[80].mxu1 }
0x13ec   : > { %v21034_v3 = vsub.f32 %v20829_v47, %v14613_v49  ;;  %v10558_v29 = vpop.f32.mrb[81].mxu1 }
0x13ed   : > { %v21037_v28 = vsub.f32 %v20826_v60, %v10558_v29  ;;  %14672 = vmatprep.mubr.msk.f32.mxu0 %vm1751_vm2, %v10683_v39 }
0x13ee   : > { %14673 = vmatmul.mubr.msk.f32.gmra.mrb[110].mxu0 %vm1751_vm2, %v10684_v11  ;;  %v10686_v41 = vmul.f32 %v21034_v3, %v21034_v3 }
0x13ef   : > { %v10685_v55 = vmul.f32 %v21037_v28, %v21037_v28  ;;  %v14616_v17 = vpop.f32.mrb[82].mxu1 }
0x13f0   : > { %v21046_v37 = vsub.f32 %v20839_v1, %v14616_v17  ;;  %v10568_v47 = vpop.f32.mrb[83].mxu1 }
0x13f1   : > { %v21049_v32 = vsub.f32 %v20836_v10, %v10568_v47  ;;  %14675 = vmatprep.mubr.msk.f32.mxu0 %vm1751_vm2, %v10685_v55 }
0x13f2   : > { %14676 = vmatmul.mubr.msk.f32.gmra.mrb[112].mxu0 %vm1751_vm2, %v10686_v41  ;;  %v10688_v30 = vmul.f32 %v21046_v37, %v21046_v37 }
0x13f3   : > { %v10687_v60 = vmul.f32 %v21049_v32, %v21049_v32  ;;  %v14619_v52 = vpop.f32.mrb[84].mxu1 }
0x13f4   : > { %v21058_v34 = vsub.f32 %v20849_v19, %v14619_v52  ;;  %v10578_v1 = vpop.f32.mrb[85].mxu1 }
0x13f5   : > { %v21061_v6 = vsub.f32 %v20846_v44, %v10578_v1  ;;  %14678 = vmatprep.mubr.msk.f32.mxu0 %vm1751_vm2, %v10687_v60 }
0x13f6   : > { %14679 = vmatmul.mubr.msk.f32.gmra.mrb[114].mxu0 %vm1751_vm2, %v10688_v30  ;;  %v10690_v59 = vmul.f32 %v21058_v34, %v21058_v34 }
0x13f7   : > { %v10689_v10 = vmul.f32 %v21061_v6, %v21061_v6  ;;  %v14622_v4 = vpop.f32.mrb[86].mxu1 }
0x13f8   : > { %v21070_v8 = vsub.f32 %v20859_v25, %v14622_v4  ;;  %v10588_v19 = vpop.f32.mrb[87].mxu1 }
0x13f9   : > { %v21073_v2 = vsub.f32 %v20856_v61, %v10588_v19  ;;  %14681 = vmatprep.mubr.msk.f32.mxu0 %vm1751_vm2, %v10689_v10 }
0x13fa   : > { %14682 = vmatmul.mubr.msk.f32.gmra.mrb[116].mxu0 %vm1751_vm2, %v10690_v59  ;;  %v10692_v21 = vmul.f32 %v21070_v8, %v21070_v8 }
0x13fb   : > { %v10691_v44 = vmul.f32 %v21073_v2, %v21073_v2  ;;  %v14625_v14 = vpop.f32.mrb[88].mxu1 }
0x13fc   : > { %v21082_v42 = vsub.f32 %v20869_v22, %v14625_v14  ;;  %v10598_v25 = vpop.f32.mrb[89].mxu1 }
0x13fd   : > { %v21085_v20 = vsub.f32 %v20866_v53, %v10598_v25  ;;  %14684 = vmatprep.mubr.msk.f32.mxu0 %vm1751_vm2, %v10691_v44 }
0x13fe   : > { %14685 = vmatmul.mubr.msk.f32.gmra.mrb[118].mxu0 %vm1751_vm2, %v10692_v21  ;;  %v10694_v58 = vmul.f32 %v21082_v42, %v21082_v42 }
0x13ff   : > { %v10693_v61 = vmul.f32 %v21085_v20, %v21085_v20  ;;  %v14628_v7 = vpop.f32.mrb[90].mxu1 }
0x1400   : > { %v21094_v56 = vsub.f32 %v20879_v62, %v14628_v7  ;;  %v10608_v22 = vpop.f32.mrb[91].mxu1 }
0x1401   : > { %v21097_v40 = vsub.f32 %v20876_v33, %v10608_v22  ;;  %14687 = vmatprep.mubr.msk.f32.mxu0 %vm1751_vm2, %v10693_v61 }
0x1402   : > { %14688 = vmatmul.mubr.msk.f32.gmra.mrb[120].mxu0 %vm1751_vm2, %v10694_v58  ;;  %v10696_v0 = vmul.f32 %v21094_v56, %v21094_v56 }
0x1403   : > { %v10695_v53 = vmul.f32 %v21097_v40, %v21097_v40  ;;  %v14631_v15 = vpop.f32.mrb[92].mxu1 }
0x1404   : > { %v21106_v35 = vsub.f32 %v20889_v27, %v14631_v15  ;;  %v10618_v62 = vpop.f32.mrb[93].mxu1 }
0x1405   : > { %v21109_v5 = vsub.f32 %v20886_v26, %v10618_v62  ;;  %14690 = vmatprep.mubr.msk.f32.mxu0 %vm1751_vm2, %v10695_v53 }
0x1406   : > { %14691 = vmatmul.mubr.msk.f32.gmra.mrb[122].mxu0 %vm1751_vm2, %v10696_v0  ;;  %v10698_v39 = vmul.f32 %v21106_v35, %v21106_v35 }
0x1407   : > { %v10697_v33 = vmul.f32 %v21109_v5, %v21109_v5  ;;  %v14634_v63 = vpop.f32.mrb[94].mxu1 }
0x1408   : > { %v21118_v49 = vsub.f32 %v20899_v54, %v14634_v63  ;;  %v10628_v27 = vpop.f32.mrb[95].mxu1 }
0x1409   : > { %v21121_v11 = vsub.f32 %v20896_v57, %v10628_v27  ;;  %14693 = vmatprep.mubr.msk.f32.mxu0 %vm1751_vm2, %v10697_v33 }
0x140a   : > { %14694 = vmatmul.mubr.msk.f32.gmra.mrb[124].mxu0 %vm1751_vm2, %v10698_v39  ;;  %v10700_v29 = vmul.f32 %v21118_v49, %v21118_v49 }
0x140b   : > { %v10699_v26 = vmul.f32 %v21121_v11, %v21121_v11 }
0x140d   : > { %14696 = vmatprep.mubr.msk.f32.mxu0 %vm1751_vm2, %v10699_v26 }
0x140e   : > { %14697 = vmatmul.mubr.msk.f32.gmra.mrb[126].mxu0 %vm1751_vm2, %v10700_v29 }
0x1494   : > { %v14653_v54 = vpop.f32.mrb[96].mxu0 }
0x1495   : > { %v10869_v55 = vadd.f32 1e-06, %v14653_v54  ;;  %v10863_v17 = vpop.f32.mrb[97].mxu0 }
0x1496   : > { %v10864_v41 = vadd.f32 1e-06, %v10863_v17 }
0x1498   : > { %15687 = vrsqrt.f32 %v10864_v41 }
0x1499   : > { %15689 = vrsqrt.f32 %v10869_v55 }
0x14a2   : > { %v15688_v57 = vpop.eup %15687 }
0x14a3   : > { %v15690_v47 = vpop.eup %15689  ;;  %14701 = vmatprep.mubr.msk.f32.mxu1 %vm2073_vm3, %v15688_v57 }
0x14a4   : > { %14702 = vmatmul.mubr.msk.f32.vlgmr.msra.gmra.mrb[96].mxu1 %vm2073_vm3, %v15690_v47  ;;  %v14656_v60 = vpop.f32.mrb[98].mxu0 }
0x14a5   : > { %v10879_v52 = vadd.f32 1e-06, %v14656_v60  ;;  %v10873_v30 = vpop.f32.mrb[99].mxu0 }
0x14a6   : > { %v10874_v1 = vadd.f32 1e-06, %v10873_v30 }
0x14a8   : > { %15691 = vrsqrt.f32 %v10874_v1 }
0x14a9   : > { %15693 = vrsqrt.f32 %v10879_v52 }
0x14ab   : > { %v14659_v10 = vpop.f32.mrb[100].mxu0 }
0x14ac   : > { %v10889_v4 = vadd.f32 1e-06, %v14659_v10  ;;  %v10883_v59 = vpop.f32.mrb[101].mxu0 }
0x14ad   : > { %v10884_v19 = vadd.f32 1e-06, %v10883_v59 }
0x14af   : > { %15695 = vrsqrt.f32 %v10884_v19 }
0x14b0   : > { %15697 = vrsqrt.f32 %v10889_v4 }
0x14b1   : > { %v14662_v44 = vpop.f32.mrb[102].mxu0 }
0x14b2   : > { %v10899_v14 = vadd.f32 1e-06, %v14662_v44  ;;  %v10893_v21 = vpop.f32.mrb[103].mxu0  ;;  %v15692_v25 = vpop.eup %15691 }
0x14b3   : > { %v10894_v61 = vadd.f32 1e-06, %v10893_v21  ;;  %v15694_v7 = vpop.eup %15693  ;;  %14704 = vmatprep.mubr.msk.f32.mxu1 %vm2073_vm3, %v15692_v25 }
0x14b4   : > { %14705 = vmatmul.mubr.msk.f32.gmra.mrb[98].mxu1 %vm2073_vm3, %v15694_v7 }
0x14b5   : > { %15699 = vrsqrt.f32 %v10894_v61  ;;  %v14665_v58 = vpop.f32.mrb[104].mxu0 }
0x14b6   : > { %15701 = vrsqrt.f32 %v10899_v14  ;;  %v10909_v22 = vadd.f32 1e-06, %v14665_v58  ;;  %v10903_v53 = vpop.f32.mrb[105].mxu0 }
0x14b7   : > { %v10904_v15 = vadd.f32 1e-06, %v10903_v53 }
0x14b9   : > { %v15696_v0 = vpop.eup %15695  ;;  %15703 = vrsqrt.f32 %v10904_v15  ;;  %v14668_v62 = vpop.f32.mrb[106].mxu0 }
0x14ba   : > { %v15698_v33 = vpop.eup %15697  ;;  %15705 = vrsqrt.f32 %v10909_v22  ;;  %v10919_v63 = vadd.f32 1e-06, %v14668_v62  ;;  %v10913_v39 = vpop.f32.mrb[107].mxu0  ;;  %14707 = vmatprep.mubr.msk.f32.mxu1 %vm2073_vm3, %v15696_v0 }
0x14bb   : > { %v10914_v27 = vadd.f32 1e-06, %v10913_v39  ;;  %14708 = vmatmul.mubr.msk.f32.gmra.mrb[100].mxu1 %vm2073_vm3, %v15698_v33 }
0x14bd   : > { %15707 = vrsqrt.f32 %v10914_v27  ;;  %v14671_v26 = vpop.f32.mrb[108].mxu0 }
0x14be   : > { %15709 = vrsqrt.f32 %v10919_v63  ;;  %v10929_v29 = vadd.f32 1e-06, %v14671_v26  ;;  %v10923_v54 = vpop.f32.mrb[109].mxu0 }
0x14bf   : > { %v15700_v55 = vpop.eup %15699  ;;  %v10924_v17 = vadd.f32 1e-06, %v10923_v54 }
0x14c0   : > { %v15702_v41 = vpop.eup %15701  ;;  %14710 = vmatprep.mubr.msk.f32.mxu1 %vm2073_vm3, %v15700_v55 }
0x14c1   : > { %15711 = vrsqrt.f32 %v10924_v17  ;;  %v14674_v57 = vpop.f32.mrb[110].mxu0  ;;  %14711 = vmatmul.mubr.msk.f32.gmra.mrb[102].mxu1 %vm2073_vm3, %v15702_v41 }
0x14c2   : > { %15713 = vrsqrt.f32 %v10929_v29  ;;  %v10939_v47 = vadd.f32 1e-06, %v14674_v57  ;;  %v10933_v60 = vpop.f32.mrb[111].mxu0 }
0x14c3   : > { %v15704_v52 = vpop.eup %15703  ;;  %v10934_v30 = vadd.f32 1e-06, %v10933_v60 }
0x14c4   : > { %v15706_v1 = vpop.eup %15705  ;;  %14713 = vmatprep.mubr.msk.f32.mxu1 %vm2073_vm3, %v15704_v52 }
0x14c5   : > { %15715 = vrsqrt.f32 %v10934_v30  ;;  %v14677_v10 = vpop.f32.mrb[112].mxu0  ;;  %14714 = vmatmul.mubr.msk.f32.gmra.mrb[104].mxu1 %vm2073_vm3, %v15706_v1 }
0x14c6   : > { %15717 = vrsqrt.f32 %v10939_v47  ;;  %v10949_v4 = vadd.f32 1e-06, %v14677_v10  ;;  %v10943_v59 = vpop.f32.mrb[113].mxu0 }
0x14c7   : > { %v15708_v19 = vpop.eup %15707  ;;  %v10944_v44 = vadd.f32 1e-06, %v10943_v59 }
0x14c8   : > { %v15710_v14 = vpop.eup %15709  ;;  %14716 = vmatprep.mubr.msk.f32.mxu1 %vm2073_vm3, %v15708_v19 }
0x14c9   : > { %15719 = vrsqrt.f32 %v10944_v44  ;;  %v14680_v21 = vpop.f32.mrb[114].mxu0  ;;  %14717 = vmatmul.mubr.msk.f32.gmra.mrb[106].mxu1 %vm2073_vm3, %v15710_v14 }
0x14ca   : > { %15721 = vrsqrt.f32 %v10949_v4  ;;  %v10959_v25 = vadd.f32 1e-06, %v14680_v21  ;;  %v10953_v61 = vpop.f32.mrb[115].mxu0 }
0x14cb   : > { %v15712_v7 = vpop.eup %15711  ;;  %v10954_v58 = vadd.f32 1e-06, %v10953_v61 }
0x14cc   : > { %v15714_v22 = vpop.eup %15713  ;;  %14719 = vmatprep.mubr.msk.f32.mxu1 %vm2073_vm3, %v15712_v7 }
0x14cd   : > { %15723 = vrsqrt.f32 %v10954_v58  ;;  %v14683_v53 = vpop.f32.mrb[116].mxu0  ;;  %14720 = vmatmul.mubr.msk.f32.gmra.mrb[108].mxu1 %vm2073_vm3, %v15714_v22 }
0x14ce   : > { %15725 = vrsqrt.f32 %v10959_v25  ;;  %v10969_v15 = vadd.f32 1e-06, %v14683_v53  ;;  %v10963_v0 = vpop.f32.mrb[117].mxu0 }
0x14cf   : > { %v15716_v62 = vpop.eup %15715  ;;  %v10964_v33 = vadd.f32 1e-06, %v10963_v0 }
0x14d0   : > { %v15718_v63 = vpop.eup %15717  ;;  %14722 = vmatprep.mubr.msk.f32.mxu1 %vm2073_vm3, %v15716_v62 }
0x14d1   : > { %15727 = vrsqrt.f32 %v10964_v33  ;;  %v14686_v39 = vpop.f32.mrb[118].mxu0  ;;  %14723 = vmatmul.mubr.msk.f32.gmra.mrb[110].mxu1 %vm2073_vm3, %v15718_v63 }
0x14d2   : > { %15729 = vrsqrt.f32 %v10969_v15  ;;  %v10979_v27 = vadd.f32 1e-06, %v14686_v39  ;;  %v10973_v26 = vpop.f32.mrb[119].mxu0 }
0x14d3   : > { %v15720_v29 = vpop.eup %15719  ;;  %v10974_v54 = vadd.f32 1e-06, %v10973_v26 }
0x14d4   : > { %v15722_v55 = vpop.eup %15721  ;;  %14725 = vmatprep.mubr.msk.f32.mxu1 %vm2073_vm3, %v15720_v29 }
0x14d5   : > { %15731 = vrsqrt.f32 %v10974_v54  ;;  %v14689_v17 = vpop.f32.mrb[120].mxu0  ;;  %14726 = vmatmul.mubr.msk.f32.gmra.mrb[112].mxu1 %vm2073_vm3, %v15722_v55 }
0x14d6   : > { %15733 = vrsqrt.f32 %v10979_v27  ;;  %v10989_v41 = vadd.f32 1e-06, %v14689_v17  ;;  %v10983_v57 = vpop.f32.mrb[121].mxu0 }
0x14d7   : > { %v15724_v47 = vpop.eup %15723  ;;  %v10984_v60 = vadd.f32 1e-06, %v10983_v57  ;;  %v21168_v57 = vld [vmem:[%s21424_s7] ss:$0 sm:$0xff] }
0x14d8   : > { %v15726_v52 = vpop.eup %15725  ;;  %14728 = vmatprep.mubr.msk.f32.mxu1 %vm2073_vm3, %v15724_v47 }
0x14d9   : > { %15735 = vrsqrt.f32 %v10984_v60  ;;  %v14692_v30 = vpop.f32.mrb[122].mxu0  ;;  %14729 = vmatmul.mubr.msk.f32.gmra.mrb[114].mxu1 %vm2073_vm3, %v15726_v52  ;;  %v21175_v52 = vld [vmem:[%s21425_s8] ss:$0 sm:$0xff] }
0x14da   : > { %15737 = vrsqrt.f32 %v10989_v41  ;;  %v10999_v1 = vadd.f32 1e-06, %v14692_v30  ;;  %v10993_v10 = vpop.f32.mrb[123].mxu0 }
0x14db   : > { %v15728_v4 = vpop.eup %15727  ;;  %v10994_v59 = vadd.f32 1e-06, %v10993_v10 }
0x14dc   : > { %v15730_v19 = vpop.eup %15729  ;;  %14731 = vmatprep.mubr.msk.f32.mxu1 %vm2073_vm3, %v15728_v4 }
0x14dd   : > { %15739 = vrsqrt.f32 %v10994_v59  ;;  %v14695_v44 = vpop.f32.mrb[124].mxu0  ;;  %14732 = vmatmul.mubr.msk.f32.gmra.mrb[116].mxu1 %vm2073_vm3, %v15730_v19 }
0x14de   : > { %15741 = vrsqrt.f32 %v10999_v1  ;;  %v11009_v14 = vadd.f32 1e-06, %v14695_v44  ;;  %v11003_v21 = vpop.f32.mrb[125].mxu0 }
0x14df   : > { %v15732_v25 = vpop.eup %15731  ;;  %v11004_v61 = vadd.f32 1e-06, %v11003_v21 }
0x14e0   : > { %v15734_v7 = vpop.eup %15733  ;;  %14734 = vmatprep.mubr.msk.f32.mxu1 %vm2073_vm3, %v15732_v25 }
0x14e1   : > { %15743 = vrsqrt.f32 %v11004_v61  ;;  %v14698_v58 = vpop.f32.mrb[126].mxu0  ;;  %14735 = vmatmul.mubr.msk.f32.gmra.mrb[118].mxu1 %vm2073_vm3, %v15734_v7 }
0x14e2   : > { %15745 = vrsqrt.f32 %v11009_v14  ;;  %v11019_v22 = vadd.f32 1e-06, %v14698_v58  ;;  %v11013_v53 = vpop.f32.mrb[127].mxu0 }
0x14e3   : > { %v15736_v15 = vpop.eup %15735  ;;  %v11014_v0 = vadd.f32 1e-06, %v11013_v53 }
0x14e4   : > { %v15738_v62 = vpop.eup %15737  ;;  %14737 = vmatprep.mubr.msk.f32.mxu1 %vm2073_vm3, %v15736_v15 }
0x14e5   : > { %15747 = vrsqrt.f32 %v11014_v0  ;;  %14738 = vmatmul.mubr.msk.f32.gmra.mrb[120].mxu1 %vm2073_vm3, %v15738_v62 }
0x14e6   : > { %15749 = vrsqrt.f32 %v11019_v22 }
0x14e7   : > { %v15740_v33 = vpop.eup %15739 }
0x14e8   : > { %v15742_v63 = vpop.eup %15741  ;;  %14740 = vmatprep.mubr.msk.f32.mxu1 %vm2073_vm3, %v15740_v33 }
0x14e9   : > { %14741 = vmatmul.mubr.msk.f32.gmra.mrb[122].mxu1 %vm2073_vm3, %v15742_v63 }
0x14eb   : > { %v15744_v39 = vpop.eup %15743 }
0x14ec   : > { %v15746_v27 = vpop.eup %15745  ;;  %14743 = vmatprep.mubr.msk.f32.mxu1 %vm2073_vm3, %v15744_v39 }
0x14ed   : > { %14744 = vmatmul.mubr.msk.f32.gmra.mrb[124].mxu1 %vm2073_vm3, %v15746_v27 }
0x14ef   : > { %v15748_v26 = vpop.eup %15747 }
0x14f0   : > { %v15750_v29 = vpop.eup %15749  ;;  %14746 = vmatprep.mubr.msk.f32.mxu1 %vm2073_vm3, %v15748_v26 }
0x14f1   : > { %14747 = vmatmul.mubr.msk.f32.gmra.mrb[126].mxu1 %vm2073_vm3, %v15750_v29 }
0x1577   : > { %v14703_v54 = vpop.f32.mrb[96].mxu1 }
0x1578   : > { %v11376_v55 = vmul.f32 %v14703_v54, %v20940_v9  ;;  %v11216_v17 = vpop.f32.mrb[97].mxu1 }
0x1579   : > { %v11375_v41 = vmul.f32 %v11216_v17, %v20943_v48 }
0x157a   : > { %v11408_v47 = vmul.f32 %v21168_v57, %v11376_v55 }
0x157b   : > { %v11407_v60 = vmul.f32 %v21168_v57, %v11375_v41 }
0x157c   : > { %v11440_v30 = vadd.f32 %v21175_v52, %v11408_v47 }
0x157d   : > { %v11439_v9 = vadd.f32 %v21175_v52, %v11407_v60 }
0x157e   : > { %11505 = vrot.lane.b32.xlu1 %v11440_v30, %s15932_s25 }
0x157f   : > { %11503 = vrot.lane.b32.xlu0 %v11439_v9, %s15932_s25 }
0x1587   : > { %v14706_v48 = vpop.f32.mrb[98].mxu1 }
0x1588   : > { %v11378_v1 = vmul.f32 %v14706_v48, %v20952_v31  ;;  %v11226_v10 = vpop.f32.mrb[99].mxu1 }
0x1589   : > { %v11377_v4 = vmul.f32 %v11226_v10, %v20955_v43 }
0x158a   : > { %v11410_v59 = vmul.f32 %v21168_v57, %v11378_v1 }
0x158b   : > { %v11409_v19 = vmul.f32 %v21168_v57, %v11377_v4 }
0x158c   : > { %v11442_v44 = vadd.f32 %v21175_v52, %v11410_v59 }
0x158d   : > { %v11441_v14 = vadd.f32 %v21175_v52, %v11409_v19 }
0x158e   : > { %v14709_v21 = vpop.f32.mrb[100].mxu1  ;;  %11509 = vrot.lane.b32.xlu1 %v11442_v44, %s15932_s25 }
0x158f   : > { %v11380_v25 = vmul.f32 %v14709_v21, %v20963_v36  ;;  %v11236_v61 = vpop.f32.mrb[101].mxu1  ;;  %11507 = vrot.lane.b32.xlu0 %v11441_v14, %s15932_s25 }
0x1590   : > { %v11379_v7 = vmul.f32 %v11236_v61, %v20967_v23 }
0x1591   : > { %v11412_v31 = vmul.f32 %v21168_v57, %v11380_v25 }
0x1592   : > { %v11411_v43 = vmul.f32 %v21168_v57, %v11379_v7 }
0x1593   : > { %v11444_v58 = vadd.f32 %v21175_v52, %v11412_v31 }
0x1594   : > { %v11443_v22 = vadd.f32 %v21175_v52, %v11411_v43  ;;  %v14712_v53 = vpop.f32.mrb[102].mxu1 }
0x1595   : > { %v11382_v15 = vmul.f32 %v14712_v53, %v20975_v46  ;;  %v11246_v0 = vpop.f32.mrb[103].mxu1  ;;  %11513 = vrot.lane.b32.xlu1 %v11444_v58, %s15932_s25 }
0x1596   : > { %v11381_v36 = vmul.f32 %v11246_v0, %v20979_v12  ;;  %11511 = vrot.lane.b32.xlu0 %v11443_v22, %s15932_s25 }
0x1597   : > { %v11414_v23 = vmul.f32 %v21168_v57, %v11382_v15 }
0x1598   : > { %v11413_v62 = vmul.f32 %v21168_v57, %v11381_v36  ;;  %v14715_v33 = vpop.f32.mrb[104].mxu1 }
0x1599   : > { %v11446_v63 = vadd.f32 %v21175_v52, %v11414_v23  ;;  %v11384_v39 = vmul.f32 %v14715_v33, %v20986_v51  ;;  %v11256_v27 = vpop.f32.mrb[105].mxu1 }
0x159a   : > { %v11445_v26 = vadd.f32 %v21175_v52, %v11413_v62  ;;  %v11383_v46 = vmul.f32 %v11256_v27, %v20989_v16 }
0x159b   : > { %v11416_v29 = vmul.f32 %v21168_v57, %v11384_v39  ;;  %11517 = vrot.lane.b32.xlu1 %v11446_v63, %s15932_s25 }
0x159c   : > { %v11415_v12 = vmul.f32 %v21168_v57, %v11383_v46  ;;  %v14718_v54 = vpop.f32.mrb[106].mxu1  ;;  %11515 = vrot.lane.b32.xlu0 %v11445_v26, %s15932_s25 }
0x159d   : > { %v11448_v55 = vadd.f32 %v21175_v52, %v11416_v29  ;;  %v11386_v17 = vmul.f32 %v14718_v54, %v20998_v24  ;;  %v11266_v41 = vpop.f32.mrb[107].mxu1 }
0x159e   : > { %v11447_v51 = vadd.f32 %v21175_v52, %v11415_v12  ;;  %v11385_v47 = vmul.f32 %v11266_v41, %v21001_v38 }
0x159f   : > { %v11418_v16 = vmul.f32 %v21168_v57, %v11386_v17  ;;  %11521 = vrot.lane.b32.xlu1 %v11448_v55, %s15932_s25 }
0x15a0   : > { %v11417_v60 = vmul.f32 %v21168_v57, %v11385_v47  ;;  %v14721_v30 = vpop.f32.mrb[108].mxu1  ;;  %11519 = vrot.lane.b32.xlu0 %v11447_v51, %s15932_s25 }
0x15a1   : > { %v11450_v9 = vadd.f32 %v21175_v52, %v11418_v16  ;;  %v11388_v48 = vmul.f32 %v14721_v30, %v21010_v18  ;;  %v11276_v1 = vpop.f32.mrb[109].mxu1 }
0x15a2   : > { %v11449_v24 = vadd.f32 %v21175_v52, %v11417_v60  ;;  %v11387_v10 = vmul.f32 %v11276_v1, %v21013_v45 }
0x15a3   : > { %v11420_v38 = vmul.f32 %v21168_v57, %v11388_v48  ;;  %11525 = vrot.lane.b32.xlu1 %v11450_v9, %s15932_s25 }
0x15a4   : > { %v11419_v4 = vmul.f32 %v21168_v57, %v11387_v10  ;;  %v14724_v59 = vpop.f32.mrb[110].mxu1  ;;  %11523 = vrot.lane.b32.xlu0 %v11449_v24, %s15932_s25 }
0x15a5   : > { %v11452_v19 = vadd.f32 %v21175_v52, %v11420_v38  ;;  %v11390_v44 = vmul.f32 %v14724_v59, %v21022_v13  ;;  %v11286_v14 = vpop.f32.mrb[111].mxu1 }
0x15a6   : > { %v11451_v18 = vadd.f32 %v21175_v52, %v11419_v4  ;;  %v11389_v21 = vmul.f32 %v11286_v14, %v21025_v50 }
0x15a7   : > { %v11422_v45 = vmul.f32 %v21168_v57, %v11390_v44  ;;  %11529 = vrot.lane.b32.xlu1 %v11452_v19, %s15932_s25 }
0x15a8   : > { %v11421_v25 = vmul.f32 %v21168_v57, %v11389_v21  ;;  %v14727_v61 = vpop.f32.mrb[112].mxu1  ;;  %11527 = vrot.lane.b32.xlu0 %v11451_v18, %s15932_s25 }
0x15a9   : > { %v11454_v7 = vadd.f32 %v21175_v52, %v11422_v45  ;;  %v11392_v31 = vmul.f32 %v14727_v61, %v21034_v3  ;;  %v11296_v43 = vpop.f32.mrb[113].mxu1 }
0x15aa   : > { %v11453_v13 = vadd.f32 %v21175_v52, %v11421_v25  ;;  %v11391_v58 = vmul.f32 %v11296_v43, %v21037_v28 }
0x15ab   : > { %v11424_v50 = vmul.f32 %v21168_v57, %v11392_v31  ;;  %11533 = vrot.lane.b32.xlu1 %v11454_v7, %s15932_s25 }
0x15ac   : > { %v11423_v22 = vmul.f32 %v21168_v57, %v11391_v58  ;;  %v14730_v53 = vpop.f32.mrb[114].mxu1  ;;  %11531 = vrot.lane.b32.xlu0 %v11453_v13, %s15932_s25 }
0x15ad   : > { %v11456_v15 = vadd.f32 %v21175_v52, %v11424_v50  ;;  %v11394_v0 = vmul.f32 %v14730_v53, %v21046_v37  ;;  %v11306_v36 = vpop.f32.mrb[115].mxu1 }
0x15ae   : > { %v11455_v3 = vadd.f32 %v21175_v52, %v11423_v22  ;;  %v11393_v23 = vmul.f32 %v11306_v36, %v21049_v32 }
0x15af   : > { %v11426_v28 = vmul.f32 %v21168_v57, %v11394_v0  ;;  %11537 = vrot.lane.b32.xlu1 %v11456_v15, %s15932_s25 }
0x15b0   : > { %v11425_v62 = vmul.f32 %v21168_v57, %v11393_v23  ;;  %v14733_v33 = vpop.f32.mrb[116].mxu1  ;;  %11535 = vrot.lane.b32.xlu0 %v11455_v3, %s15932_s25 }
0x15b1   : > { %v11458_v63 = vadd.f32 %v21175_v52, %v11426_v28  ;;  %v11396_v39 = vmul.f32 %v14733_v33, %v21058_v34  ;;  %v11316_v27 = vpop.f32.mrb[117].mxu1 }
0x15b2   : > { %v11457_v37 = vadd.f32 %v21175_v52, %v11425_v62  ;;  %v11395_v26 = vmul.f32 %v11316_v27, %v21061_v6 }
0x15b3   : > { %v11428_v32 = vmul.f32 %v21168_v57, %v11396_v39  ;;  %11541 = vrot.lane.b32.xlu1 %v11458_v63, %s15932_s25 }
0x15b4   : > { %v11427_v46 = vmul.f32 %v21168_v57, %v11395_v26  ;;  %v14736_v29 = vpop.f32.mrb[118].mxu1  ;;  %11539 = vrot.lane.b32.xlu0 %v11457_v37, %s15932_s25 }
0x15b5   : > { %v11460_v12 = vadd.f32 %v21175_v52, %v11428_v32  ;;  %v11398_v54 = vmul.f32 %v14736_v29, %v21070_v8  ;;  %v11326_v55 = vpop.f32.mrb[119].mxu1 }
0x15b6   : > { %v11459_v34 = vadd.f32 %v21175_v52, %v11427_v46  ;;  %v11397_v17 = vmul.f32 %v11326_v55, %v21073_v2 }
0x15b7   : > { %v11430_v6 = vmul.f32 %v21168_v57, %v11398_v54  ;;  %11545 = vrot.lane.b32.xlu1 %v11460_v12, %s15932_s25 }
0x15b8   : > { %v11429_v41 = vmul.f32 %v21168_v57, %v11397_v17  ;;  %v14739_v51 = vpop.f32.mrb[120].mxu1  ;;  %11543 = vrot.lane.b32.xlu0 %v11459_v34, %s15932_s25 }
0x15b9   : > { %v11462_v47 = vadd.f32 %v21175_v52, %v11430_v6  ;;  %v11400_v16 = vmul.f32 %v14739_v51, %v21082_v42  ;;  %v11336_v60 = vpop.f32.mrb[121].mxu1 }
0x15ba   : > { %v11461_v8 = vadd.f32 %v21175_v52, %v11429_v41  ;;  %v11399_v30 = vmul.f32 %v11336_v60, %v21085_v20 }
0x15bb   : > { %v11432_v2 = vmul.f32 %v21168_v57, %v11400_v16  ;;  %11549 = vrot.lane.b32.xlu1 %v11462_v47, %s15932_s25 }
0x15bc   : > { %v11431_v9 = vmul.f32 %v21168_v57, %v11399_v30  ;;  %v14742_v48 = vpop.f32.mrb[122].mxu1  ;;  %11547 = vrot.lane.b32.xlu0 %v11461_v8, %s15932_s25 }
0x15bd   : > { %v11464_v1 = vadd.f32 %v21175_v52, %v11432_v2  ;;  %v11402_v24 = vmul.f32 %v14742_v48, %v21094_v56  ;;  %v11346_v10 = vpop.f32.mrb[123].mxu1 }
0x15be   : > { %v11463_v42 = vadd.f32 %v21175_v52, %v11431_v9  ;;  %v11401_v38 = vmul.f32 %v11346_v10, %v21097_v40 }
0x15bf   : > { %v11434_v20 = vmul.f32 %v21168_v57, %v11402_v24  ;;  %11553 = vrot.lane.b32.xlu1 %v11464_v1, %s15932_s25 }
0x15c0   : > { %v11433_v4 = vmul.f32 %v21168_v57, %v11401_v38  ;;  %v14745_v59 = vpop.f32.mrb[124].mxu1  ;;  %11551 = vrot.lane.b32.xlu0 %v11463_v42, %s15932_s25 }
0x15c1   : > { %v11466_v19 = vadd.f32 %v21175_v52, %v11434_v20  ;;  %v11404_v44 = vmul.f32 %v14745_v59, %v21106_v35  ;;  %v11356_v14 = vpop.f32.mrb[125].mxu1 }
0x15c2   : > { %v11465_v56 = vadd.f32 %v21175_v52, %v11433_v4  ;;  %v11403_v18 = vmul.f32 %v11356_v14, %v21109_v5 }
0x15c3   : > { %v11436_v40 = vmul.f32 %v21168_v57, %v11404_v44  ;;  %11557 = vrot.lane.b32.xlu1 %v11466_v19, %s15932_s25 }
0x15c4   : > { %v11435_v21 = vmul.f32 %v21168_v57, %v11403_v18  ;;  %v14748_v45 = vpop.f32.mrb[126].mxu1  ;;  %11555 = vrot.lane.b32.xlu0 %v11465_v56, %s15932_s25 }
0x15c5   : > { %v11468_v25 = vadd.f32 %v21175_v52, %v11436_v40  ;;  %v11406_v35 = vmul.f32 %v14748_v45, %v21118_v49  ;;  %v11366_v61 = vpop.f32.mrb[127].mxu1 }
0x15c6   : > { %v11467_v7 = vadd.f32 %v21175_v52, %v11435_v21  ;;  %v11405_v5 = vmul.f32 %v11366_v61, %v21121_v11 }
0x15c7   : > { %v11438_v31 = vmul.f32 %v21168_v57, %v11406_v35  ;;  %11561 = vrot.lane.b32.xlu1 %v11468_v25, %s15932_s25 }
0x15c8   : > { %v11437_v43 = vmul.f32 %v21168_v57, %v11405_v5  ;;  %11559 = vrot.lane.b32.xlu0 %v11467_v7, %s15932_s25 }
0x15c9   : > { %v11470_v13 = vadd.f32 %v21175_v52, %v11438_v31 }
0x15ca   : > { %v11469_v49 = vadd.f32 %v21175_v52, %v11437_v43 }
0x15cb   : > { %11565 = vrot.lane.b32.xlu1 %v11470_v13, %s15932_s25 }
0x15cc   : > { %11563 = vrot.lane.b32.xlu0 %v11469_v49, %s15932_s25  ;;  %s12516_s25 = sshll.u32 %s16017_s21, 13  ;;  %s21376_s21 = scalar_lea.sflag [#allocation3], %s378_s24 }
0x15cd   : > { %s21366_s22 = scalar_lea.hbm %s21428_s11, %s12516_s25 }
0x15f0   : > { %v11506_v11 = vpop.permute.xlu1 %11505 }
0x15f1   : > { %11600 = vst.msk [vmem:[%s17475_s14 + $0x18] sm:$0xff] %vm6072_vm4, %v11506_v11  ;;  %v11504_v58 = vpop.permute.xlu0 %11503 }
0x15f2   : > { %11599 = vst.msk [vmem:[%s17475_s14 + $0x8] sm:$0xff] %vm6072_vm4, %v11504_v58 }
0x1600   : > { %v11510_v57 = vpop.permute.xlu1 %11509 }
0x1601   : > { %11602 = vst.msk [vmem:[%s17475_s14 + $0x38] sm:$0xff] %vm6072_vm4, %v11510_v57  ;;  %v11508_v50 = vpop.permute.xlu0 %11507 }
0x1602   : > { %11601 = vst.msk [vmem:[%s17475_s14 + $0x28] sm:$0xff] %vm6072_vm4, %v11508_v50 }
0x1607   : > { %v11514_v52 = vpop.permute.xlu1 %11513 }
0x1608   : > { %11604 = vst.msk [vmem:[%s17475_s14 + $0x58] sm:$0xff] %vm6072_vm4, %v11514_v52  ;;  %v11512_v22 = vpop.permute.xlu0 %11511 }
0x1609   : > { %11603 = vst.msk [vmem:[%s17475_s14 + $0x48] sm:$0xff] %vm6072_vm4, %v11512_v22 }
0x160d   : > { %v11518_v53 = vpop.permute.xlu1 %11517 }
0x160e   : > { %11606 = vst.msk [vmem:[%s17475_s14 + $0x78] sm:$0xff] %vm6072_vm4, %v11518_v53  ;;  %v11516_v15 = vpop.permute.xlu0 %11515 }
0x160f   : > { %11605 = vst.msk [vmem:[%s17475_s14 + $0x68] sm:$0xff] %vm6072_vm4, %v11516_v15 }
0x1611   : > { %v11522_v0 = vpop.permute.xlu1 %11521 }
0x1612   : > { %11608 = vst.msk [vmem:[%s17475_s14 + $0x98] sm:$0xff] %vm6072_vm4, %v11522_v0  ;;  %v11520_v36 = vpop.permute.xlu0 %11519 }
0x1613   : > { %11607 = vst.msk [vmem:[%s17475_s14 + $0x88] sm:$0xff] %vm6072_vm4, %v11520_v36 }
0x1615   : > { %v11526_v3 = vpop.permute.xlu1 %11525 }
0x1616   : > { %11610 = vst.msk [vmem:[%s17475_s14 + $0xb8] sm:$0xff] %vm6072_vm4, %v11526_v3  ;;  %v11524_v23 = vpop.permute.xlu0 %11523 }
0x1617   : > { %11609 = vst.msk [vmem:[%s17475_s14 + $0xa8] sm:$0xff] %vm6072_vm4, %v11524_v23 }
0x1619   : > { %v11530_v28 = vpop.permute.xlu1 %11529 }
0x161a   : > { %11612 = vst.msk [vmem:[%s17475_s14 + $0xd8] sm:$0xff] %vm6072_vm4, %v11530_v28  ;;  %v11528_v62 = vpop.permute.xlu0 %11527 }
0x161b   : > { %11611 = vst.msk [vmem:[%s17475_s14 + $0xc8] sm:$0xff] %vm6072_vm4, %v11528_v62 }
0x161d   : > { %v11534_v33 = vpop.permute.xlu1 %11533 }
0x161e   : > { %11614 = vst.msk [vmem:[%s17475_s14 + $0xf8] sm:$0xff] %vm6072_vm4, %v11534_v33  ;;  %v11532_v63 = vpop.permute.xlu0 %11531 }
0x161f   : > { %11613 = vst.msk [vmem:[%s17475_s14 + $0xe8] sm:$0xff] %vm6072_vm4, %v11532_v63 }
0x1621   : > { %v11538_v39 = vpop.permute.xlu1 %11537 }
0x1622   : > { %11616 = vst.msk [vmem:[%s17475_s14 + $0x118] sm:$0xff] %vm6072_vm4, %v11538_v39  ;;  %v11536_v27 = vpop.permute.xlu0 %11535 }
0x1623   : > { %11615 = vst.msk [vmem:[%s17475_s14 + $0x108] sm:$0xff] %vm6072_vm4, %v11536_v27 }
0x1625   : > { %v11542_v37 = vpop.permute.xlu1 %11541 }
0x1626   : > { %11618 = vst.msk [vmem:[%s17475_s14 + $0x138] sm:$0xff] %vm6072_vm4, %v11542_v37  ;;  %v11540_v26 = vpop.permute.xlu0 %11539 }
0x1627   : > { %11617 = vst.msk [vmem:[%s17475_s14 + $0x128] sm:$0xff] %vm6072_vm4, %v11540_v26 }
0x1629   : > { %v11546_v32 = vpop.permute.xlu1 %11545 }
0x162a   : > { %11620 = vst.msk [vmem:[%s17475_s14 + $0x158] sm:$0xff] %vm6072_vm4, %v11546_v32  ;;  %v11544_v46 = vpop.permute.xlu0 %11543 }
0x162b   : > { %11619 = vst.msk [vmem:[%s17475_s14 + $0x148] sm:$0xff] %vm6072_vm4, %v11544_v46 }
0x162d   : > { %v11550_v29 = vpop.permute.xlu1 %11549 }
0x162e   : > { %11622 = vst.msk [vmem:[%s17475_s14 + $0x178] sm:$0xff] %vm6072_vm4, %v11550_v29  ;;  %v11548_v12 = vpop.permute.xlu0 %11547 }
0x162f   : > { %11621 = vst.msk [vmem:[%s17475_s14 + $0x168] sm:$0xff] %vm6072_vm4, %v11548_v12 }
0x1631   : > { %v11554_v54 = vpop.permute.xlu1 %11553 }
0x1632   : > { %11624 = vst.msk [vmem:[%s17475_s14 + $0x198] sm:$0xff] %vm6072_vm4, %v11554_v54  ;;  %v11552_v55 = vpop.permute.xlu0 %11551 }
0x1633   : > { %11623 = vst.msk [vmem:[%s17475_s14 + $0x188] sm:$0xff] %vm6072_vm4, %v11552_v55 }
0x1635   : > { %v11558_v34 = vpop.permute.xlu1 %11557 }
0x1636   : > { %11626 = vst.msk [vmem:[%s17475_s14 + $0x1b8] sm:$0xff] %vm6072_vm4, %v11558_v34  ;;  %v11556_v17 = vpop.permute.xlu0 %11555 }
0x1637   : > { %11625 = vst.msk [vmem:[%s17475_s14 + $0x1a8] sm:$0xff] %vm6072_vm4, %v11556_v17 }
0x1639   : > { %v11562_v6 = vpop.permute.xlu1 %11561 }
0x163a   : > { %11628 = vst.msk [vmem:[%s17475_s14 + $0x1d8] sm:$0xff] %vm6072_vm4, %v11562_v6  ;;  %v11560_v41 = vpop.permute.xlu0 %11559 }
0x163b   : > { %11627 = vst.msk [vmem:[%s17475_s14 + $0x1c8] sm:$0xff] %vm6072_vm4, %v11560_v41 }
0x163d   : > { %v11566_v51 = vpop.permute.xlu1 %11565 }
0x163e   : > { %11630 = vst.msk [vmem:[%s17475_s14 + $0x1f8] sm:$0xff] %vm6072_vm4, %v11566_v51  ;;  %v11564_v47 = vpop.permute.xlu0 %11563 }
0x163f   : > { %11629 = vst.msk [vmem:[%s17475_s14 + $0x1e8] sm:$0xff] %vm6072_vm4, %v11564_v47 }
0x1640   : > { %15881 = shalt.err (!%p15878_p3)
}
0x1641   : > { %s15882_s24 = scalar_lea.hbm %s21366_s22, 8192  ;;  %s15886_s15 = scalar_lea.hbm %s21428_s11, 16384 }
0x1642   : > { %p15883_p4 = scmp.ne.s32.totalorder %s21366_s22, %s15882_s24  ;;  %p15887_p9 = scmp.lt.u32.totalorder %s21366_s22, %s21428_s11 }
0x1643   : > { %p15888_p10 = scmp.lt.u32.totalorder %s15886_s15, %s15882_s24  ;;  %p15890_p12 = scmp.lt.u32.totalorder %s15882_s24, %s21366_s22 }
0x1644   : > { %p15884_p7 = pnand %p15883_p4, %p16034_p5 }
0x1645   : > { %p15889_p11 = por %p15888_p10, %p15887_p9 }
0x1646   : > { %p15885_p8 = pneg %p15884_p7 }
0x1647   : > { %p15891_p13 = por %p15890_p12, %p15889_p11 }
0x1649   : > { %p15892_p0 = pnand %p15891_p13, %p15885_p8 }
0x164b   : > { %15895 = shalt.err (!%p15892_p0)
}
0x164c   : > { %s15934_s12 = smov 256   ;;  %s15935_s29 = smov 16  }
0x164d   : > { %14941 = dma.vmem_to_hbm [thread:$0]  (%p16034_p5), %s21368_s13, 8192, %s21366_s22, %s21376_s21, %s15934_s12, %s15934_s12, %s15935_s29  }
0x164e PF: > { %p14947_p1 = scmp.ge.s32.totalorder %s15930_s20, 2  ;;  %s11661_s30 = sand.u32 1, %s15918_s17  }
0x164f   : > { %s11662_s24 = scalar_lea.sflag [#allocation3], %s11661_s30 }
0x1650   : > { %p14944_p2 = pnand %p14947_p1, %p16038_p6 }
0x1652   : > { %15913 = dma.done.wait (!%p14944_p2), %s11662_s24, 8192  }
0x1653   : > { %15915 = vsyncadd (!%p14944_p2), %s11662_s24, 4294959104  ;;  %p21_p3 = scmp.ge.s32.totalorder %s16021_s23, 4   ;;  %s21718_s17 = smov %s15922_s18 }
0x1654   : > { %s21719_s18 = smov %s15926_s19  ;;  %s21720_s19 = smov %s16032_s26 }
0x1655   : > { %s21721_s20 = smov %s16021_s23  ;;  %23 = sbr.rel (!%p21_p3) target bundleno = 5 (0x5), region = 102 }
0x165c   :  { %11667 = vsyncpa [#allocation3], 1 }
0x165d   :  { %11669 = vsyncpa [#allocation3 + $0x1], 1 }

</bundles_post_ra>
